<compile_context>
chip_gen: v7x
topology: tpu7x:2x2x1
jax: 0.10.0
libtpu: 0.0.40
codegen_flags: <defaults>
</compile_context>

<pallas_src>
import jax
import jax.numpy as jnp
from jax import lax
from jax.experimental import pallas as pl
from jax.experimental.pallas import tpu as pltpu

# Deterministic synthetic "force field" parameters (in lieu of amber14-all.xml).
LJ_A = 1.0e-3       # repulsive coefficient  (A / (r^2+s)^6)
LJ_B = 2.0e-3       # attractive coefficient (B / (r^2+s)^3)
COULOMB_K = 1.0e-1  # electrostatic prefactor (k * q_i q_j / sqrt(r^2+s))
SOFTEN = 1.0        # softening added to r^2: keeps the f32 pair sum well conditioned


def _choose_block_b(B, L):
    """Largest per-step batch block s.t. (a) ~5 live (BB,L,L) f32 temporaries stay
    under ~16 MiB (fits v7x's 64 MiB VMEM with headroom) and (b) the grid keeps
    >=2 steps so dimension_semantics=('parallel',) can use both v7x TensorCores."""
    vmem_cap = max(1, (16 * 1024 * 1024) // (5 * 4 * L * L))
    target = min(B, vmem_cap, max(1, B // 2))
    bb = 1
    for d in range(1, target + 1):
        if B % d == 0:
            bb = d
    return bb


def _make_energy_kernel(bb: int, n_atoms: int):
    # Analytic self-interaction (diagonal, d2 = 0) constants; depend on SOFTEN.
    inv_s3 = (1.0 / SOFTEN) ** 3            # s^-3
    inv_s6 = inv_s3 * inv_s3                # s^-6
    inv_sqrt_s = SOFTEN ** -0.5             # s^-1/2
    self_lj_total = float(n_atoms) * (LJ_A * inv_s6 - LJ_B * inv_s3)

    def amber_energy_kernel(xq_ref, xqt_ref, e_ref):
        # xq_ref:  (BB, 4, L)  rows = [x, y, z, sqrt(K)*q], atoms lane-resident
        # xqt_ref: (BB, L, 4)  pre-transposed (atoms sublane-resident) -- avoids
        #                      in-kernel XLU lane->sublane transposes
        xq = xq_ref[...]                                    # (BB, 4, L)
        xqt = xqt_ref[...]                                  # (BB, L, 4)

        # Squared pairwise distances via explicit differences (VPU only;
        # exact, no Gram-identity cancellation, no MXU precision dependence).
        diff0 = xqt[:, :, 0:1] - xq[:, 0:1, :]              # (BB, L, L)
        d2 = diff0 * diff0
        diff1 = xqt[:, :, 1:2] - xq[:, 1:2, :]
        d2 = d2 + diff1 * diff1
        diff2 = xqt[:, :, 2:3] - xq[:, 2:3, :]
        d2 = d2 + diff2 * diff2

        # Single EUP rsqrt instead of an exact f32 divide + sqrt.
        inv_r = lax.rsqrt(d2 + SOFTEN)                      # (BB, L, L)
        inv_r2 = inv_r * inv_r
        inv_r6 = inv_r2 * inv_r2 * inv_r2

        # Charges are pre-scaled by sqrt(COULOMB_K): qq already carries K.
        qq = xqt[:, :, 3:4] * xq[:, 3:4, :]                 # (BB, L, L)

        # Horner LJ: (A*r^-6 - B)*r^-6  (no explicit r^-12), plus Coulomb.
        pair_e = (LJ_A * inv_r6 - LJ_B) * inv_r6 + qq * inv_r

        row = jnp.sum(pair_e, axis=1)                       # (BB, L) sublane reduce
        total = 0.5 * jnp.sum(row, axis=1)                  # (BB,)  pairs counted twice

        # Subtract the analytic diagonal (self-interaction) instead of masking:
        # self pair term = LJ_A*s^-6 - LJ_B*s^-3 + (sqrt(K)q_i)^2 * s^-1/2.
        q = xq[:, 3, :]                                     # (BB, L)
        q2sum = jnp.sum(q * q, axis=-1)                     # (BB,)
        diag = 0.5 * (self_lj_total + inv_sqrt_s * q2sum)

        e_ref[0, 0, :] = total - diag                       # lane row write per block

    return amber_energy_kernel


def amber14_reward_forward(positions, charges, energy_temperature=1.0, block_b=None):
    """Pallas surrogate of Amber14Reward.forward.

    positions: (B, 3, L) float32  -- B conformations, xyz coords, L atoms
    charges:   (B, 1, L) float32  -- per-atom partial charges
    Returns (log_r, logrs):
        log_r: (B,) float32 = -E / energy_temperature
        logrs: (B,) float32 = E
    """
    B, C, L = positions.shape
    assert C == 3
    if block_b is None:
        block_b = _choose_block_b(B, L)
    assert B % block_b == 0, "batch must be divisible by the per-step block"
    G = B // block_b

    positions = positions.astype(jnp.float32)
    # Pre-scale charges by sqrt(K) (O(B*L), 128x smaller than the in-kernel
    # multiply it removes) and ride them as a 4th coordinate row.
    q_scaled = charges.astype(jnp.float32) * (COULOMB_K ** 0.5)     # (B, 1, L)
    xyzq = jnp.concatenate([positions, q_scaled], axis=1)           # (B, 4, L)
    xyzq_t = jnp.transpose(xyzq, (0, 2, 1))                         # (B, L, 4)

    kernel = _make_energy_kernel(block_b, L)

    energies = pl.pallas_call(
        kernel,
        out_shape=jax.ShapeDtypeStruct((G, 1, block_b), jnp.float32),
        grid_spec=pltpu.PrefetchScalarGridSpec(
            num_scalar_prefetch=0,
            grid=(G,),
            in_specs=[
                pl.BlockSpec((block_b, 4, L), lambda g: (g, 0, 0)),
                pl.BlockSpec((block_b, L, 4), lambda g: (g, 0, 0)),
            ],
            out_specs=pl.BlockSpec((1, 1, block_b), lambda g: (g, 0, 0)),
        ),
        compiler_params=pltpu.CompilerParams(
            dimension_semantics=("parallel",),            # shard steps across v7x's 2 TCs
            vmem_limit_bytes=48 * 1024 * 1024,            # headroom; safe on v7x's 64 MiB
        ),
    )(xyzq, xyzq_t)

    logrs = energies.reshape(B)                          # matches torch `logrs` (raw E)
    log_r = -logrs / jnp.float32(energy_temperature)     # trivial O(B) op in the wrapper
    return log_r, logrs


def _reference(positions, charges, energy_temperature=1.0):
    """Pure-JAX reference (same formulation, masked diagonal) for correctness checking."""
    x = positions                                            # (B, 3, L)
    q = charges[:, 0, :]                                     # (B, L)
    diff = x[:, :, :, None] - x[:, :, None, :]               # (B, 3, L, L)
    d2 = jnp.sum(diff * diff, axis=1)                        # (B, L, L)
    inv_r = lax.rsqrt(d2 + SOFTEN)
    inv_r2 = inv_r * inv_r
    inv_r6 = inv_r2 * inv_r2 * inv_r2
    inv_r12 = inv_r6 * inv_r6
    qq = q[:, :, None] * q[:, None, :]
    pair_e = LJ_A * inv_r12 - LJ_B * inv_r6 + COULOMB_K * qq * inv_r
    L = x.shape[-1]
    mask = 1.0 - jnp.eye(L, dtype=jnp.float32)
    pair_e = pair_e * mask
    row = jnp.sum(pair_e, axis=1)
    e = 0.5 * jnp.sum(row, axis=1)
    return -e / energy_temperature, e


if __name__ == "__main__":
    B, L = 16, 128   # 16 conformations, 128 atoms each
    key = jax.random.PRNGKey(0)
    k_pos, k_chg = jax.random.split(key)

    positions = (2.0 * jax.random.normal(k_pos, (B, 3, L))).astype(jnp.float32)
    charges = (jax.random.uniform(k_chg, (B, 1, L)) - 0.5).astype(jnp.float32)

    energy_temperature = 1.0
    log_r, logrs = amber14_reward_forward(positions, charges, energy_temperature)
    jax.block_until_ready((log_r, logrs))

    ref_log_r, ref_logrs = _reference(positions, charges, energy_temperature)
    assert jnp.allclose(logrs, ref_logrs, rtol=1e-3, atol=1e-3), (logrs, ref_logrs)
    assert jnp.allclose(log_r, ref_log_r, rtol=1e-3, atol=1e-3), (log_r, ref_log_r)

    print("KERNEL_OK")
</pallas_src>

<mosaic_0001>
module attributes {stable_mosaic.version = 11 : i64} {
  func.func @amber_energy_kernel(%arg0: i32, %arg1: memref<8x4x128xf32, #tpu.memory_space<vmem>>, %arg2: memref<8x128x4xf32, #tpu.memory_space<vmem>>, %arg3: memref<1x1x8xf32, #tpu.memory_space<vmem>>) attributes {dimension_semantics = [#tpu.dimension_semantics<parallel>], iteration_bounds = array<i64: 2>, scalar_prefetch = 0 : i64, scratch_operands = 0 : i64, tpu.core_type = #tpu.core_type<tc>, window_params = [{transform_indices = @transform_0, window_bounds = array<i64: 8, 4, 128>}, {transform_indices = @transform_1, window_bounds = array<i64: 8, 128, 4>}, {transform_indices = @transform_2, window_bounds = array<i64: 1, 1, 8>}]} {
    %c0 = arith.constant 0 : index
    %c0_0 = arith.constant 0 : index
    %c0_1 = arith.constant 0 : index
    %0 = vector.load %arg1[%c0, %c0_0, %c0_1] : memref<8x4x128xf32, #tpu.memory_space<vmem>>, vector<8x4x128xf32>
    %c0_2 = arith.constant 0 : index
    %c0_3 = arith.constant 0 : index
    %c0_4 = arith.constant 0 : index
    %1 = vector.load %arg2[%c0_2, %c0_3, %c0_4] : memref<8x128x4xf32, #tpu.memory_space<vmem>>, vector<8x128x4xf32>
    %2 = vector.extract_strided_slice %1 {offsets = [0, 0, 0], sizes = [8, 128, 1], strides = [1, 1, 1]} : vector<8x128x4xf32> to vector<8x128x1xf32>
    %3 = vector.extract_strided_slice %0 {offsets = [0, 0, 0], sizes = [8, 1, 128], strides = [1, 1, 1]} : vector<8x4x128xf32> to vector<8x1x128xf32>
    %4 = vector.broadcast %2 : vector<8x128x1xf32> to vector<8x128x128xf32>
    %5 = vector.broadcast %3 : vector<8x1x128xf32> to vector<8x128x128xf32>
    %6 = arith.subf %4, %5 : vector<8x128x128xf32>
    %7 = arith.mulf %6, %6 : vector<8x128x128xf32>
    %8 = vector.extract_strided_slice %1 {offsets = [0, 0, 1], sizes = [8, 128, 1], strides = [1, 1, 1]} : vector<8x128x4xf32> to vector<8x128x1xf32>
    %9 = vector.extract_strided_slice %0 {offsets = [0, 1, 0], sizes = [8, 1, 128], strides = [1, 1, 1]} : vector<8x4x128xf32> to vector<8x1x128xf32>
    %10 = vector.broadcast %8 : vector<8x128x1xf32> to vector<8x128x128xf32>
    %11 = vector.broadcast %9 : vector<8x1x128xf32> to vector<8x128x128xf32>
    %12 = arith.subf %10, %11 : vector<8x128x128xf32>
    %13 = arith.mulf %12, %12 : vector<8x128x128xf32>
    %14 = arith.addf %7, %13 : vector<8x128x128xf32>
    %15 = vector.extract_strided_slice %1 {offsets = [0, 0, 2], sizes = [8, 128, 1], strides = [1, 1, 1]} : vector<8x128x4xf32> to vector<8x128x1xf32>
    %16 = vector.extract_strided_slice %0 {offsets = [0, 2, 0], sizes = [8, 1, 128], strides = [1, 1, 1]} : vector<8x4x128xf32> to vector<8x1x128xf32>
    %17 = vector.broadcast %15 : vector<8x128x1xf32> to vector<8x128x128xf32>
    %18 = vector.broadcast %16 : vector<8x1x128xf32> to vector<8x128x128xf32>
    %19 = arith.subf %17, %18 : vector<8x128x128xf32>
    %20 = arith.mulf %19, %19 : vector<8x128x128xf32>
    %21 = arith.addf %14, %20 : vector<8x128x128xf32>
    %cst = arith.constant 1.000000e+00 : f32
    %22 = vector.broadcast %cst : f32 to vector<8x128x128xf32>
    %23 = arith.addf %21, %22 : vector<8x128x128xf32>
    %24 = math.rsqrt %23 : vector<8x128x128xf32>
    %25 = arith.mulf %24, %24 : vector<8x128x128xf32>
    %26 = arith.mulf %25, %25 : vector<8x128x128xf32>
    %27 = arith.mulf %26, %25 : vector<8x128x128xf32>
    %28 = vector.extract_strided_slice %1 {offsets = [0, 0, 3], sizes = [8, 128, 1], strides = [1, 1, 1]} : vector<8x128x4xf32> to vector<8x128x1xf32>
    %29 = vector.extract_strided_slice %0 {offsets = [0, 3, 0], sizes = [8, 1, 128], strides = [1, 1, 1]} : vector<8x4x128xf32> to vector<8x1x128xf32>
    %30 = vector.broadcast %28 : vector<8x128x1xf32> to vector<8x128x128xf32>
    %31 = vector.broadcast %29 : vector<8x1x128xf32> to vector<8x128x128xf32>
    %32 = arith.mulf %30, %31 : vector<8x128x128xf32>
    %cst_5 = arith.constant 1.000000e-03 : f32
    %33 = vector.broadcast %cst_5 : f32 to vector<8x128x128xf32>
    %34 = arith.mulf %33, %27 : vector<8x128x128xf32>
    %cst_6 = arith.constant 2.000000e-03 : f32
    %35 = vector.broadcast %cst_6 : f32 to vector<8x128x128xf32>
    %36 = arith.subf %34, %35 : vector<8x128x128xf32>
    %37 = arith.mulf %36, %27 : vector<8x128x128xf32>
    %38 = arith.mulf %32, %24 : vector<8x128x128xf32>
    %39 = arith.addf %37, %38 : vector<8x128x128xf32>
    %cst_7 = arith.constant dense<0.000000e+00> : vector<8x128xf32>
    %40 = vector.multi_reduction <add>, %39, %cst_7 [1] : vector<8x128x128xf32> to vector<8x128xf32>
    %cst_8 = arith.constant dense<0.000000e+00> : vector<8xf32>
    %41 = vector.multi_reduction <add>, %40, %cst_8 [1] : vector<8x128xf32> to vector<8xf32>
    %cst_9 = arith.constant 5.000000e-01 : f32
    %42 = vector.broadcast %cst_9 : f32 to vector<8xf32>
    %43 = arith.mulf %42, %41 : vector<8xf32>
    %44 = vector.extract_strided_slice %0 {offsets = [0, 3, 0], sizes = [8, 1, 128], strides = [1, 1, 1]} : vector<8x4x128xf32> to vector<8x1x128xf32>
    %45 = vector.shape_cast %44 : vector<8x1x128xf32> to vector<8x128xf32>
    %46 = arith.mulf %45, %45 : vector<8x128xf32>
    %cst_10 = arith.constant dense<0.000000e+00> : vector<8xf32>
    %47 = vector.multi_reduction <add>, %46, %cst_10 [1] : vector<8x128xf32> to vector<8xf32>
    %cst_11 = arith.constant 1.000000e+00 : f32
    %48 = vector.broadcast %cst_11 : f32 to vector<8xf32>
    %49 = arith.mulf %48, %47 : vector<8xf32>
    %cst_12 = arith.constant -1.280000e-01 : f32
    %50 = vector.broadcast %cst_12 : f32 to vector<8xf32>
    %51 = arith.addf %50, %49 : vector<8xf32>
    %cst_13 = arith.constant 5.000000e-01 : f32
    %52 = vector.broadcast %cst_13 : f32 to vector<8xf32>
    %53 = arith.mulf %52, %51 : vector<8xf32>
    %54 = arith.subf %43, %53 : vector<8xf32>
    %c0_14 = arith.constant 0 : index
    %c0_15 = arith.constant 0 : index
    %c0_16 = arith.constant 0 : index
    %55 = vector.load %arg3[%c0_14, %c0_15, %c0_16] : memref<1x1x8xf32, #tpu.memory_space<vmem>>, vector<1x1x8xf32>
    %56 = vector.shape_cast %55 : vector<1x1x8xf32> to vector<8xf32>
    %57 = vector.shape_cast %54 : vector<8xf32> to vector<1x1x8xf32>
    tpu.vector_store %arg3[%c0_14, %c0_15, %c0_16], %57 {strides = array<i32>} : memref<1x1x8xf32, #tpu.memory_space<vmem>>, vector<1x1x8xf32>,
    return
  }
  func.func @transform_0(%arg0: i32) -> (i32, i32, i32) {
    %c0_i32 = arith.constant 0 : i32
    %c0_i32_0 = arith.constant 0 : i32
    %c0_i32_1 = arith.constant 0 : i32
    return %arg0, %c0_i32, %c0_i32_0 : i32, i32, i32
  }
  func.func @transform_1(%arg0: i32) -> (i32, i32, i32) {
    %c0_i32 = arith.constant 0 : i32
    %c0_i32_0 = arith.constant 0 : i32
    %c0_i32_1 = arith.constant 0 : i32
    return %arg0, %c0_i32, %c0_i32_0 : i32, i32, i32
  }
  func.func @transform_2(%arg0: i32) -> (i32, i32, i32) {
    %c0_i32 = arith.constant 0 : i32
    %c0_i32_0 = arith.constant 0 : i32
    %c0_i32_1 = arith.constant 0 : i32
    return %arg0, %c0_i32, %c0_i32_0 : i32, i32, i32
  }
}

</mosaic_0001>

<bundles_post_ra>
// kernel: tpu_custom_call.1
= control target key start
LH: loop header
LB: loop body
LE: loop exit
PB: predicated region body
PF: predicated region fallthrough
CT: control target
= control target key end

     0   :  { %7 = vsyncpa [#allocation3], 0  ;;  %s10890_s0 = inlined_call_operand.vmem [shape: f32[16,4,128], index: 0, kind: input, shape index: {}]   ;;  %s10891_s1 = inlined_call_operand.vmem [shape: f32[16,128,4], index: 1, kind: input, shape index: {}]   ;;  %s10892_s2 = inlined_call_operand.hbm [shape: f32[2,1,8], index: 2, kind: output, shape index: {}]  }
   0x1   :  { %9 = vsyncpa [#allocation3 + $0x1], 0  ;;  %s6192_s9 = smov 0   ;;  %s6194_s10 = smov 0  }
   0x2   :  { %s6196_s11 = smov 0   ;;  %s6198_s12 = smov 0  }
   0x3 LB: > { %s6213_s13 = sadd.s32 4294967295, %s6170_s12   ;;  %s5378_s14 = sadd.s32 4294967294, %s6170_s12   ;;  %s6170_s12 = sphi %s6198_s12, %s12542_s12   ;;  %s6166_s11 = sphi %s6196_s11, %s12541_s11   ;;  %s6162_s10 = sphi %s6194_s10, %s12540_s10   ;;  %s6158_s9 = sphi %s6192_s9, %s12539_s9  }
   0x4   : > { %s6217_s15 = sadd.s32 1, %s6170_s12   ;;  %s74_s16 = sadd.s32 1, %s6166_s11 }
   0x5   : > { %s71_s17 = ssub.s32 %s6170_s12, %s6217_s15  ;;  %p84_p0 = scmp.ne.s32.totalorder %s6166_s11, %s6162_s10 }
   0x6   : > { %p72_p1 = scmp.eq.s32.totalorder %s71_s17, 0  ;;  %p85_p2 = scmp.eq.s32.totalorder %s6213_s13, 1 }
   0x7   : > { %p90_p3 = scmp.ne.s32.totalorder %s6162_s10, %s6158_s9  ;;  %p91_p4 = scmp.eq.s32.totalorder %s5378_s14, 1 }
   0x8   : > { %s6228_s18 = scalar_select %p72_p1, %s6166_s11, %s74_s16  }
   0x9   : > { %p6230_p5 = por %p85_p2, %p84_p0  ;;  %p6234_p6 = por %p91_p4, %p90_p3 }
   0xa   : > { %p5381_p7 = scmp.ge.s32.totalorder %s6170_s12, 1  ;;  %p128_p8 = scmp.lt.s32.totalorder %s6170_s12, 3 }
   0xc   : > { %p129_p9 = pnand %p5381_p7, %p128_p8 }
   0xe   : > { %132 = sbr.rel (%p129_p9) target bundleno = 1534 (0x5fe), region = 28 }
  0x15   : > { %s5382_s21 = sshll.u32 %s6213_s13, 3  ;;  %v10893_v0 = vmov 0   ;;  %vm5216_vm0 = vcmask 1041409   ;;  %vm5218_vm1 = vcmask 1042434   ;;  %vm5220_vm2 = vcmask 1043459   ;;  %s153_s30 = sand.u32 1, %s6162_s10  }
  0x16   : > { %5563 = vset.pattern.permute.xlu1 %v10893_v0  ;;  %5562 = vset.pattern.permute.xlu0 %v10893_v0  ;;  %p156_p10 = scmp.lt.s32.totalorder %s5382_s21, 15  ;;  %vm5269_vm3 = vcmask 1042432   ;;  %vm5222_vm4 = vcmask 1044484   ;;  %vm5224_vm5 = vcmask 1045509   ;;  %vm5226_vm6 = vcmask 1046534   ;;  %s5515_s3 = sshll.u32 %s6213_s13, 4 }
  0x17   : > { %vm5228_vm7 = vcmask 1047559   ;;  %vm5265_vm8 = vcmask 1047555   ;;  %vm5279_vm9 = vcmask 1044480   ;;  %s154_s4 = scalar_lea.vmem [#allocation2], %s153_s30  ;;  %vm5296_vm10 = vcmask 57344   ;;  %s10848_s8 = scalar_lea.hbm %s10892_s2, %s5515_s3 }
  0x18   : > { %s12544_s21 = smov (!%p156_p10, %s5382_s21), 15  ;;  %s5311_s5 = sshll.u32 %s154_s4, 4  ;;  %s10850_s5 = int_to_ptr.vmem [resolvable:$true] %s5311_s5 }
  0x19   : > { %s5518_s22 = sshll.u32 %s12544_s21, 7  ;;  %s5383_s26 = sshll.u32 %s12544_s21, 2 }
  0x1a   : > { %s6249_s25 = scalar_lea.vmem %s10891_s1, %s5518_s22  ;;  %s7234_s29 = scalar_lea.vmem %s10890_s0, %s5383_s26 }
  0x1b   : > { %v6252_v1 = vld [vmem:[%s6249_s25 + $0x10] sm:$0xff]  ;;  %v6255_v2 = vld [vmem:[%s6249_s25] sm:$0xff]  ;;  %v6260_v3 = vld [vmem:[%s6249_s25 + $0x18] sm:$0xff]  ;;  %s5299_s14 = scalar_lea.sflag [#allocation3], %s153_s30  ;;  %s6108_s16 = scalar_lea.vmem %s10850_s5, 16 }
  0x1c   : > { %316 = vperm.xlu1 %5563, %v6252_v1   ;;  %306 = vperm.xlu0 %5562, %v6255_v2   ;;  %v6263_v4 = vld [vmem:[%s6249_s25 + $0x8] sm:$0xff]  ;;  %v6271_v6 = vld [vmem:[%s6249_s25 + $0x20] sm:$0xff]  ;;  %v6276_v7 = vld [vmem:[%s6249_s25 + $0x38] sm:$0xff]  ;;  %p6109_p11 = scmp.ne.s32.totalorder %s10850_s5, %s6108_s16  ;;  %s6176_s13 = smov [#allocation2]  }
  0x1d   : > { %v6268_v5 = vld [vmem:[%s6249_s25 + $0x28] sm:$0xff]  ;;  %v6279_v8 = vld [vmem:[%s6249_s25 + $0x30] sm:$0xff]  ;;  %v6287_v10 = vld [vmem:[%s6249_s25 + $0x40] sm:$0xff]  ;;  %s6112_s17 = sshll.u32 %s6176_s13, 4  ;;  %s6113_s17 = int_to_ptr.vmem [resolvable:$false] %s6112_s17 }
  0x1e   : > { %v6284_v9 = vld [vmem:[%s6249_s25 + $0x48] sm:$0xff]  ;;  %v6292_v11 = vld [vmem:[%s6249_s25 + $0x58] sm:$0xff]  ;;  %v6295_v12 = vld [vmem:[%s6249_s25 + $0x50] sm:$0xff]  ;;  %p6110_p12 = pnand %p6109_p11, %p6230_p5  ;;  %s6114_s21 = scalar_lea.vmem %s6113_s17, 32 }
  0x1f   : > { %v6300_v13 = vld [vmem:[%s6249_s25 + $0x68] sm:$0xff]  ;;  %v6303_v14 = vld [vmem:[%s6249_s25 + $0x60] sm:$0xff]  ;;  %v6308_v15 = vld [vmem:[%s6249_s25 + $0x78] sm:$0xff]  ;;  %p6115_p0 = scmp.lt.s32.totalorder %s10850_s5, %s6113_s17  ;;  %p6116_p1 = scmp.lt.s32.totalorder %s6114_s21, %s6108_s16 }
  0x20   : > { %321 = vperm.xlu1 %5563, %v6260_v3   ;;  %311 = vperm.xlu0 %5562, %v6263_v4   ;;  %v6311_v16 = vld [vmem:[%s6249_s25 + $0x70] sm:$0xff]  ;;  %v6316_v17 = vld [vmem:[%s6249_s25 + $0x88] sm:$0xff]  ;;  %v6319_v18 = vld [vmem:[%s6249_s25 + $0x80] sm:$0xff]  ;;  %p6111_p13 = pneg %p6110_p12 }
  0x21   : > { %v6324_v19 = vld [vmem:[%s6249_s25 + $0x98] sm:$0xff]  ;;  %v6327_v20 = vld [vmem:[%s6249_s25 + $0x90] sm:$0xff]  ;;  %v6332_v21 = vld [vmem:[%s6249_s25 + $0xa8] sm:$0xff]  ;;  %p6117_p2 = por %p6116_p1, %p6115_p0 }
  0x22   : > { %v6335_v22 = vld [vmem:[%s6249_s25 + $0xa0] sm:$0xff]  ;;  %v6340_v23 = vld [vmem:[%s6249_s25 + $0xb8] sm:$0xff]  ;;  %v6343_v24 = vld [vmem:[%s6249_s25 + $0xb0] sm:$0xff] }
  0x23   : > { %v6348_v25 = vld [vmem:[%s6249_s25 + $0xc8] sm:$0xff]  ;;  %v6351_v26 = vld [vmem:[%s6249_s25 + $0xc0] sm:$0xff]  ;;  %v6356_v27 = vld [vmem:[%s6249_s25 + $0xd8] sm:$0xff]  ;;  %p6118_p3 = pnand %p6117_p2, %p6111_p13 }
  0x24   : > { %331 = vperm.xlu1 %5563, %v6268_v5   ;;  %326 = vperm.xlu0 %5562, %v6271_v6   ;;  %v6359_v28 = vld [vmem:[%s6249_s25 + $0xd0] sm:$0xff]  ;;  %v6364_v29 = vld [vmem:[%s6249_s25 + $0xe8] sm:$0xff]  ;;  %v6367_v30 = vld [vmem:[%s6249_s25 + $0xe0] sm:$0xff] }
  0x25   : > { %v6372_v31 = vld [vmem:[%s6249_s25 + $0xf8] sm:$0xff]  ;;  %v6375_v32 = vld [vmem:[%s6249_s25 + $0xf0] sm:$0xff]  ;;  %v6380_v33 = vld [vmem:[%s6249_s25 + $0x108] sm:$0xff] }
  0x26   : > { %v6383_v34 = vld [vmem:[%s6249_s25 + $0x100] sm:$0xff]  ;;  %v6388_v35 = vld [vmem:[%s6249_s25 + $0x118] sm:$0xff]  ;;  %v6391_v36 = vld [vmem:[%s6249_s25 + $0x110] sm:$0xff] }
  0x27   : > { %v6396_v37 = vld [vmem:[%s6249_s25 + $0x128] sm:$0xff]  ;;  %v6399_v38 = vld [vmem:[%s6249_s25 + $0x120] sm:$0xff]  ;;  %v6404_v39 = vld [vmem:[%s6249_s25 + $0x138] sm:$0xff] }
  0x28   : > { %341 = vperm.xlu1 %5563, %v6276_v7   ;;  %336 = vperm.xlu0 %5562, %v6279_v8   ;;  %v6407_v40 = vld [vmem:[%s6249_s25 + $0x130] sm:$0xff]  ;;  %v6412_v41 = vld [vmem:[%s6249_s25 + $0x148] sm:$0xff]  ;;  %v6415_v42 = vld [vmem:[%s6249_s25 + $0x140] sm:$0xff] }
  0x29   : > { %v6420_v43 = vld [vmem:[%s6249_s25 + $0x158] sm:$0xff]  ;;  %v6423_v44 = vld [vmem:[%s6249_s25 + $0x150] sm:$0xff]  ;;  %v6428_v45 = vld [vmem:[%s6249_s25 + $0x168] sm:$0xff] }
  0x2a   : > { %v6431_v46 = vld [vmem:[%s6249_s25 + $0x160] sm:$0xff]  ;;  %v6436_v47 = vld [vmem:[%s6249_s25 + $0x178] sm:$0xff]  ;;  %v6439_v48 = vld [vmem:[%s6249_s25 + $0x170] sm:$0xff] }
  0x2b   : > { %v6444_v49 = vld [vmem:[%s6249_s25 + $0x188] sm:$0xff]  ;;  %v6447_v50 = vld [vmem:[%s6249_s25 + $0x180] sm:$0xff]  ;;  %v6452_v51 = vld [vmem:[%s6249_s25 + $0x198] sm:$0xff] }
  0x2c   : > { %351 = vperm.xlu1 %5563, %v6284_v9   ;;  %346 = vperm.xlu0 %5562, %v6287_v10   ;;  %v6455_v52 = vld [vmem:[%s6249_s25 + $0x190] sm:$0xff]  ;;  %v6460_v53 = vld [vmem:[%s6249_s25 + $0x1a8] sm:$0xff]  ;;  %v6463_v54 = vld [vmem:[%s6249_s25 + $0x1a0] sm:$0xff] }
  0x2d   : > { %v6468_v55 = vld [vmem:[%s6249_s25 + $0x1b8] sm:$0xff]  ;;  %v6471_v56 = vld [vmem:[%s6249_s25 + $0x1b0] sm:$0xff]  ;;  %v6476_v57 = vld [vmem:[%s6249_s25 + $0x1c8] sm:$0xff] }
  0x2e   : > { %11110 = vst [vmem:[#allocation5_spill] sm:$0xff] %v6468_v55  ;;  %11111 = vst [vmem:[#allocation6_spill] sm:$0xff] %v6476_v57  ;;  %v6479_v58 = vld [vmem:[%s6249_s25 + $0x1c0] sm:$0xff]  ;;  %v6484_v59 = vld [vmem:[%s6249_s25 + $0x1d8] sm:$0xff] }
  0x2f   : > { %11112 = vst [vmem:[#allocation7_spill] sm:$0xff] %v6479_v58  ;;  %11113 = vst [vmem:[#allocation8_spill] sm:$0xff] %v6484_v59  ;;  %v6487_v60 = vld [vmem:[%s6249_s25 + $0x1d0] sm:$0xff]  ;;  %v6492_v61 = vld [vmem:[%s6249_s25 + $0x1e8] sm:$0xff] }
  0x30   : > { %361 = vperm.xlu1 %5563, %v6292_v11   ;;  %356 = vperm.xlu0 %5562, %v6295_v12   ;;  %11114 = vst [vmem:[#allocation9_spill] sm:$0xff] %v6487_v60  ;;  %11115 = vst [vmem:[#allocation10_spill] sm:$0xff] %v6492_v61  ;;  %v6495_v62 = vld [vmem:[%s6249_s25 + $0x1e0] sm:$0xff]  ;;  %v6500_v63 = vld [vmem:[%s6249_s25 + $0x1f8] sm:$0xff] }
  0x31   : > { %11116 = vst [vmem:[#allocation11_spill] sm:$0xff] %v6495_v62  ;;  %11117 = vst [vmem:[#allocation12_spill] sm:$0xff] %v6500_v63  ;;  %v6503_v0 = vld [vmem:[%s6249_s25 + $0x1f0] sm:$0xff] }
  0x32   : > { %11118 = vst [vmem:[#allocation13_spill] sm:$0xff] %v6503_v0 }
  0x34   : > { %371 = vperm.xlu1 %5563, %v6300_v13   ;;  %366 = vperm.xlu0 %5562, %v6303_v14  }
  0x38   : > { %381 = vperm.xlu1 %5563, %v6308_v15   ;;  %376 = vperm.xlu0 %5562, %v6311_v16  }
  0x3c   : > { %391 = vperm.xlu1 %5563, %v6316_v17   ;;  %386 = vperm.xlu0 %5562, %v6319_v18  }
  0x40   : > { %401 = vperm.xlu1 %5563, %v6324_v19   ;;  %396 = vperm.xlu0 %5562, %v6327_v20  }
  0x44   : > { %411 = vperm.xlu1 %5563, %v6332_v21   ;;  %406 = vperm.xlu0 %5562, %v6335_v22  }
  0x48   : > { %421 = vperm.xlu1 %5563, %v6340_v23   ;;  %416 = vperm.xlu0 %5562, %v6343_v24  }
  0x4c   : > { %431 = vperm.xlu1 %5563, %v6348_v25   ;;  %426 = vperm.xlu0 %5562, %v6351_v26  }
  0x50   : > { %441 = vperm.xlu1 %5563, %v6356_v27   ;;  %436 = vperm.xlu0 %5562, %v6359_v28  }
  0x54   : > { %451 = vperm.xlu1 %5563, %v6364_v29   ;;  %446 = vperm.xlu0 %5562, %v6367_v30  }
  0x58   : > { %461 = vperm.xlu1 %5563, %v6372_v31   ;;  %456 = vperm.xlu0 %5562, %v6375_v32  }
  0x5c   : > { %471 = vperm.xlu1 %5563, %v6380_v33   ;;  %466 = vperm.xlu0 %5562, %v6383_v34  }
  0x60   : > { %481 = vperm.xlu1 %5563, %v6388_v35   ;;  %476 = vperm.xlu0 %5562, %v6391_v36  }
  0x64   : > { %491 = vperm.xlu1 %5563, %v6396_v37   ;;  %486 = vperm.xlu0 %5562, %v6399_v38  }
  0x68   : > { %501 = vperm.xlu1 %5563, %v6404_v39   ;;  %496 = vperm.xlu0 %5562, %v6407_v40  }
  0x6c   : > { %511 = vperm.xlu1 %5563, %v6412_v41   ;;  %506 = vperm.xlu0 %5562, %v6415_v42  }
  0x70   : > { %521 = vperm.xlu1 %5563, %v6420_v43   ;;  %516 = vperm.xlu0 %5562, %v6423_v44  }
  0x74   : > { %531 = vperm.xlu1 %5563, %v6428_v45   ;;  %526 = vperm.xlu0 %5562, %v6431_v46  }
  0x78   : > { %541 = vperm.xlu1 %5563, %v6436_v47   ;;  %536 = vperm.xlu0 %5562, %v6439_v48  }
  0x7c   : > { %551 = vperm.xlu1 %5563, %v6444_v49   ;;  %546 = vperm.xlu0 %5562, %v6447_v50  }
  0x80   : > { %561 = vperm.xlu1 %5563, %v6452_v51   ;;  %556 = vperm.xlu0 %5562, %v6455_v52  }
  0x84   : > { %571 = vperm.xlu1 %5563, %v6460_v53   ;;  %566 = vperm.xlu0 %5562, %v6463_v54  }
  0x88   : > { %581 = vperm.xlu1 %5563, %v6468_v55   ;;  %576 = vperm.xlu0 %5562, %v6471_v56  }
  0x8c   : > { %591 = vperm.xlu1 %5563, %v6476_v57   ;;  %586 = vperm.xlu0 %5562, %v6479_v58   ;;  %v6523_v58 = vld [vmem:[%s6249_s25 + $0x210] sm:$0xff] }
  0x8d   : > { %11124 = vst [vmem:[#allocation19_spill] sm:$0xff] %v6523_v58 }
  0x90   : > { %601 = vperm.xlu1 %5563, %v6484_v59   ;;  %596 = vperm.xlu0 %5562, %v6487_v60   ;;  %v6508_v59 = vld [vmem:[%s6249_s25 + $0x208] sm:$0xff]  ;;  %v6511_v60 = vld [vmem:[%s6249_s25 + $0x200] sm:$0xff] }
  0x91   : > { %11119 = vst [vmem:[#allocation14_spill] sm:$0xff] %v6508_v59  ;;  %11120 = vst [vmem:[#allocation15_spill] sm:$0xff] %v6511_v60 }
  0x94   : > { %611 = vperm.xlu1 %5563, %v6492_v61   ;;  %606 = vperm.xlu0 %5562, %v6495_v62   ;;  %v6520_v62 = vld [vmem:[%s6249_s25 + $0x218] sm:$0xff] }
  0x95   : > { %11123 = vst [vmem:[#allocation18_spill] sm:$0xff] %v6520_v62 }
  0x98   : > { %621 = vperm.xlu1 %5563, %v6500_v63   ;;  %616 = vperm.xlu0 %5562, %v6503_v0  }
  0x9b   : > { %v6513_v57 = vpop.permute.xlu1 %316  ;;  %v6515_v61 = vpop.permute.xlu0 %306 }
  0x9c   : > { %11121 = vst [vmem:[#allocation16_spill] sm:$0xff] %v6513_v57  ;;  %11122 = vst [vmem:[#allocation17_spill] sm:$0xff] %v6515_v61  ;;  %631 = vperm.xlu1 %5563, %v6508_v59   ;;  %626 = vperm.xlu0 %5562, %v6511_v60   ;;  %v6532_v61 = vld [vmem:[%s6249_s25 + $0x228] sm:$0xff]  ;;  %v6535_v57 = vld [vmem:[%s6249_s25 + $0x220] sm:$0xff] }
  0x9d   : > { %11127 = vst [vmem:[#allocation22_spill] sm:$0xff] %v6532_v61  ;;  %11128 = vst [vmem:[#allocation23_spill] sm:$0xff] %v6535_v57 }
  0x9f   : > { %v6525_v63 = vpop.permute.xlu1 %321  ;;  %v6527_v0 = vpop.permute.xlu0 %311 }
  0xa0   : > { %11125 = vst [vmem:[#allocation20_spill] sm:$0xff] %v6525_v63  ;;  %11126 = vst [vmem:[#allocation21_spill] sm:$0xff] %v6527_v0  ;;  %641 = vperm.xlu1 %5563, %v6520_v62   ;;  %636 = vperm.xlu0 %5562, %v6523_v58   ;;  %v6544_v0 = vld [vmem:[%s6249_s25 + $0x238] sm:$0xff]  ;;  %v6547_v63 = vld [vmem:[%s6249_s25 + $0x230] sm:$0xff] }
  0xa1   : > { %11131 = vst [vmem:[#allocation26_spill] sm:$0xff] %v6544_v0  ;;  %11132 = vst [vmem:[#allocation27_spill] sm:$0xff] %v6547_v63 }
  0xa3   : > { %v6537_v59 = vpop.permute.xlu1 %331  ;;  %v6539_v60 = vpop.permute.xlu0 %326 }
  0xa4   : > { %11129 = vst [vmem:[#allocation24_spill] sm:$0xff] %v6537_v59  ;;  %11130 = vst [vmem:[#allocation25_spill] sm:$0xff] %v6539_v60  ;;  %651 = vperm.xlu1 %5563, %v6532_v61   ;;  %646 = vperm.xlu0 %5562, %v6535_v57   ;;  %v6556_v60 = vld [vmem:[%s6249_s25 + $0x248] sm:$0xff]  ;;  %v6559_v59 = vld [vmem:[%s6249_s25 + $0x240] sm:$0xff] }
  0xa5   : > { %11135 = vst [vmem:[#allocation30_spill] sm:$0xff] %v6556_v60  ;;  %11136 = vst [vmem:[#allocation31_spill] sm:$0xff] %v6559_v59 }
  0xa7   : > { %v6549_v62 = vpop.permute.xlu1 %341  ;;  %v6551_v58 = vpop.permute.xlu0 %336 }
  0xa8   : > { %11133 = vst [vmem:[#allocation28_spill] sm:$0xff] %v6549_v62  ;;  %11134 = vst [vmem:[#allocation29_spill] sm:$0xff] %v6551_v58  ;;  %661 = vperm.xlu1 %5563, %v6544_v0   ;;  %656 = vperm.xlu0 %5562, %v6547_v63   ;;  %v6568_v58 = vld [vmem:[%s6249_s25 + $0x258] sm:$0xff]  ;;  %v6571_v62 = vld [vmem:[%s6249_s25 + $0x250] sm:$0xff] }
  0xa9   : > { %11139 = vst [vmem:[#allocation34_spill] sm:$0xff] %v6568_v58  ;;  %11140 = vst [vmem:[#allocation35_spill] sm:$0xff] %v6571_v62 }
  0xab   : > { %v6561_v61 = vpop.permute.xlu1 %351  ;;  %v6563_v57 = vpop.permute.xlu0 %346 }
  0xac   : > { %11137 = vst [vmem:[#allocation32_spill] sm:$0xff] %v6561_v61  ;;  %11138 = vst [vmem:[#allocation33_spill] sm:$0xff] %v6563_v57  ;;  %671 = vperm.xlu1 %5563, %v6556_v60   ;;  %666 = vperm.xlu0 %5562, %v6559_v59   ;;  %v6580_v57 = vld [vmem:[%s6249_s25 + $0x268] sm:$0xff]  ;;  %v6583_v61 = vld [vmem:[%s6249_s25 + $0x260] sm:$0xff] }
  0xad   : > { %11143 = vst [vmem:[#allocation38_spill] sm:$0xff] %v6580_v57  ;;  %11144 = vst [vmem:[#allocation39_spill] sm:$0xff] %v6583_v61 }
  0xaf   : > { %v6573_v0 = vpop.permute.xlu1 %361  ;;  %v6575_v63 = vpop.permute.xlu0 %356 }
  0xb0   : > { %11141 = vst [vmem:[#allocation36_spill] sm:$0xff] %v6573_v0  ;;  %11142 = vst [vmem:[#allocation37_spill] sm:$0xff] %v6575_v63  ;;  %681 = vperm.xlu1 %5563, %v6568_v58   ;;  %676 = vperm.xlu0 %5562, %v6571_v62   ;;  %v6592_v63 = vld [vmem:[%s6249_s25 + $0x278] sm:$0xff]  ;;  %v6595_v0 = vld [vmem:[%s6249_s25 + $0x270] sm:$0xff] }
  0xb1   : > { %11147 = vst [vmem:[#allocation42_spill] sm:$0xff] %v6592_v63  ;;  %11148 = vst [vmem:[#allocation43_spill] sm:$0xff] %v6595_v0 }
  0xb3   : > { %v6585_v60 = vpop.permute.xlu1 %371  ;;  %v6587_v59 = vpop.permute.xlu0 %366 }
  0xb4   : > { %11145 = vst [vmem:[#allocation40_spill] sm:$0xff] %v6585_v60  ;;  %11146 = vst [vmem:[#allocation41_spill] sm:$0xff] %v6587_v59  ;;  %691 = vperm.xlu1 %5563, %v6580_v57   ;;  %686 = vperm.xlu0 %5562, %v6583_v61   ;;  %v6604_v59 = vld [vmem:[%s6249_s25 + $0x288] sm:$0xff]  ;;  %v6607_v60 = vld [vmem:[%s6249_s25 + $0x280] sm:$0xff] }
  0xb5   : > { %11151 = vst [vmem:[#allocation46_spill] sm:$0xff] %v6604_v59  ;;  %11152 = vst [vmem:[#allocation47_spill] sm:$0xff] %v6607_v60 }
  0xb7   : > { %v6597_v58 = vpop.permute.xlu1 %381  ;;  %v6599_v62 = vpop.permute.xlu0 %376 }
  0xb8   : > { %11149 = vst [vmem:[#allocation44_spill] sm:$0xff] %v6597_v58  ;;  %11150 = vst [vmem:[#allocation45_spill] sm:$0xff] %v6599_v62  ;;  %701 = vperm.xlu1 %5563, %v6592_v63   ;;  %696 = vperm.xlu0 %5562, %v6595_v0   ;;  %v6616_v62 = vld [vmem:[%s6249_s25 + $0x298] sm:$0xff]  ;;  %v6619_v58 = vld [vmem:[%s6249_s25 + $0x290] sm:$0xff] }
  0xb9   : > { %11155 = vst [vmem:[#allocation50_spill] sm:$0xff] %v6616_v62  ;;  %11156 = vst [vmem:[#allocation51_spill] sm:$0xff] %v6619_v58 }
  0xbb   : > { %v6609_v57 = vpop.permute.xlu1 %391  ;;  %v6611_v61 = vpop.permute.xlu0 %386 }
  0xbc   : > { %11153 = vst [vmem:[#allocation48_spill] sm:$0xff] %v6609_v57  ;;  %11154 = vst [vmem:[#allocation49_spill] sm:$0xff] %v6611_v61  ;;  %711 = vperm.xlu1 %5563, %v6604_v59   ;;  %706 = vperm.xlu0 %5562, %v6607_v60   ;;  %v6628_v61 = vld [vmem:[%s6249_s25 + $0x2a8] sm:$0xff]  ;;  %v6631_v57 = vld [vmem:[%s6249_s25 + $0x2a0] sm:$0xff] }
  0xbd   : > { %11159 = vst [vmem:[#allocation54_spill] sm:$0xff] %v6628_v61  ;;  %11160 = vst [vmem:[#allocation55_spill] sm:$0xff] %v6631_v57 }
  0xbf   : > { %v6621_v63 = vpop.permute.xlu1 %401  ;;  %v6623_v0 = vpop.permute.xlu0 %396 }
  0xc0   : > { %11157 = vst [vmem:[#allocation52_spill] sm:$0xff] %v6621_v63  ;;  %11158 = vst [vmem:[#allocation53_spill] sm:$0xff] %v6623_v0  ;;  %721 = vperm.xlu1 %5563, %v6616_v62   ;;  %716 = vperm.xlu0 %5562, %v6619_v58   ;;  %v6640_v0 = vld [vmem:[%s6249_s25 + $0x2b8] sm:$0xff]  ;;  %v6643_v63 = vld [vmem:[%s6249_s25 + $0x2b0] sm:$0xff] }
  0xc1   : > { %11163 = vst [vmem:[#allocation58_spill] sm:$0xff] %v6640_v0  ;;  %11164 = vst [vmem:[#allocation59_spill] sm:$0xff] %v6643_v63 }
  0xc3   : > { %v6633_v59 = vpop.permute.xlu1 %411  ;;  %v6635_v60 = vpop.permute.xlu0 %406 }
  0xc4   : > { %11161 = vst [vmem:[#allocation56_spill] sm:$0xff] %v6633_v59  ;;  %11162 = vst [vmem:[#allocation57_spill] sm:$0xff] %v6635_v60  ;;  %731 = vperm.xlu1 %5563, %v6628_v61   ;;  %726 = vperm.xlu0 %5562, %v6631_v57   ;;  %v6652_v60 = vld [vmem:[%s6249_s25 + $0x2c8] sm:$0xff]  ;;  %v6655_v59 = vld [vmem:[%s6249_s25 + $0x2c0] sm:$0xff] }
  0xc5   : > { %11167 = vst [vmem:[#allocation62_spill] sm:$0xff] %v6652_v60  ;;  %11168 = vst [vmem:[#allocation63_spill] sm:$0xff] %v6655_v59 }
  0xc7   : > { %v6645_v62 = vpop.permute.xlu1 %421  ;;  %v6647_v58 = vpop.permute.xlu0 %416 }
  0xc8   : > { %11165 = vst [vmem:[#allocation60_spill] sm:$0xff] %v6645_v62  ;;  %11166 = vst [vmem:[#allocation61_spill] sm:$0xff] %v6647_v58  ;;  %741 = vperm.xlu1 %5563, %v6640_v0   ;;  %736 = vperm.xlu0 %5562, %v6643_v63   ;;  %v6664_v58 = vld [vmem:[%s6249_s25 + $0x2d8] sm:$0xff]  ;;  %v6667_v62 = vld [vmem:[%s6249_s25 + $0x2d0] sm:$0xff] }
  0xc9   : > { %11171 = vst [vmem:[#allocation66_spill] sm:$0xff] %v6664_v58  ;;  %11172 = vst [vmem:[#allocation67_spill] sm:$0xff] %v6667_v62 }
  0xcb   : > { %v6657_v61 = vpop.permute.xlu1 %431  ;;  %v6659_v57 = vpop.permute.xlu0 %426 }
  0xcc   : > { %11169 = vst [vmem:[#allocation64_spill] sm:$0xff] %v6657_v61  ;;  %11170 = vst [vmem:[#allocation65_spill] sm:$0xff] %v6659_v57  ;;  %751 = vperm.xlu1 %5563, %v6652_v60   ;;  %746 = vperm.xlu0 %5562, %v6655_v59   ;;  %v6676_v57 = vld [vmem:[%s6249_s25 + $0x2e8] sm:$0xff]  ;;  %v6679_v61 = vld [vmem:[%s6249_s25 + $0x2e0] sm:$0xff] }
  0xcd   : > { %11175 = vst [vmem:[#allocation70_spill] sm:$0xff] %v6676_v57  ;;  %11176 = vst [vmem:[#allocation71_spill] sm:$0xff] %v6679_v61 }
  0xcf   : > { %v6669_v0 = vpop.permute.xlu1 %441  ;;  %v6671_v63 = vpop.permute.xlu0 %436 }
  0xd0   : > { %11173 = vst [vmem:[#allocation68_spill] sm:$0xff] %v6669_v0  ;;  %11174 = vst [vmem:[#allocation69_spill] sm:$0xff] %v6671_v63  ;;  %761 = vperm.xlu1 %5563, %v6664_v58   ;;  %756 = vperm.xlu0 %5562, %v6667_v62   ;;  %v6688_v63 = vld [vmem:[%s6249_s25 + $0x2f8] sm:$0xff]  ;;  %v6691_v0 = vld [vmem:[%s6249_s25 + $0x2f0] sm:$0xff] }
  0xd1   : > { %11179 = vst [vmem:[#allocation74_spill] sm:$0xff] %v6688_v63  ;;  %11180 = vst [vmem:[#allocation75_spill] sm:$0xff] %v6691_v0 }
  0xd3   : > { %v6681_v60 = vpop.permute.xlu1 %451  ;;  %v6683_v59 = vpop.permute.xlu0 %446 }
  0xd4   : > { %11177 = vst [vmem:[#allocation72_spill] sm:$0xff] %v6681_v60  ;;  %11178 = vst [vmem:[#allocation73_spill] sm:$0xff] %v6683_v59  ;;  %771 = vperm.xlu1 %5563, %v6676_v57   ;;  %766 = vperm.xlu0 %5562, %v6679_v61   ;;  %v6700_v59 = vld [vmem:[%s6249_s25 + $0x308] sm:$0xff]  ;;  %v6703_v60 = vld [vmem:[%s6249_s25 + $0x300] sm:$0xff] }
  0xd5   : > { %11183 = vst [vmem:[#allocation78_spill] sm:$0xff] %v6700_v59  ;;  %11184 = vst [vmem:[#allocation79_spill] sm:$0xff] %v6703_v60 }
  0xd7   : > { %v6693_v58 = vpop.permute.xlu1 %461  ;;  %v6695_v62 = vpop.permute.xlu0 %456 }
  0xd8   : > { %11181 = vst [vmem:[#allocation76_spill] sm:$0xff] %v6693_v58  ;;  %11182 = vst [vmem:[#allocation77_spill] sm:$0xff] %v6695_v62  ;;  %781 = vperm.xlu1 %5563, %v6688_v63   ;;  %776 = vperm.xlu0 %5562, %v6691_v0   ;;  %v6712_v62 = vld [vmem:[%s6249_s25 + $0x318] sm:$0xff]  ;;  %v6715_v58 = vld [vmem:[%s6249_s25 + $0x310] sm:$0xff] }
  0xd9   : > { %11187 = vst [vmem:[#allocation82_spill] sm:$0xff] %v6712_v62  ;;  %11188 = vst [vmem:[#allocation83_spill] sm:$0xff] %v6715_v58 }
  0xdb   : > { %v6705_v57 = vpop.permute.xlu1 %471  ;;  %v6707_v61 = vpop.permute.xlu0 %466 }
  0xdc   : > { %11185 = vst [vmem:[#allocation80_spill] sm:$0xff] %v6705_v57  ;;  %11186 = vst [vmem:[#allocation81_spill] sm:$0xff] %v6707_v61  ;;  %791 = vperm.xlu1 %5563, %v6700_v59   ;;  %786 = vperm.xlu0 %5562, %v6703_v60   ;;  %v6724_v61 = vld [vmem:[%s6249_s25 + $0x328] sm:$0xff]  ;;  %v6727_v57 = vld [vmem:[%s6249_s25 + $0x320] sm:$0xff] }
  0xdd   : > { %11191 = vst [vmem:[#allocation86_spill] sm:$0xff] %v6724_v61  ;;  %11192 = vst [vmem:[#allocation87_spill] sm:$0xff] %v6727_v57 }
  0xdf   : > { %v6717_v63 = vpop.permute.xlu1 %481  ;;  %v6719_v0 = vpop.permute.xlu0 %476 }
  0xe0   : > { %11189 = vst [vmem:[#allocation84_spill] sm:$0xff] %v6717_v63  ;;  %11190 = vst [vmem:[#allocation85_spill] sm:$0xff] %v6719_v0  ;;  %801 = vperm.xlu1 %5563, %v6712_v62   ;;  %796 = vperm.xlu0 %5562, %v6715_v58   ;;  %v6736_v0 = vld [vmem:[%s6249_s25 + $0x338] sm:$0xff]  ;;  %v6739_v63 = vld [vmem:[%s6249_s25 + $0x330] sm:$0xff] }
  0xe1   : > { %11195 = vst [vmem:[#allocation90_spill] sm:$0xff] %v6736_v0  ;;  %11196 = vst [vmem:[#allocation91_spill] sm:$0xff] %v6739_v63 }
  0xe3   : > { %v6729_v59 = vpop.permute.xlu1 %491  ;;  %v6731_v60 = vpop.permute.xlu0 %486 }
  0xe4   : > { %11193 = vst [vmem:[#allocation88_spill] sm:$0xff] %v6729_v59  ;;  %11194 = vst [vmem:[#allocation89_spill] sm:$0xff] %v6731_v60  ;;  %811 = vperm.xlu1 %5563, %v6724_v61   ;;  %806 = vperm.xlu0 %5562, %v6727_v57   ;;  %v6748_v60 = vld [vmem:[%s6249_s25 + $0x348] sm:$0xff]  ;;  %v6751_v59 = vld [vmem:[%s6249_s25 + $0x340] sm:$0xff] }
  0xe5   : > { %11199 = vst [vmem:[#allocation94_spill] sm:$0xff] %v6748_v60  ;;  %11200 = vst [vmem:[#allocation95_spill] sm:$0xff] %v6751_v59 }
  0xe7   : > { %v6741_v62 = vpop.permute.xlu1 %501  ;;  %v6743_v58 = vpop.permute.xlu0 %496 }
  0xe8   : > { %11197 = vst [vmem:[#allocation92_spill] sm:$0xff] %v6741_v62  ;;  %11198 = vst [vmem:[#allocation93_spill] sm:$0xff] %v6743_v58  ;;  %821 = vperm.xlu1 %5563, %v6736_v0   ;;  %816 = vperm.xlu0 %5562, %v6739_v63   ;;  %v6760_v58 = vld [vmem:[%s6249_s25 + $0x358] sm:$0xff]  ;;  %v6763_v62 = vld [vmem:[%s6249_s25 + $0x350] sm:$0xff] }
  0xe9   : > { %11203 = vst [vmem:[#allocation98_spill] sm:$0xff] %v6760_v58  ;;  %11204 = vst [vmem:[#allocation99_spill] sm:$0xff] %v6763_v62 }
  0xeb   : > { %v6753_v61 = vpop.permute.xlu1 %511  ;;  %v6755_v57 = vpop.permute.xlu0 %506 }
  0xec   : > { %11201 = vst [vmem:[#allocation96_spill] sm:$0xff] %v6753_v61  ;;  %11202 = vst [vmem:[#allocation97_spill] sm:$0xff] %v6755_v57  ;;  %831 = vperm.xlu1 %5563, %v6748_v60   ;;  %826 = vperm.xlu0 %5562, %v6751_v59   ;;  %v6772_v57 = vld [vmem:[%s6249_s25 + $0x368] sm:$0xff]  ;;  %v6775_v61 = vld [vmem:[%s6249_s25 + $0x360] sm:$0xff] }
  0xed   : > { %11207 = vst [vmem:[#allocation102_spill] sm:$0xff] %v6772_v57  ;;  %11208 = vst [vmem:[#allocation103_spill] sm:$0xff] %v6775_v61 }
  0xef   : > { %v6765_v0 = vpop.permute.xlu1 %521  ;;  %v6767_v63 = vpop.permute.xlu0 %516 }
  0xf0   : > { %11205 = vst [vmem:[#allocation100_spill] sm:$0xff] %v6765_v0  ;;  %11206 = vst [vmem:[#allocation101_spill] sm:$0xff] %v6767_v63  ;;  %841 = vperm.xlu1 %5563, %v6760_v58   ;;  %836 = vperm.xlu0 %5562, %v6763_v62   ;;  %v6784_v63 = vld [vmem:[%s6249_s25 + $0x378] sm:$0xff]  ;;  %v6787_v0 = vld [vmem:[%s6249_s25 + $0x370] sm:$0xff] }
  0xf1   : > { %11211 = vst [vmem:[#allocation106_spill] sm:$0xff] %v6784_v63  ;;  %11212 = vst [vmem:[#allocation107_spill] sm:$0xff] %v6787_v0 }
  0xf3   : > { %v6777_v60 = vpop.permute.xlu1 %531  ;;  %v6779_v59 = vpop.permute.xlu0 %526 }
  0xf4   : > { %11209 = vst [vmem:[#allocation104_spill] sm:$0xff] %v6777_v60  ;;  %11210 = vst [vmem:[#allocation105_spill] sm:$0xff] %v6779_v59  ;;  %851 = vperm.xlu1 %5563, %v6772_v57   ;;  %846 = vperm.xlu0 %5562, %v6775_v61   ;;  %v6796_v59 = vld [vmem:[%s6249_s25 + $0x388] sm:$0xff]  ;;  %v6799_v60 = vld [vmem:[%s6249_s25 + $0x380] sm:$0xff] }
  0xf5   : > { %11215 = vst [vmem:[#allocation110_spill] sm:$0xff] %v6796_v59  ;;  %11216 = vst [vmem:[#allocation111_spill] sm:$0xff] %v6799_v60 }
  0xf7   : > { %v6789_v58 = vpop.permute.xlu1 %541  ;;  %v6791_v62 = vpop.permute.xlu0 %536 }
  0xf8   : > { %11213 = vst [vmem:[#allocation108_spill] sm:$0xff] %v6789_v58  ;;  %11214 = vst [vmem:[#allocation109_spill] sm:$0xff] %v6791_v62  ;;  %861 = vperm.xlu1 %5563, %v6784_v63   ;;  %856 = vperm.xlu0 %5562, %v6787_v0   ;;  %v6808_v62 = vld [vmem:[%s6249_s25 + $0x398] sm:$0xff]  ;;  %v6811_v58 = vld [vmem:[%s6249_s25 + $0x390] sm:$0xff] }
  0xf9   : > { %11219 = vst [vmem:[#allocation114_spill] sm:$0xff] %v6808_v62  ;;  %11220 = vst [vmem:[#allocation115_spill] sm:$0xff] %v6811_v58 }
  0xfb   : > { %v6801_v57 = vpop.permute.xlu1 %551  ;;  %v6803_v61 = vpop.permute.xlu0 %546 }
  0xfc   : > { %11217 = vst [vmem:[#allocation112_spill] sm:$0xff] %v6801_v57  ;;  %11218 = vst [vmem:[#allocation113_spill] sm:$0xff] %v6803_v61  ;;  %871 = vperm.xlu1 %5563, %v6796_v59   ;;  %866 = vperm.xlu0 %5562, %v6799_v60   ;;  %v6820_v61 = vld [vmem:[%s6249_s25 + $0x3a8] sm:$0xff]  ;;  %v6823_v57 = vld [vmem:[%s6249_s25 + $0x3a0] sm:$0xff] }
  0xfd   : > { %11223 = vst [vmem:[#allocation118_spill] sm:$0xff] %v6820_v61  ;;  %11224 = vst [vmem:[#allocation119_spill] sm:$0xff] %v6823_v57 }
  0xff   : > { %v6813_v63 = vpop.permute.xlu1 %561  ;;  %v6815_v0 = vpop.permute.xlu0 %556 }
 0x100   : > { %11221 = vst [vmem:[#allocation116_spill] sm:$0xff] %v6813_v63  ;;  %11222 = vst [vmem:[#allocation117_spill] sm:$0xff] %v6815_v0  ;;  %881 = vperm.xlu1 %5563, %v6808_v62   ;;  %876 = vperm.xlu0 %5562, %v6811_v58   ;;  %v6832_v0 = vld [vmem:[%s6249_s25 + $0x3b8] sm:$0xff]  ;;  %v6835_v63 = vld [vmem:[%s6249_s25 + $0x3b0] sm:$0xff] }
 0x101   : > { %11227 = vst [vmem:[#allocation122_spill] sm:$0xff] %v6832_v0  ;;  %11228 = vst [vmem:[#allocation123_spill] sm:$0xff] %v6835_v63 }
 0x103   : > { %v6825_v59 = vpop.permute.xlu1 %571  ;;  %v6827_v60 = vpop.permute.xlu0 %566 }
 0x104   : > { %11225 = vst [vmem:[#allocation120_spill] sm:$0xff] %v6825_v59  ;;  %11226 = vst [vmem:[#allocation121_spill] sm:$0xff] %v6827_v60  ;;  %891 = vperm.xlu1 %5563, %v6820_v61   ;;  %886 = vperm.xlu0 %5562, %v6823_v57   ;;  %v6844_v60 = vld [vmem:[%s6249_s25 + $0x3c8] sm:$0xff]  ;;  %v6847_v59 = vld [vmem:[%s6249_s25 + $0x3c0] sm:$0xff] }
 0x105   : > { %11231 = vst [vmem:[#allocation126_spill] sm:$0xff] %v6844_v60  ;;  %11232 = vst [vmem:[#allocation127_spill] sm:$0xff] %v6847_v59 }
 0x107   : > { %v6837_v62 = vpop.permute.xlu1 %581  ;;  %v6839_v58 = vpop.permute.xlu0 %576 }
 0x108   : > { %11229 = vst [vmem:[#allocation124_spill] sm:$0xff] %v6837_v62  ;;  %11230 = vst [vmem:[#allocation125_spill] sm:$0xff] %v6839_v58  ;;  %901 = vperm.xlu1 %5563, %v6832_v0   ;;  %896 = vperm.xlu0 %5562, %v6835_v63   ;;  %v6856_v58 = vld [vmem:[%s6249_s25 + $0x3d8] sm:$0xff]  ;;  %v6859_v62 = vld [vmem:[%s6249_s25 + $0x3d0] sm:$0xff] }
 0x109   : > { %11235 = vst [vmem:[#allocation130_spill] sm:$0xff] %v6856_v58  ;;  %11236 = vst [vmem:[#allocation131_spill] sm:$0xff] %v6859_v62 }
 0x10b   : > { %v6849_v61 = vpop.permute.xlu1 %591  ;;  %v6851_v57 = vpop.permute.xlu0 %586 }
 0x10c   : > { %11233 = vst [vmem:[#allocation128_spill] sm:$0xff] %v6849_v61  ;;  %11234 = vst [vmem:[#allocation129_spill] sm:$0xff] %v6851_v57  ;;  %911 = vperm.xlu1 %5563, %v6844_v60   ;;  %906 = vperm.xlu0 %5562, %v6847_v59   ;;  %v6868_v61 = vld [vmem:[%s6249_s25 + $0x3e8] sm:$0xff]  ;;  %v6871_v57 = vld [vmem:[%s6249_s25 + $0x3e0] sm:$0xff] }
 0x10d   : > { %11239 = vst [vmem:[#allocation134_spill] sm:$0xff] %v6868_v61  ;;  %v6880_v59 = vld [vmem:[%s6249_s25 + $0x3f8] sm:$0xff] }
 0x10f   : > { %v6861_v0 = vpop.permute.xlu1 %601  ;;  %v6863_v63 = vpop.permute.xlu0 %596 }
 0x110   : > { %11237 = vst [vmem:[#allocation132_spill] sm:$0xff] %v6861_v0  ;;  %11238 = vst [vmem:[#allocation133_spill] sm:$0xff] %v6863_v63  ;;  %921 = vperm.xlu1 %5563, %v6856_v58   ;;  %916 = vperm.xlu0 %5562, %v6859_v62   ;;  %v6883_v0 = vld [vmem:[%s6249_s25 + $0x3f0] sm:$0xff] }
 0x113   : > { %v6873_v55 = vpop.permute.xlu1 %611  ;;  %v6875_v60 = vpop.permute.xlu0 %606 }
 0x114   : > { %11240 = vst [vmem:[#allocation135_spill] sm:$0xff] %v6873_v55  ;;  %11241 = vst [vmem:[#allocation136_spill] sm:$0xff] %v6875_v60  ;;  %931 = vperm.xlu1 %5563, %v6868_v61   ;;  %926 = vperm.xlu0 %5562, %v6871_v57   ;;  %v6173_v60 = vmov 1  }
 0x117   : > { %v6885_v63 = vpop.permute.xlu1 %621  ;;  %v6887_v58 = vpop.permute.xlu0 %616 }
 0x118   : > { %11242 = vst [vmem:[#allocation137_spill] sm:$0xff] %v6885_v63  ;;  %11243 = vst [vmem:[#allocation138_spill] sm:$0xff] %v6887_v58  ;;  %941 = vperm.xlu1 %5563, %v6880_v59   ;;  %936 = vperm.xlu0 %5562, %v6883_v0  }
 0x11b   : > { %v6891_v62 = vpop.permute.xlu1 %631  ;;  %v6893_v55 = vpop.permute.xlu0 %626 }
 0x11c   : > { %11244 = vst [vmem:[#allocation139_spill] sm:$0xff] %v6891_v62  ;;  %5565 = vset.pattern.permute.xlu1 %v6173_v60  ;;  %5564 = vset.pattern.permute.xlu0 %v6173_v60 }
 0x11d   : > { %1237 = vperm.xlu1 %5565, %v6263_v4   ;;  %1233 = vperm.xlu0 %5564, %v6255_v2  }
 0x11f   : > { %v6897_v61 = vpop.permute.xlu1 %641  ;;  %v6899_v63 = vpop.permute.xlu0 %636 }
 0x121   : > { %1241 = vperm.xlu1 %5565, %v6252_v1   ;;  %1245 = vperm.xlu0 %5564, %v6260_v3  }
 0x123   : > { %v6903_v58 = vpop.permute.xlu1 %651  ;;  %v6905_v62 = vpop.permute.xlu0 %646 }
 0x125   : > { %1249 = vperm.xlu1 %5565, %v6271_v6   ;;  %1253 = vperm.xlu0 %5564, %v6268_v5  }
 0x127   : > { %v6909_v60 = vpop.permute.xlu1 %661  ;;  %v6911_v4 = vpop.permute.xlu0 %656 }
 0x129   : > { %1257 = vperm.xlu1 %5565, %v6279_v8   ;;  %1261 = vperm.xlu0 %5564, %v6276_v7  }
 0x12b   : > { %v6915_v2 = vpop.permute.xlu1 %671  ;;  %v6917_v1 = vpop.permute.xlu0 %666 }
 0x12d   : > { %1265 = vperm.xlu1 %5565, %v6287_v10   ;;  %1269 = vperm.xlu0 %5564, %v6284_v9  }
 0x12f   : > { %v6921_v3 = vpop.permute.xlu1 %681  ;;  %v6923_v6 = vpop.permute.xlu0 %676 }
 0x131   : > { %1273 = vperm.xlu1 %5565, %v6295_v12   ;;  %1277 = vperm.xlu0 %5564, %v6292_v11  }
 0x133   : > { %v6927_v5 = vpop.permute.xlu1 %691  ;;  %v6929_v8 = vpop.permute.xlu0 %686 }
 0x135   : > { %1281 = vperm.xlu1 %5565, %v6303_v14   ;;  %1285 = vperm.xlu0 %5564, %v6300_v13  }
 0x137   : > { %v6933_v7 = vpop.permute.xlu1 %701  ;;  %v6935_v10 = vpop.permute.xlu0 %696 }
 0x139   : > { %1289 = vperm.xlu1 %5565, %v6311_v16   ;;  %1293 = vperm.xlu0 %5564, %v6308_v15  }
 0x13b   : > { %v6939_v9 = vpop.permute.xlu1 %711  ;;  %v6941_v12 = vpop.permute.xlu0 %706 }
 0x13d   : > { %1297 = vperm.xlu1 %5565, %v6319_v18   ;;  %1301 = vperm.xlu0 %5564, %v6316_v17  }
 0x13f   : > { %v6945_v11 = vpop.permute.xlu1 %721  ;;  %v6947_v14 = vpop.permute.xlu0 %716 }
 0x141   : > { %1305 = vperm.xlu1 %5565, %v6327_v20   ;;  %1309 = vperm.xlu0 %5564, %v6324_v19  }
 0x143   : > { %v6951_v13 = vpop.permute.xlu1 %731  ;;  %v6953_v16 = vpop.permute.xlu0 %726 }
 0x145   : > { %1313 = vperm.xlu1 %5565, %v6335_v22   ;;  %1317 = vperm.xlu0 %5564, %v6332_v21  }
 0x147   : > { %v6957_v15 = vpop.permute.xlu1 %741  ;;  %v6959_v18 = vpop.permute.xlu0 %736 }
 0x149   : > { %1321 = vperm.xlu1 %5565, %v6343_v24   ;;  %1325 = vperm.xlu0 %5564, %v6340_v23  }
 0x14b   : > { %v6963_v17 = vpop.permute.xlu1 %751  ;;  %v6965_v20 = vpop.permute.xlu0 %746 }
 0x14d   : > { %1329 = vperm.xlu1 %5565, %v6351_v26   ;;  %1333 = vperm.xlu0 %5564, %v6348_v25  }
 0x14f   : > { %v6969_v19 = vpop.permute.xlu1 %761  ;;  %v6971_v22 = vpop.permute.xlu0 %756 }
 0x151   : > { %1337 = vperm.xlu1 %5565, %v6359_v28   ;;  %1341 = vperm.xlu0 %5564, %v6356_v27  }
 0x153   : > { %v6975_v21 = vpop.permute.xlu1 %771  ;;  %v6977_v24 = vpop.permute.xlu0 %766 }
 0x154   : > { %11245 = vst [vmem:[#allocation140_spill] sm:$0xff] %v6975_v21  ;;  %11246 = vst [vmem:[#allocation141_spill] sm:$0xff] %v6977_v24 }
 0x155   : > { %1345 = vperm.xlu1 %5565, %v6367_v30   ;;  %1349 = vperm.xlu0 %5564, %v6364_v29  }
 0x157   : > { %v6981_v23 = vpop.permute.xlu1 %781  ;;  %v6983_v26 = vpop.permute.xlu0 %776 }
 0x158   : > { %11247 = vst [vmem:[#allocation142_spill] sm:$0xff] %v6981_v23  ;;  %11248 = vst [vmem:[#allocation143_spill] sm:$0xff] %v6983_v26 }
 0x159   : > { %1353 = vperm.xlu1 %5565, %v6375_v32   ;;  %1357 = vperm.xlu0 %5564, %v6372_v31  }
 0x15b   : > { %v6987_v25 = vpop.permute.xlu1 %791  ;;  %v6989_v28 = vpop.permute.xlu0 %786 }
 0x15c   : > { %11249 = vst [vmem:[#allocation144_spill] sm:$0xff] %v6987_v25  ;;  %11250 = vst [vmem:[#allocation145_spill] sm:$0xff] %v6989_v28  ;;  %v11416_v28 = vld [vmem:[#allocation122_spill] sm:$0xff] }
 0x15d   : > { %1361 = vperm.xlu1 %5565, %v6383_v34   ;;  %1365 = vperm.xlu0 %5564, %v6380_v33  }
 0x15f   : > { %v6993_v27 = vpop.permute.xlu1 %801  ;;  %v6995_v30 = vpop.permute.xlu0 %796 }
 0x160   : > { %11251 = vst [vmem:[#allocation146_spill] sm:$0xff] %v6993_v27  ;;  %11252 = vst [vmem:[#allocation147_spill] sm:$0xff] %v6995_v30 }
 0x161   : > { %1369 = vperm.xlu1 %5565, %v6391_v36   ;;  %1373 = vperm.xlu0 %5564, %v6388_v35  }
 0x163   : > { %v6999_v29 = vpop.permute.xlu1 %811  ;;  %v7001_v32 = vpop.permute.xlu0 %806 }
 0x164   : > { %11253 = vst [vmem:[#allocation148_spill] sm:$0xff] %v6999_v29  ;;  %11254 = vst [vmem:[#allocation149_spill] sm:$0xff] %v7001_v32  ;;  %v11411_v32 = vld [vmem:[#allocation123_spill] sm:$0xff]  ;;  %v11413_v29 = vld [vmem:[#allocation28_spill] sm:$0xff] }
 0x165   : > { %1377 = vperm.xlu1 %5565, %v6399_v38   ;;  %1381 = vperm.xlu0 %5564, %v6396_v37  }
 0x167   : > { %v7005_v31 = vpop.permute.xlu1 %821  ;;  %v7007_v34 = vpop.permute.xlu0 %816 }
 0x168   : > { %11255 = vst [vmem:[#allocation150_spill] sm:$0xff] %v7005_v31  ;;  %11256 = vst [vmem:[#allocation151_spill] sm:$0xff] %v7007_v34  ;;  %v11410_v34 = vld [vmem:[#allocation25_spill] sm:$0xff] }
 0x169   : > { %1385 = vperm.xlu1 %5565, %v6407_v40   ;;  %1389 = vperm.xlu0 %5564, %v6404_v39  }
 0x16b   : > { %v7011_v33 = vpop.permute.xlu1 %831  ;;  %v7013_v36 = vpop.permute.xlu0 %826 }
 0x16c   : > { %11257 = vst [vmem:[#allocation152_spill] sm:$0xff] %v7011_v33  ;;  %11258 = vst [vmem:[#allocation153_spill] sm:$0xff] %v7013_v36  ;;  %v11409_v36 = vld [vmem:[#allocation24_spill] sm:$0xff] }
 0x16d   : > { %1393 = vperm.xlu1 %5565, %v6415_v42   ;;  %1397 = vperm.xlu0 %5564, %v6412_v41  }
 0x16f   : > { %v7017_v35 = vpop.permute.xlu1 %841  ;;  %v7019_v38 = vpop.permute.xlu0 %836 }
 0x170   : > { %11259 = vst [vmem:[#allocation154_spill] sm:$0xff] %v7017_v35  ;;  %11260 = vst [vmem:[#allocation155_spill] sm:$0xff] %v7019_v38  ;;  %v11408_v35 = vld [vmem:[#allocation21_spill] sm:$0xff] }
 0x171   : > { %1401 = vperm.xlu1 %5565, %v6423_v44   ;;  %1405 = vperm.xlu0 %5564, %v6420_v43  }
 0x173   : > { %v7023_v37 = vpop.permute.xlu1 %851  ;;  %v7025_v40 = vpop.permute.xlu0 %846 }
 0x174   : > { %11261 = vst [vmem:[#allocation156_spill] sm:$0xff] %v7023_v37  ;;  %11262 = vst [vmem:[#allocation157_spill] sm:$0xff] %v7025_v40  ;;  %v11403_v40 = vld [vmem:[#allocation118_spill] sm:$0xff] }
 0x175   : > { %1409 = vperm.xlu1 %5565, %v6431_v46   ;;  %1413 = vperm.xlu0 %5564, %v6428_v45  }
 0x177   : > { %v7029_v39 = vpop.permute.xlu1 %861  ;;  %v7031_v42 = vpop.permute.xlu0 %856 }
 0x178   : > { %11263 = vst [vmem:[#allocation158_spill] sm:$0xff] %v7029_v39  ;;  %11264 = vst [vmem:[#allocation159_spill] sm:$0xff] %v7031_v42  ;;  %v11401_v42 = vld [vmem:[#allocation119_spill] sm:$0xff]  ;;  %v11402_v39 = vld [vmem:[#allocation17_spill] sm:$0xff] }
 0x179   : > { %1417 = vperm.xlu1 %5565, %v6439_v48   ;;  %1421 = vperm.xlu0 %5564, %v6436_v47  }
 0x17b   : > { %v7035_v41 = vpop.permute.xlu1 %871  ;;  %v7037_v44 = vpop.permute.xlu0 %866 }
 0x17c   : > { %11265 = vst [vmem:[#allocation160_spill] sm:$0xff] %v7035_v41  ;;  %11266 = vst [vmem:[#allocation161_spill] sm:$0xff] %v7037_v44  ;;  %v11397_v44 = vld [vmem:[#allocation16_spill] sm:$0xff] }
 0x17d   : > { %1425 = vperm.xlu1 %5565, %v6447_v50   ;;  %1429 = vperm.xlu0 %5564, %v6444_v49   ;;  %v11273_v49 = vld [vmem:[#allocation5_spill] sm:$0xff] }
 0x17f   : > { %v7041_v43 = vpop.permute.xlu1 %881  ;;  %v7043_v46 = vpop.permute.xlu0 %876 }
 0x180   : > { %11267 = vst [vmem:[#allocation162_spill] sm:$0xff] %v7041_v43  ;;  %11268 = vst [vmem:[#allocation163_spill] sm:$0xff] %v7043_v46 }
 0x181   : > { %1433 = vperm.xlu1 %5565, %v6455_v52   ;;  %1437 = vperm.xlu0 %5564, %v6452_v51   ;;  %v11276_v51 = vld [vmem:[#allocation7_spill] sm:$0xff] }
 0x183   : > { %v7047_v45 = vpop.permute.xlu1 %891  ;;  %v7049_v48 = vpop.permute.xlu0 %886 }
 0x184   : > { %11269 = vst [vmem:[#allocation164_spill] sm:$0xff] %v7047_v45  ;;  %11270 = vst [vmem:[#allocation165_spill] sm:$0xff] %v7049_v48  ;;  %v11277_v45 = vld [vmem:[#allocation6_spill] sm:$0xff] }
 0x185   : > { %1441 = vperm.xlu1 %5565, %v6463_v54   ;;  %1445 = vperm.xlu0 %5564, %v6460_v53   ;;  %v11280_v53 = vld [vmem:[#allocation9_spill] sm:$0xff] }
 0x187   : > { %v7053_v47 = vpop.permute.xlu1 %901  ;;  %v7055_v50 = vpop.permute.xlu0 %896 }
 0x188   : > { %11271 = vst [vmem:[#allocation166_spill] sm:$0xff] %v7053_v47  ;;  %11272 = vst [vmem:[#allocation167_spill] sm:$0xff] %v7055_v50  ;;  %v11281_v47 = vld [vmem:[#allocation8_spill] sm:$0xff] }
 0x189   : > { %1449 = vperm.xlu1 %5565, %v6471_v56   ;;  %1453 = vperm.xlu0 %5564, %v11273_v49   ;;  %v11284_v49 = vld [vmem:[#allocation11_spill] sm:$0xff] }
 0x18b   : > { %v7059_v46 = vpop.permute.xlu1 %911  ;;  %v7061_v52 = vpop.permute.xlu0 %906 }
 0x18c   : > { %11274 = vst [vmem:[#allocation5_spill] sm:$0xff] %v7059_v46  ;;  %11275 = vst [vmem:[#allocation168_spill] sm:$0xff] %v7061_v52  ;;  %v11285_v46 = vld [vmem:[#allocation10_spill] sm:$0xff] }
 0x18d   : > { %1457 = vperm.xlu1 %5565, %v11276_v51   ;;  %1461 = vperm.xlu0 %5564, %v11277_v45   ;;  %v11288_v45 = vld [vmem:[#allocation13_spill] sm:$0xff] }
 0x18f   : > { %v7065_v48 = vpop.permute.xlu1 %921  ;;  %v7067_v54 = vpop.permute.xlu0 %916 }
 0x190   : > { %11278 = vst [vmem:[#allocation7_spill] sm:$0xff] %v7065_v48  ;;  %11279 = vst [vmem:[#allocation6_spill] sm:$0xff] %v7067_v54  ;;  %v11289_v48 = vld [vmem:[#allocation12_spill] sm:$0xff] }
 0x191   : > { %1465 = vperm.xlu1 %5565, %v11280_v53   ;;  %1469 = vperm.xlu0 %5564, %v11281_v47   ;;  %v11292_v47 = vld [vmem:[#allocation15_spill] sm:$0xff] }
 0x193   : > { %v7071_v50 = vpop.permute.xlu1 %931  ;;  %v7073_v56 = vpop.permute.xlu0 %926 }
 0x194   : > { %11282 = vst [vmem:[#allocation9_spill] sm:$0xff] %v7071_v50  ;;  %11283 = vst [vmem:[#allocation8_spill] sm:$0xff] %v7073_v56  ;;  %v11293_v50 = vld [vmem:[#allocation14_spill] sm:$0xff] }
 0x195   : > { %1473 = vperm.xlu1 %5565, %v11284_v49   ;;  %1477 = vperm.xlu0 %5564, %v11285_v46   ;;  %v11296_v46 = vld [vmem:[#allocation19_spill] sm:$0xff] }
 0x197   : > { %v7077_v52 = vpop.permute.xlu1 %941  ;;  %v7079_v51 = vpop.permute.xlu0 %936 }
 0x198   : > { %11286 = vst [vmem:[#allocation11_spill] sm:$0xff] %v7077_v52  ;;  %11287 = vst [vmem:[#allocation10_spill] sm:$0xff] %v7079_v51  ;;  %v11297_v52 = vld [vmem:[#allocation18_spill] sm:$0xff] }
 0x199   : > { %1481 = vperm.xlu1 %5565, %v11288_v45   ;;  %1485 = vperm.xlu0 %5564, %v11289_v48   ;;  %v11300_v48 = vld [vmem:[#allocation23_spill] sm:$0xff] }
 0x19c   : > { %v7083_v54 = vpop.permute.xlu1 %1237  ;;  %v7085_v53 = vpop.permute.xlu0 %1233 }
 0x19d   : > { %11290 = vst [vmem:[#allocation13_spill] sm:$0xff] %v7083_v54  ;;  %11291 = vst [vmem:[#allocation12_spill] sm:$0xff] %v7085_v53  ;;  %1489 = vperm.xlu1 %5565, %v11292_v47   ;;  %1493 = vperm.xlu0 %5564, %v11293_v50   ;;  %v11301_v54 = vld [vmem:[#allocation22_spill] sm:$0xff]  ;;  %v11304_v50 = vld [vmem:[#allocation27_spill] sm:$0xff] }
 0x1a0   : > { %v7089_v56 = vpop.permute.xlu1 %1241  ;;  %v7091_v49 = vpop.permute.xlu0 %1245 }
 0x1a1   : > { %11294 = vst [vmem:[#allocation15_spill] sm:$0xff] %v7089_v56  ;;  %11295 = vst [vmem:[#allocation14_spill] sm:$0xff] %v7091_v49  ;;  %1497 = vperm.xlu1 %5565, %v11296_v46   ;;  %1501 = vperm.xlu0 %5564, %v11297_v52   ;;  %v11305_v56 = vld [vmem:[#allocation26_spill] sm:$0xff]  ;;  %v11308_v52 = vld [vmem:[#allocation31_spill] sm:$0xff] }
 0x1a4   : > { %v7095_v51 = vpop.permute.xlu1 %1249  ;;  %v7097_v45 = vpop.permute.xlu0 %1253 }
 0x1a5   : > { %11298 = vst [vmem:[#allocation19_spill] sm:$0xff] %v7095_v51  ;;  %11299 = vst [vmem:[#allocation18_spill] sm:$0xff] %v7097_v45  ;;  %1505 = vperm.xlu1 %5565, %v11300_v48   ;;  %1509 = vperm.xlu0 %5564, %v11301_v54   ;;  %v11309_v51 = vld [vmem:[#allocation30_spill] sm:$0xff]  ;;  %v11312_v54 = vld [vmem:[#allocation35_spill] sm:$0xff] }
 0x1a8   : > { %v7101_v53 = vpop.permute.xlu1 %1257  ;;  %v7103_v47 = vpop.permute.xlu0 %1261 }
 0x1a9   : > { %11302 = vst [vmem:[#allocation23_spill] sm:$0xff] %v7101_v53  ;;  %11303 = vst [vmem:[#allocation22_spill] sm:$0xff] %v7103_v47  ;;  %1513 = vperm.xlu1 %5565, %v11304_v50   ;;  %1517 = vperm.xlu0 %5564, %v11305_v56   ;;  %v11313_v53 = vld [vmem:[#allocation34_spill] sm:$0xff]  ;;  %v11316_v56 = vld [vmem:[#allocation39_spill] sm:$0xff] }
 0x1ac   : > { %v7107_v49 = vpop.permute.xlu1 %1265  ;;  %v7109_v46 = vpop.permute.xlu0 %1269 }
 0x1ad   : > { %11306 = vst [vmem:[#allocation27_spill] sm:$0xff] %v7107_v49  ;;  %11307 = vst [vmem:[#allocation26_spill] sm:$0xff] %v7109_v46  ;;  %1521 = vperm.xlu1 %5565, %v11308_v52   ;;  %1525 = vperm.xlu0 %5564, %v11309_v51   ;;  %v11317_v49 = vld [vmem:[#allocation38_spill] sm:$0xff]  ;;  %v11320_v51 = vld [vmem:[#allocation43_spill] sm:$0xff] }
 0x1b0   : > { %v7113_v45 = vpop.permute.xlu1 %1273  ;;  %v7115_v48 = vpop.permute.xlu0 %1277 }
 0x1b1   : > { %11310 = vst [vmem:[#allocation31_spill] sm:$0xff] %v7113_v45  ;;  %11311 = vst [vmem:[#allocation30_spill] sm:$0xff] %v7115_v48  ;;  %1529 = vperm.xlu1 %5565, %v11312_v54   ;;  %1533 = vperm.xlu0 %5564, %v11313_v53   ;;  %v11321_v45 = vld [vmem:[#allocation42_spill] sm:$0xff]  ;;  %v11324_v53 = vld [vmem:[#allocation47_spill] sm:$0xff] }
 0x1b4   : > { %v7119_v47 = vpop.permute.xlu1 %1281  ;;  %v7121_v50 = vpop.permute.xlu0 %1285 }
 0x1b5   : > { %11314 = vst [vmem:[#allocation35_spill] sm:$0xff] %v7119_v47  ;;  %11315 = vst [vmem:[#allocation34_spill] sm:$0xff] %v7121_v50  ;;  %1537 = vperm.xlu1 %5565, %v11316_v56   ;;  %1541 = vperm.xlu0 %5564, %v11317_v49   ;;  %v11325_v47 = vld [vmem:[#allocation46_spill] sm:$0xff]  ;;  %v11328_v49 = vld [vmem:[#allocation51_spill] sm:$0xff] }
 0x1b8   : > { %v7125_v46 = vpop.permute.xlu1 %1289  ;;  %v7127_v52 = vpop.permute.xlu0 %1293 }
 0x1b9   : > { %11318 = vst [vmem:[#allocation39_spill] sm:$0xff] %v7125_v46  ;;  %11319 = vst [vmem:[#allocation38_spill] sm:$0xff] %v7127_v52  ;;  %1545 = vperm.xlu1 %5565, %v11320_v51   ;;  %1549 = vperm.xlu0 %5564, %v11321_v45   ;;  %v11329_v46 = vld [vmem:[#allocation50_spill] sm:$0xff]  ;;  %v11332_v45 = vld [vmem:[#allocation55_spill] sm:$0xff] }
 0x1bc   : > { %v7131_v48 = vpop.permute.xlu1 %1297  ;;  %v7133_v54 = vpop.permute.xlu0 %1301 }
 0x1bd   : > { %11322 = vst [vmem:[#allocation43_spill] sm:$0xff] %v7131_v48  ;;  %11323 = vst [vmem:[#allocation42_spill] sm:$0xff] %v7133_v54  ;;  %1553 = vperm.xlu1 %5565, %v11324_v53   ;;  %1557 = vperm.xlu0 %5564, %v11325_v47   ;;  %v11333_v48 = vld [vmem:[#allocation54_spill] sm:$0xff]  ;;  %v11336_v47 = vld [vmem:[#allocation59_spill] sm:$0xff] }
 0x1c0   : > { %v7137_v50 = vpop.permute.xlu1 %1305  ;;  %v7139_v56 = vpop.permute.xlu0 %1309 }
 0x1c1   : > { %11326 = vst [vmem:[#allocation47_spill] sm:$0xff] %v7137_v50  ;;  %11327 = vst [vmem:[#allocation46_spill] sm:$0xff] %v7139_v56  ;;  %1561 = vperm.xlu1 %5565, %v11328_v49   ;;  %1565 = vperm.xlu0 %5564, %v11329_v46   ;;  %v11337_v50 = vld [vmem:[#allocation58_spill] sm:$0xff]  ;;  %v11340_v46 = vld [vmem:[#allocation63_spill] sm:$0xff] }
 0x1c4   : > { %v7143_v52 = vpop.permute.xlu1 %1313  ;;  %v7145_v51 = vpop.permute.xlu0 %1317 }
 0x1c5   : > { %11330 = vst [vmem:[#allocation51_spill] sm:$0xff] %v7143_v52  ;;  %11331 = vst [vmem:[#allocation50_spill] sm:$0xff] %v7145_v51  ;;  %1569 = vperm.xlu1 %5565, %v11332_v45   ;;  %1573 = vperm.xlu0 %5564, %v11333_v48   ;;  %v11341_v52 = vld [vmem:[#allocation62_spill] sm:$0xff]  ;;  %v11344_v48 = vld [vmem:[#allocation67_spill] sm:$0xff] }
 0x1c8   : > { %v7149_v54 = vpop.permute.xlu1 %1321  ;;  %v7151_v53 = vpop.permute.xlu0 %1325 }
 0x1c9   : > { %11334 = vst [vmem:[#allocation55_spill] sm:$0xff] %v7149_v54  ;;  %11335 = vst [vmem:[#allocation54_spill] sm:$0xff] %v7151_v53  ;;  %1577 = vperm.xlu1 %5565, %v11336_v47   ;;  %1581 = vperm.xlu0 %5564, %v11337_v50   ;;  %v11345_v54 = vld [vmem:[#allocation66_spill] sm:$0xff]  ;;  %v11348_v50 = vld [vmem:[#allocation71_spill] sm:$0xff] }
 0x1cc   : > { %v7155_v56 = vpop.permute.xlu1 %1329  ;;  %v7157_v49 = vpop.permute.xlu0 %1333 }
 0x1cd   : > { %11338 = vst [vmem:[#allocation59_spill] sm:$0xff] %v7155_v56  ;;  %11339 = vst [vmem:[#allocation58_spill] sm:$0xff] %v7157_v49  ;;  %1585 = vperm.xlu1 %5565, %v11340_v46   ;;  %1589 = vperm.xlu0 %5564, %v11341_v52   ;;  %v11349_v56 = vld [vmem:[#allocation70_spill] sm:$0xff]  ;;  %v11352_v52 = vld [vmem:[#allocation75_spill] sm:$0xff] }
 0x1d0   : > { %v7161_v51 = vpop.permute.xlu1 %1337  ;;  %v7163_v45 = vpop.permute.xlu0 %1341 }
 0x1d1   : > { %11342 = vst [vmem:[#allocation63_spill] sm:$0xff] %v7161_v51  ;;  %11343 = vst [vmem:[#allocation62_spill] sm:$0xff] %v7163_v45  ;;  %1593 = vperm.xlu1 %5565, %v11344_v48   ;;  %1597 = vperm.xlu0 %5564, %v11345_v54   ;;  %v11353_v51 = vld [vmem:[#allocation74_spill] sm:$0xff]  ;;  %v11356_v54 = vld [vmem:[#allocation79_spill] sm:$0xff] }
 0x1d4   : > { %v7167_v53 = vpop.permute.xlu1 %1345  ;;  %v7169_v47 = vpop.permute.xlu0 %1349 }
 0x1d5   : > { %11346 = vst [vmem:[#allocation67_spill] sm:$0xff] %v7167_v53  ;;  %11347 = vst [vmem:[#allocation66_spill] sm:$0xff] %v7169_v47  ;;  %1601 = vperm.xlu1 %5565, %v11348_v50   ;;  %1605 = vperm.xlu0 %5564, %v11349_v56   ;;  %v11357_v53 = vld [vmem:[#allocation78_spill] sm:$0xff]  ;;  %v11360_v56 = vld [vmem:[#allocation83_spill] sm:$0xff] }
 0x1d8   : > { %v7173_v49 = vpop.permute.xlu1 %1353  ;;  %v7175_v46 = vpop.permute.xlu0 %1357 }
 0x1d9   : > { %11350 = vst [vmem:[#allocation71_spill] sm:$0xff] %v7173_v49  ;;  %11351 = vst [vmem:[#allocation70_spill] sm:$0xff] %v7175_v46  ;;  %1609 = vperm.xlu1 %5565, %v11352_v52   ;;  %1613 = vperm.xlu0 %5564, %v11353_v51   ;;  %v11361_v49 = vld [vmem:[#allocation82_spill] sm:$0xff]  ;;  %v11364_v51 = vld [vmem:[#allocation87_spill] sm:$0xff] }
 0x1dc   : > { %v7179_v45 = vpop.permute.xlu1 %1361  ;;  %v7181_v48 = vpop.permute.xlu0 %1365 }
 0x1dd   : > { %11354 = vst [vmem:[#allocation75_spill] sm:$0xff] %v7179_v45  ;;  %11355 = vst [vmem:[#allocation74_spill] sm:$0xff] %v7181_v48  ;;  %1617 = vperm.xlu1 %5565, %v11356_v54   ;;  %1621 = vperm.xlu0 %5564, %v11357_v53   ;;  %v11365_v45 = vld [vmem:[#allocation86_spill] sm:$0xff]  ;;  %v11368_v53 = vld [vmem:[#allocation91_spill] sm:$0xff] }
 0x1e0   : > { %v7185_v47 = vpop.permute.xlu1 %1369  ;;  %v7187_v50 = vpop.permute.xlu0 %1373 }
 0x1e1   : > { %11358 = vst [vmem:[#allocation79_spill] sm:$0xff] %v7185_v47  ;;  %11359 = vst [vmem:[#allocation78_spill] sm:$0xff] %v7187_v50  ;;  %1625 = vperm.xlu1 %5565, %v11360_v56   ;;  %1629 = vperm.xlu0 %5564, %v11361_v49   ;;  %v11369_v50 = vld [vmem:[#allocation90_spill] sm:$0xff] }
 0x1e4   : > { %v7191_v46 = vpop.permute.xlu1 %1377  ;;  %v7193_v52 = vpop.permute.xlu0 %1381 }
 0x1e5   : > { %11362 = vst [vmem:[#allocation83_spill] sm:$0xff] %v7191_v46  ;;  %11363 = vst [vmem:[#allocation82_spill] sm:$0xff] %v7193_v52  ;;  %1633 = vperm.xlu1 %5565, %v11364_v51   ;;  %1637 = vperm.xlu0 %5564, %v11365_v45   ;;  %v11372_v46 = vld [vmem:[#allocation95_spill] sm:$0xff]  ;;  %v11373_v52 = vld [vmem:[#allocation94_spill] sm:$0xff] }
 0x1e8   : > { %v7197_v48 = vpop.permute.xlu1 %1385  ;;  %v7199_v54 = vpop.permute.xlu0 %1389 }
 0x1e9   : > { %11366 = vst [vmem:[#allocation87_spill] sm:$0xff] %v7197_v48  ;;  %11367 = vst [vmem:[#allocation86_spill] sm:$0xff] %v7199_v54  ;;  %1641 = vperm.xlu1 %5565, %v11368_v53   ;;  %1645 = vperm.xlu0 %5564, %v11369_v50   ;;  %v11376_v48 = vld [vmem:[#allocation99_spill] sm:$0xff]  ;;  %v11377_v54 = vld [vmem:[#allocation98_spill] sm:$0xff]  ;;  %v10965_v50 = vlaneseq }
 0x1ec   : > { %v7203_v56 = vpop.permute.xlu1 %1393  ;;  %v7205_v49 = vpop.permute.xlu0 %1397 }
 0x1ed   : > { %11370 = vst [vmem:[#allocation91_spill] sm:$0xff] %v7203_v56  ;;  %11371 = vst [vmem:[#allocation90_spill] sm:$0xff] %v7205_v49  ;;  %1649 = vperm.xlu1 %5565, %v11372_v46   ;;  %1653 = vperm.xlu0 %5564, %v11373_v52   ;;  %v11380_v56 = vld [vmem:[#allocation103_spill] sm:$0xff]  ;;  %v11381_v49 = vld [vmem:[#allocation102_spill] sm:$0xff] }
 0x1f0   : > { %v7209_v51 = vpop.permute.xlu1 %1401  ;;  %v7211_v45 = vpop.permute.xlu0 %1405 }
 0x1f1   : > { %11374 = vst [vmem:[#allocation95_spill] sm:$0xff] %v7209_v51  ;;  %11375 = vst [vmem:[#allocation94_spill] sm:$0xff] %v7211_v45  ;;  %1657 = vperm.xlu1 %5565, %v11376_v48   ;;  %1661 = vperm.xlu0 %5564, %v11377_v54   ;;  %v7227_v45 = vshrl.u32 %v10965_v50, 7  ;;  %v11385_v48 = vld [vmem:[#allocation107_spill] sm:$0xff]  ;;  %v11386_v54 = vld [vmem:[#allocation106_spill] sm:$0xff] }
 0x1f2   : > { %v7257_v51 = vld [vmem:[%s7234_s29 + $0x4] sm:$0xf] }
 0x1f3   : > { %11384 = vst [vmem:[#allocation169_spill] sm:$0xff] %v7227_v45  ;;  %v7241_v50 = vsub.s32 0, %v7227_v45 }
 0x1f4   : > { %v7215_v47 = vpop.permute.xlu1 %1409  ;;  %v7217_v53 = vpop.permute.xlu0 %1413 }
 0x1f5   : > { %11378 = vst [vmem:[#allocation99_spill] sm:$0xff] %v7215_v47  ;;  %11379 = vst [vmem:[#allocation98_spill] sm:$0xff] %v7217_v53  ;;  %1665 = vperm.xlu1 %5565, %v11380_v56   ;;  %1669 = vperm.xlu0 %5564, %v11381_v49   ;;  %v11393_v47 = vld [vmem:[#allocation115_spill] sm:$0xff] }
 0x1f8   : > { %v7222_v46 = vpop.permute.xlu1 %1417  ;;  %v7224_v52 = vpop.permute.xlu0 %1421 }
 0x1f9   : > { %11382 = vst [vmem:[#allocation103_spill] sm:$0xff] %v7222_v46  ;;  %11383 = vst [vmem:[#allocation102_spill] sm:$0xff] %v7224_v52  ;;  %1673 = vperm.xlu1 %5565, %v11385_v48   ;;  %1677 = vperm.xlu0 %5564, %v11386_v54   ;;  %v11389_v48 = vld [vmem:[#allocation111_spill] sm:$0xff]  ;;  %v7245_v54 = vld [vmem:[%s7234_s29] sm:$0xf] }
 0x1fa   : > { %v11390_v52 = vld [vmem:[#allocation110_spill] sm:$0xff] }
 0x1fc   : > { %v7236_v56 = vpop.permute.xlu1 %1425  ;;  %v7238_v49 = vpop.permute.xlu0 %1429 }
 0x1fd   : > { %11387 = vst [vmem:[#allocation107_spill] sm:$0xff] %v7236_v56  ;;  %11388 = vst [vmem:[#allocation106_spill] sm:$0xff] %v7238_v49  ;;  %1681 = vperm.xlu1 %5565, %v11389_v48   ;;  %1685 = vperm.xlu0 %5564, %v11390_v52   ;;  %v947_v56 = vrot.slane %v7245_v54, %v7241_v50  ;;  %v11394_v49 = vld [vmem:[#allocation114_spill] sm:$0xff] }
 0x1fe   : > { %v7265_v52 = vld [vmem:[%s7234_s29 + $0x8] sm:$0xf] }
 0x1ff   : > { %v978_v41 = vsub.f32 %v11397_v44, %v947_v56  ;;  %11398 = vst [vmem:[#allocation16_spill] sm:$0xff] %v7265_v52  ;;  %v7283_v44 = vrot.slane %v7265_v52, %v7241_v50  ;;  %v981_v33 = vsub.f32 %v11409_v36, %v947_v56  ;;  %v980_v31 = vsub.f32 %v11410_v34, %v947_v56  ;;  %v11415_v52 = vld [vmem:[#allocation32_spill] sm:$0xff]  ;;  %v11419_v36 = vld [vmem:[#allocation37_spill] sm:$0xff] }
 0x200   : > { %v7248_v46 = vpop.permute.xlu1 %1433  ;;  %v7250_v53 = vpop.permute.xlu0 %1437  ;;  %v983_v30 = vsub.f32 %v11413_v29, %v947_v56  ;;  %v986_v25 = vsub.f32 %v11419_v36, %v947_v56  ;;  %v11420_v34 = vld [vmem:[#allocation40_spill] sm:$0xff] }
 0x201   : > { %11391 = vst [vmem:[#allocation111_spill] sm:$0xff] %v7248_v46  ;;  %11392 = vst [vmem:[#allocation110_spill] sm:$0xff] %v7250_v53  ;;  %1689 = vperm.xlu1 %5565, %v11393_v47   ;;  %1693 = vperm.xlu0 %5564, %v11394_v49   ;;  %v7268_v46 = vld [vmem:[%s7234_s29 + $0xc] sm:$0xf]  ;;  %v7271_v53 = vld [vmem:[%s7234_s29 + $0x10] sm:$0xf]  ;;  %v976_v47 = vsub.f32 %v11402_v39, %v947_v56  ;;  %v7278_v49 = vrot.slane %v7257_v51, %v7241_v50 }
 0x202   : > { %11399 = vst [vmem:[#allocation170_spill] sm:$0xff] %v7268_v46  ;;  %11400 = vst [vmem:[#allocation171_spill] sm:$0xff] %v7271_v53  ;;  %v7287_v37 = vrot.slane %v7268_v46, %v7241_v50  ;;  %v7297_v38 = vmul.f32 %v978_v41, %v978_v41  ;;  %v11417_v41 = vld [vmem:[#allocation33_spill] sm:$0xff]  ;;  %v989_v26 = vsub.f32 %v11420_v34, %v947_v56  ;;  %v11423_v29 = vld [vmem:[#allocation44_spill] sm:$0xff] }
 0x203   : > { %v7303_v46 = vmul.f32 %v976_v47, %v976_v47  ;;  %v11422_v47 = vld [vmem:[#allocation41_spill] sm:$0xff]  ;;  %v991_v23 = vsub.f32 %v11423_v29, %v947_v56  ;;  %v11429_v36 = vld [vmem:[#allocation48_spill] sm:$0xff]  ;;  %v7331_v34 = vld [vmem:[%s7234_s29 + $0x14] sm:$0xf]  ;;  %v7334_v29 = vmul.f32 %v983_v30, %v983_v30 }
 0x204   : > { %v7259_v43 = vpop.permute.xlu1 %1441  ;;  %v7261_v48 = vpop.permute.xlu0 %1445  ;;  %11407 = vst [vmem:[#allocation118_spill] sm:$0xff] %v7297_v38 }
 0x205   : > { %11395 = vst [vmem:[#allocation115_spill] sm:$0xff] %v7259_v43  ;;  %11396 = vst [vmem:[#allocation114_spill] sm:$0xff] %v7261_v48  ;;  %1697 = vperm.xlu1 %5565, %v11401_v42   ;;  %1701 = vperm.xlu0 %5564, %v11403_v40   ;;  %v11404_v43 = vld [vmem:[#allocation20_spill] sm:$0xff]  ;;  %v7291_v42 = vrot.slane %v7271_v53, %v7241_v50  ;;  %v11414_v53 = vld [vmem:[#allocation29_spill] sm:$0xff]  ;;  %v7353_v30 = vmul.f32 %v991_v23, %v991_v23 }
 0x206   : > { %v979_v48 = vsub.f32 %v11404_v43, %v947_v56  ;;  %v977_v43 = vsub.f32 %v11408_v35, %v947_v56  ;;  %11412 = vst [vmem:[#allocation20_spill] sm:$0xff] %v7303_v46  ;;  %v982_v27 = vsub.f32 %v11414_v53, %v947_v56  ;;  %v11418_v35 = vld [vmem:[#allocation36_spill] sm:$0xff]  ;;  %v988_v46 = vsub.f32 %v11422_v47, %v947_v56  ;;  %v11424_v53 = vld [vmem:[#allocation45_spill] sm:$0xff]  ;;  %v11431_v47 = vld [vmem:[#allocation127_spill] sm:$0xff] }
 0x207   : > { %v987_v38 = vsub.f32 %v11418_v35, %v947_v56  ;;  %v990_v24 = vsub.f32 %v11424_v53, %v947_v56  ;;  %v7326_v35 = vmul.f32 %v980_v31, %v980_v31  ;;  %11430 = vst [vmem:[#allocation29_spill] sm:$0xff] %v7331_v34  ;;  %11432 = vst [vmem:[#allocation32_spill] sm:$0xff] %v7334_v29  ;;  %v11449_v23 = vld [vmem:[#allocation56_spill] sm:$0xff] }
 0x208   : > { %v7293_v39 = vpop.permute.xlu1 %1449  ;;  %v7295_v40 = vpop.permute.xlu0 %1453  ;;  %11442 = vst [vmem:[#allocation45_spill] sm:$0xff] %v7353_v30  ;;  %v11450_v30 = vld [vmem:[#allocation131_spill] sm:$0xff] }
 0x209   : > { %11405 = vst [vmem:[#allocation119_spill] sm:$0xff] %v7293_v39  ;;  %11406 = vst [vmem:[#allocation17_spill] sm:$0xff] %v7295_v40  ;;  %1705 = vperm.xlu1 %5565, %v11411_v32   ;;  %v985_v39 = vsub.f32 %v11415_v52, %v947_v56  ;;  %1709 = vperm.xlu0 %5564, %v11416_v28   ;;  %v984_v40 = vsub.f32 %v11417_v41, %v947_v56 }
 0x20a   : > { %v7313_v32 = vmul.f32 %v979_v48, %v979_v48  ;;  %v7322_v28 = vmul.f32 %v977_v43, %v977_v43  ;;  %v7324_v41 = vmul.f32 %v981_v33, %v981_v33  ;;  %11428 = vst [vmem:[#allocation28_spill] sm:$0xff] %v7326_v35  ;;  %v993_v48 = vsub.f32 %v11429_v36, %v7278_v49  ;;  %v11435_v43 = vld [vmem:[#allocation49_spill] sm:$0xff]  ;;  %v11436_v33 = vld [vmem:[#allocation126_spill] sm:$0xff] }
 0x20b   : > { %v7336_v56 = vmul.f32 %v982_v27, %v982_v27  ;;  %v7338_v53 = vmul.f32 %v985_v39, %v985_v39  ;;  %v7343_v31 = vmul.f32 %v984_v40, %v984_v40  ;;  %v7347_v36 = vmul.f32 %v986_v25, %v986_v25  ;;  %v11447_v25 = vld [vmem:[#allocation52_spill] sm:$0xff] }
 0x20c   : > { %11421 = vst [vmem:[#allocation21_spill] sm:$0xff] %v7313_v32  ;;  %v7318_v52 = vpop.permute.xlu1 %1457  ;;  %v7320_v21 = vpop.permute.xlu0 %1461  ;;  %11427 = vst [vmem:[#allocation123_spill] sm:$0xff] %v7324_v41  ;;  %v7349_v41 = vmul.f32 %v989_v26, %v989_v26  ;;  %v7355_v27 = vmul.f32 %v990_v24, %v990_v24  ;;  %v7359_v39 = vrot.slane %v7331_v34, %v7241_v50  ;;  %v11452_v34 = vld [vmem:[#allocation57_spill] sm:$0xff] }
 0x20d   : > { %11425 = vst [vmem:[#allocation24_spill] sm:$0xff] %v7318_v52  ;;  %11426 = vst [vmem:[#allocation25_spill] sm:$0xff] %v7320_v21  ;;  %1713 = vperm.xlu1 %5565, %v11431_v47   ;;  %v992_v21 = vsub.f32 %v11435_v43, %v7278_v49  ;;  %1717 = vperm.xlu0 %5564, %v11436_v33   ;;  %v7345_v52 = vmul.f32 %v987_v38, %v987_v38 }
 0x20e   : > { %11433 = vst [vmem:[#allocation122_spill] sm:$0xff] %v7336_v56  ;;  %11434 = vst [vmem:[#allocation33_spill] sm:$0xff] %v7338_v53  ;;  %v7351_v47 = vmul.f32 %v988_v46, %v988_v46  ;;  %v7365_v38 = vmul.f32 %v993_v48, %v993_v48  ;;  %v995_v26 = vsub.f32 %v11447_v25, %v7278_v49  ;;  %v11448_v46 = vld [vmem:[#allocation53_spill] sm:$0xff]  ;;  %v11455_v25 = vld [vmem:[#allocation130_spill] sm:$0xff] }
 0x20f   : > { %11437 = vst [vmem:[#allocation36_spill] sm:$0xff] %v7343_v31  ;;  %11438 = vst [vmem:[#allocation37_spill] sm:$0xff] %v7345_v52  ;;  %v994_v33 = vsub.f32 %v11448_v46, %v7278_v49  ;;  %v997_v24 = vsub.f32 %v11449_v23, %v7278_v49  ;;  %v11456_v46 = vld [vmem:[#allocation64_spill] sm:$0xff]  ;;  %v11457_v23 = vld [vmem:[#allocation65_spill] sm:$0xff] }
 0x210   : > { %11439 = vst [vmem:[#allocation40_spill] sm:$0xff] %v7347_v36  ;;  %11440 = vst [vmem:[#allocation41_spill] sm:$0xff] %v7349_v41  ;;  %v7361_v43 = vpop.permute.xlu1 %1465  ;;  %v7363_v40 = vpop.permute.xlu0 %1469  ;;  %v1000_v52 = vsub.f32 %v11457_v23, %v7278_v49  ;;  %v11460_v36 = vld [vmem:[#allocation72_spill] sm:$0xff] }
 0x211   : > { %11441 = vst [vmem:[#allocation44_spill] sm:$0xff] %v7351_v47  ;;  %11443 = vst [vmem:[#allocation48_spill] sm:$0xff] %v7355_v27  ;;  %1721 = vperm.xlu1 %5565, %v11450_v30   ;;  %v7374_v27 = vmul.f32 %v992_v21, %v992_v21  ;;  %1725 = vperm.xlu0 %5564, %v11455_v25   ;;  %v1001_v47 = vsub.f32 %v11456_v46, %v7278_v49  ;;  %v11458_v21 = vld [vmem:[#allocation68_spill] sm:$0xff]  ;;  %v11463_v46 = vld [vmem:[#allocation77_spill] sm:$0xff] }
 0x212   : > { %11444 = vst [vmem:[#allocation127_spill] sm:$0xff] %v7361_v43  ;;  %11445 = vst [vmem:[#allocation49_spill] sm:$0xff] %v7363_v40  ;;  %v996_v43 = vsub.f32 %v11452_v34, %v7278_v49  ;;  %v11453_v40 = vld [vmem:[#allocation60_spill] sm:$0xff]  ;;  %v1003_v30 = vsub.f32 %v11458_v21, %v7278_v49  ;;  %v1006_v29 = vsub.f32 %v11463_v46, %v7278_v49  ;;  %v11470_v46 = vld [vmem:[#allocation81_spill] sm:$0xff] }
 0x213   : > { %11446 = vst [vmem:[#allocation126_spill] sm:$0xff] %v7365_v38  ;;  %11451 = vst [vmem:[#allocation52_spill] sm:$0xff] %v7374_v27  ;;  %v999_v48 = vsub.f32 %v11453_v40, %v7278_v49  ;;  %v11454_v38 = vld [vmem:[#allocation61_spill] sm:$0xff]  ;;  %v1005_v40 = vsub.f32 %v11460_v36, %v7278_v49  ;;  %v11462_v25 = vld [vmem:[#allocation76_spill] sm:$0xff]  ;;  %v7403_v21 = vmul.f32 %v995_v26, %v995_v26 }
 0x214   : > { %v998_v41 = vsub.f32 %v11454_v38, %v7278_v49  ;;  %v11459_v27 = vld [vmem:[#allocation69_spill] sm:$0xff]  ;;  %v1007_v31 = vsub.f32 %v11462_v25, %v7278_v49  ;;  %v7399_v23 = vpop.permute.xlu1 %1473  ;;  %v7401_v56 = vpop.permute.xlu0 %1477  ;;  %v7407_v35 = vmul.f32 %v997_v24, %v997_v24  ;;  %v11467_v36 = vld [vmem:[#allocation80_spill] sm:$0xff]  ;;  %v7424_v24 = vmul.f32 %v1001_v47, %v1001_v47 }
 0x215   : > { %v1002_v34 = vsub.f32 %v11459_v27, %v7278_v49  ;;  %v11461_v38 = vld [vmem:[#allocation73_spill] sm:$0xff]  ;;  %11464 = vst [vmem:[#allocation53_spill] sm:$0xff] %v7399_v23  ;;  %11465 = vst [vmem:[#allocation56_spill] sm:$0xff] %v7401_v56  ;;  %v7405_v27 = vmul.f32 %v994_v33, %v994_v33  ;;  %v1009_v32 = vsub.f32 %v11467_v36, %v7283_v44  ;;  %1729 = vperm.xlu1 %5565, %v6871_v57   ;;  %v7421_v26 = vld [vmem:[%s7234_s29 + $0x18] sm:$0xf] }
 0x216   : > { %v1004_v53 = vsub.f32 %v11461_v38, %v7278_v49  ;;  %11466 = vst [vmem:[#allocation131_spill] sm:$0xff] %v7407_v35  ;;  %v7412_v38 = vmul.f32 %v996_v43, %v996_v43  ;;  %v7414_v25 = vmul.f32 %v999_v48, %v999_v48  ;;  %v7416_v49 = vmul.f32 %v998_v41, %v998_v41  ;;  %v11472_v33 = vld [vmem:[#allocation134_spill] sm:$0xff] }
 0x217   : > { %v1008_v56 = vsub.f32 %v11470_v46, %v7283_v44  ;;  %11471 = vst [vmem:[#allocation61_spill] sm:$0xff] %v7421_v26  ;;  %1733 = vperm.xlu0 %5564, %v11472_v33   ;;  %11473 = vst [vmem:[#allocation130_spill] sm:$0xff] %v7424_v24  ;;  %v7426_v23 = vmul.f32 %v1000_v52, %v1000_v52  ;;  %v7428_v36 = vmul.f32 %v1003_v30, %v1003_v30  ;;  %v11484_v52 = vld [vmem:[#allocation84_spill] sm:$0xff] }
 0x218   : > { %11468 = vst [vmem:[#allocation57_spill] sm:$0xff] %v7414_v25  ;;  %11469 = vst [vmem:[#allocation60_spill] sm:$0xff] %v7416_v49  ;;  %v7430_v57 = vmul.f32 %v1002_v34, %v1002_v34  ;;  %v7432_v43 = vmul.f32 %v1005_v40, %v1005_v40  ;;  %v7434_v48 = vmul.f32 %v1004_v53, %v1004_v53  ;;  %v7440_v46 = vpop.permute.xlu1 %1481  ;;  %v7442_v49 = vpop.permute.xlu0 %1485  ;;  %v11485_v34 = vld [vmem:[#allocation85_spill] sm:$0xff] }
 0x219   : > { %11474 = vst [vmem:[#allocation64_spill] sm:$0xff] %v7426_v23  ;;  %11475 = vst [vmem:[#allocation65_spill] sm:$0xff] %v7428_v36  ;;  %v7436_v41 = vmul.f32 %v1007_v31, %v1007_v31  ;;  %v7438_v25 = vmul.f32 %v1006_v29, %v1006_v29  ;;  %v7444_v47 = vmul.f32 %v1009_v32, %v1009_v32  ;;  %1737 = vperm.xlu1 %5565, %v6883_v0   ;;  %v11487_v31 = vld [vmem:[#allocation88_spill] sm:$0xff]  ;;  %v11488_v32 = vld [vmem:[#allocation89_spill] sm:$0xff]  ;;  %v6174_v23 = vmov 2  }
 0x21a   : > { %11476 = vst [vmem:[#allocation68_spill] sm:$0xff] %v7430_v57  ;;  %11477 = vst [vmem:[#allocation69_spill] sm:$0xff] %v7432_v43  ;;  %v1011_v30 = vsub.f32 %v11484_v52, %v7283_v44  ;;  %v1010_v33 = vsub.f32 %v11485_v34, %v7283_v44  ;;  %v7452_v53 = vrot.slane %v7421_v26, %v7241_v50  ;;  %v11489_v52 = vld [vmem:[#allocation92_spill] sm:$0xff]  ;;  %v11490_v34 = vld [vmem:[#allocation93_spill] sm:$0xff] }
 0x21b   : > { %11478 = vst [vmem:[#allocation72_spill] sm:$0xff] %v7434_v48  ;;  %11479 = vst [vmem:[#allocation73_spill] sm:$0xff] %v7436_v41  ;;  %v7455_v29 = vmul.f32 %v1008_v56, %v1008_v56  ;;  %v1013_v40 = vsub.f32 %v11487_v31, %v7283_v44  ;;  %1741 = vperm.xlu0 %5564, %v6880_v59   ;;  %v11491_v41 = vld [vmem:[#allocation96_spill] sm:$0xff]  ;;  %v11492_v0 = vld [vmem:[#allocation97_spill] sm:$0xff] }
 0x21c   : > { %11480 = vst [vmem:[#allocation76_spill] sm:$0xff] %v7438_v25  ;;  %11481 = vst [vmem:[#allocation77_spill] sm:$0xff] %v7440_v46  ;;  %v1015_v46 = vsub.f32 %v11489_v52, %v7283_v44  ;;  %v1017_v25 = vsub.f32 %v11491_v41, %v7283_v44  ;;  %v1016_v56 = vsub.f32 %v11492_v0, %v7283_v44  ;;  %v11495_v59 = vld [vmem:[#allocation104_spill] sm:$0xff]  ;;  %v11496_v43 = vld [vmem:[#allocation105_spill] sm:$0xff]  ;;  %v7478_v48 = vpop.permute.xlu1 %1489  ;;  %v7480_v41 = vpop.permute.xlu0 %1493 }
 0x21d   : > { %11482 = vst [vmem:[#allocation80_spill] sm:$0xff] %v7442_v49  ;;  %11483 = vst [vmem:[#allocation81_spill] sm:$0xff] %v7444_v47  ;;  %v1012_v49 = vsub.f32 %v11488_v32, %v7283_v44  ;;  %v1014_v47 = vsub.f32 %v11490_v34, %v7283_v44  ;;  %v11494_v32 = vld [vmem:[#allocation101_spill] sm:$0xff]  ;;  %v1021_v52 = vsub.f32 %v11495_v59, %v7283_v44  ;;  %5566 = vset.pattern.permute.xlu1 %v6174_v23 }
 0x21e   : > { %11486 = vst [vmem:[#allocation134_spill] sm:$0xff] %v7455_v29  ;;  %v11493_v29 = vld [vmem:[#allocation100_spill] sm:$0xff]  ;;  %v1018_v26 = vsub.f32 %v11494_v32, %v7283_v44  ;;  %v1020_v34 = vsub.f32 %v11496_v43, %v7283_v44  ;;  %11497 = vst [vmem:[#allocation84_spill] sm:$0xff] %v7478_v48  ;;  %v7482_v36 = vmul.f32 %v1011_v30, %v1011_v30  ;;  %v11502_v32 = vld [vmem:[#allocation109_spill] sm:$0xff] }
 0x21f   : > { %v1019_v31 = vsub.f32 %v11493_v29, %v7283_v44  ;;  %11498 = vst [vmem:[#allocation85_spill] sm:$0xff] %v7480_v41  ;;  %v7484_v0 = vmul.f32 %v1010_v33, %v1010_v33  ;;  %v11501_v29 = vld [vmem:[#allocation108_spill] sm:$0xff]  ;;  %v1022_v24 = vsub.f32 %v11502_v32, %v7283_v44  ;;  %v7490_v59 = vmul.f32 %v1013_v40, %v1013_v40  ;;  %v5829_v40 = vld [vmem:[%s6249_s25 + $0x8] sm:$0xff] }
 0x220   : > { %11499 = vst [vmem:[#allocation88_spill] sm:$0xff] %v7482_v36  ;;  %v1023_v57 = vsub.f32 %v11501_v29, %v7283_v44  ;;  %v7492_v43 = vmul.f32 %v1012_v49, %v1012_v49  ;;  %v11505_v48 = vld [vmem:[#allocation112_spill] sm:$0xff]  ;;  %5567 = vset.pattern.permute.xlu0 %v6174_v23  ;;  %v7500_v36 = vmul.f32 %v1015_v46, %v1015_v46 }
 0x221   : > { %11500 = vst [vmem:[#allocation89_spill] sm:$0xff] %v7484_v0  ;;  %11503 = vst [vmem:[#allocation92_spill] sm:$0xff] %v7490_v59  ;;  %v1025_v41 = vsub.f32 %v11505_v48, %v7287_v37  ;;  %v7497_v30 = vld [vmem:[%s7234_s29 + $0x1c] sm:$0xf]  ;;  %v5828_v33 = vld [vmem:[%s6249_s25] sm:$0xff]  ;;  %v7502_v29 = vmul.f32 %v1014_v47, %v1014_v47  ;;  %v7504_v0 = vmul.f32 %v1017_v25, %v1017_v25  ;;  %2165 = vperm.xlu0 %5567, %v5829_v40  }
 0x222   : > { %11504 = vst [vmem:[#allocation93_spill] sm:$0xff] %v7492_v43  ;;  %11506 = vst [vmem:[#allocation96_spill] sm:$0xff] %v7497_v30  ;;  %2161 = vperm.xlu1 %5566, %v5828_v33   ;;  %v7506_v44 = vmul.f32 %v1016_v56, %v1016_v56  ;;  %v7509_v49 = vmul.f32 %v1019_v31, %v1019_v31  ;;  %v7511_v32 = vmul.f32 %v1018_v26, %v1018_v26  ;;  %v7517_v33 = vpop.permute.xlu1 %1497  ;;  %v11518_v47 = vld [vmem:[#allocation113_spill] sm:$0xff]  ;;  %v7529_v26 = vpop.permute.xlu0 %1501 }
 0x223   : > { %11507 = vst [vmem:[#allocation97_spill] sm:$0xff] %v7500_v36  ;;  %11508 = vst [vmem:[#allocation100_spill] sm:$0xff] %v7502_v29  ;;  %v7513_v48 = vmul.f32 %v1021_v52, %v1021_v52  ;;  %v7515_v23 = vmul.f32 %v1020_v34, %v1020_v34  ;;  %v7519_v46 = vmul.f32 %v1023_v57, %v1023_v57  ;;  %v11521_v34 = vld [vmem:[#allocation116_spill] sm:$0xff] }
 0x224   : > { %11509 = vst [vmem:[#allocation101_spill] sm:$0xff] %v7504_v0  ;;  %11510 = vst [vmem:[#allocation104_spill] sm:$0xff] %v7506_v44  ;;  %v7521_v25 = vmul.f32 %v1022_v24, %v1022_v24  ;;  %v1024_v56 = vsub.f32 %v11518_v47, %v7287_v37  ;;  %v7527_v31 = vrot.slane %v7497_v30, %v7241_v50  ;;  %v11523_v24 = vld [vmem:[#allocation120_spill] sm:$0xff]  ;;  %v11524_v47 = vld [vmem:[#allocation121_spill] sm:$0xff] }
 0x225   : > { %11511 = vst [vmem:[#allocation105_spill] sm:$0xff] %v7509_v49  ;;  %11512 = vst [vmem:[#allocation108_spill] sm:$0xff] %v7511_v32  ;;  %v7531_v52 = vmul.f32 %v1025_v41, %v1025_v41  ;;  %v1027_v40 = vsub.f32 %v11521_v34, %v7287_v37  ;;  %v11525_v50 = vld [vmem:[#allocation124_spill] sm:$0xff]  ;;  %v11526_v41 = vld [vmem:[#allocation125_spill] sm:$0xff] }
 0x226   : > { %11513 = vst [vmem:[#allocation109_spill] sm:$0xff] %v7513_v48  ;;  %11514 = vst [vmem:[#allocation112_spill] sm:$0xff] %v7515_v23  ;;  %v1028_v48 = vsub.f32 %v11524_v47, %v7287_v37  ;;  %v1031_v30 = vsub.f32 %v11525_v50, %v7287_v37  ;;  %v5831_v23 = vld [vmem:[%s6249_s25 + $0x20] sm:$0xff]  ;;  %v11531_v50 = vld [vmem:[#allocation135_spill] sm:$0xff]  ;;  %v7557_v44 = vpop.permute.xlu1 %1505  ;;  %v7568_v59 = vpop.permute.xlu0 %1509 }
 0x227   : > { %11515 = vst [vmem:[#allocation172_spill] sm:$0xff] %v7517_v33  ;;  %11516 = vst [vmem:[#allocation173_spill] sm:$0xff] %v7519_v46  ;;  %v11522_v33 = vld [vmem:[#allocation117_spill] sm:$0xff]  ;;  %v1029_v46 = vsub.f32 %v11523_v24, %v7287_v37  ;;  %2177 = vperm.xlu0 %5567, %v5831_v23   ;;  %v1037_v0 = vsub.f32 %v11531_v50, %v7287_v37  ;;  %v7572_v50 = vmul.f32 %v1027_v40, %v1027_v40 }
 0x228   : > { %11517 = vst [vmem:[#allocation174_spill] sm:$0xff] %v7521_v25  ;;  %11519 = vst [vmem:[#allocation113_spill] sm:$0xff] %v7529_v26  ;;  %v1026_v57 = vsub.f32 %v11522_v33, %v7287_v37  ;;  %v5830_v25 = vld [vmem:[%s6249_s25 + $0x10] sm:$0xff]  ;;  %v1030_v26 = vsub.f32 %v11526_v41, %v7287_v37  ;;  %v11528_v33 = vld [vmem:[#allocation129_spill] sm:$0xff]  ;;  %v7579_v35 = vmul.f32 %v1028_v48, %v1028_v48 }
 0x229   : > { %11520 = vst [vmem:[#allocation175_spill] sm:$0xff] %v7531_v52  ;;  %2169 = vperm.xlu1 %5566, %v5830_v25   ;;  %v11527_v52 = vld [vmem:[#allocation128_spill] sm:$0xff]  ;;  %v1032_v24 = vsub.f32 %v11528_v33, %v7287_v37  ;;  %v11530_v47 = vld [vmem:[#allocation133_spill] sm:$0xff]  ;;  %11532 = vst [vmem:[#allocation116_spill] sm:$0xff] %v7557_v44  ;;  %v7576_v43 = vmul.f32 %v1029_v46, %v1029_v46  ;;  %v7594_v46 = vmul.f32 %v1037_v0, %v1037_v0 }
 0x22a   : > { %v1033_v34 = vsub.f32 %v11527_v52, %v7287_v37  ;;  %v11529_v25 = vld [vmem:[#allocation132_spill] sm:$0xff]  ;;  %v1034_v32 = vsub.f32 %v11530_v47, %v7287_v37  ;;  %v11534_v23 = vld [vmem:[#allocation137_spill] sm:$0xff]  ;;  %v11535_v33 = vld [vmem:[#allocation138_spill] sm:$0xff]  ;;  %v7570_v47 = vmul.f32 %v1024_v56, %v1024_v56  ;;  %v7574_v44 = vmul.f32 %v1026_v57, %v1026_v57 }
 0x22b   : > { %v1035_v49 = vsub.f32 %v11529_v25, %v7287_v37  ;;  %v11533_v41 = vld [vmem:[#allocation136_spill] sm:$0xff]  ;;  %v1039_v36 = vsub.f32 %v11534_v23, %v7287_v37  ;;  %v1038_v29 = vsub.f32 %v11535_v33, %v7287_v37  ;;  %v7566_v25 = vsub.s32 1, %v7227_v45  ;;  %v5833_v45 = vld [vmem:[%s6249_s25 + $0x30] sm:$0xff] }
 0x22c   : > { %v1036_v52 = vsub.f32 %v11533_v41, %v7287_v37  ;;  %v5832_v41 = vld [vmem:[%s6249_s25 + $0x18] sm:$0xff]  ;;  %v7581_v23 = vmul.f32 %v1031_v30, %v1031_v30  ;;  %v7583_v37 = vmul.f32 %v1030_v26, %v1030_v26  ;;  %v7585_v33 = vmul.f32 %v1033_v34, %v1033_v34  ;;  %2185 = vperm.xlu0 %5567, %v5833_v45   ;;  %v7608_v34 = vpop.permute.xlu0 %1517 }
 0x22d   : > { %2173 = vperm.xlu1 %5566, %v5832_v41   ;;  %v7588_v56 = vmul.f32 %v1032_v24, %v1032_v24  ;;  %v7590_v40 = vmul.f32 %v1035_v49, %v1035_v49  ;;  %v7592_v57 = vmul.f32 %v1034_v32, %v1034_v32  ;;  %v7596_v41 = vpop.permute.xlu1 %1513  ;;  %v7600_v48 = vmul.f32 %v1039_v36, %v1039_v36  ;;  %v11540_v49 = vld [vmem:[#allocation139_spill] sm:$0xff] }
 0x22e   : > { %11536 = vst [vmem:[#allocation117_spill] sm:$0xff] %v7596_v41  ;;  %v7598_v30 = vmul.f32 %v1036_v52, %v1036_v52  ;;  %v7602_v26 = vmul.f32 %v1038_v29, %v1038_v29  ;;  %v7606_v45 = vrot.slane %v7245_v54, %v7566_v25  ;;  %11539 = vst [vmem:[#allocation124_spill] sm:$0xff] %v7608_v34  ;;  %v5834_v29 = vld [vmem:[%s6249_s25 + $0x28] sm:$0xff] }
 0x22f   : > { %11537 = vst [vmem:[#allocation120_spill] sm:$0xff] %v7600_v48  ;;  %v1041_v32 = vsub.f32 %v11540_v49, %v7291_v42  ;;  %v1040_v0 = vsub.f32 %v6893_v55, %v7291_v42  ;;  %v1043_v24 = vsub.f32 %v6897_v61, %v7291_v42  ;;  %v1042_v36 = vsub.f32 %v6899_v63, %v7291_v42  ;;  %v5835_v48 = vld [vmem:[%s6249_s25 + $0x40] sm:$0xff] }
 0x230   : > { %11538 = vst [vmem:[#allocation121_spill] sm:$0xff] %v7602_v26  ;;  %v1045_v54 = vsub.f32 %v6903_v58, %v7291_v42  ;;  %v1044_v52 = vsub.f32 %v6905_v62, %v7291_v42  ;;  %v1047_v49 = vsub.f32 %v6909_v60, %v7291_v42  ;;  %v1046_v55 = vsub.f32 %v6911_v4, %v7291_v42 }
 0x231   : > { %2181 = vperm.xlu1 %5566, %v5834_v29   ;;  %2193 = vperm.xlu0 %5567, %v5835_v48   ;;  %v1049_v61 = vsub.f32 %v6915_v2, %v7291_v42  ;;  %v1048_v63 = vsub.f32 %v6917_v1, %v7291_v42  ;;  %v1051_v58 = vsub.f32 %v6921_v3, %v7291_v42  ;;  %v7636_v29 = vpop.permute.xlu1 %1521  ;;  %v7646_v48 = vpop.permute.xlu0 %1525 }
 0x232   : > { %v1050_v62 = vsub.f32 %v6923_v6, %v7291_v42  ;;  %11541 = vst [vmem:[#allocation125_spill] sm:$0xff] %v7636_v29  ;;  %v1053_v60 = vsub.f32 %v6927_v5, %v7291_v42  ;;  %v1052_v4 = vsub.f32 %v6929_v8, %v7291_v42  ;;  %v1055_v2 = vsub.f32 %v6933_v7, %v7291_v42  ;;  %v5836_v5 = vld [vmem:[%s6249_s25 + $0x38] sm:$0xff] }
 0x233   : > { %v1054_v1 = vsub.f32 %v6935_v10, %v7291_v42  ;;  %v7648_v3 = vmul.f32 %v1041_v32, %v1041_v32  ;;  %v7650_v6 = vmul.f32 %v1040_v0, %v1040_v0  ;;  %v7652_v26 = vmul.f32 %v1043_v24, %v1043_v24  ;;  %v5837_v10 = vld [vmem:[%s6249_s25 + $0x50] sm:$0xff] }
 0x234   : > { %v7654_v29 = vmul.f32 %v1042_v36, %v1042_v36  ;;  %v7657_v34 = vmul.f32 %v1045_v54, %v1045_v54  ;;  %v7659_v8 = vmul.f32 %v1044_v52, %v1044_v52  ;;  %v7661_v7 = vmul.f32 %v1047_v49, %v1047_v49 }
 0x235   : > { %2189 = vperm.xlu1 %5566, %v5836_v5   ;;  %v7663_v41 = vmul.f32 %v1046_v55, %v1046_v55  ;;  %2201 = vperm.xlu0 %5567, %v5837_v10   ;;  %v7666_v42 = vmul.f32 %v1049_v61, %v1049_v61  ;;  %v7668_v32 = vmul.f32 %v1048_v63, %v1048_v63  ;;  %v7674_v36 = vpop.permute.xlu1 %1529  ;;  %v7684_v5 = vpop.permute.xlu0 %1533 }
 0x236   : > { %11542 = vst [vmem:[#allocation128_spill] sm:$0xff] %v7657_v34  ;;  %11543 = vst [vmem:[#allocation129_spill] sm:$0xff] %v7659_v8  ;;  %v7670_v0 = vmul.f32 %v1051_v58, %v1051_v58  ;;  %v7672_v24 = vmul.f32 %v1050_v62, %v1050_v62  ;;  %v7676_v54 = vmul.f32 %v1053_v60, %v1053_v60  ;;  %v5838_v60 = vld [vmem:[%s6249_s25 + $0x48] sm:$0xff] }
 0x237   : > { %11544 = vst [vmem:[#allocation132_spill] sm:$0xff] %v7661_v7  ;;  %11545 = vst [vmem:[#allocation133_spill] sm:$0xff] %v7663_v41  ;;  %v7678_v52 = vmul.f32 %v1052_v4, %v1052_v4  ;;  %v7680_v49 = vmul.f32 %v1055_v2, %v1055_v2  ;;  %v7682_v55 = vmul.f32 %v1054_v1, %v1054_v1  ;;  %v5839_v1 = vld [vmem:[%s6249_s25 + $0x60] sm:$0xff] }
 0x238   : > { %11546 = vst [vmem:[#allocation135_spill] sm:$0xff] %v7666_v42  ;;  %11547 = vst [vmem:[#allocation136_spill] sm:$0xff] %v7668_v32  ;;  %v1057_v61 = vsub.f32 %v6939_v9, %v7359_v39  ;;  %v1056_v63 = vsub.f32 %v6941_v12, %v7359_v39  ;;  %v1059_v58 = vsub.f32 %v6945_v11, %v7359_v39  ;;  %v5841_v42 = vld [vmem:[%s6249_s25 + $0x70] sm:$0xff]  ;;  %v5844_v32 = vld [vmem:[%s6249_s25 + $0x78] sm:$0xff] }
 0x239   : > { %11548 = vst [vmem:[#allocation137_spill] sm:$0xff] %v7670_v0  ;;  %11549 = vst [vmem:[#allocation138_spill] sm:$0xff] %v7672_v24  ;;  %v7694_v62 = vrot.slane %v7257_v51, %v7566_v25  ;;  %2197 = vperm.xlu1 %5566, %v5838_v60   ;;  %v1058_v4 = vsub.f32 %v6947_v14, %v7359_v39  ;;  %v1061_v2 = vsub.f32 %v6951_v13, %v7359_v39  ;;  %v7714_v10 = vpop.permute.xlu1 %1537  ;;  %v5840_v0 = vld [vmem:[%s6249_s25 + $0x58] sm:$0xff] }
 0x23a   : > { %11550 = vst [vmem:[#allocation139_spill] sm:$0xff] %v7676_v54  ;;  %11551 = vst [vmem:[#allocation176_spill] sm:$0xff] %v7678_v52  ;;  %v1060_v9 = vsub.f32 %v6953_v16, %v7359_v39  ;;  %v1063_v12 = vsub.f32 %v6957_v15, %v7359_v39  ;;  %2209 = vperm.xlu0 %5567, %v5839_v1   ;;  %v1062_v11 = vsub.f32 %v6959_v18, %v7359_v39  ;;  %v11554_v15 = vld [vmem:[#allocation140_spill] sm:$0xff]  ;;  %v11555_v18 = vld [vmem:[#allocation141_spill] sm:$0xff] }
 0x23b   : > { %11552 = vst [vmem:[#allocation177_spill] sm:$0xff] %v7680_v49  ;;  %11553 = vst [vmem:[#allocation178_spill] sm:$0xff] %v7682_v55  ;;  %v1065_v51 = vsub.f32 %v6963_v17, %v7359_v39  ;;  %v1064_v14 = vsub.f32 %v6965_v20, %v7359_v39  ;;  %v1067_v13 = vsub.f32 %v6969_v19, %v7359_v39  ;;  %v11556_v17 = vld [vmem:[#allocation142_spill] sm:$0xff]  ;;  %v7724_v55 = vpop.permute.xlu0 %1541  ;;  %v11560_v52 = vld [vmem:[#allocation143_spill] sm:$0xff] }
 0x23c   : > { %v1066_v16 = vsub.f32 %v6971_v22, %v7359_v39  ;;  %v1069_v60 = vsub.f32 %v11554_v15, %v7359_v39  ;;  %v1068_v1 = vsub.f32 %v11555_v18, %v7359_v39  ;;  %v1071_v49 = vsub.f32 %v11556_v17, %v7359_v39 }
 0x23d   : > { %v7726_v20 = vmul.f32 %v1057_v61, %v1057_v61  ;;  %v7728_v19 = vmul.f32 %v1056_v63, %v1056_v63  ;;  %v7730_v54 = vmul.f32 %v1059_v58, %v1059_v58  ;;  %v1070_v22 = vsub.f32 %v11560_v52, %v7359_v39  ;;  %2205 = vperm.xlu1 %5566, %v5840_v0   ;;  %v7752_v0 = vpop.permute.xlu1 %1545 }
 0x23e   : > { %v7735_v15 = vmul.f32 %v1058_v4, %v1058_v4  ;;  %v7737_v24 = vmul.f32 %v1061_v2, %v1061_v2  ;;  %v7739_v18 = vmul.f32 %v1060_v9, %v1060_v9  ;;  %v7741_v17 = vmul.f32 %v1063_v12, %v1063_v12  ;;  %2217 = vperm.xlu0 %5567, %v5841_v42  }
 0x23f   : > { %11557 = vst [vmem:[#allocation140_spill] sm:$0xff] %v7726_v20  ;;  %11558 = vst [vmem:[#allocation141_spill] sm:$0xff] %v7728_v19  ;;  %v7744_v61 = vmul.f32 %v1062_v11, %v1062_v11  ;;  %v7746_v63 = vmul.f32 %v1065_v51, %v1065_v51  ;;  %v7748_v58 = vmul.f32 %v1064_v14, %v1064_v14  ;;  %v7762_v42 = vpop.permute.xlu0 %1549  ;;  %v11575_v11 = vld [vmem:[#allocation144_spill] sm:$0xff]  ;;  %v11576_v14 = vld [vmem:[#allocation145_spill] sm:$0xff] }
 0x240   : > { %11559 = vst [vmem:[#allocation142_spill] sm:$0xff] %v7730_v54  ;;  %11561 = vst [vmem:[#allocation143_spill] sm:$0xff] %v7735_v15  ;;  %v7750_v39 = vmul.f32 %v1067_v13, %v1067_v13  ;;  %v7754_v52 = vmul.f32 %v1066_v16, %v1066_v16  ;;  %v7756_v4 = vmul.f32 %v1069_v60, %v1069_v60  ;;  %v5842_v60 = vld [vmem:[%s6249_s25 + $0x68] sm:$0xff] }
 0x241   : > { %11562 = vst [vmem:[#allocation179_spill] sm:$0xff] %v7737_v24  ;;  %11563 = vst [vmem:[#allocation180_spill] sm:$0xff] %v7739_v18  ;;  %v7758_v2 = vmul.f32 %v1068_v1, %v1068_v1  ;;  %v7760_v9 = vmul.f32 %v1071_v49, %v1071_v49  ;;  %v7764_v12 = vmul.f32 %v1070_v22, %v1070_v22  ;;  %2213 = vperm.xlu1 %5566, %v5842_v60   ;;  %v11578_v1 = vld [vmem:[#allocation146_spill] sm:$0xff]  ;;  %v11580_v22 = vld [vmem:[#allocation148_spill] sm:$0xff] }
 0x242   : > { %11564 = vst [vmem:[#allocation181_spill] sm:$0xff] %v7741_v17  ;;  %11565 = vst [vmem:[#allocation182_spill] sm:$0xff] %v7744_v61  ;;  %v1073_v51 = vsub.f32 %v11575_v11, %v7452_v53  ;;  %v1072_v13 = vsub.f32 %v11576_v14, %v7452_v53  ;;  %v1075_v49 = vsub.f32 %v11578_v1, %v7452_v53  ;;  %v11581_v11 = vld [vmem:[#allocation149_spill] sm:$0xff]  ;;  %v11583_v60 = vld [vmem:[#allocation151_spill] sm:$0xff]  ;;  %v7792_v61 = vpop.permute.xlu1 %1553 }
 0x243   : > { %11566 = vst [vmem:[#allocation183_spill] sm:$0xff] %v7746_v63  ;;  %11567 = vst [vmem:[#allocation184_spill] sm:$0xff] %v7748_v58  ;;  %v1078_v63 = vsub.f32 %v11583_v60, %v7452_v53  ;;  %v11584_v1 = vld [vmem:[#allocation152_spill] sm:$0xff]  ;;  %v11590_v60 = vld [vmem:[#allocation157_spill] sm:$0xff]  ;;  %v7802_v15 = vpop.permute.xlu0 %1557 }
 0x244   : > { %11568 = vst [vmem:[#allocation185_spill] sm:$0xff] %v7750_v39  ;;  %11569 = vst [vmem:[#allocation186_spill] sm:$0xff] %v7754_v52  ;;  %v11577_v39 = vld [vmem:[#allocation16_spill] sm:$0xff]  ;;  %v1081_v58 = vsub.f32 %v11584_v1, %v7452_v53  ;;  %v1084_v54 = vsub.f32 %v11590_v60, %v7452_v53  ;;  %v7804_v1 = vmul.f32 %v1073_v51, %v1073_v51  ;;  %v11594_v20 = vld [vmem:[#allocation158_spill] sm:$0xff] }
 0x245   : > { %11570 = vst [vmem:[#allocation187_spill] sm:$0xff] %v7756_v4  ;;  %11571 = vst [vmem:[#allocation188_spill] sm:$0xff] %v7758_v2  ;;  %v7772_v16 = vrot.slane %v11577_v39, %v7566_v25  ;;  %v1076_v2 = vsub.f32 %v11581_v11, %v7452_v53  ;;  %v5843_v52 = vld [vmem:[%s6249_s25 + $0x80] sm:$0xff]  ;;  %v11582_v39 = vld [vmem:[#allocation150_spill] sm:$0xff]  ;;  %v1087_v19 = vsub.f32 %v11594_v20, %v7452_v53  ;;  %2221 = vperm.xlu1 %5566, %v5844_v32  }
 0x246   : > { %11572 = vst [vmem:[#allocation189_spill] sm:$0xff] %v7760_v9  ;;  %11573 = vst [vmem:[#allocation190_spill] sm:$0xff] %v7762_v42  ;;  %v11579_v9 = vld [vmem:[#allocation147_spill] sm:$0xff]  ;;  %2225 = vperm.xlu0 %5567, %v5843_v52   ;;  %v1079_v14 = vsub.f32 %v11582_v39, %v7452_v53  ;;  %v11589_v39 = vld [vmem:[#allocation156_spill] sm:$0xff]  ;;  %v7826_v20 = vmul.f32 %v1081_v58, %v1081_v58  ;;  %v7830_v32 = vpop.permute.xlu1 %1561 }
 0x247   : > { %11574 = vst [vmem:[#allocation191_spill] sm:$0xff] %v7764_v12  ;;  %v1074_v4 = vsub.f32 %v11579_v9, %v7452_v53  ;;  %v1077_v12 = vsub.f32 %v11580_v22, %v7452_v53  ;;  %v11585_v9 = vld [vmem:[#allocation153_spill] sm:$0xff]  ;;  %11586 = vst [vmem:[#allocation144_spill] sm:$0xff] %v7792_v61  ;;  %v11587_v22 = vld [vmem:[#allocation154_spill] sm:$0xff]  ;;  %v1085_v18 = vsub.f32 %v11589_v39, %v7452_v53 }
 0x248   : > { %v1080_v17 = vsub.f32 %v11585_v9, %v7452_v53  ;;  %v1083_v11 = vsub.f32 %v11587_v22, %v7452_v53  ;;  %v11588_v52 = vld [vmem:[#allocation155_spill] sm:$0xff]  ;;  %11591 = vst [vmem:[#allocation145_spill] sm:$0xff] %v7802_v15  ;;  %11592 = vst [vmem:[#allocation16_spill] sm:$0xff] %v7804_v1  ;;  %v7806_v9 = vmul.f32 %v1072_v13, %v1072_v13 }
 0x249   : > { %v1082_v24 = vsub.f32 %v11588_v52, %v7452_v53  ;;  %v11595_v22 = vld [vmem:[#allocation159_spill] sm:$0xff]  ;;  %v7813_v52 = vmul.f32 %v1075_v49, %v1075_v49  ;;  %v7815_v39 = vmul.f32 %v1074_v4, %v1074_v4  ;;  %v7817_v7 = vmul.f32 %v1077_v12, %v1077_v12  ;;  %11602 = vst [vmem:[#allocation153_spill] sm:$0xff] %v7826_v20 }
 0x24a   : > { %11593 = vst [vmem:[#allocation146_spill] sm:$0xff] %v7806_v9  ;;  %v1086_v61 = vsub.f32 %v11595_v22, %v7452_v53  ;;  %v7819_v60 = vmul.f32 %v1076_v2, %v1076_v2  ;;  %v5845_v51 = vld [vmem:[%s6249_s25 + $0x90] sm:$0xff]  ;;  %v7822_v13 = vmul.f32 %v1079_v14, %v1079_v14  ;;  %v7824_v1 = vmul.f32 %v1078_v63, %v1078_v63  ;;  %v7840_v22 = vpop.permute.xlu0 %1565 }
 0x24b   : > { %11596 = vst [vmem:[#allocation147_spill] sm:$0xff] %v7813_v52  ;;  %11597 = vst [vmem:[#allocation148_spill] sm:$0xff] %v7815_v39  ;;  %2233 = vperm.xlu0 %5567, %v5845_v51   ;;  %v7828_v53 = vmul.f32 %v1080_v17, %v1080_v17  ;;  %v7832_v4 = vmul.f32 %v1083_v11, %v1083_v11  ;;  %v7834_v12 = vmul.f32 %v1082_v24, %v1082_v24  ;;  %v11612_v17 = vld [vmem:[#allocation160_spill] sm:$0xff]  ;;  %v11613_v51 = vld [vmem:[#allocation161_spill] sm:$0xff] }
 0x24c   : > { %11598 = vst [vmem:[#allocation149_spill] sm:$0xff] %v7817_v7  ;;  %11599 = vst [vmem:[#allocation150_spill] sm:$0xff] %v7819_v60  ;;  %v7836_v2 = vmul.f32 %v1085_v18, %v1085_v18  ;;  %v7838_v49 = vmul.f32 %v1084_v54, %v1084_v54  ;;  %v7842_v14 = vmul.f32 %v1087_v19, %v1087_v19  ;;  %v5846_v11 = vld [vmem:[%s6249_s25 + $0x88] sm:$0xff]  ;;  %v11615_v54 = vld [vmem:[#allocation163_spill] sm:$0xff] }
 0x24d   : > { %11600 = vst [vmem:[#allocation151_spill] sm:$0xff] %v7822_v13  ;;  %11601 = vst [vmem:[#allocation152_spill] sm:$0xff] %v7824_v1  ;;  %v7844_v63 = vmul.f32 %v1086_v61, %v1086_v61  ;;  %v1089_v58 = vsub.f32 %v11612_v17, %v7527_v31  ;;  %v1088_v20 = vsub.f32 %v11613_v51, %v7527_v31  ;;  %2229 = vperm.xlu1 %5566, %v5846_v11   ;;  %v11614_v24 = vld [vmem:[#allocation162_spill] sm:$0xff]  ;;  %v11617_v61 = vld [vmem:[#allocation165_spill] sm:$0xff]  ;;  %v7868_v13 = vpop.permute.xlu1 %1569 }
 0x24e   : > { %11603 = vst [vmem:[#allocation154_spill] sm:$0xff] %v7828_v53  ;;  %11604 = vst [vmem:[#allocation155_spill] sm:$0xff] %v7830_v32  ;;  %v1091_v18 = vsub.f32 %v11614_v24, %v7527_v31  ;;  %v11618_v17 = vld [vmem:[#allocation166_spill] sm:$0xff]  ;;  %v11619_v11 = vld [vmem:[#allocation167_spill] sm:$0xff]  ;;  %v7878_v52 = vpop.permute.xlu0 %1573 }
 0x24f   : > { %11605 = vst [vmem:[#allocation156_spill] sm:$0xff] %v7832_v4  ;;  %11606 = vst [vmem:[#allocation157_spill] sm:$0xff] %v7834_v12  ;;  %v1095_v51 = vsub.f32 %v11618_v17, %v7527_v31  ;;  %v1094_v4 = vsub.f32 %v11619_v11, %v7527_v31  ;;  %v11620_v24 = vld [vmem:[#allocation5_spill] sm:$0xff]  ;;  %v11626_v11 = vld [vmem:[#allocation8_spill] sm:$0xff] }
 0x250   : > { %11607 = vst [vmem:[#allocation158_spill] sm:$0xff] %v7836_v2  ;;  %11608 = vst [vmem:[#allocation159_spill] sm:$0xff] %v7838_v49  ;;  %v1090_v2 = vsub.f32 %v11615_v54, %v7527_v31  ;;  %v11616_v49 = vld [vmem:[#allocation164_spill] sm:$0xff]  ;;  %v1097_v12 = vsub.f32 %v11620_v24, %v7527_v31  ;;  %v11625_v17 = vld [vmem:[#allocation9_spill] sm:$0xff]  ;;  %v1100_v60 = vsub.f32 %v11626_v11, %v7527_v31 }
 0x251   : > { %11609 = vst [vmem:[#allocation192_spill] sm:$0xff] %v7840_v22  ;;  %11610 = vst [vmem:[#allocation193_spill] sm:$0xff] %v7842_v14  ;;  %v1093_v19 = vsub.f32 %v11616_v49, %v7527_v31  ;;  %v1092_v14 = vsub.f32 %v11617_v61, %v7527_v31  ;;  %v11621_v54 = vld [vmem:[#allocation168_spill] sm:$0xff]  ;;  %v11623_v49 = vld [vmem:[#allocation7_spill] sm:$0xff]  ;;  %v1101_v7 = vsub.f32 %v11625_v17, %v7527_v31 }
 0x252   : > { %11611 = vst [vmem:[#allocation194_spill] sm:$0xff] %v7844_v63  ;;  %v5847_v63 = vld [vmem:[%s6249_s25 + $0xa0] sm:$0xff]  ;;  %v1096_v53 = vsub.f32 %v11621_v54, %v7527_v31  ;;  %11622 = vst [vmem:[#allocation160_spill] sm:$0xff] %v7868_v13  ;;  %v1099_v61 = vsub.f32 %v11623_v49, %v7527_v31  ;;  %v7880_v24 = vmul.f32 %v1089_v58, %v1089_v58  ;;  %v11630_v39 = vld [vmem:[#allocation11_spill] sm:$0xff] }
 0x253   : > { %2241 = vperm.xlu0 %5567, %v5847_v63   ;;  %v11624_v63 = vld [vmem:[#allocation6_spill] sm:$0xff]  ;;  %11627 = vst [vmem:[#allocation161_spill] sm:$0xff] %v7878_v52  ;;  %v7882_v54 = vmul.f32 %v1088_v20, %v1088_v20  ;;  %v1103_v9 = vsub.f32 %v11630_v39, %v7527_v31  ;;  %v7891_v22 = vmul.f32 %v1091_v18, %v1091_v18 }
 0x254   : > { %v1098_v1 = vsub.f32 %v11624_v63, %v7527_v31  ;;  %11628 = vst [vmem:[#allocation162_spill] sm:$0xff] %v7880_v24  ;;  %v11631_v49 = vld [vmem:[#allocation170_spill] sm:$0xff]  ;;  %v5848_v63 = vld [vmem:[%s6249_s25 + $0x98] sm:$0xff]  ;;  %v7893_v17 = vmul.f32 %v1090_v2, %v1090_v2  ;;  %v7895_v11 = vmul.f32 %v1093_v19, %v1093_v19  ;;  %v7897_v52 = vmul.f32 %v1092_v14, %v1092_v14 }
 0x255   : > { %11629 = vst [vmem:[#allocation163_spill] sm:$0xff] %v7882_v54  ;;  %v7888_v13 = vrot.slane %v11631_v49, %v7566_v25  ;;  %2237 = vperm.xlu1 %5566, %v5848_v63   ;;  %11632 = vst [vmem:[#allocation164_spill] sm:$0xff] %v7891_v22  ;;  %v5849_v58 = vld [vmem:[%s6249_s25 + $0xb0] sm:$0xff]  ;;  %v7900_v20 = vmul.f32 %v1095_v51, %v1095_v51  ;;  %v7902_v39 = vmul.f32 %v1094_v4, %v1094_v4  ;;  %v7908_v63 = vpop.permute.xlu1 %1577 }
 0x256   : > { %11633 = vst [vmem:[#allocation165_spill] sm:$0xff] %v7893_v17  ;;  %11634 = vst [vmem:[#allocation166_spill] sm:$0xff] %v7895_v11  ;;  %v7904_v24 = vmul.f32 %v1097_v12, %v1097_v12  ;;  %v7906_v49 = vmul.f32 %v1096_v53, %v1096_v53  ;;  %v7910_v2 = vmul.f32 %v1099_v61, %v1099_v61  ;;  %v11647_v4 = vld [vmem:[#allocation10_spill] sm:$0xff]  ;;  %v11648_v53 = vld [vmem:[#allocation13_spill] sm:$0xff] }
 0x257   : > { %11635 = vst [vmem:[#allocation167_spill] sm:$0xff] %v7897_v52  ;;  %2249 = vperm.xlu0 %5567, %v5849_v58   ;;  %11636 = vst [vmem:[#allocation5_spill] sm:$0xff] %v7900_v20  ;;  %v7912_v18 = vmul.f32 %v1098_v1, %v1098_v1  ;;  %v7914_v14 = vmul.f32 %v1101_v7, %v1101_v7  ;;  %v7916_v19 = vmul.f32 %v1100_v60, %v1100_v60  ;;  %v7918_v58 = vpop.permute.xlu0 %1581  ;;  %v11650_v7 = vld [vmem:[#allocation15_spill] sm:$0xff]  ;;  %v11651_v60 = vld [vmem:[#allocation14_spill] sm:$0xff] }
 0x258   : > { %11637 = vst [vmem:[#allocation168_spill] sm:$0xff] %v7902_v39  ;;  %11638 = vst [vmem:[#allocation7_spill] sm:$0xff] %v7904_v24  ;;  %v7920_v51 = vmul.f32 %v1103_v9, %v1103_v9  ;;  %v1102_v12 = vsub.f32 %v11647_v4, %v7527_v31  ;;  %v1777_v24 = vsub.f32 %v11648_v53, %v7606_v45  ;;  %v11652_v9 = vld [vmem:[#allocation19_spill] sm:$0xff]  ;;  %v5851_v4 = vld [vmem:[%s6249_s25 + $0xc0] sm:$0xff] }
 0x259   : > { %11639 = vst [vmem:[#allocation6_spill] sm:$0xff] %v7906_v49  ;;  %11640 = vst [vmem:[#allocation9_spill] sm:$0xff] %v7908_v63  ;;  %v11649_v49 = vld [vmem:[#allocation12_spill] sm:$0xff]  ;;  %v1778_v1 = vsub.f32 %v11650_v7, %v7606_v45  ;;  %v11654_v53 = vld [vmem:[#allocation23_spill] sm:$0xff]  ;;  %v7946_v11 = vpop.permute.xlu1 %1585 }
 0x25a   : > { %11641 = vst [vmem:[#allocation8_spill] sm:$0xff] %v7910_v2  ;;  %11642 = vst [vmem:[#allocation11_spill] sm:$0xff] %v7912_v18  ;;  %v1776_v61 = vsub.f32 %v11649_v49, %v7606_v45  ;;  %v5850_v2 = vld [vmem:[%s6249_s25 + $0xa8] sm:$0xff]  ;;  %v1782_v49 = vsub.f32 %v11654_v53, %v7606_v45  ;;  %v11656_v7 = vld [vmem:[#allocation27_spill] sm:$0xff] }
 0x25b   : > { %11643 = vst [vmem:[#allocation170_spill] sm:$0xff] %v7914_v14  ;;  %11644 = vst [vmem:[#allocation195_spill] sm:$0xff] %v7916_v19  ;;  %2245 = vperm.xlu1 %5566, %v5850_v2   ;;  %v1779_v14 = vsub.f32 %v11651_v60, %v7606_v45  ;;  %v11653_v19 = vld [vmem:[#allocation18_spill] sm:$0xff]  ;;  %2257 = vperm.xlu0 %5567, %v5851_v4   ;;  %v1784_v20 = vsub.f32 %v11656_v7, %v7606_v45  ;;  %v11661_v53 = vld [vmem:[#allocation35_spill] sm:$0xff]  ;;  %v7956_v54 = vpop.permute.xlu0 %1589 }
 0x25c   : > { %11645 = vst [vmem:[#allocation196_spill] sm:$0xff] %v7918_v58  ;;  %11646 = vst [vmem:[#allocation197_spill] sm:$0xff] %v7920_v51  ;;  %v1780_v51 = vsub.f32 %v11652_v9, %v7606_v45  ;;  %v1781_v31 = vsub.f32 %v11653_v19, %v7606_v45  ;;  %v11655_v2 = vld [vmem:[#allocation22_spill] sm:$0xff]  ;;  %v11659_v9 = vld [vmem:[#allocation31_spill] sm:$0xff]  ;;  %v1788_v22 = vsub.f32 %v11661_v53, %v7606_v45 }
 0x25d   : > { %v1783_v18 = vsub.f32 %v11655_v2, %v7606_v45  ;;  %v11657_v60 = vld [vmem:[#allocation26_spill] sm:$0xff]  ;;  %11658 = vst [vmem:[#allocation10_spill] sm:$0xff] %v7946_v11  ;;  %v1786_v19 = vsub.f32 %v11659_v9, %v7606_v45  ;;  %11663 = vst [vmem:[#allocation13_spill] sm:$0xff] %v7956_v54  ;;  %v7958_v7 = vmul.f32 %v1102_v12, %v1102_v12  ;;  %v11665_v11 = vld [vmem:[#allocation171_spill] sm:$0xff] }
 0x25e   : > { %v1785_v39 = vsub.f32 %v11657_v60, %v7606_v45  ;;  %v11660_v4 = vld [vmem:[#allocation30_spill] sm:$0xff]  ;;  %v1905_v60 = vmul.f32 %v1777_v24, %v1777_v24  ;;  %v1904_v58 = vmul.f32 %v1776_v61, %v1776_v61  ;;  %v7962_v63 = vrot.slane %v11665_v11, %v7566_v25  ;;  %v5852_v9 = vld [vmem:[%s6249_s25 + $0xb8] sm:$0xff] }
 0x25f   : > { %v1787_v52 = vsub.f32 %v11660_v4, %v7606_v45  ;;  %v11662_v2 = vld [vmem:[#allocation34_spill] sm:$0xff]  ;;  %11664 = vst [vmem:[#allocation12_spill] sm:$0xff] %v7958_v7  ;;  %2253 = vperm.xlu1 %5566, %v5852_v9   ;;  %v1906_v32 = vmul.f32 %v1778_v1, %v1778_v1  ;;  %v1907_v4 = vmul.f32 %v1779_v14, %v1779_v14  ;;  %v7966_v7 = vpop.permute.xlu1 %1593  ;;  %v7968_v8 = vpop.permute.xlu0 %1597  ;;  %v11676_v9 = vld [vmem:[#allocation28_spill] sm:$0xff] }
 0x260   : > { %v1789_v17 = vsub.f32 %v11662_v2, %v7606_v45  ;;  %v1908_v15 = vmul.f32 %v1780_v51, %v1780_v51  ;;  %v1909_v41 = vmul.f32 %v1781_v31, %v1781_v31  ;;  %v5853_v53 = vld [vmem:[%s6249_s25 + $0xd0] sm:$0xff]  ;;  %v1910_v2 = vmul.f32 %v1782_v49, %v1782_v49  ;;  %11666 = vst [vmem:[#allocation15_spill] sm:$0xff] %v7968_v8  ;;  %v11668_v51 = vld [vmem:[#allocation20_spill] sm:$0xff]  ;;  %v5854_v49 = vld [vmem:[%s6249_s25 + $0xc8] sm:$0xff] }
 0x261   : > { %2265 = vperm.xlu0 %5567, %v5853_v53   ;;  %v1911_v42 = vmul.f32 %v1783_v18, %v1783_v18  ;;  %v1912_v54 = vmul.f32 %v1784_v20, %v1784_v20  ;;  %v1913_v12 = vmul.f32 %v1785_v39, %v1785_v39  ;;  %v1914_v24 = vmul.f32 %v1786_v19, %v1786_v19  ;;  %v11670_v31 = vld [vmem:[#allocation39_spill] sm:$0xff]  ;;  %v11671_v20 = vld [vmem:[#allocation38_spill] sm:$0xff]  ;;  %v5855_v53 = vld [vmem:[%s6249_s25 + $0xe0] sm:$0xff] }
 0x262   : > { %v1915_v61 = vmul.f32 %v1787_v52, %v1787_v52  ;;  %v1916_v11 = vmul.f32 %v1788_v22, %v1788_v22  ;;  %v1917_v34 = vmul.f32 %v1789_v17, %v1789_v17  ;;  %v7971_v14 = vadd.f32 %v1905_v60, %v7322_v28  ;;  %v11672_v19 = vld [vmem:[#allocation118_spill] sm:$0xff]  ;;  %v11674_v22 = vld [vmem:[#allocation21_spill] sm:$0xff]  ;;  %v11678_v60 = vld [vmem:[#allocation123_spill] sm:$0xff] }
 0x263   : > { %v7974_v1 = vadd.f32 %v1904_v58, %v11668_v51  ;;  %v1790_v18 = vsub.f32 %v11670_v31, %v7606_v45  ;;  %v1791_v39 = vsub.f32 %v11671_v20, %v7606_v45  ;;  %2261 = vperm.xlu1 %5566, %v5854_v49   ;;  %v7982_v52 = vadd.f32 %v1906_v32, %v11672_v19  ;;  %v11680_v51 = vld [vmem:[#allocation122_spill] sm:$0xff]  ;;  %v11682_v45 = vld [vmem:[#allocation32_spill] sm:$0xff] }
 0x264   : > { %11667 = vst [vmem:[#allocation14_spill] sm:$0xff] %v7971_v14  ;;  %v7985_v17 = vadd.f32 %v1907_v4, %v11674_v22  ;;  %v7988_v28 = vadd.f32 %v1908_v15, %v11676_v9  ;;  %v7991_v58 = vadd.f32 %v1909_v41, %v11678_v60  ;;  %v7995_v31 = vadd.f32 %v1910_v2, %v11680_v51  ;;  %v11684_v32 = vld [vmem:[#allocation36_spill] sm:$0xff]  ;;  %v11686_v4 = vld [vmem:[#allocation33_spill] sm:$0xff]  ;;  %v8006_v15 = vpop.permute.xlu1 %1601 }
 0x265   : > { %11669 = vst [vmem:[#allocation19_spill] sm:$0xff] %v7974_v1  ;;  %11673 = vst [vmem:[#allocation18_spill] sm:$0xff] %v7982_v52  ;;  %2273 = vperm.xlu0 %5567, %v5855_v53   ;;  %v7998_v20 = vadd.f32 %v1911_v42, %v11682_v45  ;;  %v8001_v49 = vadd.f32 %v1912_v54, %v11684_v32  ;;  %v8004_v19 = vadd.f32 %v1913_v12, %v11686_v4  ;;  %v11689_v22 = vld [vmem:[#allocation40_spill] sm:$0xff]  ;;  %v11691_v9 = vld [vmem:[#allocation37_spill] sm:$0xff]  ;;  %v8020_v54 = vpop.permute.xlu0 %1605 }
 0x266   : > { %11675 = vst [vmem:[#allocation23_spill] sm:$0xff] %v7985_v17  ;;  %11677 = vst [vmem:[#allocation22_spill] sm:$0xff] %v7988_v28  ;;  %v8009_v41 = vadd.f32 %v1914_v24, %v11689_v22  ;;  %v8012_v60 = vadd.f32 %v1915_v61, %v11691_v9  ;;  %v11693_v2 = vld [vmem:[#allocation44_spill] sm:$0xff]  ;;  %v11695_v42 = vld [vmem:[#allocation41_spill] sm:$0xff]  ;;  %v1918_v45 = vmul.f32 %v1790_v18, %v1790_v18 }
 0x267   : > { %11679 = vst [vmem:[#allocation27_spill] sm:$0xff] %v7991_v58  ;;  %11681 = vst [vmem:[#allocation26_spill] sm:$0xff] %v7995_v31  ;;  %v8015_v53 = vadd.f32 %v1916_v11, %v11693_v2  ;;  %v8018_v51 = vadd.f32 %v1917_v34, %v11695_v42  ;;  %v1919_v12 = vmul.f32 %v1791_v39, %v1791_v39  ;;  %v11698_v32 = vld [vmem:[#allocation43_spill] sm:$0xff]  ;;  %v11700_v61 = vld [vmem:[#allocation42_spill] sm:$0xff] }
 0x268   : > { %11683 = vst [vmem:[#allocation31_spill] sm:$0xff] %v7998_v20  ;;  %11685 = vst [vmem:[#allocation30_spill] sm:$0xff] %v8001_v49  ;;  %v1792_v4 = vsub.f32 %v11698_v32, %v7694_v62  ;;  %v11699_v49 = vld [vmem:[#allocation29_spill] sm:$0xff]  ;;  %v5856_v22 = vld [vmem:[%s6249_s25 + $0xd8] sm:$0xff]  ;;  %v1793_v11 = vsub.f32 %v11700_v61, %v7694_v62  ;;  %v8046_v31 = vpop.permute.xlu1 %1609 }
 0x269   : > { %11687 = vst [vmem:[#allocation35_spill] sm:$0xff] %v8004_v19  ;;  %11688 = vst [vmem:[#allocation34_spill] sm:$0xff] %v8006_v15  ;;  %v8026_v24 = vrot.slane %v11699_v49, %v7566_v25  ;;  %2269 = vperm.xlu1 %5566, %v5856_v22   ;;  %v11701_v9 = vld [vmem:[#allocation47_spill] sm:$0xff]  ;;  %v11702_v2 = vld [vmem:[#allocation46_spill] sm:$0xff]  ;;  %v8056_v58 = vpop.permute.xlu0 %1613 }
 0x26a   : > { %11690 = vst [vmem:[#allocation171_spill] sm:$0xff] %v8009_v41  ;;  %11692 = vst [vmem:[#allocation20_spill] sm:$0xff] %v8012_v60  ;;  %v1794_v34 = vsub.f32 %v11701_v9, %v7694_v62  ;;  %v1795_v42 = vsub.f32 %v11702_v2, %v7694_v62  ;;  %v11703_v18 = vld [vmem:[#allocation51_spill] sm:$0xff]  ;;  %v11704_v49 = vld [vmem:[#allocation50_spill] sm:$0xff]  ;;  %v1920_v14 = vmul.f32 %v1792_v4, %v1792_v4 }
 0x26b   : > { %11694 = vst [vmem:[#allocation39_spill] sm:$0xff] %v8015_v53  ;;  %11696 = vst [vmem:[#allocation38_spill] sm:$0xff] %v8018_v51  ;;  %v1796_v39 = vsub.f32 %v11703_v18, %v7694_v62  ;;  %v5857_v51 = vld [vmem:[%s6249_s25 + $0xf0] sm:$0xff]  ;;  %v1797_v32 = vsub.f32 %v11704_v49, %v7694_v62  ;;  %v5859_v8 = vld [vmem:[%s6249_s25 + $0x100] sm:$0xff] }
 0x26c   : > { %11697 = vst [vmem:[#allocation118_spill] sm:$0xff] %v8020_v54  ;;  %2281 = vperm.xlu0 %5567, %v5857_v51   ;;  %v11705_v22 = vld [vmem:[#allocation55_spill] sm:$0xff]  ;;  %v11706_v61 = vld [vmem:[#allocation54_spill] sm:$0xff]  ;;  %11708 = vst [vmem:[#allocation21_spill] sm:$0xff] %v8046_v31  ;;  %v1922_v54 = vmul.f32 %v1794_v34, %v1794_v34 }
 0x26d   : > { %v1798_v60 = vsub.f32 %v11705_v22, %v7694_v62  ;;  %v1799_v53 = vsub.f32 %v11706_v61, %v7694_v62  ;;  %v11707_v9 = vld [vmem:[#allocation59_spill] sm:$0xff]  ;;  %v11709_v2 = vld [vmem:[#allocation58_spill] sm:$0xff]  ;;  %11713 = vst [vmem:[#allocation28_spill] sm:$0xff] %v8056_v58  ;;  %v11714_v61 = vld [vmem:[#allocation48_spill] sm:$0xff]  ;;  %v1924_v15 = vmul.f32 %v1796_v39, %v1796_v39 }
 0x26e   : > { %v1800_v41 = vsub.f32 %v11707_v9, %v7694_v62  ;;  %v1801_v18 = vsub.f32 %v11709_v2, %v7694_v62  ;;  %v11710_v51 = vld [vmem:[#allocation63_spill] sm:$0xff]  ;;  %v11711_v49 = vld [vmem:[#allocation62_spill] sm:$0xff]  ;;  %v8059_v17 = vadd.f32 %v1918_v45, %v11714_v61  ;;  %v11716_v9 = vld [vmem:[#allocation45_spill] sm:$0xff] }
 0x26f   : > { %v1802_v19 = vsub.f32 %v11710_v51, %v7694_v62  ;;  %v1803_v28 = vsub.f32 %v11711_v49, %v7694_v62  ;;  %v11712_v22 = vld [vmem:[#allocation67_spill] sm:$0xff]  ;;  %v8062_v52 = vadd.f32 %v1919_v12, %v11716_v9  ;;  %v11718_v2 = vld [vmem:[#allocation66_spill] sm:$0xff]  ;;  %v1921_v51 = vmul.f32 %v1793_v11, %v1793_v11 }
 0x270   : > { %v1804_v20 = vsub.f32 %v11712_v22, %v7694_v62  ;;  %11715 = vst [vmem:[#allocation123_spill] sm:$0xff] %v8059_v17  ;;  %v1805_v1 = vsub.f32 %v11718_v2, %v7694_v62  ;;  %v5858_v31 = vld [vmem:[%s6249_s25 + $0xe8] sm:$0xff]  ;;  %v1923_v49 = vmul.f32 %v1795_v42, %v1795_v42  ;;  %2289 = vperm.xlu0 %5567, %v5859_v8   ;;  %v8068_v17 = vpop.permute.xlu1 %1617  ;;  %v11721_v42 = vld [vmem:[#allocation71_spill] sm:$0xff] }
 0x271   : > { %11717 = vst [vmem:[#allocation122_spill] sm:$0xff] %v8062_v52  ;;  %2277 = vperm.xlu1 %5566, %v5858_v31   ;;  %v1925_v22 = vmul.f32 %v1797_v32, %v1797_v32  ;;  %v1926_v58 = vmul.f32 %v1798_v60, %v1798_v60  ;;  %v1927_v45 = vmul.f32 %v1799_v53, %v1799_v53  ;;  %v8070_v52 = vpop.permute.xlu0 %1621  ;;  %v11719_v31 = vld [vmem:[#allocation52_spill] sm:$0xff]  ;;  %v11722_v60 = vld [vmem:[#allocation70_spill] sm:$0xff] }
 0x272   : > { %v1928_v61 = vmul.f32 %v1800_v41, %v1800_v41  ;;  %v1929_v12 = vmul.f32 %v1801_v18, %v1801_v18  ;;  %v1930_v4 = vmul.f32 %v1802_v19, %v1802_v19  ;;  %v1931_v9 = vmul.f32 %v1803_v28, %v1803_v28  ;;  %v5860_v41 = vld [vmem:[%s6249_s25 + $0xf8] sm:$0xff]  ;;  %v11723_v39 = vld [vmem:[#allocation126_spill] sm:$0xff] }
 0x273   : > { %v1932_v2 = vmul.f32 %v1804_v20, %v1804_v20  ;;  %v8073_v11 = vadd.f32 %v1920_v14, %v11719_v31  ;;  %v1933_v34 = vmul.f32 %v1805_v1, %v1805_v1  ;;  %v1806_v8 = vsub.f32 %v11721_v42, %v7694_v62  ;;  %v5861_v1 = vld [vmem:[%s6249_s25 + $0x110] sm:$0xff] }
 0x274   : > { %v1807_v53 = vsub.f32 %v11722_v60, %v7694_v62  ;;  %v8081_v32 = vadd.f32 %v1921_v51, %v11723_v39  ;;  %v8084_v28 = vadd.f32 %v1922_v54, %v7405_v27  ;;  %v8087_v20 = vadd.f32 %v1923_v49, %v7403_v21  ;;  %2297 = vperm.xlu0 %5567, %v5861_v1   ;;  %v11728_v19 = vld [vmem:[#allocation131_spill] sm:$0xff]  ;;  %v11730_v62 = vld [vmem:[#allocation60_spill] sm:$0xff]  ;;  %v11732_v51 = vld [vmem:[#allocation57_spill] sm:$0xff]  ;;  %v8105_v21 = vpop.permute.xlu1 %1625 }
 0x275   : > { %11720 = vst [vmem:[#allocation32_spill] sm:$0xff] %v8073_v11  ;;  %2285 = vperm.xlu1 %5566, %v5860_v41   ;;  %v8090_v14 = vadd.f32 %v1924_v15, %v7412_v38  ;;  %v8094_v18 = vadd.f32 %v1925_v22, %v11728_v19  ;;  %v8097_v31 = vadd.f32 %v1926_v58, %v11730_v62  ;;  %v11734_v27 = vld [vmem:[#allocation64_spill] sm:$0xff]  ;;  %11736 = vst [vmem:[#allocation42_spill] sm:$0xff] %v8105_v21  ;;  %v11737_v49 = vld [vmem:[#allocation130_spill] sm:$0xff] }
 0x276   : > { %11724 = vst [vmem:[#allocation36_spill] sm:$0xff] %v8081_v32  ;;  %11725 = vst [vmem:[#allocation33_spill] sm:$0xff] %v8084_v28  ;;  %v8100_v42 = vadd.f32 %v1927_v45, %v11732_v51  ;;  %v8103_v54 = vadd.f32 %v1928_v61, %v11734_v27  ;;  %v8108_v38 = vadd.f32 %v1929_v12, %v11737_v49  ;;  %v11739_v15 = vld [vmem:[#allocation68_spill] sm:$0xff]  ;;  %v11741_v22 = vld [vmem:[#allocation65_spill] sm:$0xff]  ;;  %v8119_v45 = vpop.permute.xlu0 %1629 }
 0x277   : > { %11726 = vst [vmem:[#allocation40_spill] sm:$0xff] %v8087_v20  ;;  %11727 = vst [vmem:[#allocation37_spill] sm:$0xff] %v8090_v14  ;;  %v8111_v60 = vadd.f32 %v1930_v4, %v11739_v15  ;;  %v8114_v41 = vadd.f32 %v1931_v9, %v11741_v22  ;;  %v11743_v58 = vld [vmem:[#allocation72_spill] sm:$0xff]  ;;  %v11746_v1 = vld [vmem:[#allocation69_spill] sm:$0xff]  ;;  %v1934_v19 = vmul.f32 %v1806_v8, %v1806_v8 }
 0x278   : > { %11729 = vst [vmem:[#allocation44_spill] sm:$0xff] %v8094_v18  ;;  %11731 = vst [vmem:[#allocation41_spill] sm:$0xff] %v8097_v31  ;;  %v8117_v39 = vadd.f32 %v1932_v2, %v11743_v58  ;;  %v8122_v61 = vadd.f32 %v1933_v34, %v11746_v1  ;;  %v1935_v62 = vmul.f32 %v1807_v53, %v1807_v53  ;;  %v11748_v51 = vld [vmem:[#allocation75_spill] sm:$0xff]  ;;  %v5862_v27 = vld [vmem:[%s6249_s25 + $0x108] sm:$0xff] }
 0x279   : > { %11733 = vst [vmem:[#allocation43_spill] sm:$0xff] %v8100_v42  ;;  %11735 = vst [vmem:[#allocation29_spill] sm:$0xff] %v8103_v54  ;;  %v1808_v12 = vsub.f32 %v11748_v51, %v7772_v16  ;;  %2293 = vperm.xlu1 %5566, %v5862_v27   ;;  %v11749_v4 = vld [vmem:[#allocation74_spill] sm:$0xff]  ;;  %v11750_v9 = vld [vmem:[#allocation79_spill] sm:$0xff] }
 0x27a   : > { %11738 = vst [vmem:[#allocation47_spill] sm:$0xff] %v8108_v38  ;;  %11740 = vst [vmem:[#allocation46_spill] sm:$0xff] %v8111_v60  ;;  %v1809_v49 = vsub.f32 %v11749_v4, %v7772_v16  ;;  %v1810_v15 = vsub.f32 %v11750_v9, %v7772_v16  ;;  %v11751_v2 = vld [vmem:[#allocation78_spill] sm:$0xff]  ;;  %v11752_v58 = vld [vmem:[#allocation61_spill] sm:$0xff]  ;;  %v8156_v54 = vpop.permute.xlu0 %1637 }
 0x27b   : > { %11742 = vst [vmem:[#allocation51_spill] sm:$0xff] %v8114_v41  ;;  %11744 = vst [vmem:[#allocation50_spill] sm:$0xff] %v8117_v39  ;;  %v1811_v22 = vsub.f32 %v11751_v2, %v7772_v16  ;;  %v8135_v34 = vrot.slane %v11752_v58, %v7566_v25  ;;  %v5863_v8 = vld [vmem:[%s6249_s25 + $0x120] sm:$0xff]  ;;  %v11753_v53 = vld [vmem:[#allocation83_spill] sm:$0xff]  ;;  %v8146_v2 = vpop.permute.xlu1 %1633 }
 0x27c   : > { %11745 = vst [vmem:[#allocation55_spill] sm:$0xff] %v8119_v45  ;;  %11747 = vst [vmem:[#allocation54_spill] sm:$0xff] %v8122_v61  ;;  %2305 = vperm.xlu0 %5567, %v5863_v8   ;;  %v1812_v1 = vsub.f32 %v11753_v53, %v7772_v16  ;;  %v11754_v51 = vld [vmem:[#allocation82_spill] sm:$0xff]  ;;  %v11755_v4 = vld [vmem:[#allocation87_spill] sm:$0xff]  ;;  %v1938_v11 = vmul.f32 %v1810_v15, %v1810_v15 }
 0x27d   : > { %v1813_v27 = vsub.f32 %v11754_v51, %v7772_v16  ;;  %v1814_v61 = vsub.f32 %v11755_v4, %v7772_v16  ;;  %v11756_v9 = vld [vmem:[#allocation86_spill] sm:$0xff]  ;;  %11757 = vst [vmem:[#allocation59_spill] sm:$0xff] %v8146_v2  ;;  %v11758_v58 = vld [vmem:[#allocation91_spill] sm:$0xff]  ;;  %11762 = vst [vmem:[#allocation58_spill] sm:$0xff] %v8156_v54 }
 0x27e   : > { %v1815_v41 = vsub.f32 %v11756_v9, %v7772_v16  ;;  %v1816_v39 = vsub.f32 %v11758_v58, %v7772_v16  ;;  %v11759_v8 = vld [vmem:[#allocation90_spill] sm:$0xff]  ;;  %v11760_v53 = vld [vmem:[#allocation95_spill] sm:$0xff]  ;;  %v11763_v4 = vld [vmem:[#allocation76_spill] sm:$0xff]  ;;  %v1936_v9 = vmul.f32 %v1808_v12, %v1808_v12  ;;  %v8172_v21 = vpop.permute.xlu0 %1645 }
 0x27f   : > { %v1817_v38 = vsub.f32 %v11759_v8, %v7772_v16  ;;  %v1818_v60 = vsub.f32 %v11760_v53, %v7772_v16  ;;  %v11761_v51 = vld [vmem:[#allocation94_spill] sm:$0xff]  ;;  %v8159_v18 = vadd.f32 %v1934_v19, %v11763_v4  ;;  %v11765_v31 = vld [vmem:[#allocation99_spill] sm:$0xff]  ;;  %v11767_v8 = vld [vmem:[#allocation73_spill] sm:$0xff]  ;;  %v1937_v53 = vmul.f32 %v1809_v49, %v1809_v49  ;;  %v8170_v54 = vpop.permute.xlu1 %1641 }
 0x280   : > { %v1819_v42 = vsub.f32 %v11761_v51, %v7772_v16  ;;  %v1820_v20 = vsub.f32 %v11765_v31, %v7772_v16  ;;  %v11766_v58 = vld [vmem:[#allocation98_spill] sm:$0xff]  ;;  %v5864_v32 = vld [vmem:[%s6249_s25 + $0x118] sm:$0xff]  ;;  %v8167_v28 = vadd.f32 %v1935_v62, %v11767_v8  ;;  %v1939_v51 = vmul.f32 %v1811_v22, %v1811_v22  ;;  %v11774_v8 = vld [vmem:[#allocation89_spill] sm:$0xff] }
 0x281   : > { %11764 = vst [vmem:[#allocation63_spill] sm:$0xff] %v8159_v18  ;;  %v1821_v14 = vsub.f32 %v11766_v58, %v7772_v16  ;;  %2301 = vperm.xlu1 %5566, %v5864_v32   ;;  %v5865_v2 = vld [vmem:[%s6249_s25 + $0x130] sm:$0xff]  ;;  %v1940_v19 = vmul.f32 %v1812_v1, %v1812_v1  ;;  %v1941_v4 = vmul.f32 %v1813_v27, %v1813_v27  ;;  %v5866_v27 = vld [vmem:[%s6249_s25 + $0x128] sm:$0xff] }
 0x282   : > { %11768 = vst [vmem:[#allocation62_spill] sm:$0xff] %v8167_v28  ;;  %2313 = vperm.xlu0 %5567, %v5865_v2   ;;  %v1942_v12 = vmul.f32 %v1814_v61, %v1814_v61  ;;  %v1943_v18 = vmul.f32 %v1815_v41, %v1815_v41  ;;  %v1944_v31 = vmul.f32 %v1816_v39, %v1816_v39  ;;  %v11769_v62 = vld [vmem:[#allocation134_spill] sm:$0xff]  ;;  %v11771_v2 = vld [vmem:[#allocation103_spill] sm:$0xff]  ;;  %v11772_v41 = vld [vmem:[#allocation81_spill] sm:$0xff] }
 0x283   : > { %v1945_v58 = vmul.f32 %v1817_v38, %v1817_v38  ;;  %v1946_v45 = vmul.f32 %v1818_v60, %v1818_v60  ;;  %v1947_v32 = vmul.f32 %v1819_v42, %v1819_v42  ;;  %v8175_v49 = vadd.f32 %v1936_v9, %v11769_v62  ;;  %v11776_v38 = vld [vmem:[#allocation88_spill] sm:$0xff]  ;;  %v11778_v60 = vld [vmem:[#allocation102_spill] sm:$0xff] }
 0x284   : > { %v1948_v15 = vmul.f32 %v1820_v20, %v1820_v20  ;;  %v1949_v22 = vmul.f32 %v1821_v14, %v1821_v14  ;;  %v1822_v1 = vsub.f32 %v11771_v2, %v7772_v16  ;;  %v8181_v61 = vadd.f32 %v1937_v53, %v11772_v41  ;;  %v5867_v62 = vld [vmem:[%s6249_s25 + $0x140] sm:$0xff] }
 0x285   : > { %11770 = vst [vmem:[#allocation67_spill] sm:$0xff] %v8175_v49  ;;  %2309 = vperm.xlu1 %5566, %v5866_v27   ;;  %v8184_v39 = vadd.f32 %v1938_v11, %v11774_v8  ;;  %v8187_v42 = vadd.f32 %v1939_v51, %v11776_v38  ;;  %v1823_v9 = vsub.f32 %v11778_v60, %v7772_v16  ;;  %v11779_v20 = vld [vmem:[#allocation93_spill] sm:$0xff]  ;;  %v11781_v2 = vld [vmem:[#allocation92_spill] sm:$0xff]  ;;  %v8204_v51 = vpop.permute.xlu1 %1649 }
 0x286   : > { %11773 = vst [vmem:[#allocation48_spill] sm:$0xff] %v8181_v61  ;;  %2321 = vperm.xlu0 %5567, %v5867_v62   ;;  %v8193_v14 = vadd.f32 %v1940_v19, %v11779_v20  ;;  %v8196_v27 = vadd.f32 %v1941_v4, %v11781_v2  ;;  %v11783_v53 = vld [vmem:[#allocation100_spill] sm:$0xff]  ;;  %v11785_v11 = vld [vmem:[#allocation97_spill] sm:$0xff] }
 0x287   : > { %11775 = vst [vmem:[#allocation45_spill] sm:$0xff] %v8184_v39  ;;  %11777 = vst [vmem:[#allocation66_spill] sm:$0xff] %v8187_v42  ;;  %v8199_v41 = vadd.f32 %v1942_v12, %v11783_v53  ;;  %v8202_v8 = vadd.f32 %v1943_v18, %v11785_v11  ;;  %v11787_v38 = vld [vmem:[#allocation104_spill] sm:$0xff]  ;;  %v11789_v60 = vld [vmem:[#allocation101_spill] sm:$0xff]  ;;  %v8218_v12 = vpop.permute.xlu0 %1653 }
 0x288   : > { %11780 = vst [vmem:[#allocation52_spill] sm:$0xff] %v8193_v14  ;;  %11782 = vst [vmem:[#allocation71_spill] sm:$0xff] %v8196_v27  ;;  %v8207_v16 = vadd.f32 %v1944_v31, %v11787_v38  ;;  %v8210_v62 = vadd.f32 %v1945_v58, %v11789_v60  ;;  %v11791_v19 = vld [vmem:[#allocation108_spill] sm:$0xff]  ;;  %v11793_v4 = vld [vmem:[#allocation105_spill] sm:$0xff]  ;;  %v1950_v27 = vmul.f32 %v1822_v1, %v1822_v1 }
 0x289   : > { %11784 = vst [vmem:[#allocation70_spill] sm:$0xff] %v8199_v41  ;;  %11786 = vst [vmem:[#allocation126_spill] sm:$0xff] %v8202_v8  ;;  %v8213_v20 = vadd.f32 %v1946_v45, %v11791_v19  ;;  %v8216_v2 = vadd.f32 %v1947_v32, %v11793_v4  ;;  %v11795_v53 = vld [vmem:[#allocation112_spill] sm:$0xff]  ;;  %v11797_v11 = vld [vmem:[#allocation109_spill] sm:$0xff]  ;;  %v1951_v60 = vmul.f32 %v1823_v9, %v1823_v9 }
 0x28a   : > { %11788 = vst [vmem:[#allocation131_spill] sm:$0xff] %v8207_v16  ;;  %11790 = vst [vmem:[#allocation60_spill] sm:$0xff] %v8210_v62  ;;  %v8221_v18 = vadd.f32 %v1948_v15, %v11795_v53  ;;  %v8224_v8 = vadd.f32 %v1949_v22, %v11797_v11  ;;  %v11799_v31 = vld [vmem:[#allocation107_spill] sm:$0xff]  ;;  %v11800_v45 = vld [vmem:[#allocation106_spill] sm:$0xff] }
 0x28b   : > { %11792 = vst [vmem:[#allocation57_spill] sm:$0xff] %v8213_v20  ;;  %11794 = vst [vmem:[#allocation64_spill] sm:$0xff] %v8216_v2  ;;  %v1824_v38 = vsub.f32 %v11799_v31, %v7888_v13  ;;  %v5868_v58 = vld [vmem:[%s6249_s25 + $0x138] sm:$0xff]  ;;  %v1825_v19 = vsub.f32 %v11800_v45, %v7888_v13  ;;  %v5869_v2 = vld [vmem:[%s6249_s25 + $0x150] sm:$0xff]  ;;  %v8256_v16 = vpop.permute.xlu0 %1661 }
 0x28c   : > { %11796 = vst [vmem:[#allocation130_spill] sm:$0xff] %v8221_v18  ;;  %11798 = vst [vmem:[#allocation68_spill] sm:$0xff] %v8224_v8  ;;  %2317 = vperm.xlu1 %5566, %v5868_v58   ;;  %v11801_v32 = vld [vmem:[#allocation111_spill] sm:$0xff]  ;;  %2329 = vperm.xlu0 %5567, %v5869_v2   ;;  %v11802_v15 = vld [vmem:[#allocation96_spill] sm:$0xff] }
 0x28d   : > { %v1826_v4 = vsub.f32 %v11801_v32, %v7888_v13  ;;  %v8236_v22 = vrot.slane %v11802_v15, %v7566_v25  ;;  %v11804_v1 = vld [vmem:[#allocation110_spill] sm:$0xff]  ;;  %v11805_v11 = vld [vmem:[#allocation115_spill] sm:$0xff]  ;;  %v8246_v32 = vpop.permute.xlu1 %1657  ;;  %v11809_v2 = vld [vmem:[#allocation17_spill] sm:$0xff]  ;;  %11813 = vst [vmem:[#allocation69_spill] sm:$0xff] %v8256_v16 }
 0x28e   : > { %v1827_v53 = vsub.f32 %v11804_v1, %v7888_v13  ;;  %v1828_v31 = vsub.f32 %v11805_v11, %v7888_v13  ;;  %v11806_v9 = vld [vmem:[#allocation114_spill] sm:$0xff]  ;;  %v11807_v45 = vld [vmem:[#allocation119_spill] sm:$0xff]  ;;  %11808 = vst [vmem:[#allocation72_spill] sm:$0xff] %v8246_v32  ;;  %v1831_v18 = vsub.f32 %v11809_v2, %v7888_v13  ;;  %v11810_v25 = vld [vmem:[#allocation24_spill] sm:$0xff] }
 0x28f   : > { %11803 = vst [vmem:[#allocation65_spill] sm:$0xff] %v8236_v22  ;;  %v1829_v58 = vsub.f32 %v11806_v9, %v7888_v13  ;;  %v1830_v8 = vsub.f32 %v11807_v45, %v7888_v13  ;;  %v1832_v15 = vsub.f32 %v11810_v25, %v7888_v13  ;;  %v11811_v1 = vld [vmem:[#allocation25_spill] sm:$0xff]  ;;  %v11812_v11 = vld [vmem:[#allocation127_spill] sm:$0xff]  ;;  %v11814_v9 = vld [vmem:[#allocation174_spill] sm:$0xff]  ;;  %v1952_v45 = vmul.f32 %v1824_v38, %v1824_v38 }
 0x290   : > { %v1833_v62 = vsub.f32 %v11811_v1, %v7888_v13  ;;  %v1834_v20 = vsub.f32 %v11812_v11, %v7888_v13  ;;  %v8259_v41 = vadd.f32 %v1950_v27, %v11814_v9  ;;  %v11816_v42 = vld [vmem:[#allocation49_spill] sm:$0xff]  ;;  %v1953_v1 = vmul.f32 %v1825_v19, %v1825_v19  ;;  %v11820_v11 = vld [vmem:[#allocation56_spill] sm:$0xff] }
 0x291   : > { %v1835_v14 = vsub.f32 %v11816_v42, %v7888_v13  ;;  %v11817_v2 = vld [vmem:[#allocation53_spill] sm:$0xff]  ;;  %v1954_v49 = vmul.f32 %v1826_v4, %v1826_v4  ;;  %v1837_v22 = vsub.f32 %v11820_v11, %v7888_v13  ;;  %v1955_v27 = vmul.f32 %v1827_v53, %v1827_v53 }
 0x292   : > { %11815 = vst [vmem:[#allocation75_spill] sm:$0xff] %v8259_v41  ;;  %v1836_v61 = vsub.f32 %v11817_v2, %v7888_v13  ;;  %v5870_v39 = vld [vmem:[%s6249_s25 + $0x148] sm:$0xff]  ;;  %v5871_v16 = vld [vmem:[%s6249_s25 + $0x160] sm:$0xff]  ;;  %v1956_v38 = vmul.f32 %v1828_v31, %v1828_v31  ;;  %v1957_v9 = vmul.f32 %v1829_v58, %v1829_v58  ;;  %v1958_v42 = vmul.f32 %v1830_v8, %v1830_v8  ;;  %v8272_v41 = vpop.permute.xlu1 %1665  ;;  %v5872_v31 = vld [vmem:[%s6249_s25 + $0x158] sm:$0xff] }
 0x293   : > { %2325 = vperm.xlu1 %5566, %v5870_v39   ;;  %v11818_v25 = vld [vmem:[#allocation173_spill] sm:$0xff]  ;;  %2337 = vperm.xlu0 %5567, %v5871_v16   ;;  %v1959_v2 = vmul.f32 %v1831_v18, %v1831_v18  ;;  %v1960_v39 = vmul.f32 %v1832_v15, %v1832_v15  ;;  %v1961_v32 = vmul.f32 %v1833_v62, %v1833_v62  ;;  %v11822_v8 = vld [vmem:[#allocation175_spill] sm:$0xff] }
 0x294   : > { %v8267_v28 = vadd.f32 %v1951_v60, %v11818_v25  ;;  %v1962_v60 = vmul.f32 %v1834_v20, %v1834_v20  ;;  %v8274_v25 = vpop.permute.xlu0 %1669  ;;  %v8277_v19 = vadd.f32 %v1952_v45, %v7570_v47  ;;  %v1963_v4 = vmul.f32 %v1835_v14, %v1835_v14  ;;  %v11821_v16 = vld [vmem:[#allocation77_spill] sm:$0xff]  ;;  %v11823_v20 = vld [vmem:[#allocation80_spill] sm:$0xff] }
 0x295   : > { %v1964_v11 = vmul.f32 %v1836_v61, %v1836_v61  ;;  %v1838_v53 = vsub.f32 %v11821_v16, %v7888_v13  ;;  %v8283_v58 = vadd.f32 %v1953_v1, %v11822_v8  ;;  %v8286_v18 = vadd.f32 %v1954_v49, %v7574_v44  ;;  %v11833_v16 = vld [vmem:[#allocation117_spill] sm:$0xff] }
 0x296   : > { %11819 = vst [vmem:[#allocation74_spill] sm:$0xff] %v8267_v28  ;;  %v1965_v62 = vmul.f32 %v1837_v22, %v1837_v22  ;;  %v1839_v15 = vsub.f32 %v11823_v20, %v7888_v13  ;;  %v5873_v28 = vld [vmem:[%s6249_s25 + $0x170] sm:$0xff]  ;;  %v8292_v47 = vadd.f32 %v1955_v27, %v7572_v50  ;;  %v8295_v61 = vadd.f32 %v1956_v38, %v7579_v35  ;;  %v8303_v44 = vpop.permute.xlu1 %1673  ;;  %v11829_v38 = vld [vmem:[#allocation172_spill] sm:$0xff] }
 0x297   : > { %2333 = vperm.xlu1 %5566, %v5872_v31   ;;  %2345 = vperm.xlu0 %5567, %v5873_v28   ;;  %v8298_v14 = vadd.f32 %v1957_v9, %v7576_v43  ;;  %v8301_v45 = vadd.f32 %v1958_v42, %v7583_v37  ;;  %v8306_v13 = vadd.f32 %v1959_v2, %v7581_v23  ;;  %v11826_v23 = vld [vmem:[#allocation84_spill] sm:$0xff] }
 0x298   : > { %v8309_v28 = vadd.f32 %v1960_v39, %v7588_v56  ;;  %v8312_v50 = vadd.f32 %v1961_v32, %v7585_v33  ;;  %v8315_v35 = vadd.f32 %v1962_v60, %v7592_v57  ;;  %v8317_v43 = vpop.permute.xlu0 %1677  ;;  %v8320_v37 = vadd.f32 %v1963_v4, %v7590_v40  ;;  %v5874_v56 = vld [vmem:[%s6249_s25 + $0x168] sm:$0xff]  ;;  %v5875_v9 = vld [vmem:[%s6249_s25 + $0x180] sm:$0xff] }
 0x299   : > { %v8323_v49 = vadd.f32 %v1964_v11, %v7598_v30  ;;  %v1966_v22 = vmul.f32 %v1838_v53, %v1838_v53  ;;  %v1840_v1 = vsub.f32 %v11826_v23, %v7962_v63  ;;  %v8329_v33 = vadd.f32 %v1965_v62, %v7594_v46  ;;  %v11828_v57 = vld [vmem:[#allocation85_spill] sm:$0xff]  ;;  %v11831_v2 = vld [vmem:[#allocation116_spill] sm:$0xff] }
 0x29a   : > { %11824 = vst [vmem:[#allocation79_spill] sm:$0xff] %v8320_v37  ;;  %v1967_v32 = vmul.f32 %v1839_v15, %v1839_v15  ;;  %v1841_v27 = vsub.f32 %v11828_v57, %v7962_v63  ;;  %v1842_v40 = vsub.f32 %v11829_v38, %v7962_v63  ;;  %v11830_v30 = vld [vmem:[#allocation113_spill] sm:$0xff]  ;;  %v1844_v39 = vsub.f32 %v11831_v2, %v7962_v63  ;;  %v8342_v60 = vpop.permute.xlu1 %1681  ;;  %v11834_v31 = vld [vmem:[#allocation124_spill] sm:$0xff]  ;;  %v11886_v37 = vld [vmem:[#allocation143_spill] sm:$0xff] }
 0x29b   : > { %11825 = vst [vmem:[#allocation78_spill] sm:$0xff] %v8323_v49  ;;  %2341 = vperm.xlu1 %5566, %v5874_v56   ;;  %11827 = vst [vmem:[#allocation61_spill] sm:$0xff] %v8329_v33  ;;  %2353 = vperm.xlu0 %5567, %v5875_v9   ;;  %v1843_v42 = vsub.f32 %v11830_v30, %v7962_v63  ;;  %v1845_v46 = vsub.f32 %v7568_v59, %v7962_v63  ;;  %v11832_v4 = vld [vmem:[#allocation169_spill] sm:$0xff]  ;;  %v5876_v30 = vld [vmem:[%s6249_s25 + $0x178] sm:$0xff] }
 0x29c   : > { %v8345_v11 = vsub.s32 2, %v11832_v4  ;;  %v1846_v53 = vsub.f32 %v11833_v16, %v7962_v63  ;;  %v1847_v8 = vsub.f32 %v11834_v31, %v7962_v63  ;;  %v11835_v62 = vld [vmem:[#allocation125_spill] sm:$0xff]  ;;  %v1849_v15 = vsub.f32 %v7646_v48, %v7962_v63  ;;  %v8355_v23 = vpop.permute.xlu0 %1685  ;;  %v11838_v2 = vld [vmem:[#allocation120_spill] sm:$0xff]  ;;  %v5887_v49 = vld [vmem:[%s6249_s25 + $0x1d0] sm:$0xff] }
 0x29d   : > { %v1848_v20 = vsub.f32 %v11835_v62, %v7962_v63  ;;  %v11836_v59 = vld [vmem:[#allocation121_spill] sm:$0xff]  ;;  %v1968_v57 = vmul.f32 %v1840_v1, %v1840_v1  ;;  %v1850_v38 = vsub.f32 %v7674_v36, %v7962_v63  ;;  %v1851_v9 = vsub.f32 %v7684_v5, %v7962_v63 }
 0x29e   : > { %v8358_v56 = vadd.f32 %v1966_v22, %v11836_v59  ;;  %v8366_v16 = vadd.f32 %v1967_v32, %v11838_v2  ;;  %v1969_v31 = vmul.f32 %v1841_v27, %v1841_v27  ;;  %v1970_v48 = vmul.f32 %v1842_v40, %v1842_v40  ;;  %v5877_v22 = vld [vmem:[%s6249_s25 + $0x190] sm:$0xff]  ;;  %v8371_v36 = vpop.permute.xlu1 %1689  ;;  %v5878_v4 = vld [vmem:[%s7234_s29] sm:$0xf] }
 0x29f   : > { %2349 = vperm.xlu1 %5566, %v5876_v30   ;;  %v1852_v62 = vsub.f32 %v7714_v10, %v7962_v63  ;;  %2361 = vperm.xlu0 %5567, %v5877_v22   ;;  %v1971_v1 = vmul.f32 %v1843_v42, %v1843_v42  ;;  %v1972_v59 = vmul.f32 %v1844_v39, %v1844_v39 }
 0x2a0   : > { %11837 = vst [vmem:[#allocation83_spill] sm:$0xff] %v8358_v56  ;;  %11839 = vst [vmem:[#allocation82_spill] sm:$0xff] %v8366_v16  ;;  %v1973_v33 = vmul.f32 %v1845_v46, %v1845_v46  ;;  %v8375_v5 = vrot.slane %v5878_v4, %v8345_v11  ;;  %v1974_v32 = vmul.f32 %v1846_v53, %v1846_v53  ;;  %v8377_v2 = vpop.permute.xlu0 %1693  ;;  %v5879_v46 = vld [vmem:[%s6249_s25 + $0x188] sm:$0xff] }
 0x2a1   : > { %v1975_v30 = vmul.f32 %v1847_v8, %v1847_v8  ;;  %v1976_v27 = vmul.f32 %v1848_v20, %v1848_v20  ;;  %v1977_v40 = vmul.f32 %v1849_v15, %v1849_v15  ;;  %v8380_v10 = vadd.f32 %v1968_v57, %v7650_v6  ;;  %v5880_v15 = vld [vmem:[%s6249_s25 + $0x1a0] sm:$0xff] }
 0x2a2   : > { %v1978_v22 = vmul.f32 %v1850_v38, %v1850_v38  ;;  %v1979_v42 = vmul.f32 %v1851_v9, %v1851_v9  ;;  %v1853_v39 = vsub.f32 %v7724_v55, %v7962_v63  ;;  %v8386_v4 = vadd.f32 %v1969_v31, %v7648_v3  ;;  %v11844_v57 = vld [vmem:[#allocation129_spill] sm:$0xff]  ;;  %v11846_v38 = vld [vmem:[#allocation128_spill] sm:$0xff]  ;;  %v11848_v3 = vld [vmem:[#allocation190_spill] sm:$0xff]  ;;  %v8405_v31 = vpop.permute.xlu1 %1697 }
 0x2a3   : > { %11840 = vst [vmem:[#allocation87_spill] sm:$0xff] %v8380_v10  ;;  %2357 = vperm.xlu1 %5566, %v5879_v46   ;;  %v8389_v53 = vadd.f32 %v1970_v48, %v7654_v29  ;;  %v1980_v8 = vmul.f32 %v1852_v62, %v1852_v62  ;;  %v1854_v20 = vsub.f32 %v7752_v0, %v7962_v63  ;;  %v11849_v48 = vld [vmem:[#allocation133_spill] sm:$0xff]  ;;  %v11851_v62 = vld [vmem:[#allocation132_spill] sm:$0xff] }
 0x2a4   : > { %11841 = vst [vmem:[#allocation86_spill] sm:$0xff] %v8386_v4  ;;  %2369 = vperm.xlu0 %5567, %v5880_v15   ;;  %v8395_v6 = vadd.f32 %v1971_v1, %v7652_v26  ;;  %v8398_v55 = vadd.f32 %v1972_v59, %v11844_v57  ;;  %v8401_v9 = vadd.f32 %v1973_v33, %v11846_v38  ;;  %v11853_v26 = vld [vmem:[#allocation136_spill] sm:$0xff]  ;;  %v11855_v59 = vld [vmem:[#allocation135_spill] sm:$0xff]  ;;  %v8419_v33 = vpop.permute.xlu0 %1701  ;;  %v11857_v57 = vld [vmem:[#allocation138_spill] sm:$0xff] }
 0x2a5   : > { %11842 = vst [vmem:[#allocation91_spill] sm:$0xff] %v8389_v53  ;;  %v1855_v29 = vsub.f32 %v11848_v3, %v7962_v63  ;;  %v8408_v0 = vadd.f32 %v1974_v32, %v11849_v48  ;;  %v8411_v46 = vadd.f32 %v1975_v30, %v11851_v62  ;;  %v8414_v1 = vadd.f32 %v1976_v27, %v11853_v26  ;;  %v11859_v63 = vld [vmem:[#allocation137_spill] sm:$0xff]  ;;  %v11861_v48 = vld [vmem:[#allocation144_spill] sm:$0xff] }
 0x2a6   : > { %11843 = vst [vmem:[#allocation90_spill] sm:$0xff] %v8395_v6  ;;  %11845 = vst [vmem:[#allocation95_spill] sm:$0xff] %v8398_v55  ;;  %v8417_v15 = vadd.f32 %v1977_v40, %v11855_v59  ;;  %v8422_v38 = vadd.f32 %v1978_v22, %v11857_v57  ;;  %v8425_v3 = vadd.f32 %v1979_v42, %v11859_v63  ;;  %v5881_v62 = vld [vmem:[%s6249_s25 + $0x198] sm:$0xff]  ;;  %v11864_v59 = vld [vmem:[#allocation145_spill] sm:$0xff] }
 0x2a7   : > { %11847 = vst [vmem:[#allocation94_spill] sm:$0xff] %v8401_v9  ;;  %11850 = vst [vmem:[#allocation76_spill] sm:$0xff] %v8408_v0  ;;  %v1981_v32 = vmul.f32 %v1853_v39, %v1853_v39  ;;  %v1856_v30 = vsub.f32 %v11861_v48, %v8026_v24  ;;  %2365 = vperm.xlu1 %5566, %v5881_v62   ;;  %v11862_v27 = vld [vmem:[#allocation176_spill] sm:$0xff]  ;;  %v1982_v40 = vmul.f32 %v1854_v20, %v1854_v20  ;;  %v11865_v22 = vld [vmem:[#allocation155_spill] sm:$0xff] }
 0x2a8   : > { %11852 = vst [vmem:[#allocation99_spill] sm:$0xff] %v8411_v46  ;;  %11854 = vst [vmem:[#allocation98_spill] sm:$0xff] %v8414_v1  ;;  %v8431_v26 = vadd.f32 %v1980_v8, %v11862_v27  ;;  %v1858_v57 = vsub.f32 %v11865_v22, %v8026_v24  ;;  %v1983_v42 = vmul.f32 %v1855_v29, %v1855_v29  ;;  %v11866_v39 = vld [vmem:[#allocation192_spill] sm:$0xff]  ;;  %v5883_v8 = vld [vmem:[%s7234_s29 + $0x4] sm:$0xf] }
 0x2a9   : > { %11856 = vst [vmem:[#allocation73_spill] sm:$0xff] %v8417_v15  ;;  %11858 = vst [vmem:[#allocation134_spill] sm:$0xff] %v8422_v38  ;;  %v1857_v15 = vsub.f32 %v11864_v59, %v8026_v24  ;;  %v5882_v38 = vld [vmem:[%s6249_s25 + $0x1b0] sm:$0xff]  ;;  %v1859_v63 = vsub.f32 %v11866_v39, %v8026_v24  ;;  %v11867_v48 = vld [vmem:[#allocation160_spill] sm:$0xff]  ;;  %v8446_v20 = vrot.slane %v5883_v8, %v8345_v11 }
 0x2aa   : > { %11860 = vst [vmem:[#allocation103_spill] sm:$0xff] %v8425_v3  ;;  %11863 = vst [vmem:[#allocation81_spill] sm:$0xff] %v8431_v26  ;;  %2377 = vperm.xlu0 %5567, %v5882_v38   ;;  %v1860_v62 = vsub.f32 %v11867_v48, %v8026_v24  ;;  %v8442_v3 = vpop.permute.xlu1 %1705  ;;  %v11868_v27 = vld [vmem:[#allocation161_spill] sm:$0xff]  ;;  %v11870_v29 = vld [vmem:[#allocation196_spill] sm:$0xff]  ;;  %v8456_v48 = vpop.permute.xlu0 %1709  ;;  %v1984_v8 = vmul.f32 %v1856_v30, %v1856_v30  ;;  %v1986_v53 = vmul.f32 %v1858_v57, %v1858_v57 }
 0x2ab   : > { %v1861_v59 = vsub.f32 %v11868_v27, %v8026_v24  ;;  %v11869_v38 = vld [vmem:[#allocation9_spill] sm:$0xff]  ;;  %v1863_v26 = vsub.f32 %v11870_v29, %v8026_v24  ;;  %v11871_v39 = vld [vmem:[#allocation10_spill] sm:$0xff]  ;;  %v11872_v1 = vld [vmem:[#allocation139_spill] sm:$0xff]  ;;  %v1866_v27 = vsub.f32 %v7966_v7, %v8026_v24  ;;  %v1985_v29 = vmul.f32 %v1857_v15, %v1857_v15 }
 0x2ac   : > { %v1862_v22 = vsub.f32 %v11869_v38, %v8026_v24  ;;  %v1864_v46 = vsub.f32 %v11871_v39, %v8026_v24  ;;  %v8459_v9 = vadd.f32 %v1981_v32, %v11872_v1  ;;  %v11874_v0 = vld [vmem:[#allocation13_spill] sm:$0xff]  ;;  %v11875_v38 = vld [vmem:[#allocation178_spill] sm:$0xff]  ;;  %v11877_v39 = vld [vmem:[#allocation15_spill] sm:$0xff]  ;;  %v1988_v30 = vmul.f32 %v1860_v62, %v1860_v62 }
 0x2ad   : > { %v1865_v6 = vsub.f32 %v11874_v0, %v8026_v24  ;;  %v5884_v55 = vld [vmem:[%s6249_s25 + $0x1a8] sm:$0xff]  ;;  %v8467_v4 = vadd.f32 %v1982_v40, %v11875_v38  ;;  %v1867_v16 = vsub.f32 %v11877_v39, %v8026_v24  ;;  %v5885_v10 = vld [vmem:[%s6249_s25 + $0x1c0] sm:$0xff]  ;;  %v1987_v0 = vmul.f32 %v1859_v63, %v1859_v63 }
 0x2ae   : > { %11873 = vst [vmem:[#allocation89_spill] sm:$0xff] %v8459_v9  ;;  %2373 = vperm.xlu1 %5566, %v5884_v55   ;;  %2385 = vperm.xlu0 %5567, %v5885_v10   ;;  %v11878_v1 = vld [vmem:[#allocation177_spill] sm:$0xff]  ;;  %v11880_v7 = vld [vmem:[#allocation34_spill] sm:$0xff]  ;;  %v8477_v55 = vpop.permute.xlu1 %1713  ;;  %v1989_v40 = vmul.f32 %v1861_v59, %v1861_v59  ;;  %v1990_v15 = vmul.f32 %v1862_v22, %v1862_v22 }
 0x2af   : > { %11876 = vst [vmem:[#allocation88_spill] sm:$0xff] %v8467_v4  ;;  %v8473_v32 = vadd.f32 %v1983_v42, %v11878_v1  ;;  %v1868_v9 = vsub.f32 %v11880_v7, %v8026_v24  ;;  %v1991_v57 = vmul.f32 %v1863_v26, %v1863_v26  ;;  %v1992_v38 = vmul.f32 %v1864_v46, %v1864_v46  ;;  %v8479_v4 = vpop.permute.xlu0 %1717  ;;  %v11881_v39 = vld [vmem:[#allocation141_spill] sm:$0xff]  ;;  %v11883_v63 = vld [vmem:[#allocation118_spill] sm:$0xff]  ;;  %v5886_v1 = vld [vmem:[%s6249_s25 + $0x1b8] sm:$0xff] }
 0x2b0   : > { %v8482_v56 = vadd.f32 %v1984_v8, %v11881_v39  ;;  %v1993_v10 = vmul.f32 %v1865_v6, %v1865_v6  ;;  %v1994_v42 = vmul.f32 %v1866_v27, %v1866_v27  ;;  %v1869_v62 = vsub.f32 %v11883_v63, %v8026_v24  ;;  %v11884_v7 = vld [vmem:[#allocation140_spill] sm:$0xff]  ;;  %v11888_v46 = vld [vmem:[#allocation21_spill] sm:$0xff]  ;;  %v11889_v6 = vld [vmem:[#allocation142_spill] sm:$0xff] }
 0x2b1   : > { %11879 = vst [vmem:[#allocation102_spill] sm:$0xff] %v8473_v32  ;;  %v8488_v32 = vadd.f32 %v1985_v29, %v11884_v7  ;;  %v8491_v59 = vadd.f32 %v1986_v53, %v11886_v37  ;;  %v1995_v26 = vmul.f32 %v1867_v16, %v1867_v16  ;;  %v1870_v22 = vsub.f32 %v11888_v46, %v8026_v24  ;;  %v11891_v27 = vld [vmem:[#allocation180_spill] sm:$0xff]  ;;  %v11894_v37 = vld [vmem:[#allocation179_spill] sm:$0xff]  ;;  %v11896_v53 = vld [vmem:[#allocation182_spill] sm:$0xff] }
 0x2b2   : > { %11882 = vst [vmem:[#allocation93_spill] sm:$0xff] %v8482_v56  ;;  %2381 = vperm.xlu1 %5566, %v5886_v1   ;;  %2393 = vperm.xlu0 %5567, %v5887_v49   ;;  %v8497_v8 = vadd.f32 %v1987_v0, %v11889_v6  ;;  %v8500_v39 = vadd.f32 %v1988_v30, %v11891_v27  ;;  %v11893_v29 = vld [vmem:[#allocation28_spill] sm:$0xff]  ;;  %v8504_v7 = vpop.permute.xlu1 %1721  ;;  %v11898_v49 = vld [vmem:[#allocation181_spill] sm:$0xff]  ;;  %v5948_v56 = vld [vmem:[%s6249_s25 + $0x390] sm:$0xff] }
 0x2b3   : > { %11885 = vst [vmem:[#allocation92_spill] sm:$0xff] %v8488_v32  ;;  %11887 = vst [vmem:[#allocation100_spill] sm:$0xff] %v8491_v59  ;;  %v1996_v63 = vmul.f32 %v1868_v9, %v1868_v9  ;;  %v1871_v1 = vsub.f32 %v11893_v29, %v8026_v24  ;;  %v8507_v16 = vadd.f32 %v1989_v40, %v11894_v37  ;;  %v11900_v0 = vld [vmem:[#allocation184_spill] sm:$0xff]  ;;  %v8518_v30 = vpop.permute.xlu0 %1725  ;;  %v11902_v9 = vld [vmem:[#allocation183_spill] sm:$0xff] }
 0x2b4   : > { %11890 = vst [vmem:[#allocation97_spill] sm:$0xff] %v8497_v8  ;;  %11892 = vst [vmem:[#allocation104_spill] sm:$0xff] %v8500_v39  ;;  %v8510_v46 = vadd.f32 %v1990_v15, %v11896_v53  ;;  %v8513_v32 = vadd.f32 %v1991_v57, %v11898_v49  ;;  %v8516_v6 = vadd.f32 %v1992_v38, %v11900_v0  ;;  %v11904_v24 = vld [vmem:[#allocation186_spill] sm:$0xff]  ;;  %v11906_v37 = vld [vmem:[#allocation185_spill] sm:$0xff] }
 0x2b5   : > { %11895 = vst [vmem:[#allocation101_spill] sm:$0xff] %v8507_v16  ;;  %v8521_v27 = vadd.f32 %v1993_v10, %v11902_v9  ;;  %v8524_v29 = vadd.f32 %v1994_v42, %v11904_v24  ;;  %v1997_v8 = vmul.f32 %v1869_v62, %v1869_v62  ;;  %v1872_v40 = vsub.f32 %v8068_v17, %v8135_v34  ;;  %v5888_v15 = vld [vmem:[%s6249_s25 + $0x1c8] sm:$0xff]  ;;  %v5889_v0 = vld [vmem:[%s6249_s25 + $0x1e0] sm:$0xff]  ;;  %v11911_v9 = vld [vmem:[#allocation55_spill] sm:$0xff] }
 0x2b6   : > { %11897 = vst [vmem:[#allocation108_spill] sm:$0xff] %v8510_v46  ;;  %11899 = vst [vmem:[#allocation105_spill] sm:$0xff] %v8513_v32  ;;  %2389 = vperm.xlu1 %5566, %v5888_v15   ;;  %v8530_v57 = vadd.f32 %v1995_v26, %v11906_v37  ;;  %v1998_v38 = vmul.f32 %v1870_v22, %v1870_v22  ;;  %v1873_v53 = vsub.f32 %v8070_v52, %v8135_v34  ;;  %v11908_v10 = vld [vmem:[#allocation42_spill] sm:$0xff]  ;;  %v11909_v42 = vld [vmem:[#allocation188_spill] sm:$0xff]  ;;  %v8544_v22 = vpop.permute.xlu1 %1729 }
 0x2b7   : > { %11901 = vst [vmem:[#allocation112_spill] sm:$0xff] %v8516_v6  ;;  %11903 = vst [vmem:[#allocation109_spill] sm:$0xff] %v8521_v27  ;;  %v1874_v49 = vsub.f32 %v11908_v10, %v8135_v34  ;;  %2401 = vperm.xlu0 %5567, %v5889_v0   ;;  %v8538_v62 = vadd.f32 %v1996_v63, %v11909_v42  ;;  %v1999_v17 = vmul.f32 %v1871_v1, %v1871_v1  ;;  %v11912_v26 = vld [vmem:[#allocation59_spill] sm:$0xff]  ;;  %v11913_v52 = vld [vmem:[#allocation58_spill] sm:$0xff]  ;;  %v8552_v0 = vpop.permute.xlu0 %1733 }
 0x2b8   : > { %11905 = vst [vmem:[#allocation107_spill] sm:$0xff] %v8524_v29  ;;  %11907 = vst [vmem:[#allocation106_spill] sm:$0xff] %v8530_v57  ;;  %v1875_v24 = vsub.f32 %v11911_v9, %v8135_v34  ;;  %v1876_v15 = vsub.f32 %v11912_v26, %v8135_v34  ;;  %v1877_v37 = vsub.f32 %v11913_v52, %v8135_v34  ;;  %v5890_v1 = vld [vmem:[%s7234_s29 + $0x8] sm:$0xf]  ;;  %v11914_v9 = vld [vmem:[#allocation187_spill] sm:$0xff] }
 0x2b9   : > { %11910 = vst [vmem:[#allocation111_spill] sm:$0xff] %v8538_v62  ;;  %v1878_v10 = vsub.f32 %v8170_v54, %v8135_v34  ;;  %v1879_v63 = vsub.f32 %v8172_v21, %v8135_v34  ;;  %v8556_v42 = vrot.slane %v5890_v1, %v8345_v11  ;;  %v8559_v26 = vadd.f32 %v1997_v8, %v11914_v9  ;;  %v5891_v54 = vld [vmem:[%s6249_s25 + $0x1d8] sm:$0xff]  ;;  %v5892_v16 = vld [vmem:[%s6249_s25 + $0x1f0] sm:$0xff]  ;;  %v11919_v8 = vld [vmem:[#allocation189_spill] sm:$0xff] }
 0x2ba   : > { %v2000_v57 = vmul.f32 %v1872_v40, %v1872_v40  ;;  %v1880_v52 = vsub.f32 %v8204_v51, %v8135_v34  ;;  %v1881_v62 = vsub.f32 %v8218_v12, %v8135_v34  ;;  %2397 = vperm.xlu1 %5566, %v5891_v54   ;;  %v11916_v27 = vld [vmem:[#allocation191_spill] sm:$0xff]  ;;  %v2001_v29 = vmul.f32 %v1873_v53, %v1873_v53  ;;  %v11918_v1 = vld [vmem:[#allocation72_spill] sm:$0xff]  ;;  %v11921_v12 = vld [vmem:[#allocation69_spill] sm:$0xff]  ;;  %v8577_v54 = vpop.permute.xlu1 %1737 }
 0x2bb   : > { %11915 = vst [vmem:[#allocation96_spill] sm:$0xff] %v8559_v26  ;;  %v8567_v21 = vadd.f32 %v1998_v38, %v11916_v27  ;;  %v2002_v32 = vmul.f32 %v1874_v49, %v1874_v49  ;;  %v1882_v6 = vsub.f32 %v11918_v1, %v8135_v34  ;;  %2409 = vperm.xlu0 %5567, %v5892_v16   ;;  %v8581_v1 = vpop.permute.xlu0 %1741  ;;  %v11922_v16 = vld [vmem:[#allocation146_spill] sm:$0xff]  ;;  %v5894_v46 = vld [vmem:[%s6249_s25 + $0x200] sm:$0xff] }
 0x2bc   : > { %v8573_v40 = vadd.f32 %v1999_v17, %v11919_v8  ;;  %v2003_v51 = vmul.f32 %v1875_v24, %v1875_v24  ;;  %v2004_v9 = vmul.f32 %v1876_v15, %v1876_v15  ;;  %v1883_v26 = vsub.f32 %v11921_v12, %v8135_v34  ;;  %v5893_v8 = vld [vmem:[%s6249_s25 + $0x1e8] sm:$0xff]  ;;  %v11924_v12 = vld [vmem:[#allocation16_spill] sm:$0xff] }
 0x2bd   : > { %11917 = vst [vmem:[#allocation110_spill] sm:$0xff] %v8567_v21  ;;  %v2005_v27 = vmul.f32 %v1877_v37, %v1877_v37  ;;  %v2006_v38 = vmul.f32 %v1878_v10, %v1878_v10  ;;  %v2007_v53 = vmul.f32 %v1879_v63, %v1879_v63  ;;  %v1884_v49 = vsub.f32 %v8272_v41, %v8135_v34  ;;  %v11926_v37 = vld [vmem:[#allocation148_spill] sm:$0xff] }
 0x2be   : > { %11920 = vst [vmem:[#allocation115_spill] sm:$0xff] %v8573_v40  ;;  %v8584_v21 = vadd.f32 %v2000_v57, %v11922_v16  ;;  %v2008_v17 = vmul.f32 %v1880_v52, %v1880_v52  ;;  %v2009_v24 = vmul.f32 %v1881_v62, %v1881_v62  ;;  %v1885_v15 = vsub.f32 %v8274_v25, %v8135_v34  ;;  %v11928_v57 = vld [vmem:[#allocation147_spill] sm:$0xff]  ;;  %v11930_v52 = vld [vmem:[#allocation150_spill] sm:$0xff]  ;;  %v12078_v39 = vld [vmem:[#allocation60_spill] sm:$0xff] }
 0x2bf   : > { %2405 = vperm.xlu1 %5566, %v5893_v8   ;;  %v8590_v40 = vadd.f32 %v2001_v29, %v11924_v12  ;;  %v8593_v10 = vadd.f32 %v2002_v32, %v11926_v37  ;;  %v2010_v63 = vmul.f32 %v1882_v6, %v1882_v6  ;;  %v1886_v41 = vsub.f32 %v8303_v44, %v8135_v34  ;;  %v11932_v8 = vld [vmem:[#allocation149_spill] sm:$0xff]  ;;  %v11934_v6 = vld [vmem:[#allocation152_spill] sm:$0xff]  ;;  %v11936_v44 = vld [vmem:[#allocation151_spill] sm:$0xff] }
 0x2c0   : > { %11923 = vst [vmem:[#allocation114_spill] sm:$0xff] %v8584_v21  ;;  %2417 = vperm.xlu0 %5567, %v5894_v46   ;;  %v8599_v62 = vadd.f32 %v2003_v51, %v11928_v57  ;;  %v8602_v25 = vadd.f32 %v2004_v9, %v11930_v52  ;;  %v2011_v16 = vmul.f32 %v1883_v26, %v1883_v26  ;;  %v2162_v51 = vpop.permute.xlu1 %2161  ;;  %v11938_v57 = vld [vmem:[#allocation154_spill] sm:$0xff]  ;;  %v11940_v9 = vld [vmem:[#allocation153_spill] sm:$0xff] }
 0x2c1   : > { %11925 = vst [vmem:[#allocation119_spill] sm:$0xff] %v8590_v40  ;;  %11927 = vst [vmem:[#allocation17_spill] sm:$0xff] %v8593_v10  ;;  %v1887_v29 = vsub.f32 %v8317_v43, %v8135_v34  ;;  %v8607_v32 = vadd.f32 %v2005_v27, %v11932_v8  ;;  %v8610_v12 = vadd.f32 %v2006_v38, %v11934_v6  ;;  %v2166_v43 = vpop.permute.xlu0 %2165  ;;  %v5895_v27 = vld [vmem:[%s6249_s25 + $0x1f8] sm:$0xff]  ;;  %v11942_v38 = vld [vmem:[#allocation157_spill] sm:$0xff] }
 0x2c2   : > { %11929 = vst [vmem:[#allocation24_spill] sm:$0xff] %v8599_v62  ;;  %11931 = vst [vmem:[#allocation25_spill] sm:$0xff] %v8602_v25  ;;  %v8613_v37 = vadd.f32 %v2007_v53, %v11936_v44  ;;  %v2012_v46 = vmul.f32 %v1884_v49, %v1884_v49  ;;  %v8616_v62 = vadd.f32 %v2008_v17, %v11938_v57  ;;  %v11944_v6 = vld [vmem:[#allocation65_spill] sm:$0xff]  ;;  %v5896_v44 = vld [vmem:[%s6249_s25 + $0x210] sm:$0xff] }
 0x2c3   : > { %11933 = vst [vmem:[#allocation127_spill] sm:$0xff] %v8607_v32  ;;  %11935 = vst [vmem:[#allocation174_spill] sm:$0xff] %v8610_v12  ;;  %v8619_v26 = vadd.f32 %v2009_v24, %v11940_v9  ;;  %v2013_v52 = vmul.f32 %v1885_v15, %v1885_v15  ;;  %v2704_v34 = vsub.f32 %v2162_v51, %v8375_v5  ;;  %2413 = vperm.xlu1 %5566, %v5895_v27   ;;  %v11945_v24 = vld [vmem:[#allocation156_spill] sm:$0xff]  ;;  %v11947_v27 = vld [vmem:[#allocation159_spill] sm:$0xff] }
 0x2c4   : > { %11937 = vst [vmem:[#allocation49_spill] sm:$0xff] %v8613_v37  ;;  %11939 = vst [vmem:[#allocation53_spill] sm:$0xff] %v8616_v62  ;;  %v8624_v8 = vadd.f32 %v2010_v63, %v11942_v38  ;;  %v2014_v53 = vmul.f32 %v1886_v41, %v1886_v41  ;;  %v1888_v49 = vsub.f32 %v8342_v60, %v11944_v6  ;;  %2425 = vperm.xlu0 %5567, %v5896_v44   ;;  %v5897_v38 = vld [vmem:[%s7234_s29 + $0xc] sm:$0xf]  ;;  %v5925_v62 = vld [vmem:[%s6249_s25 + $0x2e0] sm:$0xff] }
 0x2c5   : > { %11941 = vst [vmem:[#allocation173_spill] sm:$0xff] %v8619_v26  ;;  %v2705_v17 = vsub.f32 %v2166_v43, %v8375_v5  ;;  %v8631_v15 = vadd.f32 %v2011_v16, %v11945_v24  ;;  %v2015_v51 = vmul.f32 %v1887_v29, %v1887_v29  ;;  %v1889_v57 = vsub.f32 %v8355_v23, %v11944_v6  ;;  %v2170_v43 = vpop.permute.xlu1 %2169  ;;  %v11949_v16 = vld [vmem:[#allocation158_spill] sm:$0xff]  ;;  %v11951_v29 = vld [vmem:[#allocation19_spill] sm:$0xff]  ;;  %v5938_v10 = vld [vmem:[%s6249_s25 + $0x340] sm:$0xff] }
 0x2c6   : > { %11943 = vst [vmem:[#allocation56_spill] sm:$0xff] %v8624_v8  ;;  %v2832_v9 = vmul.f32 %v2704_v34, %v2704_v34  ;;  %v8636_v63 = vadd.f32 %v2012_v46, %v11947_v27  ;;  %v1890_v41 = vsub.f32 %v8371_v36, %v11944_v6  ;;  %v8642_v44 = vrot.slane %v5897_v38, %v8345_v11  ;;  %v2178_v27 = vpop.permute.xlu0 %2177  ;;  %v11952_v36 = vld [vmem:[#allocation194_spill] sm:$0xff] }
 0x2c7   : > { %11946 = vst [vmem:[#allocation77_spill] sm:$0xff] %v8631_v15  ;;  %v2833_v60 = vmul.f32 %v2705_v17, %v2705_v17  ;;  %v8645_v24 = vadd.f32 %v2013_v52, %v11949_v16  ;;  %v1891_v23 = vsub.f32 %v8377_v2, %v11944_v6  ;;  %v2706_v46 = vsub.f32 %v2170_v43, %v8375_v5  ;;  %v5898_v15 = vld [vmem:[%s6249_s25 + $0x208] sm:$0xff]  ;;  %v5899_v16 = vld [vmem:[%s6249_s25 + $0x220] sm:$0xff] }
 0x2c8   : > { %11948 = vst [vmem:[#allocation175_spill] sm:$0xff] %v8636_v63  ;;  %v2960_v34 = vadd.f32 %v2832_v9, %v11951_v29  ;;  %2421 = vperm.xlu1 %5566, %v5898_v15   ;;  %v8653_v17 = vadd.f32 %v2014_v53, %v11952_v36  ;;  %v2016_v63 = vmul.f32 %v1888_v49, %v1888_v49  ;;  %v11954_v26 = vld [vmem:[#allocation14_spill] sm:$0xff]  ;;  %v11955_v2 = vld [vmem:[#allocation193_spill] sm:$0xff] }
 0x2c9   : > { %11950 = vst [vmem:[#allocation80_spill] sm:$0xff] %v8645_v24  ;;  %v1892_v38 = vsub.f32 %v8405_v31, %v11944_v6  ;;  %v2961_v52 = vadd.f32 %v2833_v60, %v11954_v26  ;;  %2433 = vperm.xlu0 %5567, %v5899_v16   ;;  %v8660_v24 = vadd.f32 %v2015_v51, %v11955_v2  ;;  %v2174_v15 = vpop.permute.xlu1 %2173  ;;  %v11961_v16 = vld [vmem:[#allocation18_spill] sm:$0xff] }
 0x2ca   : > { %11953 = vst [vmem:[#allocation84_spill] sm:$0xff] %v8653_v17  ;;  %v2017_v9 = vmul.f32 %v1889_v57, %v1889_v57  ;;  %v3088_v43 = vadd.f32 1.0, %v2960_v34  ;;  %v2834_v29 = vmul.f32 %v2706_v46, %v2706_v46  ;;  %v2018_v8 = vmul.f32 %v1890_v41, %v1890_v41  ;;  %v2186_v57 = vpop.permute.xlu0 %2185  ;;  %v5900_v34 = vld [vmem:[%s6249_s25 + $0x218] sm:$0xff]  ;;  %v12052_v25 = vld [vmem:[#allocation62_spill] sm:$0xff] }
 0x2cb   : > { %11956 = vst [vmem:[#allocation85_spill] sm:$0xff] %v8660_v24  ;;  %v1893_v53 = vsub.f32 %v8419_v33, %v11944_v6  ;;  %v1894_v49 = vsub.f32 %v8442_v3, %v11944_v6  ;;  %v3089_v31 = vadd.f32 1.0, %v2961_v52  ;;  %v2019_v26 = vmul.f32 %v1891_v23, %v1891_v23  ;;  %v11957_v41 = vld [vmem:[#allocation163_spill] sm:$0xff]  ;;  %v11959_v23 = vld [vmem:[#allocation162_spill] sm:$0xff] }
 0x2cc   : > { %v1895_v60 = vsub.f32 %v8456_v48, %v11944_v6  ;;  %5572 = vrsqrt.f32 %v3088_v43  ;;  %v2707_v51 = vsub.f32 %v2174_v15, %v8375_v5  ;;  %2429 = vperm.xlu1 %5566, %v5900_v34   ;;  %v8671_v46 = vadd.f32 %v2016_v63, %v11957_v41  ;;  %v5901_v3 = vld [vmem:[%s6249_s25 + $0x230] sm:$0xff]  ;;  %v11962_v15 = vld [vmem:[#allocation165_spill] sm:$0xff]  ;;  %v11964_v41 = vld [vmem:[#allocation164_spill] sm:$0xff] }
 0x2cd   : > { %v2020_v36 = vmul.f32 %v1892_v38, %v1892_v38  ;;  %v1896_v33 = vsub.f32 %v8477_v55, %v11944_v6  ;;  %5574 = vrsqrt.f32 %v3089_v31  ;;  %2441 = vperm.xlu0 %5567, %v5901_v3   ;;  %v8677_v52 = vadd.f32 %v2017_v9, %v11959_v23  ;;  %v2182_v31 = vpop.permute.xlu1 %2181  ;;  %v11966_v23 = vld [vmem:[#allocation23_spill] sm:$0xff] }
 0x2ce   : > { %11958 = vst [vmem:[#allocation172_spill] sm:$0xff] %v8671_v46  ;;  %v1897_v48 = vsub.f32 %v8479_v4, %v11944_v6  ;;  %v2962_v2 = vadd.f32 %v2834_v29, %v11961_v16  ;;  %v2835_v43 = vmul.f32 %v2707_v51, %v2707_v51  ;;  %v8683_v63 = vadd.f32 %v2018_v8, %v11962_v15  ;;  %v2194_v29 = vpop.permute.xlu0 %2193  ;;  %v5902_v51 = vld [vmem:[%s6249_s25 + $0x228] sm:$0xff]  ;;  %v11967_v8 = vld [vmem:[#allocation167_spill] sm:$0xff] }
 0x2cf   : > { %11960 = vst [vmem:[#allocation113_spill] sm:$0xff] %v8677_v52  ;;  %v2021_v38 = vmul.f32 %v1893_v53, %v1893_v53  ;;  %v2022_v34 = vmul.f32 %v1894_v49, %v1894_v49  ;;  %v1898_v55 = vsub.f32 %v8504_v7, %v11944_v6  ;;  %v8688_v3 = vadd.f32 %v2019_v26, %v11964_v41  ;;  %v5903_v26 = vld [vmem:[%s6249_s25 + $0x240] sm:$0xff]  ;;  %v11969_v41 = vld [vmem:[#allocation166_spill] sm:$0xff] }
 0x2d0   : > { %11963 = vst [vmem:[#allocation116_spill] sm:$0xff] %v8683_v63  ;;  %v2023_v9 = vmul.f32 %v1895_v60, %v1895_v60  ;;  %v2963_v52 = vadd.f32 %v2835_v43, %v11966_v23  ;;  %v2709_v4 = vsub.f32 %v2182_v31, %v8375_v5  ;;  %2437 = vperm.xlu1 %5566, %v5902_v51   ;;  %v3090_v43 = vadd.f32 1.0, %v2962_v2  ;;  %v11971_v51 = vld [vmem:[#allocation168_spill] sm:$0xff] }
 0x2d1   : > { %11965 = vst [vmem:[#allocation117_spill] sm:$0xff] %v8688_v3  ;;  %v8694_v16 = vadd.f32 %v2020_v36, %v11967_v8  ;;  %v2024_v53 = vmul.f32 %v1896_v33, %v1896_v33  ;;  %v1899_v49 = vsub.f32 %v8518_v30, %v11944_v6  ;;  %v1900_v7 = vsub.f32 %v8544_v22, %v11944_v6  ;;  %v2190_v8 = vpop.permute.xlu1 %2189  ;;  %v11973_v3 = vld [vmem:[#allocation5_spill] sm:$0xff] }
 0x2d2   : > { %2449 = vperm.xlu0 %5567, %v5903_v26   ;;  %v2025_v60 = vmul.f32 %v1897_v48, %v1897_v48  ;;  %v3091_v15 = vadd.f32 1.0, %v2963_v52  ;;  %v2837_v31 = vmul.f32 %v2709_v4, %v2709_v4  ;;  %v8702_v23 = vadd.f32 %v2021_v38, %v11969_v41  ;;  %v11975_v26 = vld [vmem:[#allocation27_spill] sm:$0xff]  ;;  %v2202_v2 = vpop.permute.xlu0 %2201  ;;  %v11976_v38 = vld [vmem:[#allocation6_spill] sm:$0xff] }
 0x2d3   : > { %11968 = vst [vmem:[#allocation124_spill] sm:$0xff] %v8694_v16  ;;  %v8705_v36 = vadd.f32 %v2022_v34, %v11971_v51  ;;  %v2026_v33 = vmul.f32 %v1898_v55, %v1898_v55  ;;  %v2708_v30 = vsub.f32 %v2178_v27, %v8375_v5  ;;  %v8709_v22 = vadd.f32 %v2023_v9, %v11973_v3  ;;  %v5904_v4 = vld [vmem:[%s6249_s25 + $0x238] sm:$0xff]  ;;  %v5905_v55 = vld [vmem:[%s6249_s25 + $0x250] sm:$0xff] }
 0x2d4   : > { %11970 = vst [vmem:[#allocation125_spill] sm:$0xff] %v8702_v23  ;;  %5576 = vrsqrt.f32 %v3091_v15  ;;  %v2965_v48 = vadd.f32 %v2837_v31, %v11975_v26  ;;  %v2711_v52 = vsub.f32 %v2190_v8, %v8375_v5  ;;  %2445 = vperm.xlu1 %5566, %v5904_v4   ;;  %v8715_v41 = vadd.f32 %v2024_v53, %v11976_v38  ;;  %v11979_v9 = vld [vmem:[#allocation7_spill] sm:$0xff] }
 0x2d5   : > { %11972 = vst [vmem:[#allocation121_spill] sm:$0xff] %v8705_v36  ;;  %11974 = vst [vmem:[#allocation120_spill] sm:$0xff] %v8709_v22  ;;  %v2027_v34 = vmul.f32 %v1899_v49, %v1899_v49  ;;  %v2028_v51 = vmul.f32 %v1900_v7, %v1900_v7  ;;  %v1901_v27 = vsub.f32 %v8552_v0, %v11944_v6  ;;  %5578 = vrsqrt.f32 %v3090_v43  ;;  %v11982_v53 = vld [vmem:[#allocation11_spill] sm:$0xff]  ;;  %v2198_v38 = vpop.permute.xlu1 %2197  ;;  %v5911_v36 = vld [vmem:[%s6249_s25 + $0x268] sm:$0xff] }
 0x2d6   : > { %11977 = vst [vmem:[#allocation129_spill] sm:$0xff] %v8715_v41  ;;  %2457 = vperm.xlu0 %5567, %v5905_v55   ;;  %v8720_v3 = vpop.eup %5572  ;;  %v8723_v15 = vadd.f32 %v2025_v60, %v11979_v9  ;;  %v2710_v31 = vsub.f32 %v2186_v57, %v8375_v5  ;;  %v2839_v8 = vmul.f32 %v2711_v52, %v2711_v52  ;;  %v3093_v0 = vadd.f32 1.0, %v2965_v48  ;;  %v11984_v55 = vld [vmem:[#allocation31_spill] sm:$0xff]  ;;  %v2210_v9 = vpop.permute.xlu0 %2209  ;;  %v5906_v57 = vld [vmem:[%s6249_s25 + $0x248] sm:$0xff] }
 0x2d7   : > { %11978 = vst [vmem:[#allocation128_spill] sm:$0xff] %v8720_v3  ;;  %v8726_v26 = vpop.eup %5574  ;;  %v8729_v49 = vadd.f32 %v2026_v33, %v11982_v53  ;;  %v2836_v7 = vmul.f32 %v2708_v30, %v2708_v30  ;;  %v2712_v4 = vsub.f32 %v2194_v29, %v8375_v5  ;;  %v2714_v60 = vsub.f32 %v2202_v2, %v8375_v5  ;;  %v11985_v33 = vld [vmem:[#allocation8_spill] sm:$0xff]  ;;  %v11987_v30 = vld [vmem:[#allocation195_spill] sm:$0xff] }
 0x2d8   : > { %11980 = vst [vmem:[#allocation190_spill] sm:$0xff] %v8723_v15  ;;  %11981 = vst [vmem:[#allocation133_spill] sm:$0xff] %v8726_v26  ;;  %v2967_v22 = vadd.f32 %v2839_v8, %v11984_v55  ;;  %v2713_v43 = vsub.f32 %v2198_v38, %v8375_v5  ;;  %2453 = vperm.xlu1 %5566, %v5906_v57   ;;  %v3344_v52 = vmul.f32 %v8720_v3, %v8720_v3  ;;  %v5907_v2 = vld [vmem:[%s6249_s25 + $0x260] sm:$0xff]  ;;  %v11989_v3 = vld [vmem:[#allocation22_spill] sm:$0xff] }
 0x2d9   : > { %11983 = vst [vmem:[#allocation132_spill] sm:$0xff] %v8729_v49  ;;  %v8739_v53 = vadd.f32 %v2027_v34, %v11985_v33  ;;  %v8742_v48 = vadd.f32 %v2028_v51, %v11987_v30  ;;  %v2029_v29 = vmul.f32 %v1901_v27, %v1901_v27  ;;  %v1902_v8 = vsub.f32 %v8577_v54, %v11944_v6  ;;  %v2206_v33 = vpop.permute.xlu1 %2205  ;;  %v11990_v54 = vld [vmem:[#allocation35_spill] sm:$0xff] }
 0x2da   : > { %2465 = vperm.xlu0 %5567, %v5907_v2   ;;  %v2838_v38 = vmul.f32 %v2710_v31, %v2710_v31  ;;  %v3095_v55 = vadd.f32 1.0, %v2967_v22  ;;  %v2841_v15 = vmul.f32 %v2713_v43, %v2713_v43  ;;  %v3345_v57 = vmul.f32 %v8726_v26, %v8726_v26  ;;  %v2218_v31 = vpop.permute.xlu0 %2217  ;;  %v5908_v22 = vld [vmem:[%s6249_s25 + $0x258] sm:$0xff] }
 0x2db   : > { %11986 = vst [vmem:[#allocation136_spill] sm:$0xff] %v8739_v53  ;;  %11988 = vst [vmem:[#allocation135_spill] sm:$0xff] %v8742_v48  ;;  %v2964_v34 = vadd.f32 %v2836_v7, %v11989_v3  ;;  %5580 = vrsqrt.f32 %v3093_v0  ;;  %v2840_v51 = vmul.f32 %v2712_v4, %v2712_v4  ;;  %v2716_v27 = vsub.f32 %v2210_v9, %v8375_v5  ;;  %v11991_v48 = vld [vmem:[#allocation170_spill] sm:$0xff] }
 0x2dc   : > { %v2842_v30 = vmul.f32 %v2714_v60, %v2714_v60  ;;  %v2969_v53 = vadd.f32 %v2841_v15, %v11990_v54  ;;  %v2715_v2 = vsub.f32 %v2206_v33, %v8375_v5  ;;  %2461 = vperm.xlu1 %5566, %v5908_v22   ;;  %v3472_v43 = vmul.f32 %v3344_v52, %v3344_v52  ;;  %v5909_v0 = vld [vmem:[%s6249_s25 + $0x270] sm:$0xff] }
 0x2dd   : > { %v8755_v26 = vadd.f32 %v2029_v29, %v11991_v48  ;;  %v1903_v3 = vsub.f32 %v8581_v1, %v11944_v6  ;;  %v2718_v7 = vsub.f32 %v2218_v31, %v8375_v5  ;;  %v5910_v4 = vld [vmem:[%s7234_s29 + $0x10] sm:$0xf]  ;;  %v2030_v9 = vmul.f32 %v1902_v8, %v1902_v8  ;;  %v2214_v31 = vpop.permute.xlu1 %2213 }
 0x2de   : > { %2473 = vperm.xlu0 %5567, %v5909_v0   ;;  %v8763_v15 = vrot.slane %v5910_v4, %v8345_v11  ;;  %v8765_v60 = vpop.eup %5576  ;;  %v11994_v33 = vld [vmem:[#allocation26_spill] sm:$0xff]  ;;  %5582 = vrsqrt.f32 %v3095_v55  ;;  %v3473_v48 = vmul.f32 %v3345_v57, %v3345_v57  ;;  %v3092_v29 = vadd.f32 1.0, %v2964_v34  ;;  %v11997_v0 = vld [vmem:[#allocation171_spill] sm:$0xff]  ;;  %v2226_v23 = vpop.permute.xlu0 %2225  ;;  %v5912_v34 = vld [vmem:[%s6249_s25 + $0x280] sm:$0xff] }
 0x2df   : > { %11992 = vst [vmem:[#allocation138_spill] sm:$0xff] %v8755_v26  ;;  %11993 = vst [vmem:[#allocation137_spill] sm:$0xff] %v8765_v60  ;;  %v2966_v54 = vadd.f32 %v2838_v38, %v11994_v33  ;;  %v11995_v22 = vld [vmem:[#allocation30_spill] sm:$0xff]  ;;  %v2844_v6 = vmul.f32 %v2716_v27, %v2716_v27  ;;  %v8769_v26 = vpop.eup %5578  ;;  %v2970_v49 = vadd.f32 %v2842_v30, %v11997_v0  ;;  %v3097_v41 = vadd.f32 1.0, %v2969_v53  ;;  %v11998_v27 = vld [vmem:[#allocation12_spill] sm:$0xff] }
 0x2e0   : > { %v2968_v1 = vadd.f32 %v2840_v51, %v11995_v22  ;;  %11996 = vst [vmem:[#allocation144_spill] sm:$0xff] %v8769_v26  ;;  %v2843_v4 = vmul.f32 %v2715_v2, %v2715_v2  ;;  %2469 = vperm.xlu1 %5566, %v5911_v36   ;;  %v8773_v8 = vmul.f32 %v3472_v43, %v3344_v52  ;;  %5584 = vrsqrt.f32 %v3092_v29  ;;  %v12000_v52 = vld [vmem:[#allocation39_spill] sm:$0xff]  ;;  %v12001_v0 = vld [vmem:[#allocation20_spill] sm:$0xff] }
 0x2e1   : > { %v2031_v38 = vmul.f32 %v1903_v3, %v1903_v3  ;;  %v2846_v55 = vmul.f32 %v2718_v7, %v2718_v7  ;;  %v2717_v33 = vsub.f32 %v2214_v31, %v8375_v5  ;;  %v3347_v51 = vmul.f32 %v8765_v60, %v8765_v60  ;;  %v2222_v3 = vpop.permute.xlu1 %2221  ;;  %v5916_v60 = vld [vmem:[%s6249_s25 + $0x2a0] sm:$0xff] }
 0x2e2   : > { %2481 = vperm.xlu0 %5567, %v5912_v34   ;;  %v8780_v22 = vadd.f32 %v2030_v9, %v11998_v27  ;;  %v3094_v53 = vadd.f32 1.0, %v2966_v54  ;;  %v2720_v30 = vsub.f32 %v2226_v23, %v8446_v20  ;;  %v8783_v2 = vmul.f32 %v3473_v48, %v3345_v57  ;;  %v2234_v9 = vpop.permute.xlu0 %2233  ;;  %v5913_v27 = vld [vmem:[%s6249_s25 + $0x278] sm:$0xff] }
 0x2e3   : > { %v3096_v36 = vadd.f32 1.0, %v2968_v1  ;;  %v2972_v43 = vadd.f32 %v2844_v6, %v12000_v52  ;;  %v3346_v7 = vmul.f32 %v8769_v26, %v8769_v26  ;;  %v3098_v31 = vadd.f32 1.0, %v2970_v49  ;;  %v12003_v54 = vld [vmem:[#allocation123_spill] sm:$0xff]  ;;  %v12004_v49 = vld [vmem:[#allocation197_spill] sm:$0xff] }
 0x2e4   : > { %11999 = vst [vmem:[#allocation176_spill] sm:$0xff] %v8780_v22  ;;  %5586 = vrsqrt.f32 %v3097_v41  ;;  %v2971_v34 = vadd.f32 %v2843_v4, %v12001_v0  ;;  %2477 = vperm.xlu1 %5566, %v5913_v27   ;;  %v4400_v23 = vmul.f32 0.001, %v8773_v8  ;;  %v2974_v48 = vadd.f32 %v2846_v55, %v12003_v54  ;;  %v5914_v6 = vld [vmem:[%s6249_s25 + $0x290] sm:$0xff] }
 0x2e5   : > { %v8791_v57 = vpop.eup %5580  ;;  %v2845_v29 = vmul.f32 %v2717_v33, %v2717_v33  ;;  %v2719_v1 = vsub.f32 %v2222_v3, %v8375_v5  ;;  %v3475_v52 = vmul.f32 %v3347_v51, %v3347_v51  ;;  %v8797_v41 = vadd.f32 %v2031_v38, %v12004_v49  ;;  %v2230_v55 = vpop.permute.xlu1 %2229 }
 0x2e6   : > { %12002 = vst [vmem:[#allocation145_spill] sm:$0xff] %v8791_v57  ;;  %2489 = vperm.xlu0 %5567, %v5914_v6   ;;  %5588 = vrsqrt.f32 %v3094_v53  ;;  %v2848_v4 = vmul.f32 %v2720_v30, %v2720_v30  ;;  %v4401_v0 = vmul.f32 0.001, %v8783_v2  ;;  %v3100_v27 = vadd.f32 1.0, %v2972_v43  ;;  %v2242_v3 = vpop.permute.xlu0 %2241  ;;  %v5915_v6 = vld [vmem:[%s6249_s25 + $0x288] sm:$0xff] }
 0x2e7   : > { %12005 = vst [vmem:[#allocation155_spill] sm:$0xff] %v8797_v41  ;;  %5590 = vrsqrt.f32 %v3096_v36  ;;  %v2722_v26 = vsub.f32 %v2234_v9, %v8446_v20  ;;  %v3474_v33 = vmul.f32 %v3346_v7, %v3346_v7  ;;  %v3099_v5 = vadd.f32 1.0, %v2971_v34  ;;  %v12007_v36 = vld [vmem:[#allocation38_spill] sm:$0xff]  ;;  %v12008_v41 = vld [vmem:[#allocation32_spill] sm:$0xff]  ;;  %v5917_v34 = vld [vmem:[%s7234_s29 + $0x14] sm:$0xf] }
 0x2e8   : > { %v8801_v54 = vpop.eup %5582  ;;  %5592 = vrsqrt.f32 %v3098_v31  ;;  %2485 = vperm.xlu1 %5566, %v5915_v6   ;;  %v5387_v38 = vadd.f32 -0.002, %v4400_v23  ;;  %v3349_v53 = vmul.f32 %v8791_v57, %v8791_v57  ;;  %v3102_v30 = vadd.f32 1.0, %v2974_v48 }
 0x2e9   : > { %12006 = vst [vmem:[#allocation192_spill] sm:$0xff] %v8801_v54  ;;  %v2973_v49 = vadd.f32 %v2845_v29, %v12007_v36  ;;  %v2847_v43 = vmul.f32 %v2719_v1, %v2719_v1  ;;  %v8808_v9 = vmul.f32 %v3475_v52, %v3347_v51  ;;  %v2976_v22 = vadd.f32 %v2848_v4, %v12008_v41  ;;  %v2238_v57 = vpop.permute.xlu1 %2237  ;;  %v5918_v52 = vld [vmem:[%s6249_s25 + $0x298] sm:$0xff] }
 0x2ea   : > { %2497 = vperm.xlu0 %5567, %v5916_v60   ;;  %v2721_v31 = vsub.f32 %v2230_v55, %v8446_v20  ;;  %v8814_v6 = vrot.slane %v5917_v34, %v8345_v11  ;;  %v5388_v23 = vadd.f32 -0.002, %v4401_v0  ;;  %5594 = vrsqrt.f32 %v3100_v27  ;;  %v2250_v1 = vpop.permute.xlu0 %2249  ;;  %v8825_v0 = vpop.eup %5584  ;;  %v12011_v27 = vld [vmem:[#allocation122_spill] sm:$0xff] }
 0x2eb   : > { %v2850_v48 = vmul.f32 %v2722_v26, %v2722_v26  ;;  %v8816_v29 = vmul.f32 %v3474_v33, %v3346_v7  ;;  %v3351_v60 = vmul.f32 %v8801_v54, %v8801_v54  ;;  %5596 = vrsqrt.f32 %v3099_v5  ;;  %12010 = vst [vmem:[#allocation161_spill] sm:$0xff] %v8825_v0  ;;  %v5919_v55 = vld [vmem:[%s6249_s25 + $0x2b0] sm:$0xff] }
 0x2ec   : > { %v2724_v51 = vsub.f32 %v2242_v3, %v8446_v20  ;;  %2493 = vperm.xlu1 %5566, %v5918_v52   ;;  %v8823_v41 = vmul.f32 %v5387_v38, %v8773_v8  ;;  %v3477_v4 = vmul.f32 %v3349_v53, %v3349_v53  ;;  %5598 = vrsqrt.f32 %v3102_v30  ;;  %v12014_v38 = vld [vmem:[#allocation33_spill] sm:$0xff] }
 0x2ed   : > { %v3101_v26 = vadd.f32 1.0, %v2973_v49  ;;  %v2975_v7 = vadd.f32 %v2847_v43, %v12011_v27  ;;  %v4403_v33 = vmul.f32 0.001, %v8808_v9  ;;  %v3104_v3 = vadd.f32 1.0, %v2976_v22  ;;  %v2246_v49 = vpop.permute.xlu1 %2245 }
 0x2ee   : > { %12009 = vst [vmem:[#allocation160_spill] sm:$0xff] %v8823_v41  ;;  %2505 = vperm.xlu0 %5567, %v5919_v55   ;;  %v8830_v5 = vpop.eup %5586  ;;  %v2849_v36 = vmul.f32 %v2721_v31, %v2721_v31  ;;  %v2723_v34 = vsub.f32 %v2238_v57, %v8446_v20  ;;  %v8834_v8 = vmul.f32 %v5388_v23, %v8783_v2  ;;  %v4402_v43 = vmul.f32 0.001, %v8816_v29  ;;  %v2258_v31 = vpop.permute.xlu0 %2257  ;;  %v5920_v41 = vld [vmem:[%s6249_s25 + $0x2a8] sm:$0xff] }
 0x2ef   : > { %12012 = vst [vmem:[#allocation9_spill] sm:$0xff] %v8830_v5  ;;  %v2978_v52 = vadd.f32 %v2850_v48, %v12014_v38  ;;  %v2726_v30 = vsub.f32 %v2250_v1, %v8446_v20  ;;  %v3479_v27 = vmul.f32 %v3351_v60, %v3351_v60  ;;  %v2852_v54 = vmul.f32 %v2724_v51, %v2724_v51  ;;  %v5921_v1 = vld [vmem:[%s6249_s25 + $0x2c0] sm:$0xff] }
 0x2f0   : > { %12013 = vst [vmem:[#allocation196_spill] sm:$0xff] %v8834_v8  ;;  %v8839_v55 = vpop.eup %5588  ;;  %v2725_v22 = vsub.f32 %v2246_v49, %v8446_v20  ;;  %2501 = vperm.xlu1 %5566, %v5920_v41   ;;  %v8843_v57 = vmul.f32 %v3477_v4, %v3349_v53  ;;  %v3348_v2 = vmul.f32 %v8825_v0, %v8825_v0  ;;  %5600 = vrsqrt.f32 %v3101_v26  ;;  %v12018_v41 = vld [vmem:[#allocation36_spill] sm:$0xff] }
 0x2f1   : > { %12015 = vst [vmem:[#allocation10_spill] sm:$0xff] %v8839_v55  ;;  %v8847_v23 = vpop.eup %5590  ;;  %v3103_v48 = vadd.f32 1.0, %v2975_v7  ;;  %v5390_v38 = vadd.f32 -0.002, %v4403_v33  ;;  %v3353_v51 = vmul.f32 %v8830_v5, %v8830_v5  ;;  %5602 = vrsqrt.f32 %v3104_v3  ;;  %v2254_v26 = vpop.permute.xlu1 %2253  ;;  %v5922_v5 = vld [vmem:[%s6249_s25 + $0x2b8] sm:$0xff] }
 0x2f2   : > { %12016 = vst [vmem:[#allocation139_spill] sm:$0xff] %v8847_v23  ;;  %2513 = vperm.xlu0 %5567, %v5921_v1   ;;  %v8852_v49 = vpop.eup %5592  ;;  %v2977_v53 = vadd.f32 %v2849_v36, %v12018_v41  ;;  %v2851_v4 = vmul.f32 %v2723_v34, %v2723_v34  ;;  %v2728_v8 = vsub.f32 %v2258_v31, %v8446_v20  ;;  %v3106_v0 = vadd.f32 1.0, %v2978_v52  ;;  %v12019_v1 = vld [vmem:[#allocation37_spill] sm:$0xff]  ;;  %v2266_v46 = vpop.permute.xlu0 %2265  ;;  %v5923_v52 = vld [vmem:[%s6249_s25 + $0x2d0] sm:$0xff] }
 0x2f3   : > { %12017 = vst [vmem:[#allocation13_spill] sm:$0xff] %v8852_v49  ;;  %v2854_v16 = vmul.f32 %v2726_v30, %v2726_v30  ;;  %v5389_v7 = vadd.f32 -0.002, %v4402_v43  ;;  %v8856_v63 = vmul.f32 %v3479_v27, %v3351_v60  ;;  %v2980_v33 = vadd.f32 %v2852_v54, %v12019_v1  ;;  %v12023_v27 = vld [vmem:[#allocation40_spill] sm:$0xff] }
 0x2f4   : > { %v2853_v24 = vmul.f32 %v2725_v22, %v2725_v22  ;;  %2509 = vperm.xlu1 %5566, %v5922_v5   ;;  %v4405_v3 = vmul.f32 0.001, %v8843_v57  ;;  %v3476_v17 = vmul.f32 %v3348_v2, %v3348_v2  ;;  %v8861_v36 = vpop.eup %5594  ;;  %5604 = vrsqrt.f32 %v3103_v48  ;;  %v12025_v48 = vld [vmem:[#allocation41_spill] sm:$0xff] }
 0x2f5   : > { %12020 = vst [vmem:[#allocation178_spill] sm:$0xff] %v8861_v36  ;;  %v2727_v34 = vsub.f32 %v2254_v26, %v8446_v20  ;;  %v8866_v30 = vmul.f32 %v5390_v38, %v8808_v9  ;;  %v3481_v60 = vmul.f32 %v3353_v51, %v3353_v51  ;;  %v8868_v54 = vpop.eup %5596  ;;  %v3105_v43 = vadd.f32 1.0, %v2977_v53  ;;  %v2262_v1 = vpop.permute.xlu1 %2261 }
 0x2f6   : > { %2521 = vperm.xlu0 %5567, %v5923_v52   ;;  %12022 = vst [vmem:[#allocation177_spill] sm:$0xff] %v8868_v54  ;;  %v2979_v5 = vadd.f32 %v2851_v4, %v12023_v27  ;;  %v2856_v22 = vmul.f32 %v2728_v8, %v2728_v8  ;;  %v2730_v31 = vsub.f32 %v2266_v46, %v8446_v20  ;;  %v8872_v41 = vpop.eup %5598  ;;  %5606 = vrsqrt.f32 %v3106_v0  ;;  %v2274_v37 = vpop.permute.xlu0 %2273  ;;  %v5924_v4 = vld [vmem:[%s6249_s25 + $0x2c8] sm:$0xff] }
 0x2f7   : > { %12021 = vst [vmem:[#allocation15_spill] sm:$0xff] %v8866_v30  ;;  %12024 = vst [vmem:[#allocation34_spill] sm:$0xff] %v8872_v41  ;;  %v2982_v26 = vadd.f32 %v2854_v16, %v12025_v48  ;;  %v8876_v9 = vmul.f32 %v5389_v7, %v8816_v29  ;;  %v4407_v38 = vmul.f32 0.001, %v8856_v63  ;;  %v3108_v52 = vadd.f32 1.0, %v2980_v33  ;;  %v12027_v30 = vld [vmem:[#allocation44_spill] sm:$0xff] }
 0x2f8   : > { %v2981_v53 = vadd.f32 %v2853_v24, %v12027_v30  ;;  %2517 = vperm.xlu1 %5566, %v5924_v4   ;;  %v5392_v8 = vadd.f32 -0.002, %v4405_v3  ;;  %v8881_v46 = vmul.f32 %v3476_v17, %v3348_v2  ;;  %v2855_v27 = vmul.f32 %v2727_v34, %v2727_v34  ;;  %v12028_v24 = vld [vmem:[#allocation29_spill] sm:$0xff]  ;;  %v5927_v4 = vld [vmem:[%s6249_s25 + $0x2f0] sm:$0xff] }
 0x2f9   : > { %12026 = vst [vmem:[#allocation141_spill] sm:$0xff] %v8876_v9  ;;  %v2729_v0 = vsub.f32 %v2262_v1, %v8446_v20  ;;  %v8885_v16 = vmul.f32 %v3481_v60, %v3353_v51  ;;  %v3350_v29 = vmul.f32 %v8839_v55, %v8839_v55  ;;  %5608 = vrsqrt.f32 %v3105_v43  ;;  %v2270_v3 = vpop.permute.xlu1 %2269 }
 0x2fa   : > { %2529 = vperm.xlu0 %5567, %v5925_v62   ;;  %v3107_v7 = vadd.f32 1.0, %v2979_v5  ;;  %v2984_v33 = vadd.f32 %v2856_v22, %v12028_v24  ;;  %v2858_v30 = vmul.f32 %v2730_v31, %v2730_v31  ;;  %v8890_v48 = vpop.eup %5600  ;;  %v3110_v17 = vadd.f32 1.0, %v2982_v26  ;;  %v2282_v43 = vpop.permute.xlu0 %2281  ;;  %v5926_v5 = vld [vmem:[%s6249_s25 + $0x2d8] sm:$0xff] }
 0x2fb   : > { %12029 = vst [vmem:[#allocation118_spill] sm:$0xff] %v8890_v48  ;;  %v2732_v2 = vsub.f32 %v2274_v37, %v8446_v20  ;;  %v5394_v34 = vadd.f32 -0.002, %v4407_v38  ;;  %v3355_v62 = vmul.f32 %v8868_v54, %v8868_v54  ;;  %v8895_v51 = vpop.eup %5602  ;;  %5610 = vrsqrt.f32 %v3108_v52  ;;  %v12032_v26 = vld [vmem:[#allocation43_spill] sm:$0xff] }
 0x2fc   : > { %12030 = vst [vmem:[#allocation140_spill] sm:$0xff] %v8895_v51  ;;  %v3109_v60 = vadd.f32 1.0, %v2981_v53  ;;  %2525 = vperm.xlu1 %5566, %v5926_v5   ;;  %v8899_v22 = vmul.f32 %v5392_v8, %v8843_v57  ;;  %v4404_v31 = vmul.f32 0.001, %v8881_v46  ;;  %v2983_v1 = vadd.f32 %v2855_v27, %v12032_v26  ;;  %v12033_v53 = vld [vmem:[#allocation46_spill] sm:$0xff] }
 0x2fd   : > { %v2857_v37 = vmul.f32 %v2729_v0, %v2729_v0  ;;  %v4409_v38 = vmul.f32 0.001, %v8885_v16  ;;  %v3478_v24 = vmul.f32 %v3350_v29, %v3350_v29  ;;  %5612 = vrsqrt.f32 %v3107_v7  ;;  %v2278_v8 = vpop.permute.xlu1 %2277  ;;  %v5928_v7 = vld [vmem:[%s6249_s25 + $0x2e8] sm:$0xff] }
 0x2fe   : > { %12031 = vst [vmem:[#allocation143_spill] sm:$0xff] %v8899_v22  ;;  %2537 = vperm.xlu0 %5567, %v5927_v4   ;;  %v3112_v52 = vadd.f32 1.0, %v2984_v33  ;;  %v2986_v54 = vadd.f32 %v2858_v30, %v12033_v53  ;;  %v2731_v5 = vsub.f32 %v2270_v3, %v8446_v20  ;;  %v8907_v55 = vpop.eup %5604  ;;  %5614 = vrsqrt.f32 %v3110_v17  ;;  %v2290_v4 = vpop.permute.xlu0 %2289  ;;  %v12037_v17 = vld [vmem:[#allocation47_spill] sm:$0xff]  ;;  %v5929_v22 = vld [vmem:[%s6249_s25 + $0x300] sm:$0xff] }
 0x2ff   : > { %12034 = vst [vmem:[#allocation21_spill] sm:$0xff] %v8907_v55  ;;  %v2860_v57 = vmul.f32 %v2732_v2, %v2732_v2  ;;  %v8910_v27 = vmul.f32 %v5394_v34, %v8856_v63  ;;  %v3483_v0 = vmul.f32 %v3355_v62, %v3355_v62  ;;  %5616 = vrsqrt.f32 %v3109_v60 }
 0x300   : > { %v2734_v26 = vsub.f32 %v2282_v43, %v8446_v20  ;;  %2533 = vperm.xlu1 %5566, %v5928_v7   ;;  %v5391_v33 = vadd.f32 -0.002, %v4404_v31  ;;  %v3352_v30 = vmul.f32 %v8847_v23, %v8847_v23  ;;  %v8916_v3 = vpop.eup %5606  ;;  %v3111_v53 = vadd.f32 1.0, %v2983_v1  ;;  %v12038_v31 = vld [vmem:[#allocation50_spill] sm:$0xff] }
 0x301   : > { %12035 = vst [vmem:[#allocation142_spill] sm:$0xff] %v8910_v27  ;;  %12036 = vst [vmem:[#allocation180_spill] sm:$0xff] %v8916_v3  ;;  %v2985_v2 = vadd.f32 %v2857_v37, %v12037_v17  ;;  %v5396_v63 = vadd.f32 -0.002, %v4409_v38  ;;  %v8920_v34 = vmul.f32 %v3478_v24, %v3350_v29  ;;  %5618 = vrsqrt.f32 %v3112_v52  ;;  %v2286_v9 = vpop.permute.xlu1 %2285  ;;  %v5930_v24 = vld [vmem:[%s6249_s25 + $0x2f8] sm:$0xff] }
 0x302   : > { %2545 = vperm.xlu0 %5567, %v5929_v22   ;;  %v3114_v60 = vadd.f32 1.0, %v2986_v54  ;;  %v2859_v43 = vmul.f32 %v2731_v5, %v2731_v5  ;;  %v2733_v7 = vsub.f32 %v2278_v8, %v8446_v20  ;;  %v2988_v27 = vadd.f32 %v2860_v57, %v12038_v31  ;;  %v2298_v54 = vpop.permute.xlu0 %2297  ;;  %v5931_v8 = vld [vmem:[%s6249_s25 + $0x310] sm:$0xff] }
 0x303   : > { %v2736_v23 = vsub.f32 %v2290_v4, %v8556_v42  ;;  %v8925_v1 = vmul.f32 %v3483_v0, %v3355_v62  ;;  %v3357_v22 = vmul.f32 %v8890_v48, %v8890_v48  ;;  %v8929_v37 = vpop.eup %5608  ;;  %v2862_v29 = vmul.f32 %v2734_v26, %v2734_v26  ;;  %v12045_v31 = vld [vmem:[#allocation63_spill] sm:$0xff] }
 0x304   : > { %12039 = vst [vmem:[#allocation28_spill] sm:$0xff] %v8929_v37  ;;  %v2735_v38 = vsub.f32 %v2286_v9, %v8446_v20  ;;  %2541 = vperm.xlu1 %5566, %v5930_v24   ;;  %v8934_v52 = vmul.f32 %v5391_v33, %v8881_v46  ;;  %v3480_v5 = vmul.f32 %v3352_v30, %v3352_v30  ;;  %5620 = vrsqrt.f32 %v3111_v53  ;;  %v12043_v20 = vld [vmem:[#allocation51_spill] sm:$0xff] }
 0x305   : > { %v3113_v57 = vadd.f32 1.0, %v2985_v2  ;;  %v8938_v62 = vmul.f32 %v5396_v63, %v8885_v16  ;;  %v4406_v0 = vmul.f32 0.001, %v8920_v34  ;;  %v8941_v26 = vpop.eup %5610  ;;  %5622 = vrsqrt.f32 %v3114_v60  ;;  %v2294_v17 = vpop.permute.xlu1 %2293  ;;  %v5932_v60 = vld [vmem:[%s6249_s25 + $0x308] sm:$0xff] }
 0x306   : > { %12040 = vst [vmem:[#allocation179_spill] sm:$0xff] %v8934_v52  ;;  %2553 = vperm.xlu0 %5567, %v5931_v8   ;;  %12042 = vst [vmem:[#allocation181_spill] sm:$0xff] %v8941_v26  ;;  %v2987_v9 = vadd.f32 %v2859_v43, %v12043_v20  ;;  %v2861_v4 = vmul.f32 %v2733_v7, %v2733_v7  ;;  %v2738_v46 = vsub.f32 %v2298_v54, %v8556_v42  ;;  %v2306_v48 = vpop.permute.xlu0 %2305  ;;  %v5933_v54 = vld [vmem:[%s6249_s25 + $0x320] sm:$0xff]  ;;  %v5934_v20 = vld [vmem:[%s7234_s29 + $0x18] sm:$0xf] }
 0x307   : > { %12041 = vst [vmem:[#allocation182_spill] sm:$0xff] %v8938_v62  ;;  %v3116_v33 = vadd.f32 1.0, %v2988_v27  ;;  %v2864_v53 = vmul.f32 %v2736_v23, %v2736_v23  ;;  %v4411_v2 = vmul.f32 0.001, %v8925_v1  ;;  %v3485_v16 = vmul.f32 %v3357_v22, %v3357_v22  ;;  %v8946_v63 = vpop.eup %5612 }
 0x308   : > { %12044 = vst [vmem:[#allocation184_spill] sm:$0xff] %v8946_v63  ;;  %v2990_v24 = vadd.f32 %v2862_v29, %v12045_v31  ;;  %v2863_v8 = vmul.f32 %v2735_v38, %v2735_v38  ;;  %2549 = vperm.xlu1 %5566, %v5932_v60   ;;  %v8950_v43 = vmul.f32 %v3480_v5, %v3352_v30  ;;  %v8954_v7 = vpop.eup %5614  ;;  %5624 = vrsqrt.f32 %v3113_v57  ;;  %v12049_v5 = vld [vmem:[#allocation54_spill] sm:$0xff]  ;;  %v12050_v57 = vld [vmem:[#allocation67_spill] sm:$0xff] }
 0x309   : > { %v3354_v27 = vmul.f32 %v8852_v49, %v8852_v49  ;;  %12046 = vst [vmem:[#allocation183_spill] sm:$0xff] %v8954_v7  ;;  %v2737_v23 = vsub.f32 %v2294_v17, %v8556_v42  ;;  %v8960_v62 = vrot.slane %v5934_v20, %v8345_v11  ;;  %v5393_v29 = vadd.f32 -0.002, %v4406_v0  ;;  %v8962_v38 = vpop.eup %5616 }
 0x30a   : > { %2561 = vperm.xlu0 %5567, %v5933_v54   ;;  %12048 = vst [vmem:[#allocation185_spill] sm:$0xff] %v8962_v38  ;;  %v3115_v30 = vadd.f32 1.0, %v2987_v9  ;;  %v2989_v31 = vadd.f32 %v2861_v4, %v12049_v5  ;;  %v2866_v60 = vmul.f32 %v2738_v46, %v2738_v46  ;;  %v3359_v49 = vmul.f32 %v8907_v55, %v8907_v55  ;;  %v2302_v54 = vpop.permute.xlu1 %2301  ;;  %v2314_v40 = vpop.permute.xlu0 %2313  ;;  %v5935_v4 = vld [vmem:[%s6249_s25 + $0x318] sm:$0xff] }
 0x30b   : > { %12047 = vst [vmem:[#allocation186_spill] sm:$0xff] %v8960_v62  ;;  %v2992_v52 = vadd.f32 %v2864_v53, %v12050_v57  ;;  %v2740_v17 = vsub.f32 %v2306_v48, %v8556_v42  ;;  %v5398_v32 = vadd.f32 -0.002, %v4411_v2  ;;  %v8969_v20 = vmul.f32 %v3485_v16, %v3357_v22  ;;  %v8971_v12 = vpop.eup %5618  ;;  %v5936_v48 = vld [vmem:[%s6249_s25 + $0x330] sm:$0xff]  ;;  %v12054_v16 = vld [vmem:[#allocation45_spill] sm:$0xff] }
 0x30c   : > { %12051 = vst [vmem:[#allocation42_spill] sm:$0xff] %v8971_v12  ;;  %v3118_v0 = vadd.f32 1.0, %v2990_v24  ;;  %v2991_v9 = vadd.f32 %v2863_v8, %v12052_v25  ;;  %2557 = vperm.xlu1 %5566, %v5935_v4   ;;  %v4408_v46 = vmul.f32 0.001, %v8950_v43  ;;  %v3482_v5 = vmul.f32 %v3354_v27, %v3354_v27 }
 0x30d   : > { %5626 = vrsqrt.f32 %v3116_v33  ;;  %v2865_v53 = vmul.f32 %v2737_v23, %v2737_v23  ;;  %v2739_v57 = vsub.f32 %v2302_v54, %v8556_v42  ;;  %v8979_v22 = vmul.f32 %v5393_v29, %v8920_v34 }
 0x30e   : > { %2569 = vperm.xlu0 %5567, %v5936_v48   ;;  %5628 = vrsqrt.f32 %v3115_v30  ;;  %v3117_v2 = vadd.f32 1.0, %v2989_v31  ;;  %v2994_v25 = vadd.f32 %v2866_v60, %v12054_v16  ;;  %v3487_v24 = vmul.f32 %v3359_v49, %v3359_v49  ;;  %v8982_v8 = vpop.eup %5620  ;;  %v2310_v33 = vpop.permute.xlu1 %2309  ;;  %v5937_v30 = vld [vmem:[%s6249_s25 + $0x328] sm:$0xff]  ;;  %v12058_v16 = vld [vmem:[#allocation48_spill] sm:$0xff] }
 0x30f   : > { %12053 = vst [vmem:[#allocation188_spill] sm:$0xff] %v8979_v22  ;;  %12055 = vst [vmem:[#allocation55_spill] sm:$0xff] %v8982_v8  ;;  %v3120_v4 = vadd.f32 1.0, %v2992_v52  ;;  %v2868_v55 = vmul.f32 %v2740_v17, %v2740_v17  ;;  %v8985_v23 = vmul.f32 %v5398_v32, %v8925_v1  ;;  %v4413_v54 = vmul.f32 0.001, %v8969_v20  ;;  %v8988_v48 = vpop.eup %5622  ;;  %v2322_v29 = vpop.permute.xlu0 %2321 }
 0x310   : > { %12057 = vst [vmem:[#allocation58_spill] sm:$0xff] %v8988_v48  ;;  %5630 = vrsqrt.f32 %v3118_v0  ;;  %v3119_v34 = vadd.f32 1.0, %v2991_v9  ;;  %2565 = vperm.xlu1 %5566, %v5937_v30   ;;  %v5395_v31 = vadd.f32 -0.002, %v4408_v46  ;;  %v8991_v60 = vmul.f32 %v3482_v5, %v3354_v27  ;;  %v12060_v27 = vld [vmem:[#allocation52_spill] sm:$0xff] }
 0x311   : > { %12056 = vst [vmem:[#allocation59_spill] sm:$0xff] %v8985_v23  ;;  %v2993_v52 = vadd.f32 %v2865_v53, %v12058_v16  ;;  %v2867_v22 = vmul.f32 %v2739_v57, %v2739_v57  ;;  %v2742_v17 = vsub.f32 %v2314_v40, %v8556_v42  ;;  %v3356_v32 = vmul.f32 %v8861_v36, %v8861_v36  ;;  %v5940_v16 = vld [vmem:[%s6249_s25 + $0x350] sm:$0xff] }
 0x312   : > { %2577 = vperm.xlu0 %5567, %v5938_v10   ;;  %5632 = vrsqrt.f32 %v3117_v2  ;;  %v3122_v1 = vadd.f32 1.0, %v2994_v25  ;;  %v2741_v0 = vsub.f32 %v2310_v33, %v8556_v42  ;;  %v8999_v9 = vmul.f32 %v3487_v24, %v3359_v49  ;;  %v9001_v46 = vpop.eup %5624  ;;  %v2318_v53 = vpop.permute.xlu1 %2317  ;;  %v5939_v25 = vld [vmem:[%s6249_s25 + $0x338] sm:$0xff] }
 0x313   : > { %12059 = vst [vmem:[#allocation187_spill] sm:$0xff] %v9001_v46  ;;  %5634 = vrsqrt.f32 %v3120_v4  ;;  %v2996_v5 = vadd.f32 %v2868_v55, %v12060_v27  ;;  %v5400_v40 = vadd.f32 -0.002, %v4413_v54  ;;  %v3361_v10 = vmul.f32 %v8929_v37, %v8929_v37  ;;  %v2330_v2 = vpop.permute.xlu0 %2329  ;;  %v12062_v4 = vld [vmem:[#allocation66_spill] sm:$0xff] }
 0x314   : > { %5636 = vrsqrt.f32 %v3119_v34  ;;  %v2744_v57 = vsub.f32 %v2322_v29, %v8556_v42  ;;  %2573 = vperm.xlu1 %5566, %v5939_v25   ;;  %v9009_v49 = vmul.f32 %v5395_v31, %v8950_v43  ;;  %v4410_v24 = vmul.f32 0.001, %v8991_v60 }
 0x315   : > { %v3121_v33 = vadd.f32 1.0, %v2993_v52  ;;  %v2995_v30 = vadd.f32 %v2867_v22, %v12062_v4  ;;  %v2870_v55 = vmul.f32 %v2742_v17, %v2742_v17  ;;  %v3484_v54 = vmul.f32 %v3356_v32, %v3356_v32 }
 0x316   : > { %12061 = vst [vmem:[#allocation191_spill] sm:$0xff] %v9009_v49  ;;  %2585 = vperm.xlu0 %5567, %v5940_v16   ;;  %5638 = vrsqrt.f32 %v3122_v1  ;;  %v2869_v34 = vmul.f32 %v2741_v0, %v2741_v0  ;;  %v2743_v29 = vsub.f32 %v2318_v53, %v8556_v42  ;;  %v4415_v27 = vmul.f32 0.001, %v8999_v9  ;;  %v2326_v52 = vpop.permute.xlu1 %2325  ;;  %v5941_v53 = vld [vmem:[%s6249_s25 + $0x348] sm:$0xff]  ;;  %v5942_v49 = vld [vmem:[%s6249_s25 + $0x360] sm:$0xff] }
 0x317   : > { %v9016_v25 = vpop.eup %5626  ;;  %v3124_v43 = vadd.f32 1.0, %v2996_v5  ;;  %v2746_v31 = vsub.f32 %v2330_v2, %v8556_v42  ;;  %v9020_v22 = vmul.f32 %v5400_v40, %v8969_v20  ;;  %v3489_v17 = vmul.f32 %v3361_v10, %v3361_v10  ;;  %v2338_v0 = vpop.permute.xlu0 %2337  ;;  %v12066_v2 = vld [vmem:[#allocation70_spill] sm:$0xff] }
 0x318   : > { %12063 = vst [vmem:[#allocation72_spill] sm:$0xff] %v9016_v25  ;;  %v9022_v4 = vpop.eup %5628  ;;  %v2872_v16 = vmul.f32 %v2744_v57, %v2744_v57  ;;  %v2745_v1 = vsub.f32 %v2326_v52, %v8556_v42  ;;  %2581 = vperm.xlu1 %5566, %v5941_v53   ;;  %v5397_v37 = vadd.f32 -0.002, %v4410_v24  ;;  %v3358_v5 = vmul.f32 %v8872_v41, %v8872_v41  ;;  %v12068_v57 = vld [vmem:[#allocation71_spill] sm:$0xff] }
 0x319   : > { %12064 = vst [vmem:[#allocation189_spill] sm:$0xff] %v9020_v22  ;;  %12065 = vst [vmem:[#allocation69_spill] sm:$0xff] %v9022_v4  ;;  %5640 = vrsqrt.f32 %v3121_v33  ;;  %v3123_v36 = vadd.f32 1.0, %v2995_v30  ;;  %v2998_v23 = vadd.f32 %v2870_v55, %v12066_v2  ;;  %v9030_v20 = vmul.f32 %v3484_v54, %v3356_v32  ;;  %v12070_v32 = vld [vmem:[#allocation131_spill] sm:$0xff] }
 0x31a   : > { %2593 = vperm.xlu0 %5567, %v5942_v49   ;;  %v9032_v40 = vpop.eup %5630  ;;  %v2997_v52 = vadd.f32 %v2869_v34, %v12068_v57  ;;  %v2871_v22 = vmul.f32 %v2743_v29, %v2743_v29  ;;  %v5402_v21 = vadd.f32 -0.002, %v4415_v27  ;;  %v3363_v24 = vmul.f32 %v8946_v63, %v8946_v63  ;;  %v2334_v30 = vpop.permute.xlu1 %2333  ;;  %v5943_v34 = vld [vmem:[%s6249_s25 + $0x358] sm:$0xff]  ;;  %v12074_v57 = vld [vmem:[#allocation126_spill] sm:$0xff] }
 0x31b   : > { %12067 = vst [vmem:[#allocation146_spill] sm:$0xff] %v9032_v40  ;;  %5642 = vrsqrt.f32 %v3124_v43  ;;  %v2874_v53 = vmul.f32 %v2746_v31, %v2746_v31  ;;  %v2748_v33 = vsub.f32 %v2338_v0, %v8556_v42  ;;  %v9038_v55 = vmul.f32 %v3489_v17, %v3361_v10  ;;  %v2346_v41 = vpop.permute.xlu0 %2345  ;;  %v5944_v10 = vld [vmem:[%s6249_s25 + $0x370] sm:$0xff] }
 0x31c   : > { %v9040_v49 = vpop.eup %5632  ;;  %v3000_v54 = vadd.f32 %v2872_v16, %v12070_v32  ;;  %v2873_v2 = vmul.f32 %v2745_v1, %v2745_v1  ;;  %2589 = vperm.xlu1 %5566, %v5943_v34   ;;  %v9045_v29 = vmul.f32 %v5397_v37, %v8991_v60  ;;  %v3486_v27 = vmul.f32 %v3358_v5, %v3358_v5  ;;  %v12076_v34 = vld [vmem:[#allocation57_spill] sm:$0xff] }
 0x31d   : > { %12069 = vst [vmem:[#allocation16_spill] sm:$0xff] %v9040_v49  ;;  %v9047_v43 = vpop.eup %5634  ;;  %5644 = vrsqrt.f32 %v3123_v36  ;;  %v3126_v31 = vadd.f32 1.0, %v2998_v23  ;;  %v2747_v0 = vsub.f32 %v2334_v30, %v8556_v42  ;;  %v4412_v17 = vmul.f32 0.001, %v9030_v20 }
 0x31e   : > { %12071 = vst [vmem:[#allocation148_spill] sm:$0xff] %v9045_v29  ;;  %12072 = vst [vmem:[#allocation147_spill] sm:$0xff] %v9047_v43  ;;  %2601 = vperm.xlu0 %5567, %v5944_v10   ;;  %v9052_v16 = vpop.eup %5636  ;;  %v3125_v1 = vadd.f32 1.0, %v2997_v52  ;;  %v2999_v32 = vadd.f32 %v2871_v22, %v12074_v57  ;;  %v9056_v37 = vmul.f32 %v5402_v21, %v8999_v9  ;;  %v2342_v30 = vpop.permute.xlu1 %2341  ;;  %v4417_v10 = vmul.f32 0.001, %v9038_v55  ;;  %v5945_v22 = vld [vmem:[%s6249_s25 + $0x368] sm:$0xff] }
 0x31f   : > { %12073 = vst [vmem:[#allocation150_spill] sm:$0xff] %v9052_v16  ;;  %v3491_v60 = vmul.f32 %v3363_v24, %v3363_v24  ;;  %v3002_v63 = vadd.f32 %v2874_v53, %v12076_v34  ;;  %v2876_v36 = vmul.f32 %v2748_v33, %v2748_v33  ;;  %v2750_v23 = vsub.f32 %v2346_v41, %v8556_v42  ;;  %v2354_v59 = vpop.permute.xlu0 %2353  ;;  %v5946_v33 = vld [vmem:[%s6249_s25 + $0x380] sm:$0xff] }
 0x320   : > { %12075 = vst [vmem:[#allocation149_spill] sm:$0xff] %v9056_v37  ;;  %v9061_v29 = vpop.eup %5638  ;;  %v3128_v62 = vadd.f32 1.0, %v3000_v54  ;;  %v3001_v52 = vadd.f32 %v2873_v2, %v12078_v39  ;;  %2597 = vperm.xlu1 %5566, %v5945_v22   ;;  %v9065_v21 = vmul.f32 %v3486_v27, %v3358_v5  ;;  %v3360_v9 = vmul.f32 %v8895_v51, %v8895_v51  ;;  %v12080_v27 = vld [vmem:[#allocation130_spill] sm:$0xff] }
 0x321   : > { %12077 = vst [vmem:[#allocation152_spill] sm:$0xff] %v9061_v29  ;;  %5646 = vrsqrt.f32 %v3126_v31  ;;  %v2875_v53 = vmul.f32 %v2747_v0, %v2747_v0  ;;  %v2749_v41 = vsub.f32 %v2342_v30, %v8556_v42  ;;  %v5399_v57 = vadd.f32 -0.002, %v4412_v17 }
 0x322   : > { %2609 = vperm.xlu0 %5567, %v5946_v33   ;;  %5648 = vrsqrt.f32 %v3125_v1  ;;  %v3127_v54 = vadd.f32 1.0, %v2999_v32  ;;  %v2752_v39 = vsub.f32 %v2354_v59, %v8642_v44  ;;  %v9072_v2 = vmul.f32 %v3491_v60, %v3363_v24  ;;  %v2350_v0 = vpop.permute.xlu1 %2349  ;;  %v5947_v33 = vld [vmem:[%s6249_s25 + $0x378] sm:$0xff] }
 0x323   : > { %v9074_v34 = vpop.eup %5640  ;;  %v3130_v5 = vadd.f32 1.0, %v3002_v63  ;;  %v3004_v22 = vadd.f32 %v2876_v36, %v12080_v27  ;;  %v2878_v31 = vmul.f32 %v2750_v23, %v2750_v23  ;;  %v5404_v51 = vadd.f32 -0.002, %v4417_v10  ;;  %v2362_v37 = vpop.permute.xlu0 %2361  ;;  %v12082_v24 = vld [vmem:[#allocation64_spill] sm:$0xff] }
 0x324   : > { %12079 = vst [vmem:[#allocation151_spill] sm:$0xff] %v9074_v34  ;;  %5650 = vrsqrt.f32 %v3128_v62  ;;  %v3129_v30 = vadd.f32 1.0, %v3001_v52  ;;  %2605 = vperm.xlu1 %5566, %v5947_v33   ;;  %v4414_v17 = vmul.f32 0.001, %v9065_v21  ;;  %v3488_v1 = vmul.f32 %v3360_v9, %v3360_v9 }
 0x325   : > { %v9079_v59 = vpop.eup %5642  ;;  %v3003_v32 = vadd.f32 %v2875_v53, %v12082_v24  ;;  %v2877_v60 = vmul.f32 %v2749_v41, %v2749_v41  ;;  %v9084_v63 = vmul.f32 %v5399_v57, %v9030_v20  ;;  %v3365_v62 = vmul.f32 %v8962_v38, %v8962_v38  ;;  %v12085_v41 = vld [vmem:[#allocation75_spill] sm:$0xff]  ;;  %v12087_v24 = vld [vmem:[#allocation68_spill] sm:$0xff] }
 0x326   : > { %12081 = vst [vmem:[#allocation154_spill] sm:$0xff] %v9079_v59  ;;  %2617 = vperm.xlu0 %5567, %v5948_v56   ;;  %5652 = vrsqrt.f32 %v3127_v54  ;;  %v2880_v36 = vmul.f32 %v2752_v39, %v2752_v39  ;;  %v2751_v23 = vsub.f32 %v2350_v0, %v8556_v42  ;;  %v4419_v10 = vmul.f32 0.001, %v9072_v2  ;;  %v2358_v27 = vpop.permute.xlu1 %2357  ;;  %v5949_v39 = vld [vmem:[%s6249_s25 + $0x388] sm:$0xff] }
 0x327   : > { %12083 = vst [vmem:[#allocation153_spill] sm:$0xff] %v9084_v63  ;;  %v9090_v52 = vpop.eup %5644  ;;  %5654 = vrsqrt.f32 %v3130_v5  ;;  %v3132_v53 = vadd.f32 1.0, %v3004_v22  ;;  %v3006_v56 = vadd.f32 %v2878_v31, %v12085_v41  ;;  %v9094_v20 = vmul.f32 %v5404_v51, %v9038_v55  ;;  %v2370_v54 = vpop.permute.xlu0 %2369  ;;  %v5950_v22 = vld [vmem:[%s6249_s25 + $0x3a0] sm:$0xff] }
 0x328   : > { %12084 = vst [vmem:[#allocation157_spill] sm:$0xff] %v9090_v52  ;;  %5656 = vrsqrt.f32 %v3129_v30  ;;  %v2754_v57 = vsub.f32 %v2362_v37, %v8642_v44  ;;  %2613 = vperm.xlu1 %5566, %v5949_v39   ;;  %v5401_v42 = vadd.f32 -0.002, %v4414_v17  ;;  %v9098_v0 = vmul.f32 %v3488_v1, %v3360_v9 }
 0x329   : > { %12086 = vst [vmem:[#allocation65_spill] sm:$0xff] %v9094_v20  ;;  %v3131_v33 = vadd.f32 1.0, %v3003_v32  ;;  %v3005_v5 = vadd.f32 %v2877_v60, %v12087_v24  ;;  %v3493_v31 = vmul.f32 %v3365_v62, %v3365_v62  ;;  %v3362_v51 = vmul.f32 %v8916_v3, %v8916_v3  ;;  %v5951_v60 = vld [vmem:[%s7234_s29 + $0x1c] sm:$0xf] }
 0x32a   : > { %2625 = vperm.xlu0 %5567, %v5950_v22   ;;  %v3008_v55 = vadd.f32 %v2880_v36, %v8277_v19  ;;  %v2879_v37 = vmul.f32 %v2751_v23, %v2751_v23  ;;  %v2753_v30 = vsub.f32 %v2358_v27, %v8642_v44  ;;  %v5406_v41 = vadd.f32 -0.002, %v4419_v10  ;;  %v2366_v32 = vpop.permute.xlu1 %2365  ;;  %v5952_v36 = vld [vmem:[%s6249_s25 + $0x398] sm:$0xff]  ;;  %v5953_v27 = vld [vmem:[%s6249_s25 + $0x3b0] sm:$0xff] }
 0x32b   : > { %v9106_v17 = vpop.eup %5646  ;;  %5658 = vrsqrt.f32 %v3132_v53  ;;  %v3134_v9 = vadd.f32 1.0, %v3006_v56  ;;  %v2756_v1 = vsub.f32 %v2370_v54, %v8642_v44  ;;  %v9111_v39 = vrot.slane %v5951_v60, %v8345_v11  ;;  %v2378_v19 = vpop.permute.xlu0 %2377  ;;  %v5956_v20 = vld [vmem:[%s6249_s25 + $0x3b8] sm:$0xff] }
 0x32c   : > { %12088 = vst [vmem:[#allocation156_spill] sm:$0xff] %v9106_v17  ;;  %v9113_v24 = vpop.eup %5648  ;;  %v2882_v22 = vmul.f32 %v2754_v57, %v2754_v57  ;;  %2621 = vperm.xlu1 %5566, %v5952_v36   ;;  %v9117_v23 = vmul.f32 %v5401_v42, %v9065_v21  ;;  %v4416_v10 = vmul.f32 0.001, %v9098_v0  ;;  %v3367_v53 = vmul.f32 %v8982_v8, %v8982_v8  ;;  %v12092_v36 = vld [vmem:[#allocation74_spill] sm:$0xff] }
 0x32d   : > { %12089 = vst [vmem:[#allocation159_spill] sm:$0xff] %v9113_v24  ;;  %5660 = vrsqrt.f32 %v3131_v33  ;;  %v3133_v56 = vadd.f32 1.0, %v3005_v5  ;;  %v9123_v11 = vmul.f32 %v3493_v31, %v3365_v62  ;;  %v3490_v54 = vmul.f32 %v3362_v51, %v3362_v51 }
 0x32e   : > { %12090 = vst [vmem:[#allocation158_spill] sm:$0xff] %v9117_v23  ;;  %2633 = vperm.xlu0 %5567, %v5953_v27   ;;  %v9125_v57 = vpop.eup %5650  ;;  %v3136_v60 = vadd.f32 1.0, %v3008_v55  ;;  %v3007_v38 = vadd.f32 %v2879_v37, %v12092_v36  ;;  %v2881_v21 = vmul.f32 %v2753_v30, %v2753_v30  ;;  %v9129_v42 = vmul.f32 %v5406_v41, %v9072_v2  ;;  %v2374_v5 = vpop.permute.xlu1 %2373  ;;  %v5954_v30 = vld [vmem:[%s6249_s25 + $0x3a8] sm:$0xff] }
 0x32f   : > { %12091 = vst [vmem:[#allocation19_spill] sm:$0xff] %v9125_v57  ;;  %5662 = vrsqrt.f32 %v3134_v9  ;;  %v2884_v8 = vmul.f32 %v2756_v1, %v2756_v1  ;;  %v2755_v33 = vsub.f32 %v2366_v32, %v8642_v44  ;;  %v3364_v62 = vmul.f32 %v8941_v26, %v8941_v26  ;;  %v2386_v37 = vpop.permute.xlu0 %2385  ;;  %v5955_v32 = vld [vmem:[%s6249_s25 + $0x3c0] sm:$0xff] }
 0x330   : > { %12093 = vst [vmem:[#allocation194_spill] sm:$0xff] %v9129_v42  ;;  %v9134_v31 = vpop.eup %5652  ;;  %v3010_v27 = vadd.f32 %v2882_v22, %v8286_v18  ;;  %v2758_v55 = vsub.f32 %v2378_v19, %v8642_v44  ;;  %2629 = vperm.xlu1 %5566, %v5954_v30   ;;  %v5403_v2 = vadd.f32 -0.002, %v4416_v10  ;;  %v3495_v41 = vmul.f32 %v3367_v53, %v3367_v53 }
 0x331   : > { %12094 = vst [vmem:[#allocation14_spill] sm:$0xff] %v9134_v31  ;;  %v9139_v9 = vpop.eup %5654  ;;  %5664 = vrsqrt.f32 %v3133_v56  ;;  %v2757_v1 = vsub.f32 %v2374_v5, %v8642_v44  ;;  %v4421_v36 = vmul.f32 0.001, %v9123_v11  ;;  %v9144_v26 = vmul.f32 %v3490_v54, %v3362_v51 }
 0x332   : > { %12095 = vst [vmem:[#allocation193_spill] sm:$0xff] %v9139_v9  ;;  %2641 = vperm.xlu0 %5567, %v5955_v32   ;;  %v9146_v18 = vpop.eup %5656  ;;  %5666 = vrsqrt.f32 %v3136_v60  ;;  %v3135_v22 = vadd.f32 1.0, %v3007_v38  ;;  %v3009_v19 = vadd.f32 %v2881_v21, %v8283_v58  ;;  %v2760_v10 = vsub.f32 %v2386_v37, %v8642_v44  ;;  %v2382_v5 = vpop.permute.xlu1 %2381 }
 0x333   : > { %12096 = vst [vmem:[#allocation163_spill] sm:$0xff] %v9146_v18  ;;  %v3012_v56 = vadd.f32 %v2884_v8, %v8295_v61  ;;  %v2883_v30 = vmul.f32 %v2755_v33, %v2755_v33  ;;  %v3492_v42 = vmul.f32 %v3364_v62, %v3364_v62  ;;  %v3369_v32 = vmul.f32 %v9001_v46, %v9001_v46  ;;  %v2394_v54 = vpop.permute.xlu0 %2393  ;;  %v5957_v8 = vld [vmem:[%s6249_s25 + $0x3d0] sm:$0xff]  ;;  %v5958_v46 = vld [vmem:[%s6249_s25 + $0x3c8] sm:$0xff] }
 0x334   : > { %v3138_v3 = vadd.f32 1.0, %v3010_v27  ;;  %v2886_v51 = vmul.f32 %v2758_v55, %v2758_v55  ;;  %2637 = vperm.xlu1 %5566, %v5956_v20   ;;  %v9155_v38 = vmul.f32 %v5403_v2, %v9098_v0  ;;  %v9157_v58 = vmul.f32 %v3495_v41, %v3367_v53 }
 0x335   : > { %v9159_v60 = vpop.eup %5658  ;;  %v2885_v21 = vmul.f32 %v2757_v1, %v2757_v1  ;;  %v2759_v61 = vsub.f32 %v2382_v5, %v8642_v44  ;;  %v5408_v33 = vadd.f32 -0.002, %v4421_v36  ;;  %v4418_v27 = vmul.f32 0.001, %v9144_v26 }
 0x336   : > { %12097 = vst [vmem:[#allocation162_spill] sm:$0xff] %v9155_v38  ;;  %12098 = vst [vmem:[#allocation18_spill] sm:$0xff] %v9159_v60  ;;  %2649 = vperm.xlu0 %5567, %v5957_v8   ;;  %5668 = vrsqrt.f32 %v3135_v22  ;;  %v3137_v55 = vadd.f32 1.0, %v3009_v19  ;;  %v2888_v37 = vmul.f32 %v2760_v10, %v2760_v10  ;;  %v2762_v20 = vsub.f32 %v2394_v54, %v8642_v44  ;;  %v2390_v41 = vpop.permute.xlu1 %2389  ;;  %v12123_v38 = vld [vmem:[#allocation91_spill] sm:$0xff] }
 0x337   : > { %v9165_v0 = vpop.eup %5660  ;;  %v3140_v53 = vadd.f32 1.0, %v3012_v56  ;;  %v3011_v2 = vadd.f32 %v2883_v30, %v8292_v47  ;;  %v9168_v1 = vmul.f32 %v3492_v42, %v3364_v62  ;;  %v3497_v5 = vmul.f32 %v3369_v32, %v3369_v32  ;;  %v2402_v8 = vpop.permute.xlu0 %2401  ;;  %v5959_v30 = vld [vmem:[%s6249_s25 + $0x3e0] sm:$0xff] }
 0x338   : > { %12099 = vst [vmem:[#allocation165_spill] sm:$0xff] %v9165_v0  ;;  %5670 = vrsqrt.f32 %v3138_v3  ;;  %v3014_v36 = vadd.f32 %v2886_v51, %v8301_v45  ;;  %2645 = vperm.xlu1 %5566, %v5958_v46   ;;  %v4423_v22 = vmul.f32 0.001, %v9157_v58  ;;  %v3366_v19 = vmul.f32 %v8954_v7, %v8954_v7 }
 0x339   : > { %v9175_v10 = vpop.eup %5662  ;;  %v3013_v56 = vadd.f32 %v2885_v21, %v8298_v14  ;;  %v2887_v47 = vmul.f32 %v2759_v61, %v2759_v61  ;;  %v9180_v42 = vmul.f32 %v5408_v33, %v9123_v11  ;;  %v5405_v45 = vadd.f32 -0.002, %v4418_v27 }
 0x33a   : > { %12100 = vst [vmem:[#allocation164_spill] sm:$0xff] %v9175_v10  ;;  %2657 = vperm.xlu0 %5567, %v5959_v30   ;;  %5672 = vrsqrt.f32 %v3137_v55  ;;  %v3016_v3 = vadd.f32 %v2888_v37, %v8309_v28  ;;  %v2890_v46 = vmul.f32 %v2762_v20, %v2762_v20  ;;  %v2761_v62 = vsub.f32 %v2390_v41, %v8642_v44  ;;  %v2398_v14 = vpop.permute.xlu1 %2397  ;;  %v5960_v28 = vld [vmem:[%s6249_s25 + $0x3d8] sm:$0xff] }
 0x33b   : > { %12101 = vst [vmem:[#allocation23_spill] sm:$0xff] %v9180_v42  ;;  %v9184_v51 = vpop.eup %5664  ;;  %5674 = vrsqrt.f32 %v3140_v53  ;;  %v3139_v54 = vadd.f32 1.0, %v3011_v2  ;;  %v4420_v21 = vmul.f32 0.001, %v9168_v1  ;;  %v9187_v61 = vmul.f32 %v3497_v5, %v3369_v32  ;;  %v2410_v55 = vpop.permute.xlu0 %2409  ;;  %v5961_v53 = vld [vmem:[%s6249_s25 + $0x3f0] sm:$0xff] }
 0x33c   : > { %12102 = vst [vmem:[#allocation167_spill] sm:$0xff] %v9184_v51  ;;  %v9189_v11 = vpop.eup %5666  ;;  %v3142_v33 = vadd.f32 1.0, %v3014_v36  ;;  %v2764_v27 = vsub.f32 %v2402_v8, %v8642_v44  ;;  %2653 = vperm.xlu1 %5566, %v5960_v28   ;;  %v5410_v37 = vadd.f32 -0.002, %v4423_v22  ;;  %v3494_v20 = vmul.f32 %v3366_v19, %v3366_v19 }
 0x33d   : > { %12103 = vst [vmem:[#allocation166_spill] sm:$0xff] %v9189_v11  ;;  %v3141_v41 = vadd.f32 1.0, %v3013_v56  ;;  %v3015_v30 = vadd.f32 %v2887_v47, %v8306_v13  ;;  %v9196_v2 = vmul.f32 %v5405_v45, %v9144_v26  ;;  %v3371_v32 = vmul.f32 %v9022_v4, %v9022_v4  ;;  %v5962_v4 = vld [vmem:[%s6249_s25 + $0x3e8] sm:$0xff] }
 0x33e   : > { %2665 = vperm.xlu0 %5567, %v5961_v53   ;;  %v3144_v5 = vadd.f32 1.0, %v3016_v3  ;;  %v3018_v36 = vadd.f32 %v2890_v46, %v8315_v35  ;;  %v2889_v8 = vmul.f32 %v2761_v62, %v2761_v62  ;;  %v2763_v28 = vsub.f32 %v2398_v14, %v8642_v44  ;;  %v2406_v56 = vpop.permute.xlu1 %2405 }
 0x33f   : > { %12104 = vst [vmem:[#allocation168_spill] sm:$0xff] %v9196_v2  ;;  %5676 = vrsqrt.f32 %v3139_v54  ;;  %v2766_v22 = vsub.f32 %v2410_v55, %v8642_v44  ;;  %v5407_v13 = vadd.f32 -0.002, %v4420_v21  ;;  %v4425_v47 = vmul.f32 0.001, %v9187_v61  ;;  %v2418_v45 = vpop.permute.xlu0 %2417  ;;  %v5963_v55 = vld [vmem:[%s6249_s25] sm:$0xff] }
 0x340   : > { %v9204_v53 = vpop.eup %5668  ;;  %5678 = vrsqrt.f32 %v3142_v33  ;;  %v2892_v26 = vmul.f32 %v2764_v27, %v2764_v27  ;;  %2661 = vperm.xlu1 %5566, %v5962_v4   ;;  %v9208_v35 = vmul.f32 %v5410_v37, %v9157_v58  ;;  %v9210_v3 = vmul.f32 %v3494_v20, %v3366_v19 }
 0x341   : > { %12105 = vst [vmem:[#allocation5_spill] sm:$0xff] %v9204_v53  ;;  %5680 = vrsqrt.f32 %v3141_v41  ;;  %v3143_v46 = vadd.f32 1.0, %v3015_v30  ;;  %v2765_v62 = vsub.f32 %v2406_v56, %v8642_v44  ;;  %v6175_v54 = vmov 3   ;;  %v12110_v56 = vld [vmem:[#allocation78_spill] sm:$0xff] }
 0x342   : > { %12106 = vst [vmem:[#allocation27_spill] sm:$0xff] %v9208_v35  ;;  %5568 = vset.pattern.permute.xlu0 %v6175_v54  ;;  %v3499_v14 = vmul.f32 %v3371_v32, %v3371_v32  ;;  %v9213_v21 = vpop.eup %5670  ;;  %5682 = vrsqrt.f32 %v3144_v5  ;;  %v3146_v33 = vadd.f32 1.0, %v3018_v36  ;;  %v3017_v27 = vadd.f32 %v2889_v8, %v8312_v50  ;;  %v2414_v37 = vpop.permute.xlu1 %2413  ;;  %v5964_v50 = vld [vmem:[%s6249_s25 + $0x3f8] sm:$0xff] }
 0x343   : > { %12107 = vst [vmem:[#allocation6_spill] sm:$0xff] %v9213_v21  ;;  %v2891_v4 = vmul.f32 %v2763_v28, %v2763_v28  ;;  %3729 = vperm.xlu0 %5568, %v5963_v55   ;;  %v2894_v58 = vmul.f32 %v2766_v22, %v2766_v22  ;;  %v2768_v19 = vsub.f32 %v2418_v45, %v8763_v15  ;;  %v5412_v41 = vadd.f32 -0.002, %v4425_v47  ;;  %v2426_v36 = vpop.permute.xlu0 %2425 }
 0x344   : > { %v9219_v20 = vmul.f32 %v5407_v13, %v9168_v1  ;;  %v9221_v30 = vpop.eup %5672  ;;  %v3020_v35 = vadd.f32 %v2892_v26, %v12110_v56  ;;  %v2767_v5 = vsub.f32 %v2414_v37, %v8642_v44  ;;  %2669 = vperm.xlu1 %5566, %v5964_v50   ;;  %v4422_v8 = vmul.f32 0.001, %v9210_v3  ;;  %v12112_v44 = vld [vmem:[#allocation79_spill] sm:$0xff] }
 0x345   : > { %12109 = vst [vmem:[#allocation11_spill] sm:$0xff] %v9221_v30  ;;  %v3368_v28 = vmul.f32 %v8971_v12, %v8971_v12  ;;  %v9229_v22 = vpop.eup %5674  ;;  %5684 = vrsqrt.f32 %v3143_v46  ;;  %v2893_v1 = vmul.f32 %v2765_v62, %v2765_v62  ;;  %v9231_v13 = vmul.f32 %v3499_v14, %v3371_v32  ;;  %v5965_v37 = vld [vmem:[%s6249_s25 + $0x18] sm:$0xff]  ;;  %v12114_v46 = vld [vmem:[#allocation169_spill] sm:$0xff] }
 0x346   : > { %12108 = vst [vmem:[#allocation7_spill] sm:$0xff] %v9219_v20  ;;  %12111 = vst [vmem:[#allocation31_spill] sm:$0xff] %v9229_v22  ;;  %v3373_v47 = vmul.f32 %v9040_v49, %v9040_v49  ;;  %5686 = vrsqrt.f32 %v3146_v33  ;;  %v3145_v26 = vadd.f32 1.0, %v3017_v27  ;;  %v3019_v45 = vadd.f32 %v2891_v4, %v12112_v44  ;;  %v12113_v56 = vld [vmem:[#allocation83_spill] sm:$0xff]  ;;  %v5968_v20 = vld [vmem:[%s7234_s29] sm:$0xf] }
 0x347   : > { %v2770_v55 = vsub.f32 %v2426_v36, %v8763_v15  ;;  %3741 = vperm.xlu0 %5568, %v5965_v37   ;;  %v3022_v50 = vadd.f32 %v2894_v58, %v12113_v56  ;;  %v2896_v12 = vmul.f32 %v2768_v19, %v2768_v19  ;;  %v2422_v7 = vpop.permute.xlu1 %2421  ;;  %v9240_v62 = vsub.s32 3, %v12114_v46  ;;  %v12117_v37 = vld [vmem:[#allocation61_spill] sm:$0xff] }
 0x348   : > { %v9243_v32 = vmul.f32 %v5412_v41, %v9187_v61  ;;  %v3148_v14 = vadd.f32 1.0, %v3020_v35  ;;  %v2895_v33 = vmul.f32 %v2767_v5, %v2767_v5  ;;  %v2434_v27 = vpop.permute.xlu0 %2433  ;;  %5569 = vset.pattern.permute.xlu1 %v6175_v54  ;;  %v5409_v4 = vadd.f32 -0.002, %v4422_v8  ;;  %v5966_v58 = vld [vmem:[%s6249_s25 + $0x8] sm:$0xff] }
 0x349   : > { %v3496_v36 = vmul.f32 %v3368_v28, %v3368_v28  ;;  %v9245_v44 = vpop.eup %5676  ;;  %v3021_v49 = vadd.f32 %v2893_v1, %v12117_v37  ;;  %3733 = vperm.xlu1 %5569, %v5966_v58   ;;  %v4427_v19 = vmul.f32 0.001, %v9231_v13  ;;  %v3501_v56 = vmul.f32 %v3373_v47, %v3373_v47  ;;  %v5967_v8 = vld [vmem:[%s6249_s25 + $0x28] sm:$0xff]  ;;  %v12120_v58 = vld [vmem:[#allocation87_spill] sm:$0xff] }
 0x34a   : > { %12115 = vst [vmem:[#allocation8_spill] sm:$0xff] %v9243_v32  ;;  %12116 = vst [vmem:[#allocation195_spill] sm:$0xff] %v9245_v44  ;;  %v3370_v61 = vmul.f32 %v8988_v48, %v8988_v48  ;;  %v9252_v35 = vpop.eup %5678  ;;  %5688 = vrsqrt.f32 %v3145_v26  ;;  %v3147_v41 = vadd.f32 1.0, %v3019_v45  ;;  %v2898_v54 = vmul.f32 %v2770_v55, %v2770_v55 }
 0x34b   : > { %12118 = vst [vmem:[#allocation22_spill] sm:$0xff] %v9252_v35  ;;  %v2769_v5 = vsub.f32 %v2422_v7, %v8763_v15  ;;  %3749 = vperm.xlu0 %5568, %v5967_v8   ;;  %v9256_v1 = vpop.eup %5680  ;;  %v3150_v37 = vadd.f32 1.0, %v3022_v50  ;;  %v3024_v46 = vadd.f32 %v2896_v12, %v12120_v58  ;;  %v2772_v32 = vsub.f32 %v2434_v27, %v8763_v15  ;;  %v2430_v42 = vpop.permute.xlu1 %2429  ;;  %v12122_v7 = vld [vmem:[#allocation82_spill] sm:$0xff] }
 0x34c   : > { %12119 = vst [vmem:[#allocation35_spill] sm:$0xff] %v9256_v1  ;;  %v9262_v48 = vrot.slane %v5968_v20, %v9240_v62  ;;  %v9264_v26 = vpop.eup %5682  ;;  %5690 = vrsqrt.f32 %v3148_v14  ;;  %v3023_v45 = vadd.f32 %v2895_v33, %v12122_v7  ;;  %v2442_v55 = vpop.permute.xlu0 %2441  ;;  %v9267_v8 = vmul.f32 %v3496_v36, %v3368_v28  ;;  %v5969_v58 = vld [vmem:[%s6249_s25 + $0x10] sm:$0xff]  ;;  %v5970_v33 = vld [vmem:[%s6249_s25 + $0x38] sm:$0xff] }
 0x34d   : > { %12121 = vst [vmem:[#allocation170_spill] sm:$0xff] %v9264_v26  ;;  %v3375_v50 = vmul.f32 %v9052_v16, %v9052_v16  ;;  %v3149_v12 = vadd.f32 1.0, %v3021_v49  ;;  %3737 = vperm.xlu1 %5569, %v5969_v58   ;;  %v5414_v27 = vadd.f32 -0.002, %v4427_v19  ;;  %v9272_v2 = vmul.f32 %v3501_v56, %v3373_v47 }
 0x34e   : > { %v3498_v20 = vmul.f32 %v3370_v61, %v3370_v61  ;;  %5692 = vrsqrt.f32 %v3147_v41  ;;  %v3026_v23 = vadd.f32 %v2898_v54, %v12123_v38  ;;  %v2897_v63 = vmul.f32 %v2769_v5, %v2769_v5  ;;  %v5971_v5 = vld [vmem:[%s6249_s25 + $0x20] sm:$0xff] }
 0x34f   : > { %v2771_v14 = vsub.f32 %v2430_v42, %v8763_v15  ;;  %3757 = vperm.xlu0 %5568, %v5970_v33   ;;  %v9277_v28 = vpop.eup %5684  ;;  %5694 = vrsqrt.f32 %v3150_v37  ;;  %v3152_v36 = vadd.f32 1.0, %v3024_v46  ;;  %v2900_v49 = vmul.f32 %v2772_v32, %v2772_v32  ;;  %v2438_v7 = vpop.permute.xlu1 %2437  ;;  %v12128_v37 = vld [vmem:[#allocation86_spill] sm:$0xff] }
 0x350   : > { %12124 = vst [vmem:[#allocation26_spill] sm:$0xff] %v9277_v28  ;;  %v9280_v19 = vmul.f32 %v5409_v4, %v9210_v3  ;;  %v9282_v47 = vpop.eup %5686  ;;  %v3151_v56 = vadd.f32 1.0, %v3023_v45  ;;  %v2774_v38 = vsub.f32 %v2442_v55, %v8763_v15  ;;  %v4424_v42 = vmul.f32 0.001, %v9267_v8  ;;  %v5972_v33 = vld [vmem:[%s6249_s25 + $0x48] sm:$0xff] }
 0x351   : > { %12126 = vst [vmem:[#allocation171_spill] sm:$0xff] %v9282_v47  ;;  %v2450_v41 = vpop.permute.xlu0 %2449  ;;  %v3503_v54 = vmul.f32 %v3375_v50, %v3375_v50  ;;  %5696 = vrsqrt.f32 %v3149_v12  ;;  %3745 = vperm.xlu1 %5569, %v5971_v5   ;;  %v9288_v46 = vmul.f32 %v5414_v27, %v9231_v13  ;;  %v4429_v32 = vmul.f32 0.001, %v9272_v2  ;;  %v12129_v12 = vld [vmem:[#allocation95_spill] sm:$0xff] }
 0x352   : > { %12125 = vst [vmem:[#allocation30_spill] sm:$0xff] %v9280_v19  ;;  %v9291_v3 = vmul.f32 %v3498_v20, %v3370_v61  ;;  %v3154_v4 = vadd.f32 1.0, %v3026_v23  ;;  %v3025_v58 = vadd.f32 %v2897_v63, %v12128_v37  ;;  %v2899_v45 = vmul.f32 %v2771_v14, %v2771_v14  ;;  %v12134_v19 = vld [vmem:[#allocation76_spill] sm:$0xff] }
 0x353   : > { %12127 = vst [vmem:[#allocation12_spill] sm:$0xff] %v9288_v46  ;;  %v2773_v55 = vsub.f32 %v2438_v7, %v8763_v15  ;;  %3765 = vperm.xlu0 %5568, %v5972_v33   ;;  %5698 = vrsqrt.f32 %v3152_v36  ;;  %v3028_v16 = vadd.f32 %v2900_v49, %v12129_v12  ;;  %v2776_v5 = vsub.f32 %v2450_v41, %v8763_v15  ;;  %v2446_v13 = vpop.permute.xlu1 %2445  ;;  %v5973_v36 = vld [vmem:[%s6249_s25 + $0x30] sm:$0xff] }
 0x354   : > { %v3372_v27 = vmul.f32 %v9016_v25, %v9016_v25  ;;  %v9300_v61 = vpop.eup %5688  ;;  %5700 = vrsqrt.f32 %v3151_v56  ;;  %v2902_v63 = vmul.f32 %v2774_v38, %v2774_v38  ;;  %v5411_v20 = vadd.f32 -0.002, %v4424_v42  ;;  %v12132_v12 = vld [vmem:[#allocation90_spill] sm:$0xff] }
 0x355   : > { %12130 = vst [vmem:[#allocation39_spill] sm:$0xff] %v9300_v61  ;;  %v2458_v23 = vpop.permute.xlu0 %2457  ;;  %v9302_v14 = vmul.f32 %v3503_v54, %v3375_v50  ;;  %v2775_v7 = vsub.f32 %v2446_v13, %v8763_v15  ;;  %3753 = vperm.xlu1 %5569, %v5973_v36   ;;  %v5416_v49 = vadd.f32 -0.002, %v4429_v32  ;;  %v4426_v41 = vmul.f32 0.001, %v9291_v3  ;;  %v5974_v50 = vld [vmem:[%s6249_s25 + $0x58] sm:$0xff] }
 0x356   : > { %v3377_v37 = vmul.f32 %v9074_v34, %v9074_v34  ;;  %v9309_v33 = vpop.eup %5690  ;;  %5702 = vrsqrt.f32 %v3154_v4  ;;  %v3153_v56 = vadd.f32 1.0, %v3025_v58  ;;  %v3027_v38 = vadd.f32 %v2899_v45, %v12132_v12 }
 0x357   : > { %12131 = vst [vmem:[#allocation20_spill] sm:$0xff] %v9309_v33  ;;  %v2901_v25 = vmul.f32 %v2773_v55, %v2773_v55  ;;  %3773 = vperm.xlu0 %5568, %v5974_v50   ;;  %v3156_v42 = vadd.f32 1.0, %v3028_v16  ;;  %v2904_v54 = vmul.f32 %v2776_v5, %v2776_v5  ;;  %v2778_v13 = vsub.f32 %v2458_v23, %v8763_v15  ;;  %v2454_v32 = vpop.permute.xlu1 %2453  ;;  %v5975_v5 = vld [vmem:[%s6249_s25 + $0x40] sm:$0xff]  ;;  %v12138_v50 = vld [vmem:[#allocation94_spill] sm:$0xff] }
 0x358   : > { %v3500_v36 = vmul.f32 %v3372_v27, %v3372_v27  ;;  %v9314_v46 = vpop.eup %5692  ;;  %v3030_v34 = vadd.f32 %v2902_v63, %v12134_v19  ;;  %v9318_v4 = vmul.f32 %v5411_v20, %v9267_v8  ;;  %v4431_v58 = vmul.f32 0.001, %v9302_v14 }
 0x359   : > { %12133 = vst [vmem:[#allocation123_spill] sm:$0xff] %v9314_v46  ;;  %v2466_v33 = vpop.permute.xlu0 %2465  ;;  %v3374_v45 = vmul.f32 %v9032_v40, %v9032_v40  ;;  %v9323_v16 = vpop.eup %5694  ;;  %v2903_v55 = vmul.f32 %v2775_v7, %v2775_v7  ;;  %3761 = vperm.xlu1 %5569, %v5975_v5   ;;  %v9327_v23 = vmul.f32 %v5416_v49, %v9272_v2  ;;  %v5413_v12 = vadd.f32 -0.002, %v4426_v41  ;;  %v12140_v7 = vld [vmem:[#allocation98_spill] sm:$0xff] }
 0x35a   : > { %12135 = vst [vmem:[#allocation197_spill] sm:$0xff] %v9318_v4  ;;  %12136 = vst [vmem:[#allocation38_spill] sm:$0xff] %v9323_v16  ;;  %v3505_v19 = vmul.f32 %v3377_v37, %v3377_v37  ;;  %5704 = vrsqrt.f32 %v3153_v56  ;;  %v3155_v63 = vadd.f32 1.0, %v3027_v38  ;;  %v3029_v8 = vadd.f32 %v2901_v25, %v12138_v50  ;;  %v5976_v4 = vld [vmem:[%s6249_s25 + $0x68] sm:$0xff]  ;;  %v12142_v50 = vld [vmem:[#allocation99_spill] sm:$0xff] }
 0x35b   : > { %12137 = vst [vmem:[#allocation32_spill] sm:$0xff] %v9327_v23  ;;  %v2777_v20 = vsub.f32 %v2454_v32, %v8763_v15  ;;  %3781 = vperm.xlu0 %5568, %v5976_v4   ;;  %v9332_v40 = vpop.eup %5696  ;;  %5706 = vrsqrt.f32 %v3156_v42  ;;  %v3032_v16 = vadd.f32 %v2904_v54, %v12140_v7  ;;  %v2906_v5 = vmul.f32 %v2778_v13, %v2778_v13  ;;  %v2462_v47 = vpop.permute.xlu1 %2461  ;;  %v5977_v23 = vld [vmem:[%s6249_s25 + $0x50] sm:$0xff] }
 0x35c   : > { %12139 = vst [vmem:[#allocation122_spill] sm:$0xff] %v9332_v40  ;;  %v9335_v2 = vmul.f32 %v3500_v36, %v3372_v27  ;;  %v3158_v49 = vadd.f32 1.0, %v3030_v34  ;;  %v2780_v41 = vsub.f32 %v2466_v33, %v8763_v15  ;;  %v5418_v25 = vadd.f32 -0.002, %v4431_v58  ;;  %v5978_v58 = vld [vmem:[%s6249_s25 + $0x78] sm:$0xff] }
 0x35d   : > { %v2474_v56 = vpop.permute.xlu0 %2473  ;;  %v3502_v38 = vmul.f32 %v3374_v45, %v3374_v45  ;;  %v9338_v32 = vpop.eup %5698  ;;  %v3031_v4 = vadd.f32 %v2903_v55, %v12142_v50  ;;  %3769 = vperm.xlu1 %5569, %v5977_v23   ;;  %v9343_v42 = vmul.f32 %v5413_v12, %v9291_v3  ;;  %v9345_v54 = vmul.f32 %v3505_v19, %v3377_v37  ;;  %v12145_v23 = vld [vmem:[#allocation134_spill] sm:$0xff] }
 0x35e   : > { %12141 = vst [vmem:[#allocation33_spill] sm:$0xff] %v9338_v32  ;;  %v3379_v34 = vmul.f32 %v9090_v52, %v9090_v52  ;;  %v9349_v27 = vpop.eup %5700  ;;  %5708 = vrsqrt.f32 %v3155_v63  ;;  %v3157_v33 = vadd.f32 1.0, %v3029_v8  ;;  %v2905_v13 = vmul.f32 %v2777_v20, %v2777_v20 }
 0x35f   : > { %12143 = vst [vmem:[#allocation36_spill] sm:$0xff] %v9343_v42  ;;  %12144 = vst [vmem:[#allocation37_spill] sm:$0xff] %v9349_v27  ;;  %v2779_v36 = vsub.f32 %v2462_v47, %v8763_v15  ;;  %3789 = vperm.xlu0 %5568, %v5978_v58   ;;  %v3160_v55 = vadd.f32 1.0, %v3032_v16  ;;  %v3034_v7 = vadd.f32 %v2906_v5, %v12145_v23  ;;  %v2470_v37 = vpop.permute.xlu1 %2469  ;;  %v4428_v12 = vmul.f32 0.001, %v9335_v2  ;;  %v5979_v16 = vld [vmem:[%s6249_s25 + $0x60] sm:$0xff] }
 0x360   : > { %v2782_v3 = vsub.f32 %v2474_v56, %v8763_v15  ;;  %v9356_v19 = vpop.eup %5702  ;;  %5710 = vrsqrt.f32 %v3158_v49  ;;  %v2908_v63 = vmul.f32 %v2780_v41, %v2780_v41  ;;  %v9359_v20 = vmul.f32 %v5418_v25, %v9302_v14  ;;  %v12148_v23 = vld [vmem:[#allocation73_spill] sm:$0xff] }
 0x361   : > { %12146 = vst [vmem:[#allocation40_spill] sm:$0xff] %v9356_v19  ;;  %v2482_v8 = vpop.permute.xlu0 %2481  ;;  %v9361_v47 = vmul.f32 %v3502_v38, %v3374_v45  ;;  %v3159_v50 = vadd.f32 1.0, %v3031_v4  ;;  %3777 = vperm.xlu1 %5569, %v5979_v16   ;;  %v4433_v5 = vmul.f32 0.001, %v9345_v54  ;;  %v3507_v56 = vmul.f32 %v3379_v34, %v3379_v34  ;;  %v5980_v14 = vld [vmem:[%s6249_s25 + $0x88] sm:$0xff]  ;;  %v5982_v19 = vld [vmem:[%s6249_s25 + $0x98] sm:$0xff] }
 0x362   : > { %12147 = vst [vmem:[#allocation41_spill] sm:$0xff] %v9359_v20  ;;  %v3376_v58 = vmul.f32 %v9047_v43, %v9047_v43  ;;  %5712 = vrsqrt.f32 %v3157_v33  ;;  %v3033_v52 = vadd.f32 %v2905_v13, %v12148_v23  ;;  %v2907_v49 = vmul.f32 %v2779_v36, %v2779_v36  ;;  %v12150_v20 = vld [vmem:[#allocation81_spill] sm:$0xff] }
 0x363   : > { %v2781_v41 = vsub.f32 %v2470_v37, %v8763_v15  ;;  %3797 = vperm.xlu0 %5568, %v5980_v14   ;;  %5714 = vrsqrt.f32 %v3160_v55  ;;  %v3162_v45 = vadd.f32 1.0, %v3034_v7  ;;  %v2910_v25 = vmul.f32 %v2782_v3, %v2782_v3  ;;  %v2478_v38 = vpop.permute.xlu1 %2477  ;;  %v5981_v55 = vld [vmem:[%s6249_s25 + $0x70] sm:$0xff] }
 0x364   : > { %v5415_v4 = vadd.f32 -0.002, %v4428_v12  ;;  %v9370_v16 = vpop.eup %5704  ;;  %v3036_v42 = vadd.f32 %v2908_v63, %v12150_v20  ;;  %v2784_v33 = vsub.f32 %v2482_v8, %v8814_v6  ;;  %v4430_v13 = vmul.f32 0.001, %v9361_v47  ;;  %v12152_v63 = vld [vmem:[#allocation103_spill] sm:$0xff] }
 0x365   : > { %12149 = vst [vmem:[#allocation44_spill] sm:$0xff] %v9370_v16  ;;  %v2490_v43 = vpop.permute.xlu0 %2489  ;;  %v3381_v36 = vmul.f32 %v9113_v24, %v9113_v24  ;;  %v9377_v37 = vpop.eup %5706  ;;  %5716 = vrsqrt.f32 %v3159_v50  ;;  %3785 = vperm.xlu1 %5569, %v5981_v55   ;;  %v5420_v7 = vadd.f32 -0.002, %v4433_v5  ;;  %v9380_v3 = vmul.f32 %v3507_v56, %v3379_v34  ;;  %v12153_v24 = vld [vmem:[#allocation88_spill] sm:$0xff] }
 0x366   : > { %12151 = vst [vmem:[#allocation29_spill] sm:$0xff] %v9377_v37  ;;  %v3504_v12 = vmul.f32 %v3376_v58, %v3376_v58  ;;  %v3161_v23 = vadd.f32 1.0, %v3033_v52  ;;  %v3035_v20 = vadd.f32 %v2907_v49, %v12152_v63  ;;  %v2909_v14 = vmul.f32 %v2781_v41, %v2781_v41 }
 0x367   : > { %v2783_v8 = vsub.f32 %v2478_v38, %v8763_v15  ;;  %3805 = vperm.xlu0 %5568, %v5982_v19   ;;  %5718 = vrsqrt.f32 %v3162_v45  ;;  %v3038_v32 = vadd.f32 %v2910_v25, %v12153_v24  ;;  %v2786_v50 = vsub.f32 %v2490_v43, %v8814_v6  ;;  %v2486_v37 = vpop.permute.xlu1 %2485  ;;  %v5983_v19 = vld [vmem:[%s6249_s25 + $0x80] sm:$0xff] }
 0x368   : > { %v9388_v5 = vmul.f32 %v5415_v4, %v9335_v2  ;;  %v9390_v34 = vpop.eup %5708  ;;  %v3164_v52 = vadd.f32 1.0, %v3036_v42  ;;  %v2912_v56 = vmul.f32 %v2784_v33, %v2784_v33  ;;  %v5417_v41 = vadd.f32 -0.002, %v4430_v13  ;;  %v12158_v25 = vld [vmem:[#allocation89_spill] sm:$0xff] }
 0x369   : > { %12155 = vst [vmem:[#allocation46_spill] sm:$0xff] %v9390_v34  ;;  %v2498_v49 = vpop.permute.xlu0 %2497  ;;  %v3509_v55 = vmul.f32 %v3381_v36, %v3381_v36  ;;  %v2785_v15 = vsub.f32 %v2486_v37, %v8814_v6  ;;  %3793 = vperm.xlu1 %5569, %v5983_v19   ;;  %v9395_v24 = vmul.f32 %v5420_v7, %v9345_v54  ;;  %v4435_v43 = vmul.f32 0.001, %v9380_v3  ;;  %v5984_v33 = vld [vmem:[%s6249_s25 + $0xa8] sm:$0xff] }
 0x36a   : > { %12154 = vst [vmem:[#allocation43_spill] sm:$0xff] %v9388_v5  ;;  %v9398_v45 = vmul.f32 %v3504_v12, %v3376_v58  ;;  %v9400_v2 = vpop.eup %5710  ;;  %5720 = vrsqrt.f32 %v3161_v23  ;;  %v3163_v42 = vadd.f32 1.0, %v3035_v20  ;;  %v3037_v38 = vadd.f32 %v2909_v14, %v12158_v25  ;;  %v12160_v12 = vld [vmem:[#allocation93_spill] sm:$0xff] }
 0x36b   : > { %12156 = vst [vmem:[#allocation47_spill] sm:$0xff] %v9395_v24  ;;  %12157 = vst [vmem:[#allocation50_spill] sm:$0xff] %v9400_v2  ;;  %v2911_v4 = vmul.f32 %v2783_v8, %v2783_v8  ;;  %3813 = vperm.xlu0 %5568, %v5984_v33   ;;  %v3166_v13 = vadd.f32 1.0, %v3038_v32  ;;  %v2914_v37 = vmul.f32 %v2786_v50, %v2786_v50  ;;  %v2494_v54 = vpop.permute.xlu1 %2493  ;;  %5722 = vrsqrt.f32 %v3164_v52  ;;  %v12163_v33 = vld [vmem:[#allocation102_spill] sm:$0xff]  ;;  %v12168_v2 = vld [vmem:[#allocation104_spill] sm:$0xff] }
 0x36c   : > { %v2788_v63 = vsub.f32 %v2498_v49, %v8814_v6  ;;  %v3378_v7 = vmul.f32 %v9061_v29, %v9061_v29  ;;  %v9407_v58 = vpop.eup %5712  ;;  %v3040_v23 = vadd.f32 %v2912_v56, %v12160_v12  ;;  %v9411_v14 = vmul.f32 %v5417_v41, %v9361_v47  ;;  %v5985_v49 = vld [vmem:[%s6249_s25 + $0x90] sm:$0xff]  ;;  %v5989_v5 = vld [vmem:[%s6249_s25 + $0xc8] sm:$0xff] }
 0x36d   : > { %12159 = vst [vmem:[#allocation51_spill] sm:$0xff] %v9407_v58  ;;  %v2506_v20 = vpop.permute.xlu0 %2505  ;;  %v9413_v8 = vmul.f32 %v3509_v55, %v3381_v36  ;;  %v9415_v32 = vpop.eup %5714  ;;  %v2913_v50 = vmul.f32 %v2785_v15, %v2785_v15  ;;  %3801 = vperm.xlu1 %5569, %v5985_v49   ;;  %v5422_v19 = vadd.f32 -0.002, %v4435_v43  ;;  %v4432_v25 = vmul.f32 0.001, %v9398_v45  ;;  %v5986_v36 = vld [vmem:[%s6249_s25 + $0xb8] sm:$0xff] }
 0x36e   : > { %12161 = vst [vmem:[#allocation63_spill] sm:$0xff] %v9411_v14  ;;  %12162 = vst [vmem:[#allocation54_spill] sm:$0xff] %v9415_v32  ;;  %v3383_v52 = vmul.f32 %v9134_v31, %v9134_v31  ;;  %5724 = vrsqrt.f32 %v3163_v42  ;;  %v3165_v56 = vadd.f32 1.0, %v3037_v38  ;;  %v3039_v12 = vadd.f32 %v2911_v4, %v12163_v33  ;;  %v12165_v55 = vld [vmem:[#allocation100_spill] sm:$0xff]  ;;  %v5987_v38 = vld [vmem:[%s7234_s29 + $0x4] sm:$0xf] }
 0x36f   : > { %v2787_v47 = vsub.f32 %v2494_v54, %v8814_v6  ;;  %3821 = vperm.xlu0 %5568, %v5986_v36   ;;  %v9424_v41 = vpop.eup %5716  ;;  %5726 = vrsqrt.f32 %v3166_v13  ;;  %v3042_v15 = vadd.f32 %v2914_v37, %v12165_v55  ;;  %v2916_v43 = vmul.f32 %v2788_v63, %v2788_v63  ;;  %v2502_v49 = vpop.permute.xlu1 %2501  ;;  %v12167_v36 = vld [vmem:[#allocation92_spill] sm:$0xff] }
 0x370   : > { %12164 = vst [vmem:[#allocation67_spill] sm:$0xff] %v9424_v41  ;;  %v3506_v29 = vmul.f32 %v3378_v7, %v3378_v7  ;;  %v3168_v24 = vadd.f32 1.0, %v3040_v23  ;;  %v2790_v31 = vsub.f32 %v2506_v20, %v8814_v6  ;;  %v9430_v4 = vrot.slane %v5987_v38, %v9240_v62  ;;  %v5988_v14 = vld [vmem:[%s6249_s25 + $0xa0] sm:$0xff] }
 0x371   : > { %v2514_v42 = vpop.permute.xlu0 %2513  ;;  %v4437_v54 = vmul.f32 0.001, %v9413_v8  ;;  %v9433_v33 = vpop.eup %5718  ;;  %v3041_v13 = vadd.f32 %v2913_v50, %v12167_v36  ;;  %3809 = vperm.xlu1 %5569, %v5988_v14   ;;  %v9438_v37 = vmul.f32 %v5422_v19, %v9380_v3  ;;  %v5419_v63 = vadd.f32 -0.002, %v4432_v25 }
 0x372   : > { %12166 = vst [vmem:[#allocation62_spill] sm:$0xff] %v9433_v33  ;;  %v3511_v23 = vmul.f32 %v3383_v52, %v3383_v52  ;;  %5728 = vrsqrt.f32 %v3165_v56  ;;  %v3167_v20 = vadd.f32 1.0, %v3039_v12  ;;  %v2915_v55 = vmul.f32 %v2787_v47, %v2787_v47 }
 0x373   : > { %v2789_v38 = vsub.f32 %v2502_v49, %v8814_v6  ;;  %3829 = vperm.xlu0 %5568, %v5989_v5   ;;  %v3170_v32 = vadd.f32 1.0, %v3042_v15  ;;  %v3044_v33 = vadd.f32 %v2916_v43, %v12168_v2  ;;  %v2510_v41 = vpop.permute.xlu1 %2509  ;;  %v9443_v50 = vmul.f32 %v3506_v29, %v3378_v7  ;;  %v5990_v5 = vld [vmem:[%s6249_s25 + $0xb0] sm:$0xff] }
 0x374   : > { %v3380_v3 = vmul.f32 %v9079_v59, %v9079_v59  ;;  %v9447_v14 = vpop.eup %5720  ;;  %5730 = vrsqrt.f32 %v3168_v24  ;;  %v2918_v19 = vmul.f32 %v2790_v31, %v2790_v31  ;;  %v2792_v25 = vsub.f32 %v2514_v42, %v8814_v6  ;;  %v12171_v24 = vld [vmem:[#allocation97_spill] sm:$0xff]  ;;  %v5991_v42 = vld [vmem:[%s6249_s25 + $0xd8] sm:$0xff] }
 0x375   : > { %12169 = vst [vmem:[#allocation45_spill] sm:$0xff] %v9447_v14  ;;  %v2522_v56 = vpop.permute.xlu0 %2521  ;;  %v5424_v12 = vadd.f32 -0.002, %v4437_v54  ;;  %v3169_v47 = vadd.f32 1.0, %v3041_v13  ;;  %3817 = vperm.xlu1 %5569, %v5990_v5   ;;  %v9452_v2 = vmul.f32 %v5419_v63, %v9398_v45  ;;  %v9454_v29 = vmul.f32 %v3511_v23, %v3383_v52  ;;  %v9458_v15 = vpop.eup %5722  ;;  %v12173_v63 = vld [vmem:[#allocation108_spill] sm:$0xff] }
 0x376   : > { %v3385_v7 = vmul.f32 %v9146_v18, %v9146_v18  ;;  %12170 = vst [vmem:[#allocation48_spill] sm:$0xff] %v9458_v15  ;;  %5732 = vrsqrt.f32 %v3167_v20  ;;  %v3043_v31 = vadd.f32 %v2915_v55, %v12171_v24  ;;  %v2917_v43 = vmul.f32 %v2789_v38, %v2789_v38 }
 0x377   : > { %v2791_v49 = vsub.f32 %v2510_v41, %v8814_v6  ;;  %3837 = vperm.xlu0 %5568, %v5991_v42   ;;  %5734 = vrsqrt.f32 %v3170_v32  ;;  %v3172_v54 = vadd.f32 1.0, %v3044_v33  ;;  %v2518_v45 = vpop.permute.xlu1 %2517  ;;  %v4434_v52 = vmul.f32 0.001, %v9443_v50  ;;  %v5992_v32 = vld [vmem:[%s6249_s25 + $0xc0] sm:$0xff] }
 0x378   : > { %v3508_v36 = vmul.f32 %v3380_v3, %v3380_v3  ;;  %v9464_v13 = vpop.eup %5724  ;;  %v3046_v23 = vadd.f32 %v2918_v19, %v12173_v63  ;;  %v2920_v20 = vmul.f32 %v2792_v25, %v2792_v25  ;;  %v2794_v55 = vsub.f32 %v2522_v56, %v8814_v6  ;;  %v12176_v63 = vld [vmem:[#allocation101_spill] sm:$0xff] }
 0x379   : > { %12172 = vst [vmem:[#allocation52_spill] sm:$0xff] %v9464_v13  ;;  %v2530_v38 = vpop.permute.xlu0 %2529  ;;  %v9469_v41 = vmul.f32 %v5424_v12, %v9413_v8  ;;  %v9471_v5 = vpop.eup %5726  ;;  %5736 = vrsqrt.f32 %v3169_v47  ;;  %3825 = vperm.xlu1 %5569, %v5992_v32   ;;  %v4439_v33 = vmul.f32 0.001, %v9454_v29  ;;  %v3513_v24 = vmul.f32 %v3385_v7, %v3385_v7  ;;  %v5993_v8 = vld [vmem:[%s6249_s25 + $0xe8] sm:$0xff] }
 0x37a   : > { %12175 = vst [vmem:[#allocation70_spill] sm:$0xff] %v9471_v5  ;;  %v3382_v42 = vmul.f32 %v9106_v17, %v9106_v17  ;;  %v3171_v19 = vadd.f32 1.0, %v3043_v31  ;;  %v3045_v25 = vadd.f32 %v2917_v43, %v12176_v63  ;;  %v2919_v56 = vmul.f32 %v2791_v49, %v2791_v49  ;;  %v12178_v17 = vld [vmem:[#allocation112_spill] sm:$0xff] }
 0x37b   : > { %12174 = vst [vmem:[#allocation66_spill] sm:$0xff] %v9469_v41  ;;  %v2793_v15 = vsub.f32 %v2518_v45, %v8814_v6  ;;  %3845 = vperm.xlu0 %5568, %v5993_v8   ;;  %5738 = vrsqrt.f32 %v3172_v54  ;;  %v2796_v12 = vsub.f32 %v2530_v38, %v8814_v6  ;;  %v2526_v47 = vpop.permute.xlu1 %2525  ;;  %v5421_v32 = vadd.f32 -0.002, %v4434_v52  ;;  %v5994_v45 = vld [vmem:[%s6249_s25 + $0xd0] sm:$0xff] }
 0x37c   : > { %v9481_v5 = vmul.f32 %v3508_v36, %v3380_v3  ;;  %v9483_v13 = vpop.eup %5728  ;;  %v3174_v18 = vadd.f32 1.0, %v3046_v23  ;;  %v3048_v31 = vadd.f32 %v2920_v20, %v12178_v17  ;;  %v2922_v43 = vmul.f32 %v2794_v55, %v2794_v55  ;;  %v12179_v23 = vld [vmem:[#allocation105_spill] sm:$0xff]  ;;  %v5995_v20 = vld [vmem:[%s6249_s25 + $0xf8] sm:$0xff] }
 0x37d   : > { %12177 = vst [vmem:[#allocation71_spill] sm:$0xff] %v9483_v13  ;;  %v2795_v49 = vsub.f32 %v2526_v47, %v8814_v6  ;;  %v2538_v63 = vpop.permute.xlu0 %2537  ;;  %3833 = vperm.xlu1 %5569, %v5994_v45   ;;  %v5426_v8 = vadd.f32 -0.002, %v4439_v33  ;;  %v9488_v54 = vmul.f32 %v3513_v24, %v3385_v7  ;;  %v3510_v38 = vmul.f32 %v3382_v42, %v3382_v42 }
 0x37e   : > { %v3387_v3 = vmul.f32 %v9165_v0, %v9165_v0  ;;  %v9492_v52 = vpop.eup %5730  ;;  %5740 = vrsqrt.f32 %v3171_v19  ;;  %v3173_v36 = vadd.f32 1.0, %v3045_v25  ;;  %v3047_v13 = vadd.f32 %v2919_v56, %v12179_v23  ;;  %v12182_v25 = vld [vmem:[#allocation107_spill] sm:$0xff] }
 0x37f   : > { %v2921_v17 = vmul.f32 %v2793_v15, %v2793_v15  ;;  %3853 = vperm.xlu0 %5568, %v5995_v20   ;;  %v2924_v55 = vmul.f32 %v2796_v12, %v2796_v12  ;;  %v2798_v47 = vsub.f32 %v2538_v63, %v8814_v6  ;;  %v2534_v33 = vpop.permute.xlu1 %2533  ;;  %v9498_v7 = vmul.f32 %v5421_v32, %v9443_v50  ;;  %v5996_v12 = vld [vmem:[%s6249_s25 + $0xe0] sm:$0xff] }
 0x380   : > { %v4436_v24 = vmul.f32 0.001, %v9481_v5  ;;  %v9501_v45 = vpop.eup %5732  ;;  %5742 = vrsqrt.f32 %v3174_v18  ;;  %v3176_v19 = vadd.f32 1.0, %v3048_v31  ;;  %v3050_v56 = vadd.f32 %v2922_v43, %v12182_v25 }
 0x381   : > { %12180 = vst [vmem:[#allocation131_spill] sm:$0xff] %v9498_v7  ;;  %12181 = vst [vmem:[#allocation126_spill] sm:$0xff] %v9501_v45  ;;  %v2923_v23 = vmul.f32 %v2795_v49, %v2795_v49  ;;  %v2546_v15 = vpop.permute.xlu0 %2545  ;;  %v9504_v0 = vpop.eup %5734  ;;  %3841 = vperm.xlu1 %5569, %v5996_v12   ;;  %v9508_v63 = vmul.f32 %v5426_v8, %v9454_v29  ;;  %v4441_v50 = vmul.f32 0.001, %v9488_v54  ;;  %5744 = vrsqrt.f32 %v3173_v36  ;;  %v12185_v45 = vld [vmem:[#allocation109_spill] sm:$0xff]  ;;  %v12187_v12 = vld [vmem:[#allocation111_spill] sm:$0xff] }
 0x382   : > { %12183 = vst [vmem:[#allocation57_spill] sm:$0xff] %v9504_v0  ;;  %v9511_v32 = vmul.f32 %v3510_v38, %v3382_v42  ;;  %v3515_v20 = vmul.f32 %v3387_v3, %v3387_v3  ;;  %v3175_v18 = vadd.f32 1.0, %v3047_v13  ;;  %v3049_v31 = vadd.f32 %v2921_v17, %v12185_v45  ;;  %v5997_v49 = vld [vmem:[%s6249_s25 + $0x108] sm:$0xff] }
 0x383   : > { %12184 = vst [vmem:[#allocation60_spill] sm:$0xff] %v9508_v63  ;;  %v2797_v43 = vsub.f32 %v2534_v33, %v8814_v6  ;;  %3861 = vperm.xlu0 %5568, %v5997_v49   ;;  %v9516_v25 = vpop.eup %5736  ;;  %v3052_v59 = vadd.f32 %v2924_v55, %v12187_v12  ;;  %v2926_v29 = vmul.f32 %v2798_v47, %v2798_v47  ;;  %v2542_v8 = vpop.permute.xlu1 %2541  ;;  %v5423_v63 = vadd.f32 -0.002, %v4436_v24  ;;  %v12188_v38 = vld [vmem:[#allocation106_spill] sm:$0xff] }
 0x384   : > { %12186 = vst [vmem:[#allocation130_spill] sm:$0xff] %v9516_v25  ;;  %v3384_v42 = vmul.f32 %v9125_v57, %v9125_v57  ;;  %5746 = vrsqrt.f32 %v3176_v19  ;;  %v3178_v13 = vadd.f32 1.0, %v3050_v56  ;;  %v3051_v36 = vadd.f32 %v2923_v23, %v12188_v38  ;;  %v12189_v17 = vld [vmem:[#allocation186_spill] sm:$0xff] }
 0x385   : > { %v2800_v45 = vsub.f32 %v2546_v15, %v12189_v17  ;;  %v2554_v33 = vpop.permute.xlu0 %2553  ;;  %v9523_v7 = vpop.eup %5738  ;;  %v5998_v49 = vld [vmem:[%s6249_s25 + $0xf0] sm:$0xff]  ;;  %v5428_v41 = vadd.f32 -0.002, %v4441_v50  ;;  %v4438_v55 = vmul.f32 0.001, %v9511_v32  ;;  %v9527_v47 = vmul.f32 %v3515_v20, %v3387_v3  ;;  %v5999_v15 = vld [vmem:[%s6249_s25 + $0x118] sm:$0xff] }
 0x386   : > { %12190 = vst [vmem:[#allocation64_spill] sm:$0xff] %v9523_v7  ;;  %3849 = vperm.xlu1 %5569, %v5998_v49   ;;  %v3389_v24 = vmul.f32 %v9184_v51, %v9184_v51  ;;  %5748 = vrsqrt.f32 %v3175_v18  ;;  %v3177_v19 = vadd.f32 1.0, %v3049_v31  ;;  %v2925_v56 = vmul.f32 %v2797_v43, %v2797_v43  ;;  %v12191_v38 = vld [vmem:[#allocation110_spill] sm:$0xff] }
 0x387   : > { %v2799_v23 = vsub.f32 %v2542_v8, %v8814_v6  ;;  %3869 = vperm.xlu0 %5568, %v5999_v15   ;;  %v3180_v12 = vadd.f32 1.0, %v3052_v59  ;;  %v3054_v57 = vadd.f32 %v2926_v29, %v12191_v38  ;;  %v2550_v49 = vpop.permute.xlu1 %2549  ;;  %v9535_v50 = vmul.f32 %v5423_v63, %v9481_v5  ;;  %v6000_v6 = vld [vmem:[%s6249_s25 + $0x100] sm:$0xff] }
 0x388   : > { %v3512_v3 = vmul.f32 %v3384_v42, %v3384_v42  ;;  %v9537_v20 = vpop.eup %5740  ;;  %5750 = vrsqrt.f32 %v3178_v13  ;;  %v3179_v18 = vadd.f32 1.0, %v3051_v36  ;;  %v2928_v31 = vmul.f32 %v2800_v45, %v2800_v45  ;;  %v12194_v15 = vld [vmem:[#allocation96_spill] sm:$0xff] }
 0x389   : > { %12192 = vst [vmem:[#allocation75_spill] sm:$0xff] %v9537_v20  ;;  %v2802_v43 = vsub.f32 %v2554_v33, %v12189_v17  ;;  %v2562_v51 = vpop.permute.xlu0 %2561  ;;  %v9542_v59 = vmul.f32 %v5428_v41, %v9488_v54  ;;  %v5425_v29 = vadd.f32 -0.002, %v4438_v55  ;;  %v4443_v8 = vmul.f32 0.001, %v9527_v47  ;;  %v6001_v33 = vld [vmem:[%s6249_s25 + $0x128] sm:$0xff] }
 0x38a   : > { %3857 = vperm.xlu1 %5569, %v6000_v6   ;;  %v3517_v5 = vmul.f32 %v3389_v24, %v3389_v24  ;;  %v9545_v63 = vpop.eup %5742  ;;  %5752 = vrsqrt.f32 %v3177_v19  ;;  %v3053_v13 = vadd.f32 %v2925_v56, %v12194_v15  ;;  %v2927_v36 = vmul.f32 %v2799_v23, %v2799_v23  ;;  %v12205_v20 = vld [vmem:[#allocation25_spill] sm:$0xff] }
 0x38b   : > { %12193 = vst [vmem:[#allocation68_spill] sm:$0xff] %v9545_v63  ;;  %v2801_v45 = vsub.f32 %v2550_v49, %v12189_v17  ;;  %3877 = vperm.xlu0 %5568, %v6001_v33   ;;  %5754 = vrsqrt.f32 %v3180_v12  ;;  %v3182_v38 = vadd.f32 1.0, %v3054_v57  ;;  %v2804_v41 = vsub.f32 %v2562_v51, %v12189_v17  ;;  %v2558_v54 = vpop.permute.xlu1 %2557  ;;  %v9553_v6 = vpop.eup %5744  ;;  %v12196_v63 = vld [vmem:[#allocation114_spill] sm:$0xff] }
 0x38c   : > { %v9551_v55 = vmul.f32 %v3512_v3, %v3384_v42  ;;  %12195 = vst [vmem:[#allocation74_spill] sm:$0xff] %v9553_v6  ;;  %5756 = vrsqrt.f32 %v3179_v18  ;;  %v3056_v19 = vadd.f32 %v2928_v31, %v12196_v63  ;;  %v2930_v56 = vmul.f32 %v2802_v43, %v2802_v43  ;;  %v6002_v49 = vld [vmem:[%s6249_s25 + $0x110] sm:$0xff]  ;;  %v12201_v6 = vld [vmem:[#allocation17_spill] sm:$0xff] }
 0x38d   : > { %v2570_v15 = vpop.permute.xlu0 %2569  ;;  %v3386_v23 = vmul.f32 %v9139_v9, %v9139_v9  ;;  %v9560_v57 = vmul.f32 %v5425_v29, %v9511_v32  ;;  %v5430_v51 = vadd.f32 -0.002, %v4443_v8  ;;  %v9562_v12 = vmul.f32 %v3517_v5, %v3389_v24  ;;  %v12199_v31 = vld [vmem:[#allocation115_spill] sm:$0xff] }
 0x38e   : > { %3865 = vperm.xlu1 %5569, %v6002_v49   ;;  %v3391_v42 = vmul.f32 %v9204_v53, %v9204_v53  ;;  %v9566_v3 = vpop.eup %5746  ;;  %v3181_v18 = vadd.f32 1.0, %v3053_v13  ;;  %v3055_v43 = vadd.f32 %v2927_v36, %v12199_v31  ;;  %v2929_v63 = vmul.f32 %v2801_v45, %v2801_v45  ;;  %v6003_v49 = vld [vmem:[%s6249_s25 + $0x138] sm:$0xff]  ;;  %v6004_v45 = vld [vmem:[%s7234_s29 + $0x8] sm:$0xf] }
 0x38f   : > { %12197 = vst [vmem:[#allocation78_spill] sm:$0xff] %v9560_v57  ;;  %12198 = vst [vmem:[#allocation79_spill] sm:$0xff] %v9566_v3  ;;  %v2803_v33 = vsub.f32 %v2558_v54, %v12189_v17  ;;  %3885 = vperm.xlu0 %5568, %v6003_v49   ;;  %5758 = vrsqrt.f32 %v3182_v38  ;;  %v2932_v32 = vmul.f32 %v2804_v41, %v2804_v41  ;;  %v2566_v29 = vpop.permute.xlu1 %2565  ;;  %v4440_v8 = vmul.f32 0.001, %v9551_v55  ;;  %v6005_v41 = vld [vmem:[%s6249_s25 + $0x120] sm:$0xff] }
 0x390   : > { %v2806_v24 = vsub.f32 %v2570_v15, %v12189_v17  ;;  %v9573_v5 = vpop.eup %5748  ;;  %v3184_v3 = vadd.f32 1.0, %v3056_v19  ;;  %v3058_v13 = vadd.f32 %v2930_v56, %v12201_v6  ;;  %v9578_v54 = vrot.slane %v6004_v45, %v9240_v62  ;;  %v12204_v56 = vld [vmem:[#allocation119_spill] sm:$0xff]  ;;  %v6006_v45 = vld [vmem:[%s6249_s25 + $0x148] sm:$0xff] }
 0x391   : > { %12200 = vst [vmem:[#allocation83_spill] sm:$0xff] %v9573_v5  ;;  %v2578_v36 = vpop.permute.xlu0 %2577  ;;  %v3514_v31 = vmul.f32 %v3386_v23, %v3386_v23  ;;  %v2805_v38 = vsub.f32 %v2566_v29, %v12189_v17  ;;  %v9583_v15 = vmul.f32 %v5430_v51, %v9527_v47  ;;  %v4445_v49 = vmul.f32 0.001, %v9562_v12 }
 0x392   : > { %3873 = vperm.xlu1 %5569, %v6005_v41   ;;  %v3519_v5 = vmul.f32 %v3391_v42, %v3391_v42  ;;  %v9586_v19 = vpop.eup %5750  ;;  %5760 = vrsqrt.f32 %v3181_v18  ;;  %v3183_v6 = vadd.f32 1.0, %v3055_v43  ;;  %v3057_v53 = vadd.f32 %v2929_v63, %v12204_v56 }
 0x393   : > { %12202 = vst [vmem:[#allocation61_spill] sm:$0xff] %v9583_v15  ;;  %12203 = vst [vmem:[#allocation87_spill] sm:$0xff] %v9586_v19  ;;  %v2931_v9 = vmul.f32 %v2803_v33, %v2803_v33  ;;  %3893 = vperm.xlu0 %5568, %v6006_v45   ;;  %v3060_v29 = vadd.f32 %v2932_v32, %v12205_v20  ;;  %v2934_v7 = vmul.f32 %v2806_v24, %v2806_v24  ;;  %v2574_v47 = vpop.permute.xlu1 %2573  ;;  %v6007_v32 = vld [vmem:[%s6249_s25 + $0x130] sm:$0xff]  ;;  %v6008_v45 = vld [vmem:[%s6249_s25 + $0x158] sm:$0xff] }
 0x394   : > { %v2808_v41 = vsub.f32 %v2578_v36, %v12189_v17  ;;  %v5427_v51 = vadd.f32 -0.002, %v4440_v8  ;;  %v9592_v15 = vpop.eup %5752  ;;  %5762 = vrsqrt.f32 %v3184_v3  ;;  %v3186_v57 = vadd.f32 1.0, %v3058_v13  ;;  %v12209_v13 = vld [vmem:[#allocation24_spill] sm:$0xff] }
 0x395   : > { %12206 = vst [vmem:[#allocation82_spill] sm:$0xff] %v9592_v15  ;;  %v2586_v18 = vpop.permute.xlu0 %2585  ;;  %v9594_v43 = vmul.f32 %v3514_v31, %v3386_v23  ;;  %v3388_v63 = vmul.f32 %v9159_v60, %v9159_v60  ;;  %v9598_v33 = vpop.eup %5754  ;;  %v2933_v56 = vmul.f32 %v2805_v38, %v2805_v38  ;;  %v2807_v20 = vsub.f32 %v2574_v47, %v12189_v17  ;;  %v12210_v38 = vld [vmem:[#allocation174_spill] sm:$0xff] }
 0x396   : > { %12207 = vst [vmem:[#allocation91_spill] sm:$0xff] %v9598_v33  ;;  %3881 = vperm.xlu1 %5569, %v6007_v32   ;;  %v5432_v24 = vadd.f32 -0.002, %v4445_v49  ;;  %v9602_v8 = vmul.f32 %v3519_v5, %v3391_v42  ;;  %v9604_v36 = vpop.eup %5756  ;;  %5764 = vrsqrt.f32 %v3183_v6  ;;  %v3185_v3 = vadd.f32 1.0, %v3057_v53 }
 0x397   : > { %12208 = vst [vmem:[#allocation86_spill] sm:$0xff] %v9604_v36  ;;  %v3059_v23 = vadd.f32 %v2931_v9, %v12209_v13  ;;  %v2810_v31 = vsub.f32 %v2586_v18, %v12189_v17  ;;  %3901 = vperm.xlu0 %5568, %v6008_v45   ;;  %v3188_v33 = vadd.f32 1.0, %v3060_v29  ;;  %v3062_v19 = vadd.f32 %v2934_v7, %v12210_v38  ;;  %v2582_v15 = vpop.permute.xlu1 %2581  ;;  %v12212_v18 = vld [vmem:[#allocation127_spill] sm:$0xff]  ;;  %v6009_v7 = vld [vmem:[%s6249_s25 + $0x140] sm:$0xff]  ;;  %v6010_v45 = vld [vmem:[%s6249_s25 + $0x168] sm:$0xff] }
 0x398   : > { %v2936_v47 = vmul.f32 %v2808_v41, %v2808_v41  ;;  %v9611_v49 = vmul.f32 %v5427_v51, %v9551_v55  ;;  %5766 = vrsqrt.f32 %v3186_v57  ;;  %v4442_v53 = vmul.f32 0.001, %v9594_v43 }
 0x399   : > { %v2594_v42 = vpop.permute.xlu0 %2593  ;;  %v3516_v5 = vmul.f32 %v3388_v63, %v3388_v63  ;;  %v3393_v9 = vmul.f32 %v9221_v30, %v9221_v30  ;;  %v9616_v6 = vpop.eup %5758  ;;  %v3061_v29 = vadd.f32 %v2933_v56, %v12212_v18  ;;  %v2935_v32 = vmul.f32 %v2807_v20, %v2807_v20 }
 0x39a   : > { %12211 = vst [vmem:[#allocation95_spill] sm:$0xff] %v9616_v6  ;;  %3889 = vperm.xlu1 %5569, %v6009_v7   ;;  %v9621_v41 = vmul.f32 %v5432_v24, %v9562_v12  ;;  %v4447_v55 = vmul.f32 0.001, %v9602_v8  ;;  %5768 = vrsqrt.f32 %v3185_v3  ;;  %v3187_v57 = vadd.f32 1.0, %v3059_v23  ;;  %v12213_v6 = vld [vmem:[#allocation53_spill] sm:$0xff] }
 0x39b   : > { %v2938_v51 = vmul.f32 %v2810_v31, %v2810_v31  ;;  %v2809_v13 = vsub.f32 %v2582_v15, %v12189_v17  ;;  %3909 = vperm.xlu0 %5568, %v6010_v45   ;;  %5770 = vrsqrt.f32 %v3188_v33  ;;  %v3190_v38 = vadd.f32 1.0, %v3062_v19  ;;  %v2590_v20 = vpop.permute.xlu1 %2589  ;;  %v12215_v45 = vld [vmem:[#allocation49_spill] sm:$0xff] }
 0x39c   : > { %v3064_v56 = vadd.f32 %v2936_v47, %v12213_v6  ;;  %v3390_v18 = vmul.f32 %v9175_v10, %v9175_v10  ;;  %v9629_v12 = vpop.eup %5760  ;;  %v2812_v24 = vsub.f32 %v2594_v42, %v12189_v17  ;;  %v5429_v23 = vadd.f32 -0.002, %v4442_v53  ;;  %v6011_v47 = vld [vmem:[%s6249_s25 + $0x150] sm:$0xff]  ;;  %v6012_v53 = vld [vmem:[%s6249_s25 + $0x178] sm:$0xff] }
 0x39d   : > { %12214 = vst [vmem:[#allocation90_spill] sm:$0xff] %v9629_v12  ;;  %v2602_v3 = vpop.permute.xlu0 %2601  ;;  %v9632_v31 = vmul.f32 %v3516_v5, %v3388_v63  ;;  %v3521_v15 = vmul.f32 %v3393_v9, %v3393_v9  ;;  %v3189_v7 = vadd.f32 1.0, %v3061_v29  ;;  %v3063_v33 = vadd.f32 %v2935_v32, %v12215_v45  ;;  %v12217_v12 = vld [vmem:[#allocation56_spill] sm:$0xff] }
 0x39e   : > { %v2811_v19 = vsub.f32 %v2590_v20, %v12189_v17  ;;  %3897 = vperm.xlu1 %5569, %v6011_v47   ;;  %v5434_v6 = vadd.f32 -0.002, %v4447_v55  ;;  %v9637_v36 = vpop.eup %5762  ;;  %5772 = vrsqrt.f32 %v3187_v57  ;;  %v3066_v10 = vadd.f32 %v2938_v51, %v12217_v12 }
 0x39f   : > { %12216 = vst [vmem:[#allocation76_spill] sm:$0xff] %v9637_v36  ;;  %v2937_v42 = vmul.f32 %v2809_v13, %v2809_v13  ;;  %v2814_v30 = vsub.f32 %v2602_v3, %v12189_v17  ;;  %3917 = vperm.xlu0 %5568, %v6012_v53   ;;  %5774 = vrsqrt.f32 %v3190_v38  ;;  %v3192_v63 = vadd.f32 1.0, %v3064_v56  ;;  %v2598_v5 = vpop.permute.xlu1 %2597  ;;  %v6013_v3 = vld [vmem:[%s6249_s25 + $0x160] sm:$0xff] }
 0x3a0   : > { %v3518_v29 = vmul.f32 %v3390_v18, %v3390_v18  ;;  %v3395_v32 = vmul.f32 %v9245_v44, %v9245_v44  ;;  %v9644_v20 = vpop.eup %5764  ;;  %v2940_v55 = vmul.f32 %v2812_v24, %v2812_v24  ;;  %v9647_v51 = vmul.f32 %v5429_v23, %v9594_v43  ;;  %v12221_v53 = vld [vmem:[#allocation173_spill] sm:$0xff] }
 0x3a1   : > { %12218 = vst [vmem:[#allocation94_spill] sm:$0xff] %v9644_v20  ;;  %v2610_v57 = vpop.permute.xlu0 %2609  ;;  %v4444_v13 = vmul.f32 0.001, %v9632_v31  ;;  %v9650_v12 = vmul.f32 %v3521_v15, %v3393_v9  ;;  %5776 = vrsqrt.f32 %v3189_v7  ;;  %v3191_v38 = vadd.f32 1.0, %v3063_v33  ;;  %v6014_v23 = vld [vmem:[%s6249_s25 + $0x188] sm:$0xff] }
 0x3a2   : > { %12219 = vst [vmem:[#allocation98_spill] sm:$0xff] %v9647_v51  ;;  %v2939_v56 = vmul.f32 %v2811_v19, %v2811_v19  ;;  %3905 = vperm.xlu1 %5569, %v6013_v3   ;;  %v9654_v45 = vmul.f32 %v5434_v6, %v9602_v8  ;;  %v9656_v47 = vpop.eup %5766  ;;  %v3194_v24 = vadd.f32 1.0, %v3066_v10  ;;  %v3065_v20 = vadd.f32 %v2937_v42, %v12221_v53  ;;  %v12223_v19 = vld [vmem:[#allocation175_spill] sm:$0xff]  ;;  %v6018_v51 = vld [vmem:[%s6249_s25 + $0x1a8] sm:$0xff] }
 0x3a3   : > { %v2942_v44 = vmul.f32 %v2814_v30, %v2814_v30  ;;  %v2813_v43 = vsub.f32 %v2598_v5, %v12189_v17  ;;  %3925 = vperm.xlu0 %5568, %v6014_v23   ;;  %5778 = vrsqrt.f32 %v3192_v63  ;;  %v2816_v9 = vsub.f32 %v2610_v57, %v9111_v39  ;;  %v2606_v15 = vpop.permute.xlu1 %2605  ;;  %v12225_v63 = vld [vmem:[#allocation77_spill] sm:$0xff]  ;;  %v12226_v23 = vld [vmem:[#allocation84_spill] sm:$0xff] }
 0x3a4   : > { %12220 = vst [vmem:[#allocation99_spill] sm:$0xff] %v9654_v45  ;;  %v9662_v7 = vmul.f32 %v3518_v29, %v3390_v18  ;;  %v3523_v33 = vmul.f32 %v3395_v32, %v3395_v32  ;;  %v9664_v8 = vpop.eup %5768  ;;  %v3068_v6 = vadd.f32 %v2940_v55, %v12223_v19  ;;  %v2815_v10 = vsub.f32 %v2606_v15, %v12189_v17  ;;  %v6015_v29 = vld [vmem:[%s6249_s25 + $0x170] sm:$0xff]  ;;  %v12229_v45 = vld [vmem:[#allocation80_spill] sm:$0xff] }
 0x3a5   : > { %12222 = vst [vmem:[#allocation134_spill] sm:$0xff] %v9664_v8  ;;  %v2618_v30 = vpop.permute.xlu0 %2617  ;;  %v5431_v42 = vadd.f32 -0.002, %v4444_v13  ;;  %v4449_v5 = vmul.f32 0.001, %v9650_v12  ;;  %v9669_v3 = vpop.eup %5770  ;;  %5780 = vrsqrt.f32 %v3191_v38  ;;  %v3067_v57 = vadd.f32 %v2939_v56, %v12225_v63  ;;  %v6016_v13 = vld [vmem:[%s6249_s25 + $0x198] sm:$0xff] }
 0x3a6   : > { %12224 = vst [vmem:[#allocation73_spill] sm:$0xff] %v9669_v3  ;;  %v2818_v18 = vsub.f32 %v2618_v30, %v9111_v39  ;;  %3913 = vperm.xlu1 %5569, %v6015_v29   ;;  %v3392_v53 = vmul.f32 %v9189_v11, %v9189_v11  ;;  %5782 = vrsqrt.f32 %v3194_v24  ;;  %v3193_v55 = vadd.f32 1.0, %v3065_v20 }
 0x3a7   : > { %v3070_v17 = vadd.f32 %v2942_v44, %v12226_v23  ;;  %v2941_v15 = vmul.f32 %v2813_v43, %v2813_v43  ;;  %3933 = vperm.xlu0 %5568, %v6016_v13   ;;  %v2944_v19 = vmul.f32 %v2816_v9, %v2816_v9  ;;  %v2614_v60 = vpop.permute.xlu1 %2613  ;;  %v4446_v38 = vmul.f32 0.001, %v9662_v7 }
 0x3a8   : > { %v9679_v56 = vmul.f32 %v3523_v33, %v3395_v32  ;;  %v3397_v30 = vmul.f32 %v9256_v1, %v9256_v1  ;;  %v9683_v63 = vpop.eup %5772  ;;  %v3196_v24 = vadd.f32 1.0, %v3068_v6  ;;  %v2943_v20 = vmul.f32 %v2815_v10, %v2815_v10  ;;  %v6017_v32 = vld [vmem:[%s6249_s25 + $0x180] sm:$0xff] }
 0x3a9   : > { %12227 = vst [vmem:[#allocation81_spill] sm:$0xff] %v9683_v63  ;;  %v2817_v44 = vsub.f32 %v2614_v60, %v9111_v39  ;;  %v2626_v43 = vpop.permute.xlu0 %2625  ;;  %v5436_v29 = vadd.f32 -0.002, %v4449_v5  ;;  %v9686_v23 = vpop.eup %5774  ;;  %v3195_v9 = vadd.f32 1.0, %v3067_v57  ;;  %v2946_v13 = vmul.f32 %v2818_v18, %v2818_v18  ;;  %v12231_v10 = vld [vmem:[#allocation172_spill] sm:$0xff] }
 0x3aa   : > { %12228 = vst [vmem:[#allocation103_spill] sm:$0xff] %v9686_v23  ;;  %v2820_v11 = vsub.f32 %v2626_v43, %v9111_v39  ;;  %3921 = vperm.xlu1 %5569, %v6017_v32   ;;  %v3520_v33 = vmul.f32 %v3392_v53, %v3392_v53  ;;  %5784 = vrsqrt.f32 %v3193_v55  ;;  %v3198_v1 = vadd.f32 1.0, %v3070_v17  ;;  %v12232_v55 = vld [vmem:[#allocation85_spill] sm:$0xff] }
 0x3ab   : > { %v3069_v63 = vadd.f32 %v2941_v15, %v12229_v45  ;;  %3941 = vperm.xlu0 %5568, %v6018_v51   ;;  %v9693_v6 = vmul.f32 %v5431_v42, %v9632_v31  ;;  %v9695_v60 = vpop.eup %5776  ;;  %v3072_v5 = vadd.f32 %v2944_v19, %v12231_v10  ;;  %v2622_v57 = vpop.permute.xlu1 %2621  ;;  %v5433_v18 = vadd.f32 -0.002, %v4446_v38  ;;  %v12234_v42 = vld [vmem:[#allocation116_spill] sm:$0xff]  ;;  %v6019_v10 = vld [vmem:[%s6249_s25 + $0x190] sm:$0xff] }
 0x3ac   : > { %12230 = vst [vmem:[#allocation88_spill] sm:$0xff] %v9695_v60  ;;  %v4451_v43 = vmul.f32 0.001, %v9679_v56  ;;  %v3525_v32 = vmul.f32 %v3397_v30, %v3397_v30  ;;  %5786 = vrsqrt.f32 %v3196_v24  ;;  %v3071_v17 = vadd.f32 %v2943_v20, %v12232_v55  ;;  %v6020_v20 = vld [vmem:[%s6249_s25 + $0x1b8] sm:$0xff] }
 0x3ad   : > { %v2945_v45 = vmul.f32 %v2817_v44, %v2817_v44  ;;  %v2634_v15 = vpop.permute.xlu0 %2633  ;;  %v9701_v51 = vmul.f32 %v5436_v29, %v9650_v12  ;;  %v9703_v31 = vpop.eup %5778  ;;  %5788 = vrsqrt.f32 %v3195_v9  ;;  %v3074_v60 = vadd.f32 %v2946_v13, %v12234_v42 }
 0x3ae   : > { %12233 = vst [vmem:[#allocation89_spill] sm:$0xff] %v9703_v31  ;;  %v2948_v19 = vmul.f32 %v2820_v11, %v2820_v11  ;;  %3929 = vperm.xlu1 %5569, %v6019_v10   ;;  %v9707_v38 = vmul.f32 %v3520_v33, %v3392_v53  ;;  %5790 = vrsqrt.f32 %v3198_v1  ;;  %v3197_v23 = vadd.f32 1.0, %v3069_v63  ;;  %v12237_v33 = vld [vmem:[#allocation113_spill] sm:$0xff]  ;;  %v6021_v10 = vld [vmem:[%s7234_s29 + $0xc] sm:$0xf] }
 0x3af   : > { %v2819_v24 = vsub.f32 %v2622_v57, %v9111_v39  ;;  %3949 = vperm.xlu0 %5568, %v6020_v20   ;;  %v3394_v12 = vmul.f32 %v9213_v21, %v9213_v21  ;;  %v9713_v44 = vpop.eup %5780  ;;  %v3200_v29 = vadd.f32 1.0, %v3072_v5  ;;  %v2630_v9 = vpop.permute.xlu1 %2629  ;;  %v9716_v11 = vmul.f32 %v5433_v18, %v9662_v7  ;;  %v6022_v18 = vld [vmem:[%s6249_s25 + $0x1a0] sm:$0xff] }
 0x3b0   : > { %12235 = vst [vmem:[#allocation93_spill] sm:$0xff] %v9713_v44  ;;  %v5438_v53 = vadd.f32 -0.002, %v4451_v43  ;;  %v9718_v13 = vmul.f32 %v3525_v32, %v3397_v30  ;;  %v9720_v1 = vpop.eup %5782  ;;  %v3199_v63 = vadd.f32 1.0, %v3071_v17  ;;  %v3073_v57 = vadd.f32 %v2945_v45, %v12237_v33  ;;  %v12238_v44 = vld [vmem:[#allocation124_spill] sm:$0xff]  ;;  %v6023_v45 = vld [vmem:[%s6249_s25 + $0x1c8] sm:$0xff] }
 0x3b1   : > { %12236 = vst [vmem:[#allocation102_spill] sm:$0xff] %v9720_v1  ;;  %v2822_v55 = vsub.f32 %v2634_v15, %v9111_v39  ;;  %v2642_v42 = vpop.permute.xlu0 %2641  ;;  %v9726_v20 = vrot.slane %v6021_v10, %v9240_v62  ;;  %v3202_v5 = vadd.f32 1.0, %v3074_v60  ;;  %v3076_v7 = vadd.f32 %v2948_v19, %v12238_v44 }
 0x3b2   : > { %3937 = vperm.xlu1 %5569, %v6022_v18   ;;  %v4448_v30 = vmul.f32 0.001, %v9707_v38  ;;  %v3399_v43 = vmul.f32 %v9277_v28, %v9277_v28  ;;  %5792 = vrsqrt.f32 %v3197_v23  ;;  %v2947_v32 = vmul.f32 %v2819_v24, %v2819_v24 }
 0x3b3   : > { %v2821_v17 = vsub.f32 %v2630_v9, %v9111_v39  ;;  %3957 = vperm.xlu0 %5568, %v6023_v45   ;;  %v3522_v15 = vmul.f32 %v3394_v12, %v3394_v12  ;;  %5794 = vrsqrt.f32 %v3200_v29  ;;  %v2824_v60 = vsub.f32 %v2642_v42, %v9111_v39  ;;  %v2638_v33 = vpop.permute.xlu1 %2637  ;;  %v6024_v45 = vld [vmem:[%s6249_s25 + $0x1b0] sm:$0xff] }
 0x3b4   : > { %v9737_v19 = vmul.f32 %v5438_v53, %v9679_v56  ;;  %v4453_v44 = vmul.f32 0.001, %v9718_v13  ;;  %v9740_v10 = vpop.eup %5784  ;;  %5796 = vrsqrt.f32 %v3199_v63  ;;  %v3201_v23 = vadd.f32 1.0, %v3073_v57  ;;  %v12242_v53 = vld [vmem:[#allocation117_spill] sm:$0xff]  ;;  %v6025_v63 = vld [vmem:[%s6249_s25 + $0x1d8] sm:$0xff] }
 0x3b5   : > { %12240 = vst [vmem:[#allocation92_spill] sm:$0xff] %v9740_v10  ;;  %v2950_v24 = vmul.f32 %v2822_v55, %v2822_v55  ;;  %v2650_v9 = vpop.permute.xlu0 %2649  ;;  %v3396_v18 = vmul.f32 %v9229_v22, %v9229_v22  ;;  %5798 = vrsqrt.f32 %v3202_v5  ;;  %v3204_v29 = vadd.f32 1.0, %v3076_v7  ;;  %v6027_v22 = vld [vmem:[%s6249_s25 + $0x1e8] sm:$0xff] }
 0x3b6   : > { %12239 = vst [vmem:[#allocation100_spill] sm:$0xff] %v9737_v19  ;;  %3945 = vperm.xlu1 %5569, %v6024_v45   ;;  %v5435_v42 = vadd.f32 -0.002, %v4448_v30  ;;  %v3527_v1 = vmul.f32 %v3399_v43, %v3399_v43  ;;  %v9745_v56 = vpop.eup %5786  ;;  %v3075_v31 = vadd.f32 %v2947_v32, %v12242_v53  ;;  %v2949_v28 = vmul.f32 %v2821_v17, %v2821_v17  ;;  %v12245_v17 = vld [vmem:[#allocation121_spill] sm:$0xff] }
 0x3b7   : > { %12241 = vst [vmem:[#allocation104_spill] sm:$0xff] %v9745_v56  ;;  %v2823_v10 = vsub.f32 %v2638_v33, %v9111_v39  ;;  %3965 = vperm.xlu0 %5568, %v6025_v63   ;;  %v9750_v57 = vmul.f32 %v3522_v15, %v3394_v12  ;;  %v9752_v55 = vpop.eup %5788  ;;  %v2952_v5 = vmul.f32 %v2824_v60, %v2824_v60  ;;  %v2646_v45 = vpop.permute.xlu1 %2645  ;;  %v5440_v30 = vadd.f32 -0.002, %v4453_v44  ;;  %v6026_v63 = vld [vmem:[%s6249_s25 + $0x1c0] sm:$0xff] }
 0x3b8   : > { %12243 = vst [vmem:[#allocation97_spill] sm:$0xff] %v9752_v55  ;;  %v2826_v7 = vsub.f32 %v2650_v9, %v9111_v39  ;;  %v3401_v56 = vmul.f32 %v9300_v61, %v9300_v61  ;;  %v9757_v32 = vpop.eup %5790  ;;  %5800 = vrsqrt.f32 %v3201_v23  ;;  %v3078_v33 = vadd.f32 %v2950_v24, %v12245_v17  ;;  %v12247_v61 = vld [vmem:[#allocation125_spill] sm:$0xff] }
 0x3b9   : > { %12244 = vst [vmem:[#allocation108_spill] sm:$0xff] %v9757_v32  ;;  %v2825_v53 = vsub.f32 %v2646_v45, %v9111_v39  ;;  %v2658_v12 = vpop.permute.xlu0 %2657  ;;  %v3524_v15 = vmul.f32 %v3396_v18, %v3396_v18  ;;  %5802 = vrsqrt.f32 %v3204_v29  ;;  %v9764_v44 = vmul.f32 %v5435_v42, %v9707_v38  ;;  %v12248_v45 = vld [vmem:[#allocation129_spill] sm:$0xff] }
 0x3ba   : > { %v2828_v60 = vsub.f32 %v2658_v12, %v9111_v39  ;;  %3953 = vperm.xlu1 %5569, %v6026_v63   ;;  %v9766_v9 = vmul.f32 %v3527_v1, %v3399_v43  ;;  %v3203_v55 = vadd.f32 1.0, %v3075_v31  ;;  %v3077_v32 = vadd.f32 %v2949_v28, %v12247_v61  ;;  %v6030_v19 = vld [vmem:[%s6249_s25 + $0x1e0] sm:$0xff] }
 0x3bb   : > { %12246 = vst [vmem:[#allocation101_spill] sm:$0xff] %v9764_v44  ;;  %v2951_v23 = vmul.f32 %v2823_v10, %v2823_v10  ;;  %3973 = vperm.xlu0 %5568, %v6027_v22   ;;  %v4450_v24 = vmul.f32 0.001, %v9750_v57  ;;  %v3080_v29 = vadd.f32 %v2952_v5, %v12248_v45  ;;  %v2954_v17 = vmul.f32 %v2826_v7, %v2826_v7  ;;  %v2654_v12 = vpop.permute.xlu1 %2653  ;;  %v6028_v7 = vld [vmem:[%s6249_s25 + $0x1d0] sm:$0xff]  ;;  %v6029_v45 = vld [vmem:[%s6249_s25 + $0x1f8] sm:$0xff] }
 0x3bc   : > { %v9773_v63 = vmul.f32 %v5440_v30, %v9718_v13  ;;  %v3529_v38 = vmul.f32 %v3401_v56, %v3401_v56  ;;  %v9775_v42 = vpop.eup %5792  ;;  %v3206_v1 = vadd.f32 1.0, %v3078_v33  ;;  %v2953_v31 = vmul.f32 %v2825_v53, %v2825_v53  ;;  %v12252_v53 = vld [vmem:[#allocation120_spill] sm:$0xff] }
 0x3bd   : > { %12250 = vst [vmem:[#allocation105_spill] sm:$0xff] %v9775_v42  ;;  %v2666_v28 = vpop.permute.xlu0 %2665  ;;  %v9777_v61 = vmul.f32 %v3524_v15, %v3396_v18  ;;  %v3398_v22 = vmul.f32 %v9252_v35, %v9252_v35  ;;  %v9781_v43 = vpop.eup %5794  ;;  %v2956_v10 = vmul.f32 %v2828_v60, %v2828_v60  ;;  %v2827_v5 = vsub.f32 %v2654_v12, %v9111_v39  ;;  %v12254_v35 = vld [vmem:[#allocation132_spill] sm:$0xff] }
 0x3be   : > { %12249 = vst [vmem:[#allocation112_spill] sm:$0xff] %v9773_v63  ;;  %3961 = vperm.xlu1 %5569, %v6028_v7   ;;  %v4455_v13 = vmul.f32 0.001, %v9766_v9  ;;  %v3403_v30 = vmul.f32 %v9314_v46, %v9314_v46  ;;  %v9788_v33 = vpop.eup %5796  ;;  %5804 = vrsqrt.f32 %v3203_v55  ;;  %v3205_v18 = vadd.f32 1.0, %v3077_v32  ;;  %v12255_v55 = vld [vmem:[#allocation190_spill] sm:$0xff] }
 0x3bf   : > { %12251 = vst [vmem:[#allocation107_spill] sm:$0xff] %v9788_v33  ;;  %v3079_v15 = vadd.f32 %v2951_v23, %v12252_v53  ;;  %3981 = vperm.xlu0 %5568, %v6029_v45   ;;  %v5437_v42 = vadd.f32 -0.002, %v4450_v24  ;;  %v9792_v60 = vpop.eup %5798  ;;  %v3208_v12 = vadd.f32 1.0, %v3080_v29  ;;  %v3082_v7 = vadd.f32 %v2954_v17, %v12254_v35  ;;  %v2662_v63 = vpop.permute.xlu1 %2661  ;;  %v12256_v33 = vld [vmem:[#allocation135_spill] sm:$0xff] }
 0x3c0   : > { %12253 = vst [vmem:[#allocation109_spill] sm:$0xff] %v9792_v60  ;;  %v2830_v21 = vsub.f32 %v2666_v28, %v9111_v39  ;;  %v9796_v46 = vmul.f32 %v3529_v38, %v3401_v56  ;;  %5806 = vrsqrt.f32 %v3206_v1  ;;  %v3081_v32 = vadd.f32 %v2953_v31, %v12255_v55  ;;  %v6031_v56 = vld [vmem:[%s6249_s25 + $0x208] sm:$0xff] }
 0x3c1   : > { %v4452_v23 = vmul.f32 0.001, %v9777_v61  ;;  %v3526_v53 = vmul.f32 %v3398_v22, %v3398_v22  ;;  %v3084_v45 = vadd.f32 %v2956_v10, %v12256_v33  ;;  %v2955_v24 = vmul.f32 %v2827_v5, %v2827_v5 }
 0x3c2   : > { %v3730_v44 = vpop.permute.xlu0 %3729  ;;  %3969 = vperm.xlu1 %5569, %v6030_v19   ;;  %v5442_v29 = vadd.f32 -0.002, %v4455_v13  ;;  %v3531_v35 = vmul.f32 %v3403_v30, %v3403_v30  ;;  %v9802_v17 = vpop.eup %5800  ;;  %5808 = vrsqrt.f32 %v3205_v18  ;;  %v3207_v28 = vadd.f32 1.0, %v3079_v15 }
 0x3c3   : > { %3989 = vperm.xlu0 %5568, %v6031_v56   ;;  %v9806_v38 = vmul.f32 %v5437_v42, %v9750_v57  ;;  %v3400_v1 = vmul.f32 %v9264_v26, %v9264_v26  ;;  %v9810_v31 = vpop.eup %5802  ;;  %5810 = vrsqrt.f32 %v3208_v12  ;;  %v3210_v10 = vadd.f32 1.0, %v3082_v7  ;;  %v2670_v5 = vpop.permute.xlu1 %2669  ;;  %v12259_v42 = vld [vmem:[#allocation136_spill] sm:$0xff]  ;;  %v6032_v26 = vld [vmem:[%s6249_s25 + $0x1f0] sm:$0xff] }
 0x3c4   : > { %12258 = vst [vmem:[#allocation106_spill] sm:$0xff] %v9810_v31  ;;  %v2958_v19 = vmul.f32 %v2830_v21, %v2830_v21  ;;  %v4457_v13 = vmul.f32 0.001, %v9796_v46  ;;  %v3209_v33 = vadd.f32 1.0, %v3081_v32  ;;  %v2829_v18 = vsub.f32 %v2662_v63, %v9111_v39  ;;  %v6033_v32 = vld [vmem:[%s6249_s25 + $0x218] sm:$0xff] }
 0x3c5   : > { %12257 = vst [vmem:[#allocation111_spill] sm:$0xff] %v9806_v38  ;;  %v5439_v15 = vadd.f32 -0.002, %v4452_v23  ;;  %v9814_v55 = vmul.f32 %v3526_v53, %v3398_v22  ;;  %v3212_v57 = vadd.f32 1.0, %v3084_v45  ;;  %v3083_v56 = vadd.f32 %v2955_v24, %v12259_v42  ;;  %v12260_v23 = vld [vmem:[#allocation176_spill] sm:$0xff] }
 0x3c6   : > { %v3742_v38 = vpop.permute.xlu0 %3741  ;;  %3977 = vperm.xlu1 %5569, %v6032_v26   ;;  %v9819_v12 = vmul.f32 %v5442_v29, %v9766_v9  ;;  %v9821_v21 = vmul.f32 %v3531_v35, %v3403_v30  ;;  %5812 = vrsqrt.f32 %v3207_v28  ;;  %v2831_v7 = vsub.f32 %v2670_v5, %v9111_v39  ;;  %v12263_v42 = vld [vmem:[#allocation128_spill] sm:$0xff] }
 0x3c7   : > { %3997 = vperm.xlu0 %5568, %v6033_v32   ;;  %v3528_v63 = vmul.f32 %v3400_v1, %v3400_v1  ;;  %v3405_v22 = vmul.f32 %v9332_v40, %v9332_v40  ;;  %5814 = vrsqrt.f32 %v3210_v10  ;;  %v3086_v53 = vadd.f32 %v2958_v19, %v12260_v23  ;;  %v6034_v19 = vld [vmem:[%s6249_s25 + $0x200] sm:$0xff]  ;;  %v12267_v40 = vld [vmem:[#allocation138_spill] sm:$0xff] }
 0x3c8   : > { %v4272_v26 = vmul.f32 %v9262_v48, %v3730_v44  ;;  %v5444_v45 = vadd.f32 -0.002, %v4457_v13  ;;  %v9829_v9 = vpop.eup %5804  ;;  %5816 = vrsqrt.f32 %v3209_v33  ;;  %v2957_v30 = vmul.f32 %v2829_v18, %v2829_v18  ;;  %v3734_v24 = vpop.permute.xlu1 %3733  ;;  %v6035_v18 = vld [vmem:[%s6249_s25 + $0x228] sm:$0xff] }
 0x3c9   : > { %12261 = vst [vmem:[#allocation186_spill] sm:$0xff] %v9829_v9  ;;  %v9832_v39 = vmul.f32 %v5439_v15, %v9777_v61  ;;  %v4454_v29 = vmul.f32 0.001, %v9814_v55  ;;  %5818 = vrsqrt.f32 %v3212_v57  ;;  %v3211_v35 = vadd.f32 1.0, %v3083_v56  ;;  %v12264_v32 = vld [vmem:[#allocation133_spill] sm:$0xff] }
 0x3ca   : > { %v4273_v28 = vmul.f32 %v9262_v48, %v3734_v24  ;;  %v3750_v10 = vpop.permute.xlu0 %3749  ;;  %3985 = vperm.xlu1 %5569, %v6034_v19   ;;  %v4459_v44 = vmul.f32 0.001, %v9821_v21  ;;  %v9838_v5 = vpop.eup %5806  ;;  %v2959_v13 = vmul.f32 %v2831_v7, %v2831_v7  ;;  %v4275_v33 = vmul.f32 %v9262_v48, %v3742_v38 }
 0x3cb   : > { %12262 = vst [vmem:[#allocation110_spill] sm:$0xff] %v9838_v5  ;;  %4005 = vperm.xlu0 %5568, %v6035_v18   ;;  %v9842_v61 = vmul.f32 %v3528_v63, %v3400_v1  ;;  %v3533_v15 = vmul.f32 %v3405_v22, %v3405_v22  ;;  %v3214_v57 = vadd.f32 1.0, %v3086_v53  ;;  %v4784_v56 = vmul.f32 %v12263_v42, %v4272_v26  ;;  %v12268_v18 = vld [vmem:[#allocation171_spill] sm:$0xff]  ;;  %v12270_v26 = vld [vmem:[#allocation196_spill] sm:$0xff] }
 0x3cc   : > { %v4785_v23 = vmul.f32 %v12264_v32, %v4273_v28  ;;  %v9847_v24 = vmul.f32 %v5444_v45, %v9796_v46  ;;  %v9849_v19 = vpop.eup %5808  ;;  %v3085_v7 = vadd.f32 %v2957_v30, %v12267_v40  ;;  %v3738_v38 = vpop.permute.xlu1 %3737  ;;  %v5441_v5 = vadd.f32 -0.002, %v4454_v29  ;;  %v6036_v42 = vld [vmem:[%s6249_s25 + $0x210] sm:$0xff]  ;;  %v12272_v29 = vld [vmem:[#allocation137_spill] sm:$0xff] }
 0x3cd   : > { %12266 = vst [vmem:[#allocation114_spill] sm:$0xff] %v9849_v19  ;;  %v3402_v1 = vmul.f32 %v12268_v18, %v12268_v18  ;;  %v3407_v63 = vmul.f32 %v9349_v27, %v9349_v27  ;;  %v9856_v53 = vpop.eup %5810  ;;  %5820 = vrsqrt.f32 %v3211_v35  ;;  %v4274_v46 = vmul.f32 %v9262_v48, %v3738_v38  ;;  %v12271_v40 = vld [vmem:[#allocation155_spill] sm:$0xff]  ;;  %v12273_v35 = vld [vmem:[#allocation160_spill] sm:$0xff] }
 0x3ce   : > { %12265 = vst [vmem:[#allocation96_spill] sm:$0xff] %v9847_v24  ;;  %12269 = vst [vmem:[#allocation115_spill] sm:$0xff] %v9856_v53  ;;  %v4913_v28 = vadd.f32 %v4785_v23, %v12270_v26  ;;  %v3758_v45 = vpop.permute.xlu0 %3757  ;;  %3993 = vperm.xlu1 %5569, %v6036_v42   ;;  %v5446_v32 = vadd.f32 -0.002, %v4459_v44  ;;  %v3087_v30 = vadd.f32 %v2959_v13, %v12271_v40  ;;  %v6037_v24 = vld [vmem:[%s6249_s25 + $0x238] sm:$0xff]  ;;  %5822 = vrsqrt.f32 %v3214_v57  ;;  %v12278_v57 = vld [vmem:[#allocation141_spill] sm:$0xff] }
 0x3cf   : > { %v4787_v19 = vmul.f32 %v12272_v29, %v4275_v33  ;;  %4013 = vperm.xlu0 %5568, %v6037_v24   ;;  %v4456_v18 = vmul.f32 0.001, %v9842_v61  ;;  %v9865_v27 = vmul.f32 %v3533_v15, %v3405_v22  ;;  %v4912_v23 = vadd.f32 %v4784_v56, %v12273_v35  ;;  %v12274_v26 = vld [vmem:[#allocation144_spill] sm:$0xff] }
 0x3d0   : > { %v4277_v38 = vmul.f32 %v9262_v48, %v3750_v10  ;;  %v4786_v53 = vmul.f32 %v12274_v26, %v4274_v46  ;;  %v9870_v42 = vpop.eup %5812  ;;  %v3213_v44 = vadd.f32 1.0, %v3085_v7  ;;  %v3746_v13 = vpop.permute.xlu1 %3745  ;;  %v9873_v33 = vmul.f32 %v5441_v5, %v9814_v55  ;;  %v6038_v35 = vld [vmem:[%s6249_s25 + $0x220] sm:$0xff]  ;;  %v12281_v55 = vld [vmem:[#allocation15_spill] sm:$0xff] }
 0x3d1   : > { %12275 = vst [vmem:[#allocation17_spill] sm:$0xff] %v9870_v42  ;;  %v3530_v24 = vmul.f32 %v3402_v1, %v3402_v1  ;;  %v3535_v40 = vmul.f32 %v3407_v63, %v3407_v63  ;;  %v9875_v22 = vpop.eup %5814  ;;  %v5040_v15 = vadd.f32 %v4913_v28, %v4912_v23  ;;  %v4276_v56 = vmul.f32 %v9262_v48, %v3746_v13  ;;  %v6039_v42 = vld [vmem:[%s6249_s25 + $0x248] sm:$0xff] }
 0x3d2   : > { %12276 = vst [vmem:[#allocation119_spill] sm:$0xff] %v9873_v33  ;;  %12277 = vst [vmem:[#allocation25_spill] sm:$0xff] %v9875_v22  ;;  %v4914_v29 = vadd.f32 %v4786_v53, %v12278_v57  ;;  %v3766_v10 = vpop.permute.xlu0 %3765  ;;  %4001 = vperm.xlu1 %5569, %v6038_v35   ;;  %v9881_v46 = vmul.f32 %v5446_v32, %v9821_v21  ;;  %v9883_v7 = vpop.eup %5816  ;;  %v3215_v26 = vadd.f32 1.0, %v3087_v30  ;;  %v5443_v33 = vadd.f32 -0.002, %v4456_v18  ;;  %v12283_v23 = vld [vmem:[#allocation145_spill] sm:$0xff] }
 0x3d3   : > { %12280 = vst [vmem:[#allocation174_spill] sm:$0xff] %v9883_v7  ;;  %v4915_v5 = vadd.f32 %v4787_v19, %v12281_v55  ;;  %4021 = vperm.xlu0 %5568, %v6039_v42   ;;  %v4461_v28 = vmul.f32 0.001, %v9865_v27  ;;  %v9888_v53 = vpop.eup %5818  ;;  %v4789_v13 = vmul.f32 %v12283_v23, %v4277_v38  ;;  %v4279_v35 = vmul.f32 %v9262_v48, %v3758_v45  ;;  %v12284_v21 = vld [vmem:[#allocation161_spill] sm:$0xff]  ;;  %v12285_v42 = vld [vmem:[#allocation20_spill] sm:$0xff]  ;;  %v6040_v23 = vld [vmem:[%s6249_s25 + $0x230] sm:$0xff] }
 0x3d4   : > { %12279 = vst [vmem:[#allocation24_spill] sm:$0xff] %v9881_v46  ;;  %12282 = vst [vmem:[#allocation127_spill] sm:$0xff] %v9888_v53  ;;  %v5041_v57 = vadd.f32 %v5040_v15, %v4914_v29  ;;  %v4788_v32 = vmul.f32 %v12284_v21, %v4276_v56  ;;  %v3754_v22 = vpop.permute.xlu1 %3753  ;;  %v9893_v30 = vmul.f32 %v3530_v24, %v3402_v1  ;;  %5824 = vrsqrt.f32 %v3213_v44  ;;  %v12286_v53 = vld [vmem:[#allocation179_spill] sm:$0xff]  ;;  %v12291_v21 = vld [vmem:[#allocation10_spill] sm:$0xff] }
 0x3d5   : > { %v9895_v19 = vmul.f32 %v3535_v40, %v3407_v63  ;;  %v3404_v18 = vmul.f32 %v12285_v42, %v12285_v42  ;;  %v3409_v55 = vmul.f32 %v9370_v16, %v9370_v16  ;;  %v4278_v45 = vmul.f32 %v9262_v48, %v3754_v22  ;;  %v6041_v63 = vld [vmem:[%s6249_s25 + $0x288] sm:$0xff]  ;;  %v12289_v44 = vld [vmem:[#allocation143_spill] sm:$0xff] }
 0x3d6   : > { %v4916_v38 = vadd.f32 %v4788_v32, %v12286_v53  ;;  %v5042_v15 = vadd.f32 %v5041_v57, %v4915_v5  ;;  %v3774_v29 = vpop.permute.xlu0 %3773  ;;  %4009 = vperm.xlu1 %5569, %v6040_v23   ;;  %5826 = vrsqrt.f32 %v3215_v26  ;;  %v4281_v1 = vmul.f32 %v9262_v48, %v3766_v10  ;;  %v12290_v5 = vld [vmem:[#allocation192_spill] sm:$0xff] }
 0x3d7   : > { %4053 = vperm.xlu0 %5568, %v6041_v63   ;;  %v9907_v24 = vmul.f32 %v5443_v33, %v9842_v61  ;;  %v5448_v40 = vadd.f32 -0.002, %v4461_v28  ;;  %v9909_v56 = vpop.eup %5820  ;;  %v4917_v53 = vadd.f32 %v4789_v13, %v12289_v44  ;;  %v4791_v57 = vmul.f32 %v12290_v5, %v4279_v35  ;;  %v12293_v28 = vld [vmem:[#allocation188_spill] sm:$0xff] }
 0x3d8   : > { %12288 = vst [vmem:[#allocation49_spill] sm:$0xff] %v9909_v56  ;;  %v5043_v22 = vadd.f32 %v5042_v15, %v4916_v38  ;;  %v4790_v32 = vmul.f32 %v12291_v21, %v4278_v45  ;;  %v3762_v26 = vpop.permute.xlu1 %3761  ;;  %v4458_v10 = vmul.f32 0.001, %v9893_v30  ;;  %v4463_v23 = vmul.f32 0.001, %v9895_v19  ;;  %v9916_v33 = vpop.eup %5822  ;;  %v6042_v35 = vld [vmem:[%s6249_s25 + $0x240] sm:$0xff] }
 0x3d9   : > { %12287 = vst [vmem:[#allocation53_spill] sm:$0xff] %v9907_v24  ;;  %v3532_v63 = vmul.f32 %v3404_v18, %v3404_v18  ;;  %v3537_v61 = vmul.f32 %v3409_v55, %v3409_v55  ;;  %12292 = vst [vmem:[#allocation56_spill] sm:$0xff] %v9916_v33  ;;  %v4280_v13 = vmul.f32 %v9262_v48, %v3762_v26  ;;  %v12294_v38 = vld [vmem:[#allocation38_spill] sm:$0xff]  ;;  %v12295_v45 = vld [vmem:[#allocation9_spill] sm:$0xff] }
 0x3da   : > { %v4918_v7 = vadd.f32 %v4790_v32, %v12293_v28  ;;  %v5044_v56 = vadd.f32 %v5043_v22, %v4917_v53  ;;  %v3782_v44 = vpop.permute.xlu0 %3781  ;;  %4017 = vperm.xlu1 %5569, %v6042_v35   ;;  %v3406_v15 = vmul.f32 %v12294_v38, %v12294_v38  ;;  %v4793_v5 = vmul.f32 %v12295_v45, %v4281_v1  ;;  %v6043_v21 = vld [vmem:[%s6249_s25 + $0x308] sm:$0xff]  ;;  %v12299_v38 = vld [vmem:[#allocation139_spill] sm:$0xff] }
 0x3db   : > { %4117 = vperm.xlu0 %5568, %v6043_v21   ;;  %v9926_v16 = vmul.f32 %v5448_v40, %v9865_v27  ;;  %v3411_v32 = vmul.f32 %v9390_v34, %v9390_v34  ;;  %v12297_v53 = vld [vmem:[#allocation33_spill] sm:$0xff]  ;;  %v12298_v26 = vld [vmem:[#allocation142_spill] sm:$0xff]  ;;  %v4283_v33 = vmul.f32 %v9262_v48, %v3774_v29  ;;  %v4792_v1 = vmul.f32 %v12299_v38, %v4280_v13 }
 0x3dc   : > { %v3408_v22 = vmul.f32 %v12297_v53, %v12297_v53  ;;  %v4919_v28 = vadd.f32 %v4791_v57, %v12298_v26  ;;  %v5045_v35 = vadd.f32 %v5044_v56, %v4918_v7  ;;  %v3770_v45 = vpop.permute.xlu1 %3769  ;;  %v5445_v21 = vadd.f32 -0.002, %v4458_v10  ;;  %v6044_v57 = vld [vmem:[%s6249_s25 + $0x280] sm:$0xff]  ;;  %v12301_v56 = vld [vmem:[#allocation182_spill] sm:$0xff] }
 0x3dd   : > { %12296 = vst [vmem:[#allocation173_spill] sm:$0xff] %v9926_v16  ;;  %v5450_v42 = vadd.f32 -0.002, %v4463_v23  ;;  %v9935_v27 = vmul.f32 %v3532_v63, %v3404_v18  ;;  %v9937_v40 = vmul.f32 %v3537_v61, %v3409_v55  ;;  %v12300_v16 = vld [vmem:[#allocation191_spill] sm:$0xff]  ;;  %v4282_v53 = vmul.f32 %v9262_v48, %v3770_v45  ;;  %v6045_v13 = vld [vmem:[%s6249_s25 + $0x380] sm:$0xff] }
 0x3de   : > { %v4920_v34 = vadd.f32 %v4792_v1, %v12300_v16  ;;  %v5046_v24 = vadd.f32 %v5045_v35, %v4919_v28  ;;  %v3790_v46 = vpop.permute.xlu0 %3789  ;;  %4049 = vperm.xlu1 %5569, %v6044_v57   ;;  %v3534_v7 = vmul.f32 %v3406_v15, %v3406_v15  ;;  %v4921_v29 = vadd.f32 %v4793_v5, %v12301_v56  ;;  %v9946_v55 = vpop.eup %5824  ;;  %v12303_v16 = vld [vmem:[#allocation177_spill] sm:$0xff]  ;;  %v6046_v57 = vld [vmem:[%s7234_s29 + $0x10] sm:$0xf] }
 0x3df   : > { %4177 = vperm.xlu0 %5568, %v6045_v13   ;;  %v3539_v10 = vmul.f32 %v3411_v32, %v3411_v32  ;;  %v3536_v23 = vmul.f32 %v3408_v22, %v3408_v22  ;;  %v3413_v18 = vmul.f32 %v9407_v58, %v9407_v58  ;;  %12302 = vst [vmem:[#allocation175_spill] sm:$0xff] %v9946_v55  ;;  %v12304_v26 = vld [vmem:[#allocation13_spill] sm:$0xff]  ;;  %v4460_v45 = vmul.f32 0.001, %v9935_v27  ;;  %v12308_v58 = vld [vmem:[#allocation59_spill] sm:$0xff] }
 0x3e0   : > { %v4795_v63 = vmul.f32 %v12303_v16, %v4283_v33  ;;  %v5047_v61 = vadd.f32 %v5046_v24, %v4920_v34  ;;  %v4285_v38 = vmul.f32 %v9262_v48, %v3782_v44  ;;  %v4794_v28 = vmul.f32 %v12304_v26, %v4282_v53  ;;  %v9951_v35 = vpop.eup %5826  ;;  %v3778_v5 = vpop.permute.xlu1 %3777  ;;  %v12307_v34 = vld [vmem:[#allocation148_spill] sm:$0xff] }
 0x3e1   : > { %12305 = vst [vmem:[#allocation77_spill] sm:$0xff] %v9951_v35  ;;  %v9954_v1 = vmul.f32 %v5445_v21, %v9893_v30  ;;  %v9959_v56 = vrot.slane %v6046_v57, %v9240_v62  ;;  %v4465_v33 = vmul.f32 0.001, %v9937_v40  ;;  %v4284_v53 = vmul.f32 %v9262_v48, %v3778_v5  ;;  %v6047_v16 = vld [vmem:[%s6249_s25 + $0x300] sm:$0xff]  ;;  %v6048_v21 = vld [vmem:[%s6249_s25 + $0x310] sm:$0xff] }
 0x3e2   : > { %v4922_v24 = vadd.f32 %v4794_v28, %v12307_v34  ;;  %v5048_v44 = vadd.f32 %v5047_v61, %v4921_v29  ;;  %v3798_v13 = vpop.permute.xlu0 %3797  ;;  %4113 = vperm.xlu1 %5569, %v6047_v16   ;;  %v9965_v26 = vmul.f32 %v3534_v7, %v3406_v15  ;;  %v4287_v30 = vmul.f32 %v9262_v48, %v3790_v46  ;;  %v12309_v29 = vld [vmem:[#allocation118_spill] sm:$0xff] }
 0x3e3   : > { %12306 = vst [vmem:[#allocation84_spill] sm:$0xff] %v9959_v56  ;;  %4121 = vperm.xlu0 %5568, %v6048_v21   ;;  %v9969_v35 = vmul.f32 %v3539_v10, %v3411_v32  ;;  %v9971_v57 = vmul.f32 %v3536_v23, %v3408_v22  ;;  %v3541_v55 = vmul.f32 %v3413_v18, %v3413_v18  ;;  %v12310_v34 = vld [vmem:[#allocation178_spill] sm:$0xff]  ;;  %v5447_v46 = vadd.f32 -0.002, %v4460_v45  ;;  %v12311_v32 = vld [vmem:[#allocation40_spill] sm:$0xff]  ;;  %v12312_v22 = vld [vmem:[#allocation153_spill] sm:$0xff] }
 0x3e4   : > { %v4923_v28 = vadd.f32 %v4795_v63, %v12308_v58  ;;  %v4797_v61 = vmul.f32 %v12309_v29, %v4285_v38  ;;  %v5049_v5 = vadd.f32 %v5048_v44, %v4922_v24  ;;  %v4796_v16 = vmul.f32 %v12310_v34, %v4284_v53  ;;  %v3786_v15 = vpop.permute.xlu1 %3785  ;;  %v6049_v38 = vld [vmem:[%s6249_s25 + $0x290] sm:$0xff]  ;;  %v12313_v44 = vld [vmem:[#allocation21_spill] sm:$0xff] }
 0x3e5   : > { %v9977_v7 = vmul.f32 %v5450_v42, %v9895_v19  ;;  %v5452_v21 = vadd.f32 -0.002, %v4465_v33  ;;  %v3410_v10 = vmul.f32 %v12311_v32, %v12311_v32  ;;  %v4286_v58 = vmul.f32 %v9262_v48, %v3786_v15  ;;  %v6050_v29 = vld [vmem:[%s6249_s25 + $0x390] sm:$0xff]  ;;  %v12314_v33 = vld [vmem:[#allocation189_spill] sm:$0xff]  ;;  %v12321_v32 = vld [vmem:[#allocation28_spill] sm:$0xff] }
 0x3e6   : > { %v4924_v23 = vadd.f32 %v4796_v16, %v12312_v22  ;;  %v5050_v56 = vadd.f32 %v5049_v5, %v4923_v28  ;;  %v3806_v63 = vpop.permute.xlu0 %3805  ;;  %4057 = vperm.xlu1 %5569, %v6049_v38   ;;  %v4462_v24 = vmul.f32 0.001, %v9965_v26  ;;  %v4799_v53 = vmul.f32 %v12313_v44, %v4287_v30  ;;  %v12315_v34 = vld [vmem:[#allocation34_spill] sm:$0xff]  ;;  %v12318_v44 = vld [vmem:[#allocation67_spill] sm:$0xff] }
 0x3e7   : > { %4185 = vperm.xlu0 %5568, %v6050_v29   ;;  %v4467_v19 = vmul.f32 0.001, %v9969_v35  ;;  %v4464_v42 = vmul.f32 0.001, %v9971_v57  ;;  %v9989_v45 = vmul.f32 %v3541_v55, %v3413_v18  ;;  %v4925_v28 = vadd.f32 %v4797_v61, %v12314_v33  ;;  %v12319_v55 = vld [vmem:[#allocation158_spill] sm:$0xff]  ;;  %v12320_v33 = vld [vmem:[#allocation149_spill] sm:$0xff] }
 0x3e8   : > { %v5051_v5 = vadd.f32 %v5050_v56, %v4924_v23  ;;  %v4289_v48 = vmul.f32 %v9430_v4, %v3798_v13  ;;  %v4798_v16 = vmul.f32 %v12315_v34, %v4286_v58  ;;  %v3794_v15 = vpop.permute.xlu1 %3793  ;;  %v9995_v30 = vmul.f32 %v5447_v46, %v9935_v27  ;;  %v6051_v13 = vld [vmem:[%s6249_s25 + $0x388] sm:$0xff]  ;;  %v6052_v27 = vld [vmem:[%s6249_s25 + $0x2a0] sm:$0xff] }
 0x3e9   : > { %v9998_v22 = vmul.f32 %v5452_v21, %v9937_v40  ;;  %v3538_v38 = vmul.f32 %v3410_v10, %v3410_v10  ;;  %v3415_v18 = vmul.f32 %v12318_v44, %v12318_v44  ;;  %v4288_v56 = vmul.f32 %v9430_v4, %v3794_v15 }
 0x3ea   : > { %12316 = vst [vmem:[#allocation80_spill] sm:$0xff] %v9995_v30  ;;  %v4926_v29 = vadd.f32 %v4798_v16, %v12319_v55  ;;  %v5052_v61 = vadd.f32 %v5051_v5, %v4925_v28  ;;  %v3814_v23 = vpop.permute.xlu0 %3813  ;;  %4181 = vperm.xlu1 %5569, %v6051_v13   ;;  %v5449_v58 = vadd.f32 -0.002, %v4462_v24  ;;  %v4927_v34 = vadd.f32 %v4799_v53, %v12320_v33  ;;  %v12322_v5 = vld [vmem:[#allocation140_spill] sm:$0xff]  ;;  %v12323_v53 = vld [vmem:[#allocation29_spill] sm:$0xff] }
 0x3eb   : > { %12317 = vst [vmem:[#allocation172_spill] sm:$0xff] %v9998_v22  ;;  %4065 = vperm.xlu0 %5568, %v6052_v27   ;;  %v5454_v40 = vadd.f32 -0.002, %v4467_v19  ;;  %v5451_v46 = vadd.f32 -0.002, %v4464_v42  ;;  %v4801_v44 = vmul.f32 %v12321_v32, %v4289_v48  ;;  %v4291_v28 = vmul.f32 %v9430_v4, %v3806_v63  ;;  %v12324_v42 = vld [vmem:[#allocation162_spill] sm:$0xff] }
 0x3ec   : > { %v4469_v21 = vmul.f32 0.001, %v9989_v45  ;;  %v5053_v22 = vadd.f32 %v5052_v61, %v4926_v29  ;;  %v4800_v16 = vmul.f32 %v12322_v5, %v4288_v56  ;;  %v3802_v15 = vpop.permute.xlu1 %3801  ;;  %v10011_v55 = vmul.f32 %v3538_v38, %v3410_v10  ;;  %v6053_v29 = vld [vmem:[%s6249_s25 + $0x298] sm:$0xff]  ;;  %v12326_v61 = vld [vmem:[#allocation50_spill] sm:$0xff]  ;;  %v6054_v56 = vld [vmem:[%s6249_s25 + $0x320] sm:$0xff] }
 0x3ed   : > { %v3543_v24 = vmul.f32 %v3415_v18, %v3415_v18  ;;  %v3412_v13 = vmul.f32 %v12323_v53, %v12323_v53  ;;  %v3417_v19 = vmul.f32 %v9447_v14, %v9447_v14  ;;  %v4290_v32 = vmul.f32 %v9430_v4, %v3802_v15  ;;  %v12329_v15 = vld [vmem:[#allocation65_spill] sm:$0xff] }
 0x3ee   : > { %v4928_v33 = vadd.f32 %v4800_v16, %v12324_v42  ;;  %v3822_v48 = vpop.permute.xlu0 %3821  ;;  %4061 = vperm.xlu1 %5569, %v6053_v29   ;;  %v10021_v63 = vmul.f32 %v5449_v58, %v9965_v26  ;;  %v3414_v10 = vmul.f32 %v12326_v61, %v12326_v61  ;;  %v5054_v38 = vadd.f32 %v5053_v22, %v4927_v34  ;;  %v12330_v29 = vld [vmem:[#allocation184_spill] sm:$0xff] }
 0x3ef   : > { %4129 = vperm.xlu0 %5568, %v6054_v56   ;;  %v10027_v27 = vmul.f32 %v5454_v40, %v9969_v35  ;;  %v10030_v5 = vmul.f32 %v5451_v46, %v9971_v57  ;;  %v5456_v16 = vadd.f32 -0.002, %v4469_v21  ;;  %v4929_v42 = vadd.f32 %v4801_v44, %v12329_v15  ;;  %v12331_v58 = vld [vmem:[#allocation180_spill] sm:$0xff] }
 0x3f0   : > { %12325 = vst [vmem:[#allocation85_spill] sm:$0xff] %v10021_v63  ;;  %v4803_v14 = vmul.f32 %v12330_v29, %v4291_v28  ;;  %v4293_v26 = vmul.f32 %v9430_v4, %v3814_v23  ;;  %v4802_v61 = vmul.f32 %v12331_v58, %v4290_v32  ;;  %v3810_v22 = vpop.permute.xlu1 %3809  ;;  %v4466_v34 = vmul.f32 0.001, %v10011_v55  ;;  %v12332_v57 = vld [vmem:[#allocation168_spill] sm:$0xff] }
 0x3f1   : > { %12327 = vst [vmem:[#allocation116_spill] sm:$0xff] %v10027_v27  ;;  %12328 = vst [vmem:[#allocation113_spill] sm:$0xff] %v10030_v5  ;;  %v10037_v56 = vmul.f32 %v3543_v24, %v3415_v18  ;;  %v3540_v35 = vmul.f32 %v3412_v13, %v3412_v13  ;;  %v3545_v40 = vmul.f32 %v3417_v19, %v3417_v19  ;;  %v6055_v15 = vld [vmem:[%s6249_s25 + $0x318] sm:$0xff]  ;;  %v5055_v23 = vrot.slane %v5054_v38, 4  ;;  %v6056_v32 = vld [vmem:[%s6249_s25 + $0x3a0] sm:$0xff] }
 0x3f2   : > { %v5061_v53 = vadd.f32 %v4929_v42, %v4928_v33  ;;  %v4930_v46 = vadd.f32 %v4802_v61, %v12332_v57  ;;  %v4292_v21 = vmul.f32 %v9430_v4, %v3810_v22  ;;  %v3830_v44 = vpop.permute.xlu0 %3829  ;;  %4125 = vperm.xlu1 %5569, %v6055_v15   ;;  %v3542_v28 = vmul.f32 %v3414_v10, %v3414_v10  ;;  %v12334_v33 = vld [vmem:[#allocation194_spill] sm:$0xff]  ;;  %v12335_v42 = vld [vmem:[#allocation185_spill] sm:$0xff] }
 0x3f3   : > { %v4295_v29 = vmul.f32 %v9430_v4, %v3822_v48  ;;  %4193 = vperm.xlu0 %5568, %v6056_v32   ;;  %v10045_v18 = vmul.f32 %v5456_v16, %v9989_v45  ;;  %v3425_v24 = vmul.f32 %v9516_v25, %v9516_v25  ;;  %v4931_v61 = vadd.f32 %v4803_v14, %v12334_v33  ;;  %v12336_v57 = vld [vmem:[#allocation181_spill] sm:$0xff]  ;;  %v12337_v45 = vld [vmem:[#allocation7_spill] sm:$0xff] }
 0x3f4   : > { %v4805_v58 = vmul.f32 %v12335_v42, %v4293_v26  ;;  %v5062_v22 = vadd.f32 %v5061_v53, %v4930_v46  ;;  %v4804_v15 = vmul.f32 %v12336_v57, %v4292_v21  ;;  %v3818_v5 = vpop.permute.xlu1 %3817  ;;  %v5453_v27 = vadd.f32 -0.002, %v4466_v34  ;;  %v6057_v33 = vld [vmem:[%s6249_s25 + $0x398] sm:$0xff]  ;;  %v6058_v42 = vld [vmem:[%s6249_s25 + $0x2b0] sm:$0xff] }
 0x3f5   : > { %12333 = vst [vmem:[#allocation124_spill] sm:$0xff] %v10045_v18  ;;  %v4471_v48 = vmul.f32 0.001, %v10037_v56  ;;  %v10053_v32 = vmul.f32 %v3540_v35, %v3412_v13  ;;  %v10055_v63 = vmul.f32 %v3545_v40, %v3417_v19  ;;  %v4294_v25 = vmul.f32 %v9430_v4, %v3818_v5  ;;  %v12338_v46 = vld [vmem:[#allocation55_spill] sm:$0xff]  ;;  %v12341_v5 = vld [vmem:[#allocation54_spill] sm:$0xff] }
 0x3f6   : > { %v4932_v16 = vadd.f32 %v4804_v15, %v12337_v45  ;;  %v5063_v18 = vadd.f32 %v5062_v22, %v4931_v61  ;;  %v3838_v14 = vpop.permute.xlu0 %3837  ;;  %4189 = vperm.xlu1 %5569, %v6057_v33   ;;  %v10060_v53 = vmul.f32 %v3542_v28, %v3414_v10  ;;  %v5056_v26 = vadd.f32 %v5055_v23, %v5054_v38  ;;  %v12339_v19 = vld [vmem:[#allocation23_spill] sm:$0xff] }
 0x3f7   : > { %v4807_v21 = vmul.f32 %v12338_v46, %v4295_v29  ;;  %v4297_v34 = vmul.f32 %v9430_v4, %v3830_v44  ;;  %4073 = vperm.xlu0 %5568, %v6058_v42   ;;  %v3553_v13 = vmul.f32 %v3425_v24, %v3425_v24  ;;  %v4933_v35 = vadd.f32 %v4805_v58, %v12339_v19  ;;  %v12340_v61 = vld [vmem:[#allocation183_spill] sm:$0xff]  ;;  %v12342_v29 = vld [vmem:[#allocation30_spill] sm:$0xff] }
 0x3f8   : > { %v5064_v40 = vadd.f32 %v5063_v18, %v4932_v16  ;;  %v4806_v22 = vmul.f32 %v12340_v61, %v4294_v25  ;;  %v3416_v57 = vmul.f32 %v12341_v5, %v12341_v5  ;;  %v3826_v10 = vpop.permute.xlu1 %3825  ;;  %v5458_v28 = vadd.f32 -0.002, %v4471_v48  ;;  %v6059_v25 = vld [vmem:[%s6249_s25 + $0x2a8] sm:$0xff]  ;;  %v12343_v46 = vld [vmem:[#allocation27_spill] sm:$0xff] }
 0x3f9   : > { %v4468_v38 = vmul.f32 0.001, %v10053_v32  ;;  %v4473_v23 = vmul.f32 0.001, %v10055_v63  ;;  %v3441_v44 = vmul.f32 %v9664_v8, %v9664_v8  ;;  %v4296_v18 = vmul.f32 %v9430_v4, %v3826_v10  ;;  %v12344_v42 = vld [vmem:[#allocation187_spill] sm:$0xff] }
 0x3fa   : > { %v4934_v15 = vadd.f32 %v4806_v22, %v12342_v29  ;;  %v5065_v45 = vadd.f32 %v5064_v40, %v4933_v35  ;;  %v3846_v58 = vpop.permute.xlu0 %3845  ;;  %4069 = vperm.xlu1 %5569, %v6059_v25   ;;  %v4470_v16 = vmul.f32 0.001, %v10060_v53  ;;  %v5057_v33 = vrot.slane %v5056_v26, 2  ;;  %v6060_v61 = vld [vmem:[%s6249_s25 + $0x330] sm:$0xff] }
 0x3fb   : > { %v4935_v48 = vadd.f32 %v4807_v21, %v12343_v46  ;;  %v4809_v19 = vmul.f32 %v12344_v42, %v4297_v34  ;;  %4137 = vperm.xlu0 %5568, %v6060_v61   ;;  %v10080_v5 = vmul.f32 %v3553_v13, %v3425_v24  ;;  %v4299_v35 = vmul.f32 %v9430_v4, %v3838_v14  ;;  %v12345_v40 = vld [vmem:[#allocation42_spill] sm:$0xff]  ;;  %v12346_v42 = vld [vmem:[#allocation197_spill] sm:$0xff] }
 0x3fc   : > { %v5066_v8 = vadd.f32 %v5065_v45, %v4934_v15  ;;  %v4808_v22 = vmul.f32 %v12345_v40, %v4296_v18  ;;  %v3544_v10 = vmul.f32 %v3416_v57, %v3416_v57  ;;  %v3834_v29 = vpop.permute.xlu1 %3833  ;;  %v10085_v25 = vmul.f32 %v5453_v27, %v10011_v55  ;;  %v6061_v14 = vld [vmem:[%s6249_s25 + $0x328] sm:$0xff]  ;;  %v12348_v40 = vld [vmem:[#allocation8_spill] sm:$0xff]  ;;  %v6062_v55 = vld [vmem:[%s6249_s25 + $0x3b0] sm:$0xff] }
 0x3fd   : > { %v10088_v21 = vmul.f32 %v5458_v28, %v10037_v56  ;;  %v5455_v34 = vadd.f32 -0.002, %v4468_v38  ;;  %v3569_v46 = vmul.f32 %v3441_v44, %v3441_v44  ;;  %v4298_v13 = vmul.f32 %v9430_v4, %v3834_v29  ;;  %v12349_v28 = vld [vmem:[#allocation69_spill] sm:$0xff] }
 0x3fe   : > { %v4936_v61 = vadd.f32 %v4808_v22, %v12346_v42  ;;  %v5067_v24 = vadd.f32 %v5066_v8, %v4935_v48  ;;  %v3854_v15 = vpop.permute.xlu0 %3853  ;;  %4133 = vperm.xlu1 %5569, %v6061_v14   ;;  %v5460_v45 = vadd.f32 -0.002, %v4473_v23  ;;  %v10093_v18 = vadd.f32 %v5057_v33, %v5056_v26  ;;  %v12350_v8 = vld [vmem:[#allocation58_spill] sm:$0xff]  ;;  %v12351_v42 = vld [vmem:[#allocation36_spill] sm:$0xff] }
 0x3ff   : > { %v4937_v30 = vadd.f32 %v4809_v19, %v12348_v40  ;;  %4201 = vperm.xlu0 %5568, %v6062_v55   ;;  %v5457_v27 = vadd.f32 -0.002, %v4470_v16  ;;  %v4481_v56 = vmul.f32 0.001, %v10080_v5  ;;  %v4811_v38 = vmul.f32 %v12349_v28, %v4299_v35  ;;  %v12352_v14 = vld [vmem:[#allocation12_spill] sm:$0xff] }
 0x400   : > { %12347 = vst [vmem:[#allocation117_spill] sm:$0xff] %v10093_v18  ;;  %v5068_v22 = vadd.f32 %v5067_v24, %v4936_v61  ;;  %v4810_v48 = vmul.f32 %v12350_v8, %v4298_v13  ;;  %v10100_v29 = vmul.f32 %v3544_v10, %v3416_v57  ;;  %v4301_v23 = vmul.f32 %v9430_v4, %v3846_v58  ;;  %v3842_v26 = vpop.permute.xlu1 %3841  ;;  %v6063_v57 = vld [vmem:[%s6249_s25 + $0x3a8] sm:$0xff]  ;;  %v12353_v28 = vld [vmem:[#allocation72_spill] sm:$0xff] }
 0x401   : > { %v10104_v33 = vmul.f32 %v5455_v34, %v10053_v32  ;;  %v10106_v19 = vmul.f32 %v3569_v46, %v3441_v44  ;;  %v3424_v16 = vmul.f32 %v9492_v52, %v9492_v52  ;;  %v4300_v24 = vmul.f32 %v9430_v4, %v3842_v26  ;;  %v6064_v32 = vld [vmem:[%s6249_s25 + $0x2c0] sm:$0xff]  ;;  %v6065_v34 = vld [vmem:[%s7234_s29 + $0x14] sm:$0xf]  ;;  %v12359_v10 = vld [vmem:[#allocation150_spill] sm:$0xff] }
 0x402   : > { %v4938_v35 = vadd.f32 %v4810_v48, %v12351_v42  ;;  %v5069_v61 = vadd.f32 %v5068_v22, %v4937_v30  ;;  %v3862_v13 = vpop.permute.xlu0 %3861  ;;  %4197 = vperm.xlu1 %5569, %v6063_v57   ;;  %v10114_v58 = vmul.f32 %v5460_v45, %v10055_v63  ;;  %v10119_v44 = vmul.f32 %v5457_v27, %v10060_v53  ;;  %v12354_v22 = vld [vmem:[#allocation16_spill] sm:$0xff] }
 0x403   : > { %4081 = vperm.xlu0 %5568, %v6064_v32   ;;  %v10123_v46 = vrot.slane %v6065_v34, %v9240_v62  ;;  %v5468_v30 = vadd.f32 -0.002, %v4481_v56  ;;  %v4939_v40 = vadd.f32 %v4811_v38, %v12352_v14  ;;  %v4812_v63 = vmul.f32 %v12353_v28, %v4300_v24  ;;  %v12355_v38 = vld [vmem:[#allocation43_spill] sm:$0xff]  ;;  %v6067_v32 = vld [vmem:[%s6249_s25 + $0x340] sm:$0xff] }
 0x404   : > { %v5070_v55 = vadd.f32 %v5069_v61, %v4938_v35  ;;  %v4472_v45 = vmul.f32 0.001, %v10100_v29  ;;  %v4813_v8 = vmul.f32 %v12354_v22, %v4301_v23  ;;  %v4497_v53 = vmul.f32 0.001, %v10106_v19  ;;  %v6066_v57 = vld [vmem:[%s6249_s25 + $0x2b8] sm:$0xff] }
 0x405   : > { %v3850_v48 = vpop.permute.xlu1 %3849  ;;  %v3552_v27 = vmul.f32 %v3424_v16, %v3424_v16  ;;  %v3456_v26 = vmul.f32 %v9781_v43, %v9781_v43  ;;  %v4303_v56 = vmul.f32 %v9430_v4, %v3854_v15  ;;  %v4940_v42 = vadd.f32 %v4812_v63, %v12355_v38  ;;  %v6068_v14 = vld [vmem:[%s7234_s29 + $0x18] sm:$0xf]  ;;  %v6069_v15 = vld [vmem:[%s7234_s29 + $0x1c] sm:$0xf]  ;;  %v12356_v63 = vld [vmem:[#allocation146_spill] sm:$0xff] }
 0x406   : > { %v5071_v35 = vadd.f32 %v5070_v55, %v4939_v40  ;;  %v4302_v61 = vmul.f32 %v9430_v4, %v3850_v48  ;;  %v3870_v24 = vpop.permute.xlu0 %3869  ;;  %4077 = vperm.xlu1 %5569, %v6066_v57   ;;  %v10139_v34 = vmul.f32 %v5468_v30, %v10080_v5  ;;  %v10143_v28 = vrot.slane %v6068_v14, %v9240_v62  ;;  %v12357_v38 = vld [vmem:[#allocation32_spill] sm:$0xff]  ;;  %v12358_v57 = vld [vmem:[#allocation157_spill] sm:$0xff] }
 0x407   : > { %v4307_v23 = vmul.f32 %v9578_v54, %v3870_v24  ;;  %4145 = vperm.xlu0 %5568, %v6067_v32   ;;  %v10147_v40 = vrot.slane %v6069_v15, %v9240_v62  ;;  %v4305_v55 = vmul.f32 %v9578_v54, %v3862_v13  ;;  %v5459_v48 = vadd.f32 -0.002, %v4472_v45  ;;  %v12360_v45 = vld [vmem:[#allocation63_spill] sm:$0xff] }
 0x408   : > { %v5072_v4 = vadd.f32 %v5071_v35, %v4940_v42  ;;  %v4814_v22 = vmul.f32 %v12356_v63, %v4302_v61  ;;  %v4941_v24 = vadd.f32 %v4813_v8, %v12357_v38  ;;  %v3584_v32 = vmul.f32 %v3456_v26, %v3456_v26  ;;  %v6070_v35 = vld [vmem:[%s6249_s25 + $0x338] sm:$0xff]  ;;  %v6071_v38 = vld [vmem:[%s6249_s25 + $0x3c0] sm:$0xff] }
 0x409   : > { %v4819_v5 = vmul.f32 %v12358_v57, %v4307_v23  ;;  %v3858_v30 = vpop.permute.xlu1 %3857  ;;  %v3440_v14 = vmul.f32 %v9637_v36, %v9637_v36  ;;  %v4815_v18 = vmul.f32 %v12359_v10, %v4303_v56  ;;  %v5484_v13 = vadd.f32 -0.002, %v4497_v53  ;;  %v12361_v57 = vld [vmem:[#allocation151_spill] sm:$0xff] }
 0x40a   : > { %v4304_v62 = vmul.f32 %v9578_v54, %v3858_v30  ;;  %v3878_v42 = vpop.permute.xlu0 %3877  ;;  %4141 = vperm.xlu1 %5569, %v6070_v35   ;;  %v10158_v61 = vmul.f32 %v3552_v27, %v3424_v16  ;;  %v4942_v8 = vadd.f32 %v4814_v22, %v12360_v45  ;;  %v5073_v15 = vadd.f32 %v5072_v4, %v4941_v24  ;;  %v12362_v56 = vld [vmem:[#allocation147_spill] sm:$0xff]  ;;  %v12364_v35 = vld [vmem:[#allocation41_spill] sm:$0xff] }
 0x40b   : > { %v4947_v23 = vadd.f32 %v4819_v5, %v9438_v37  ;;  %v4309_v63 = vmul.f32 %v9578_v54, %v3878_v42  ;;  %4209 = vperm.xlu0 %5568, %v6071_v38   ;;  %v4817_v10 = vmul.f32 %v12361_v57, %v4305_v55  ;;  %v10167_v36 = vmul.f32 %v5459_v48, %v10100_v29  ;;  %v12363_v53 = vld [vmem:[#allocation159_spill] sm:$0xff]  ;;  %v6073_v57 = vld [vmem:[%s6249_s25 + $0x348] sm:$0xff] }
 0x40c   : > { %v4816_v30 = vmul.f32 %v12362_v56, %v4304_v62  ;;  %v3442_v16 = vmul.f32 %v9656_v47, %v9656_v47  ;;  %v10172_v37 = vmul.f32 %v3584_v32, %v3456_v26  ;;  %v3568_v22 = vmul.f32 %v3440_v14, %v3440_v14  ;;  %v6072_v29 = vld [vmem:[%s6249_s25 + $0x3b8] sm:$0xff]  ;;  %v12365_v32 = vld [vmem:[#allocation66_spill] sm:$0xff] }
 0x40d   : > { %v4821_v27 = vmul.f32 %v12363_v53, %v4309_v63  ;;  %v3866_v4 = vpop.permute.xlu1 %3865  ;;  %v3426_v24 = vmul.f32 %v9504_v0, %v9504_v0  ;;  %v10180_v48 = vmul.f32 %v5484_v13, %v10106_v19  ;;  %v4480_v42 = vmul.f32 0.001, %v10158_v61  ;;  %v12368_v13 = vld [vmem:[#allocation14_spill] sm:$0xff] }
 0x40e   : > { %v4944_v55 = vadd.f32 %v4816_v30, %v9452_v2  ;;  %v4306_v5 = vmul.f32 %v9578_v54, %v3866_v4  ;;  %v3886_v62 = vpop.permute.xlu0 %3885  ;;  %4205 = vperm.xlu1 %5569, %v6072_v29   ;;  %v4943_v45 = vadd.f32 %v4815_v18, %v12364_v35  ;;  %v5074_v26 = vadd.f32 %v5073_v15, %v4942_v8  ;;  %v12366_v2 = vld [vmem:[#allocation47_spill] sm:$0xff]  ;;  %v12367_v30 = vld [vmem:[#allocation152_spill] sm:$0xff] }
 0x40f   : > { %v4949_v63 = vadd.f32 %v4821_v27, %v12365_v32  ;;  %v4311_v38 = vmul.f32 %v9578_v54, %v3886_v62  ;;  %4149 = vperm.xlu0 %5568, %v6073_v57   ;;  %v4945_v56 = vadd.f32 %v4817_v10, %v12366_v2  ;;  %v3570_v4 = vmul.f32 %v3442_v16, %v3442_v16  ;;  %v12369_v35 = vld [vmem:[#allocation131_spill] sm:$0xff] }
 0x410   : > { %v4818_v53 = vmul.f32 %v12367_v30, %v4306_v5  ;;  %v3458_v19 = vmul.f32 %v9792_v60, %v9792_v60  ;;  %v4512_v8 = vmul.f32 0.001, %v10172_v37  ;;  %v10193_v15 = vmul.f32 %v3568_v22, %v3440_v14  ;;  %v6074_v5 = vld [vmem:[%s6249_s25 + $0x2c8] sm:$0xff]  ;;  %v12370_v60 = vld [vmem:[#allocation60_spill] sm:$0xff] }
 0x411   : > { %v4823_v29 = vmul.f32 %v12368_v13, %v4311_v38  ;;  %v3874_v18 = vpop.permute.xlu1 %3873  ;;  %v3554_v27 = vmul.f32 %v3426_v24, %v3426_v24  ;;  %v5082_v62 = vadd.f32 %v4945_v56, %v4944_v55  ;;  %v5467_v2 = vadd.f32 -0.002, %v4480_v42  ;;  %v6075_v13 = vld [vmem:[%s6249_s25 + $0x3c8] sm:$0xff] }
 0x412   : > { %v4946_v32 = vadd.f32 %v4818_v53, %v12369_v35  ;;  %v4308_v10 = vmul.f32 %v9578_v54, %v3874_v18  ;;  %v3894_v57 = vpop.permute.xlu0 %3893  ;;  %4085 = vperm.xlu1 %5569, %v6074_v5   ;;  %v5075_v30 = vadd.f32 %v5074_v26, %v4943_v45  ;;  %v3457_v14 = vmul.f32 %v9802_v17, %v9802_v17  ;;  %v12371_v55 = vld [vmem:[#allocation154_spill] sm:$0xff]  ;;  %v12372_v35 = vld [vmem:[#allocation163_spill] sm:$0xff] }
 0x413   : > { %v4951_v0 = vadd.f32 %v4823_v29, %v12370_v60  ;;  %v4313_v38 = vmul.f32 %v9578_v54, %v3894_v57  ;;  %4213 = vperm.xlu0 %5568, %v6075_v13   ;;  %v10204_v53 = vmul.f32 %v3570_v4, %v3442_v16  ;;  %v3586_v18 = vmul.f32 %v3458_v19, %v3458_v19 }
 0x414   : > { %v5083_v22 = vadd.f32 %v5082_v62, %v4946_v32  ;;  %v4820_v56 = vmul.f32 %v12371_v55, %v4308_v10  ;;  %v5499_v26 = vadd.f32 -0.002, %v4512_v8  ;;  %v4496_v60 = vmul.f32 0.001, %v10193_v15  ;;  %v6076_v32 = vld [vmem:[%s6249_s25 + $0x250] sm:$0xff] }
 0x415   : > { %v4825_v42 = vmul.f32 %v12372_v35, %v4313_v38  ;;  %v3882_v45 = vpop.permute.xlu1 %3881  ;;  %v10208_v29 = vmul.f32 %v3554_v27, %v3426_v24  ;;  %v10214_v16 = vmul.f32 %v5467_v2, %v10158_v61  ;;  %v5076_v4 = vrot.slane %v5075_v30, 4  ;;  %v6077_v38 = vld [vmem:[%s6249_s25 + $0x350] sm:$0xff] }
 0x416   : > { %v4948_v57 = vadd.f32 %v4820_v56, %v9535_v50  ;;  %v5084_v5 = vadd.f32 %v5083_v22, %v4947_v23  ;;  %v4310_v13 = vmul.f32 %v9578_v54, %v3882_v45  ;;  %v3902_v62 = vpop.permute.xlu0 %3901  ;;  %4025 = vperm.xlu1 %5569, %v6076_v32   ;;  %v3585_v24 = vmul.f32 %v3457_v14, %v3457_v14  ;;  %v12373_v50 = vld [vmem:[#allocation156_spill] sm:$0xff]  ;;  %v12374_v56 = vld [vmem:[#allocation165_spill] sm:$0xff]  ;;  %v12375_v45 = vld [vmem:[#allocation78_spill] sm:$0xff] }
 0x417   : > { %v4953_v10 = vadd.f32 %v4825_v42, %v9542_v59  ;;  %v4315_v8 = vmul.f32 %v9578_v54, %v3902_v62  ;;  %4153 = vperm.xlu0 %5568, %v6077_v38   ;;  %v4498_v22 = vmul.f32 0.001, %v10204_v53  ;;  %v10221_v55 = vmul.f32 %v3586_v18, %v3458_v19  ;;  %v12376_v19 = vld [vmem:[#allocation64_spill] sm:$0xff] }
 0x418   : > { %v5085_v27 = vadd.f32 %v5084_v5, %v4948_v57  ;;  %v4822_v23 = vmul.f32 %v12373_v50, %v4310_v13  ;;  %v10225_v35 = vmul.f32 %v5499_v26, %v10172_v37  ;;  %v5483_v59 = vadd.f32 -0.002, %v4496_v60  ;;  %v6078_v13 = vld [vmem:[%s6249_s25 + $0x2d0] sm:$0xff] }
 0x419   : > { %v4827_v61 = vmul.f32 %v12374_v56, %v4315_v8  ;;  %v3890_v2 = vpop.permute.xlu1 %3889  ;;  %v4482_v42 = vmul.f32 0.001, %v10208_v29  ;;  %v3428_v18 = vmul.f32 %v12376_v19, %v12376_v19  ;;  %v5077_v38 = vadd.f32 %v5076_v4, %v5075_v30  ;;  %v12377_v8 = vld [vmem:[#allocation61_spill] sm:$0xff]  ;;  %v6079_v26 = vld [vmem:[%s6249_s25 + $0x3d0] sm:$0xff] }
 0x41a   : > { %v4950_v62 = vadd.f32 %v4822_v23, %v12375_v45  ;;  %v5086_v32 = vadd.f32 %v5085_v27, %v4949_v63  ;;  %v4312_v57 = vmul.f32 %v9578_v54, %v3890_v2  ;;  %v3910_v5 = vpop.permute.xlu0 %3909  ;;  %4089 = vperm.xlu1 %5569, %v6078_v13   ;;  %v10236_v60 = vmul.f32 %v3585_v24, %v3457_v14  ;;  %v12378_v63 = vld [vmem:[#allocation19_spill] sm:$0xff] }
 0x41b   : > { %v4955_v50 = vadd.f32 %v4827_v61, %v12377_v8  ;;  %v4317_v37 = vmul.f32 %v9578_v54, %v3910_v5  ;;  %4217 = vperm.xlu0 %5568, %v6079_v26   ;;  %v5485_v56 = vadd.f32 -0.002, %v4498_v22  ;;  %v4514_v2 = vmul.f32 0.001, %v10221_v55  ;;  %v12379_v45 = vld [vmem:[#allocation167_spill] sm:$0xff] }
 0x41c   : > { %v5087_v23 = vadd.f32 %v5086_v32, %v4950_v62  ;;  %v4824_v27 = vmul.f32 %v12378_v63, %v4312_v57  ;;  %v10242_v30 = vmul.f32 %v5483_v59, %v10193_v15  ;;  %v5469_v4 = vadd.f32 -0.002, %v4482_v42  ;;  %v12380_v61 = vld [vmem:[#allocation75_spill] sm:$0xff]  ;;  %v12381_v63 = vld [vmem:[#allocation193_spill] sm:$0xff] }
 0x41d   : > { %v4829_v13 = vmul.f32 %v12379_v45, %v4317_v37  ;;  %v3898_v19 = vpop.permute.xlu1 %3897  ;;  %v3427_v5 = vmul.f32 %v12380_v61, %v12380_v61  ;;  %v6080_v22 = vld [vmem:[%s6249_s25 + $0x258] sm:$0xff]  ;;  %v3556_v57 = vmul.f32 %v3428_v18, %v3428_v18  ;;  %v5078_v8 = vrot.slane %v5077_v38, 2 }
 0x41e   : > { %v4952_v14 = vadd.f32 %v4824_v27, %v9611_v49  ;;  %v5088_v24 = vadd.f32 %v5087_v23, %v4951_v0  ;;  %v4314_v62 = vmul.f32 %v9578_v54, %v3898_v19  ;;  %v3918_v32 = vpop.permute.xlu0 %3917  ;;  %4029 = vperm.xlu1 %5569, %v6080_v22   ;;  %v6081_v15 = vld [vmem:[%s6249_s25 + $0x358] sm:$0xff]  ;;  %v4513_v59 = vmul.f32 0.001, %v10236_v60  ;;  %v12382_v23 = vld [vmem:[#allocation5_spill] sm:$0xff]  ;;  %v12383_v22 = vld [vmem:[#allocation98_spill] sm:$0xff] }
 0x41f   : > { %v4957_v37 = vadd.f32 %v4829_v13, %v9621_v41  ;;  %v4319_v26 = vmul.f32 %v9578_v54, %v3918_v32  ;;  %4157 = vperm.xlu0 %5568, %v6081_v15   ;;  %v10255_v0 = vmul.f32 %v5485_v56, %v10204_v53  ;;  %v5501_v19 = vadd.f32 -0.002, %v4514_v2  ;;  %v6082_v53 = vld [vmem:[%s6249_s25 + $0x2d8] sm:$0xff] }
 0x420   : > { %v5089_v42 = vadd.f32 %v5088_v24, %v4952_v14  ;;  %v4826_v49 = vmul.f32 %v12381_v63, %v4314_v62  ;;  %v10259_v41 = vmul.f32 %v5469_v4, %v10208_v29  ;;  %v3555_v13 = vmul.f32 %v3427_v5, %v3427_v5  ;;  %v6083_v4 = vld [vmem:[%s6249_s25 + $0x3d8] sm:$0xff] }
 0x421   : > { %v4831_v27 = vmul.f32 %v12382_v23, %v4319_v26  ;;  %v3906_v45 = vpop.permute.xlu1 %3905  ;;  %v3444_v32 = vmul.f32 %v9669_v3, %v9669_v3  ;;  %v10266_v56 = vmul.f32 %v3556_v57, %v3428_v18  ;;  %v10268_v2 = vadd.f32 %v5078_v8, %v5077_v38  ;;  %v12385_v26 = vld [vmem:[#allocation99_spill] sm:$0xff] }
 0x422   : > { %v4954_v15 = vadd.f32 %v4826_v49, %v12383_v22  ;;  %v5090_v14 = vadd.f32 %v5089_v42, %v4953_v10  ;;  %v4316_v24 = vmul.f32 %v9578_v54, %v3906_v45  ;;  %v3926_v62 = vpop.permute.xlu0 %3925  ;;  %4093 = vperm.xlu1 %5569, %v6082_v53   ;;  %v5500_v23 = vadd.f32 -0.002, %v4513_v59  ;;  %v12386_v49 = vld [vmem:[#allocation18_spill] sm:$0xff]  ;;  %v12387_v45 = vld [vmem:[#allocation81_spill] sm:$0xff]  ;;  %v12388_v57 = vld [vmem:[#allocation11_spill] sm:$0xff] }
 0x423   : > { %12384 = vst [vmem:[#allocation121_spill] sm:$0xff] %v10268_v2  ;;  %v4959_v63 = vadd.f32 %v4831_v27, %v12385_v26  ;;  %v4321_v29 = vmul.f32 %v9726_v20, %v3926_v62  ;;  %4221 = vperm.xlu0 %5568, %v6083_v4   ;;  %v10275_v42 = vmul.f32 %v5501_v19, %v10221_v55  ;;  %v6084_v19 = vld [vmem:[%s6249_s25 + $0x260] sm:$0xff] }
 0x424   : > { %v5091_v3 = vadd.f32 %v5090_v14, %v4954_v15  ;;  %v4828_v10 = vmul.f32 %v12386_v49, %v4316_v24  ;;  %v3443_v18 = vmul.f32 %v12387_v45, %v12387_v45  ;;  %v10280_v27 = vmul.f32 %v3555_v13, %v3427_v5  ;;  %v6085_v13 = vld [vmem:[%s6249_s25 + $0x360] sm:$0xff]  ;;  %v12390_v49 = vld [vmem:[#allocation195_spill] sm:$0xff] }
 0x425   : > { %v4833_v38 = vmul.f32 %v12388_v57, %v4321_v29  ;;  %v3914_v8 = vpop.permute.xlu1 %3913  ;;  %v3572_v22 = vmul.f32 %v3444_v32, %v3444_v32  ;;  %v3460_v62 = vmul.f32 %v9810_v31, %v9810_v31  ;;  %v4484_v24 = vmul.f32 0.001, %v10266_v56 }
 0x426   : > { %v4956_v59 = vadd.f32 %v4828_v10, %v9693_v6  ;;  %v5092_v15 = vadd.f32 %v5091_v3, %v4955_v50  ;;  %v4318_v14 = vmul.f32 %v9578_v54, %v3914_v8  ;;  %v3934_v55 = vpop.permute.xlu0 %3933  ;;  %4033 = vperm.xlu1 %5569, %v6084_v19   ;;  %v10293_v29 = vmul.f32 %v5500_v23, %v10236_v60  ;;  %v12389_v6 = vld [vmem:[#allocation164_spill] sm:$0xff] }
 0x427   : > { %v4961_v26 = vadd.f32 %v4833_v38, %v9701_v51  ;;  %v4323_v5 = vmul.f32 %v9726_v20, %v3934_v55  ;;  %4161 = vperm.xlu0 %5568, %v6085_v13   ;;  %v3571_v50 = vmul.f32 %v3443_v18, %v3443_v18  ;;  %v3459_v4 = vmul.f32 %v9829_v9, %v9829_v9  ;;  %v12391_v19 = vld [vmem:[#allocation100_spill] sm:$0xff] }
 0x428   : > { %v5093_v3 = vadd.f32 %v5092_v15, %v4956_v59  ;;  %v4830_v54 = vmul.f32 %v12389_v6, %v4318_v14  ;;  %v4483_v51 = vmul.f32 0.001, %v10280_v27  ;;  %v10300_v38 = vmul.f32 %v3572_v22, %v3444_v32  ;;  %v6086_v15 = vld [vmem:[%s6249_s25 + $0x2e0] sm:$0xff]  ;;  %v12393_v22 = vld [vmem:[#allocation74_spill] sm:$0xff] }
 0x429   : > { %v4835_v10 = vmul.f32 %v12390_v49, %v4323_v5  ;;  %v3922_v57 = vpop.permute.xlu1 %3921  ;;  %v3588_v8 = vmul.f32 %v3460_v62, %v3460_v62  ;;  %v5471_v14 = vadd.f32 -0.002, %v4484_v24  ;;  %v6087_v5 = vld [vmem:[%s6249_s25 + $0x3e0] sm:$0xff]  ;;  %v3587_v24 = vmul.f32 %v3459_v4, %v3459_v4 }
 0x42a   : > { %v4958_v55 = vadd.f32 %v4830_v54, %v9716_v11  ;;  %v5094_v60 = vadd.f32 %v5093_v3, %v4957_v37  ;;  %v4320_v23 = vmul.f32 %v9726_v20, %v3922_v57  ;;  %v3942_v59 = vpop.permute.xlu0 %3941  ;;  %4097 = vperm.xlu1 %5569, %v6086_v15   ;;  %v12392_v49 = vld [vmem:[#allocation68_spill] sm:$0xff]  ;;  %v3429_v11 = vmul.f32 %v12393_v22, %v12393_v22  ;;  %v12394_v3 = vld [vmem:[#allocation166_spill] sm:$0xff]  ;;  %v12395_v15 = vld [vmem:[#allocation35_spill] sm:$0xff] }
 0x42b   : > { %v4963_v13 = vadd.f32 %v4835_v10, %v12391_v19  ;;  %v4325_v6 = vmul.f32 %v9726_v20, %v3942_v59  ;;  %4225 = vperm.xlu0 %5568, %v6087_v5   ;;  %v3430_v32 = vmul.f32 %v12392_v49, %v12392_v49  ;;  %v10313_v57 = vmul.f32 %v3571_v50, %v3443_v18  ;;  %v12396_v49 = vld [vmem:[#allocation101_spill] sm:$0xff]  ;;  %v12397_v18 = vld [vmem:[#allocation103_spill] sm:$0xff] }
 0x42c   : > { %v5095_v37 = vadd.f32 %v5094_v60, %v4958_v55  ;;  %v4832_v54 = vmul.f32 %v12394_v3, %v4320_v23  ;;  %v5470_v59 = vadd.f32 -0.002, %v4483_v51  ;;  %v4500_v5 = vmul.f32 0.001, %v10300_v38  ;;  %v6088_v23 = vld [vmem:[%s6249_s25 + $0x268] sm:$0xff]  ;;  %v12398_v3 = vld [vmem:[#allocation112_spill] sm:$0xff] }
 0x42d   : > { %v4837_v10 = vmul.f32 %v12395_v15, %v4325_v6  ;;  %v3930_v19 = vpop.permute.xlu1 %3929  ;;  %v10317_v53 = vmul.f32 %v3588_v8, %v3460_v62  ;;  %v3446_v50 = vmul.f32 %v12397_v18, %v12397_v18  ;;  %v6089_v15 = vld [vmem:[%s6249_s25 + $0x368] sm:$0xff]  ;;  %v3558_v62 = vmul.f32 %v3430_v32, %v3430_v32 }
 0x42e   : > { %v10319_v2 = vadd.f32 %v5095_v37, %v4959_v63  ;;  %v4960_v9 = vadd.f32 %v4832_v54, %v12396_v49  ;;  %v4322_v55 = vmul.f32 %v9726_v20, %v3930_v19  ;;  %v3950_v60 = vpop.permute.xlu0 %3949  ;;  %4037 = vperm.xlu1 %5569, %v6088_v23   ;;  %v3557_v63 = vmul.f32 %v3429_v11, %v3429_v11  ;;  %v12399_v37 = vld [vmem:[#allocation6_spill] sm:$0xff] }
 0x42f   : > { %v4965_v6 = vadd.f32 %v4837_v10, %v12398_v3  ;;  %v4327_v51 = vmul.f32 %v9726_v20, %v3950_v60  ;;  %4165 = vperm.xlu0 %5568, %v6089_v15   ;;  %v4499_v54 = vmul.f32 0.001, %v10313_v57  ;;  %v10331_v19 = vmul.f32 %v3587_v24, %v3459_v4  ;;  %v12400_v23 = vld [vmem:[#allocation26_spill] sm:$0xff]  ;;  %v12401_v15 = vld [vmem:[#allocation111_spill] sm:$0xff] }
 0x430   : > { %v5103_v8 = vadd.f32 %v4961_v26, %v4960_v9  ;;  %v4834_v49 = vmul.f32 %v12399_v37, %v4322_v55  ;;  %v10335_v10 = vmul.f32 %v5471_v14, %v10266_v56  ;;  %v5487_v60 = vadd.f32 -0.002, %v4500_v5  ;;  %v6090_v55 = vld [vmem:[%s6249_s25 + $0x2e8] sm:$0xff] }
 0x431   : > { %v4839_v22 = vmul.f32 %v12400_v23, %v4327_v51  ;;  %v3938_v18 = vpop.permute.xlu1 %3937  ;;  %v4516_v3 = vmul.f32 0.001, %v10317_v53  ;;  %v10342_v37 = vmul.f32 %v5470_v59, %v10280_v27  ;;  %v3574_v4 = vmul.f32 %v3446_v50, %v3446_v50  ;;  %v6091_v56 = vld [vmem:[%s6249_s25 + $0x3e8] sm:$0xff]  ;;  %v12403_v59 = vld [vmem:[#allocation39_spill] sm:$0xff] }
 0x432   : > { %v4962_v31 = vadd.f32 %v4834_v49, %v12401_v15  ;;  %v4324_v9 = vmul.f32 %v9726_v20, %v3938_v18  ;;  %v3958_v26 = vpop.permute.xlu0 %3957  ;;  %4101 = vperm.xlu1 %5569, %v6090_v55   ;;  %v10347_v14 = vmul.f32 %v3558_v62, %v3430_v32  ;;  %v10349_v5 = vmul.f32 %v3557_v63, %v3429_v11  ;;  %v12402_v18 = vld [vmem:[#allocation31_spill] sm:$0xff] }
 0x433   : > { %v4967_v24 = vadd.f32 %v4839_v22, %v9819_v12  ;;  %v4329_v51 = vmul.f32 %v9726_v20, %v3958_v26  ;;  %4229 = vperm.xlu0 %5568, %v6091_v56   ;;  %v5486_v15 = vadd.f32 -0.002, %v4499_v54  ;;  %v4515_v27 = vmul.f32 0.001, %v10331_v19  ;;  %v12405_v26 = vld [vmem:[#allocation88_spill] sm:$0xff] }
 0x434   : > { %v5104_v49 = vadd.f32 %v5103_v8, %v4962_v31  ;;  %v4836_v23 = vmul.f32 %v12402_v18, %v4324_v9  ;;  %v10355_v12 = vmul.f32 %v5487_v60, %v10300_v38  ;;  %v5503_v22 = vadd.f32 -0.002, %v4516_v3  ;;  %v6092_v8 = vld [vmem:[%s6249_s25 + $0x270] sm:$0xff]  ;;  %v12406_v9 = vld [vmem:[#allocation96_spill] sm:$0xff] }
 0x435   : > { %v4841_v55 = vmul.f32 %v12403_v59, %v4329_v51  ;;  %v3946_v45 = vpop.permute.xlu1 %3945  ;;  %v3445_v32 = vmul.f32 %v12405_v26, %v12405_v26  ;;  %v10362_v54 = vmul.f32 %v3574_v4, %v3446_v50  ;;  %v6093_v38 = vld [vmem:[%s6249_s25 + $0x370] sm:$0xff]  ;;  %v4486_v60 = vmul.f32 0.001, %v10347_v14 }
 0x436   : > { %12404 = vst [vmem:[#allocation125_spill] sm:$0xff] %v10355_v12  ;;  %v4964_v11 = vadd.f32 %v4836_v23, %v9832_v39  ;;  %v5105_v62 = vadd.f32 %v5104_v49, %v4963_v13  ;;  %v4326_v31 = vmul.f32 %v9726_v20, %v3946_v45  ;;  %v3966_v63 = vpop.permute.xlu0 %3965  ;;  %4041 = vperm.xlu1 %5569, %v6092_v8   ;;  %v4485_v3 = vmul.f32 0.001, %v10349_v5  ;;  %v12407_v13 = vld [vmem:[#allocation22_spill] sm:$0xff]  ;;  %v12409_v18 = vld [vmem:[#allocation123_spill] sm:$0xff] }
 0x437   : > { %v4969_v51 = vadd.f32 %v4841_v55, %v12406_v9  ;;  %v4331_v56 = vmul.f32 %v9726_v20, %v3966_v63  ;;  %4169 = vperm.xlu0 %5568, %v6093_v38   ;;  %v10371_v45 = vmul.f32 %v5486_v15, %v10313_v57  ;;  %v5502_v50 = vadd.f32 -0.002, %v4515_v27  ;;  %v12410_v63 = vld [vmem:[#allocation110_spill] sm:$0xff]  ;;  %v12411_v9 = vld [vmem:[#allocation119_spill] sm:$0xff]  ;;  %v12412_v15 = vld [vmem:[#allocation24_spill] sm:$0xff] }
 0x438   : > { %v5106_v39 = vadd.f32 %v5105_v62, %v4964_v11  ;;  %v4838_v49 = vmul.f32 %v12407_v13, %v4326_v31  ;;  %v5097_v4 = vrot.slane %v10319_v2, 4  ;;  %v3573_v55 = vmul.f32 %v3445_v32, %v3445_v32  ;;  %v6094_v31 = vld [vmem:[%s6249_s25 + $0x2f0] sm:$0xff] }
 0x439   : > { %12408 = vst [vmem:[#allocation129_spill] sm:$0xff] %v10371_v45  ;;  %v4843_v23 = vmul.f32 %v12409_v18, %v4331_v56  ;;  %v3954_v59 = vpop.permute.xlu1 %3953  ;;  %v3462_v8 = vmul.f32 %v12410_v63, %v12410_v63  ;;  %v4502_v57 = vmul.f32 0.001, %v10362_v54  ;;  %v6095_v56 = vld [vmem:[%s6249_s25 + $0x3f0] sm:$0xff]  ;;  %v5473_v18 = vadd.f32 -0.002, %v4486_v60 }
 0x43a   : > { %v4966_v38 = vadd.f32 %v4838_v49, %v12411_v9  ;;  %v5107_v26 = vadd.f32 %v5106_v39, %v4965_v6  ;;  %v4328_v11 = vmul.f32 %v9726_v20, %v3954_v59  ;;  %v3974_v62 = vpop.permute.xlu0 %3973  ;;  %4105 = vperm.xlu1 %5569, %v6094_v31   ;;  %v5472_v12 = vadd.f32 -0.002, %v4485_v3  ;;  %v12413_v45 = vld [vmem:[#allocation170_spill] sm:$0xff] }
 0x43b   : > { %v4971_v27 = vadd.f32 %v4843_v23, %v12412_v15  ;;  %v4333_v13 = vmul.f32 %v9726_v20, %v3974_v62  ;;  %4233 = vperm.xlu0 %5568, %v6095_v56   ;;  %v10386_v6 = vmul.f32 %v5503_v22, %v10317_v53  ;;  %v10389_v39 = vmul.f32 %v5502_v50, %v10331_v19  ;;  %v12416_v23 = vld [vmem:[#allocation122_spill] sm:$0xff]  ;;  %v12417_v56 = vld [vmem:[#allocation53_spill] sm:$0xff]  ;;  %v6097_v50 = vld [vmem:[%s6249_s25 + $0x3f8] sm:$0xff] }
 0x43c   : > { %v5108_v63 = vadd.f32 %v5107_v26, %v4966_v38  ;;  %v4840_v49 = vmul.f32 %v12413_v45, %v4328_v11  ;;  %v5098_v59 = vadd.f32 %v5097_v4, %v10319_v2  ;;  %v3701_v31 = vmul.f32 %v3573_v55, %v3445_v32  ;;  %v6096_v38 = vld [vmem:[%s6249_s25 + $0x278] sm:$0xff]  ;;  %v12418_v22 = vld [vmem:[#allocation173_spill] sm:$0xff] }
 0x43d   : > { %12414 = vst [vmem:[#allocation120_spill] sm:$0xff] %v10386_v6  ;;  %12415 = vst [vmem:[#allocation132_spill] sm:$0xff] %v10389_v39  ;;  %v4845_v9 = vmul.f32 %v12416_v23, %v4333_v13  ;;  %v3962_v62 = vpop.permute.xlu1 %3961  ;;  %v3590_v15 = vmul.f32 %v3462_v8, %v3462_v8  ;;  %v5489_v53 = vadd.f32 -0.002, %v4502_v57  ;;  %v10400_v2 = vmul.f32 %v5473_v18, %v10347_v14  ;;  %v12421_v4 = vld [vmem:[#allocation171_spill] sm:$0xff]  ;;  %v12440_v6 = vld [vmem:[#allocation85_spill] sm:$0xff] }
 0x43e   : > { %v4968_v60 = vadd.f32 %v4840_v49, %v12417_v56  ;;  %v5109_v3 = vadd.f32 %v5108_v63, %v4967_v24  ;;  %v4330_v26 = vmul.f32 %v9726_v20, %v3962_v62  ;;  %v3982_v45 = vpop.permute.xlu0 %3981  ;;  %4045 = vperm.xlu1 %5569, %v6096_v38   ;;  %v10403_v32 = vmul.f32 %v5472_v12, %v10349_v5  ;;  %v12422_v63 = vld [vmem:[#allocation114_spill] sm:$0xff]  ;;  %v12423_v57 = vld [vmem:[#allocation79_spill] sm:$0xff] }
 0x43f   : > { %v4973_v11 = vadd.f32 %v4845_v9, %v12418_v22  ;;  %v4335_v19 = vmul.f32 %v9726_v20, %v3982_v45  ;;  %4237 = vperm.xlu0 %5568, %v6097_v50   ;;  %12419 = vst [vmem:[#allocation190_spill] sm:$0xff] %v10400_v2  ;;  %v3461_v13 = vmul.f32 %v12422_v63, %v12422_v63  ;;  %v5099_v23 = vrot.slane %v5098_v59, 2  ;;  %v12424_v9 = vld [vmem:[#allocation37_spill] sm:$0xff]  ;;  %v12426_v22 = vld [vmem:[#allocation84_spill] sm:$0xff] }
 0x440   : > { %12420 = vst [vmem:[#allocation135_spill] sm:$0xff] %v10403_v32  ;;  %v5110_v24 = vadd.f32 %v5109_v3, %v4968_v60  ;;  %v4842_v55 = vmul.f32 %v12421_v4, %v4330_v26  ;;  %v3432_v49 = vmul.f32 %v12423_v57, %v12423_v57  ;;  %v4501_v45 = vmul.f32 0.001, %v3701_v31  ;;  %v6098_v60 = vld [vmem:[%s6249_s25 + $0x2f8] sm:$0xff] }
 0x441   : > { %v4847_v62 = vmul.f32 %v12424_v9, %v4335_v19  ;;  %v3970_v56 = vpop.permute.xlu1 %3969  ;;  %v10411_v38 = vmul.f32 %v3590_v15, %v3462_v8  ;;  %v10417_v3 = vmul.f32 %v5489_v53, %v10362_v54  ;;  %v12427_v19 = vld [vmem:[#allocation83_spill] sm:$0xff]  ;;  %v12428_v8 = vld [vmem:[#allocation89_spill] sm:$0xff]  ;;  %v3589_v9 = vmul.f32 %v3461_v13, %v3461_v13  ;;  %v12432_v53 = vld [vmem:[#allocation44_spill] sm:$0xff] }
 0x442   : > { %v4970_v14 = vadd.f32 %v4842_v55, %v9954_v1  ;;  %v5111_v5 = vadd.f32 %v5110_v24, %v4969_v51  ;;  %v4332_v12 = vmul.f32 %v9726_v20, %v3970_v56  ;;  %v3990_v18 = vpop.permute.xlu0 %3989  ;;  %4109 = vperm.xlu1 %5569, %v6098_v60   ;;  %v3431_v4 = vmul.f32 %v12427_v19, %v12427_v19  ;;  %v12430_v24 = vld [vmem:[#allocation20_spill] sm:$0xff]  ;;  %v12433_v60 = vld [vmem:[#allocation93_spill] sm:$0xff] }
 0x443   : > { %12425 = vst [vmem:[#allocation136_spill] sm:$0xff] %v10417_v3  ;;  %v4975_v26 = vadd.f32 %v4847_v62, %v9977_v7  ;;  %v4337_v50 = vmul.f32 %v12426_v22, %v3990_v18  ;;  %v3448_v1 = vmul.f32 %v12428_v8, %v12428_v8  ;;  %v12429_v51 = vmov 0   ;;  %v12434_v57 = vld [vmem:[#allocation80_spill] sm:$0xff] }
 0x444   : > { %5571 = vset.pattern.permute.xlu0 %v12429_v51  ;;  %v5112_v15 = vadd.f32 %v5111_v5, %v4970_v14  ;;  %v4844_v55 = vmul.f32 %v12430_v24, %v4332_v12  ;;  %v3560_v56 = vmul.f32 %v3432_v49, %v3432_v49  ;;  %v10427_v54 = vadd.f32 %v5099_v23, %v5098_v59  ;;  %v6099_v14 = vld [vmem:[%s6249_s25 + $0x378] sm:$0xff] }
 0x445   : > { %v4849_v7 = vmul.f32 %v12432_v53, %v4337_v50  ;;  %v3978_v62 = vpop.permute.xlu1 %3977  ;;  %v5488_v18 = vadd.f32 -0.002, %v4501_v45  ;;  %v3447_v19 = vmul.f32 %v12433_v60, %v12433_v60  ;;  %v4518_v5 = vmul.f32 0.001, %v10411_v38  ;;  %v12435_v12 = vld [vmem:[#allocation172_spill] sm:$0xff]  ;;  %v12436_v53 = vld [vmem:[#allocation38_spill] sm:$0xff] }
 0x446   : > { %12431 = vst [vmem:[#allocation176_spill] sm:$0xff] %v10427_v54  ;;  %v4972_v63 = vadd.f32 %v4844_v55, %v12434_v57  ;;  %v5113_v3 = vadd.f32 %v5112_v15, %v4971_v27  ;;  %v4334_v8 = vmul.f32 %v9726_v20, %v3978_v62  ;;  %v3998_v2 = vpop.permute.xlu0 %3997  ;;  %4173 = vperm.xlu1 %5569, %v6099_v14   ;;  %v12437_v57 = vld [vmem:[#allocation46_spill] sm:$0xff]  ;;  %v12439_v62 = vld [vmem:[#allocation115_spill] sm:$0xff] }
 0x447   : > { %v4977_v59 = vadd.f32 %v4849_v7, %v12435_v12  ;;  %v4339_v23 = vmul.f32 %v12426_v22, %v3998_v2  ;;  %v3559_v50 = vmul.f32 %v3431_v4, %v3431_v4  ;;  %v3576_v24 = vmul.f32 %v3448_v1, %v3448_v1 }
 0x448   : > { %v5114_v45 = vadd.f32 %v5113_v3, %v4972_v63  ;;  %v4846_v54 = vmul.f32 %v12436_v53, %v4334_v8  ;;  %v3717_v60 = vmul.f32 %v3589_v9, %v3461_v13  ;;  %v3688_v32 = vmul.f32 %v3560_v56, %v3432_v49  ;;  %v12441_v63 = vld [vmem:[#allocation17_spill] sm:$0xff]  ;;  %v12442_v13 = vld [vmem:[#allocation116_spill] sm:$0xff] }
 0x449   : > { %v4851_v27 = vmul.f32 %v12437_v57, %v4339_v23  ;;  %v3986_v15 = vpop.permute.xlu1 %3985  ;;  %v10440_v20 = vmul.f32 %v5488_v18, %v3701_v31  ;;  %v3575_v55 = vmul.f32 %v3447_v19, %v3447_v19  ;;  %v3464_v14 = vmul.f32 %v12439_v62, %v12439_v62  ;;  %v12443_v18 = vld [vmem:[#allocation33_spill] sm:$0xff] }
 0x44a   : > { %v4974_v7 = vadd.f32 %v4846_v54, %v12440_v6  ;;  %v5115_v12 = vadd.f32 %v5114_v45, %v4973_v11  ;;  %v4336_v2 = vmul.f32 %v12426_v22, %v3986_v15  ;;  %v4006_v39 = vpop.permute.xlu0 %4005  ;;  %v3463_v3 = vmul.f32 %v12441_v63, %v12441_v63  ;;  %5570 = vset.pattern.permute.xlu1 %v12429_v51  ;;  %v12444_v11 = vld [vmem:[#allocation51_spill] sm:$0xff]  ;;  %v12445_v51 = vld [vmem:[#allocation113_spill] sm:$0xff] }
 0x44b   : > { %12438 = vst [vmem:[#allocation128_spill] sm:$0xff] %v10440_v20  ;;  %v4979_v49 = vadd.f32 %v4851_v27, %v12442_v13  ;;  %v4341_v31 = vmul.f32 %v12426_v22, %v4006_v39  ;;  %v3687_v8 = vmul.f32 %v3559_v50, %v3431_v4  ;;  %v3704_v9 = vmul.f32 %v3576_v24, %v3448_v1  ;;  %v12446_v1 = vld [vmem:[#allocation124_spill] sm:$0xff] }
 0x44c   : > { %v5116_v56 = vadd.f32 %v5115_v12, %v4974_v7  ;;  %v4848_v23 = vmul.f32 %v12443_v18, %v4336_v2  ;;  %v4517_v53 = vmul.f32 0.001, %v3717_v60  ;;  %v4488_v6 = vmul.f32 0.001, %v3688_v32  ;;  %v12447_v13 = vld [vmem:[#allocation40_spill] sm:$0xff] }
 0x44d   : > { %v4853_v54 = vmul.f32 %v12444_v11, %v4341_v31  ;;  %v3994_v45 = vpop.permute.xlu1 %3993  ;;  %v5505_v57 = vadd.f32 -0.002, %v4518_v5  ;;  %v3703_v15 = vmul.f32 %v3575_v55, %v3447_v19  ;;  %v3592_v62 = vmul.f32 %v3464_v14, %v3464_v14  ;;  %v12448_v55 = vld [vmem:[#allocation67_spill] sm:$0xff]  ;;  %v12449_v11 = vld [vmem:[#allocation92_spill] sm:$0xff] }
 0x44e   : > { %v10453_v63 = vadd.f32 %v5116_v56, %v4975_v26  ;;  %v4976_v20 = vadd.f32 %v4848_v23, %v12445_v51  ;;  %v4338_v27 = vmul.f32 %v12426_v22, %v3994_v45  ;;  %v4014_v39 = vpop.permute.xlu0 %4013  ;;  %v3591_v4 = vmul.f32 %v3463_v3, %v3463_v3 }
 0x44f   : > { %v4981_v50 = vadd.f32 %v4853_v54, %v12446_v1  ;;  %v4343_v24 = vmul.f32 %v12426_v22, %v4014_v39  ;;  %v4487_v7 = vmul.f32 0.001, %v3687_v8  ;;  %v4504_v12 = vmul.f32 0.001, %v3704_v9 }
 0x450   : > { %v5124_v2 = vadd.f32 %v4977_v59, %v4976_v20  ;;  %v4850_v31 = vmul.f32 %v12447_v13, %v4338_v27  ;;  %v5504_v5 = vadd.f32 -0.002, %v4517_v53  ;;  %v5475_v19 = vadd.f32 -0.002, %v4488_v6 }
 0x451   : > { %v4855_v26 = vmul.f32 %v12448_v55, %v4343_v24  ;;  %v4002_v56 = vpop.permute.xlu1 %4001  ;;  %v4503_v18 = vmul.f32 0.001, %v3703_v15  ;;  %v3720_v23 = vmul.f32 %v3592_v62, %v3464_v14  ;;  %v3449_v45 = vmul.f32 %v12449_v11, %v12449_v11  ;;  %v12450_v62 = vld [vmem:[#allocation29_spill] sm:$0xff] }
 0x452   : > { %v4978_v51 = vadd.f32 %v4850_v31, %v10085_v25  ;;  %v4340_v54 = vmul.f32 %v12426_v22, %v4002_v56  ;;  %v4022_v39 = vpop.permute.xlu0 %4021  ;;  %v10466_v1 = vmul.f32 %v5505_v57, %v10411_v38  ;;  %v3719_v59 = vmul.f32 %v3591_v4, %v3463_v3  ;;  %v12451_v25 = vld [vmem:[#allocation45_spill] sm:$0xff] }
 0x453   : > { %v4983_v20 = vadd.f32 %v4855_v26, %v10088_v21  ;;  %v4345_v53 = vmul.f32 %v12426_v22, %v4022_v39  ;;  %v5474_v6 = vadd.f32 -0.002, %v4487_v7  ;;  %v5491_v27 = vadd.f32 -0.002, %v4504_v12  ;;  %v12452_v26 = vld [vmem:[#allocation50_spill] sm:$0xff] }
 0x454   : > { %v5125_v24 = vadd.f32 %v5124_v2, %v4978_v51  ;;  %v4852_v14 = vmul.f32 %v12450_v62, %v4340_v54  ;;  %v10471_v13 = vmul.f32 %v5504_v5, %v3717_v60  ;;  %v10473_v55 = vmul.f32 %v5475_v19, %v3688_v32  ;;  %v12453_v51 = vld [vmem:[#allocation82_spill] sm:$0xff] }
 0x455   : > { %v4857_v31 = vmul.f32 %v12451_v25, %v4345_v53  ;;  %v4010_v56 = vpop.permute.xlu1 %4009  ;;  %v5490_v11 = vadd.f32 -0.002, %v4503_v18  ;;  %v4520_v38 = vmul.f32 0.001, %v3720_v23  ;;  %v3577_v57 = vmul.f32 %v3449_v45, %v3449_v45  ;;  %v12455_v39 = vld [vmem:[#allocation130_spill] sm:$0xff] }
 0x456   : > { %v4980_v3 = vadd.f32 %v4852_v14, %v10104_v33  ;;  %v5126_v21 = vadd.f32 %v5125_v24, %v4979_v49  ;;  %v4342_v4 = vmul.f32 %v12426_v22, %v4010_v56  ;;  %v4054_v7 = vpop.permute.xlu0 %4053  ;;  %v4519_v12 = vmul.f32 0.001, %v3719_v59  ;;  %v12454_v33 = vld [vmem:[#allocation174_spill] sm:$0xff] }
 0x457   : > { %v4985_v2 = vadd.f32 %v4857_v31, %v10114_v58  ;;  %v4353_v60 = vmul.f32 %v10123_v46, %v4054_v7  ;;  %v10480_v5 = vmul.f32 %v5474_v6, %v3687_v8  ;;  %v10482_v32 = vmul.f32 %v5491_v27, %v3704_v9 }
 0x458   : > { %v5127_v19 = vadd.f32 %v5126_v21, %v4980_v3  ;;  %v4854_v18 = vmul.f32 %v12452_v26, %v4342_v4  ;;  %v3433_v54 = vmul.f32 %v12453_v51, %v12453_v51  ;;  %v3465_v49 = vmul.f32 %v12454_v33, %v12454_v33  ;;  %v12456_v21 = vld [vmem:[#allocation62_spill] sm:$0xff] }
 0x459   : > { %v4865_v53 = vmul.f32 %v12455_v39, %v4353_v60  ;;  %v4018_v24 = vpop.permute.xlu1 %4017  ;;  %v10490_v62 = vmul.f32 %v5490_v11, %v3703_v15  ;;  %v5507_v58 = vadd.f32 -0.002, %v4520_v38  ;;  %v3705_v14 = vmul.f32 %v3577_v57, %v3449_v45  ;;  %v12457_v11 = vld [vmem:[#allocation54_spill] sm:$0xff] }
 0x45a   : > { %v4982_v8 = vadd.f32 %v4854_v18, %v10119_v44  ;;  %v5128_v9 = vadd.f32 %v5127_v19, %v4981_v50  ;;  %v4344_v6 = vmul.f32 %v12426_v22, %v4018_v24  ;;  %v4118_v27 = vpop.permute.xlu0 %4117  ;;  %v5506_v25 = vadd.f32 -0.002, %v4519_v12  ;;  %v12458_v44 = vld [vmem:[#allocation134_spill] sm:$0xff] }
 0x45b   : > { %v5118_v31 = vrot.slane %v10453_v63, 4  ;;  %v4993_v56 = vadd.f32 %v4865_v53, %v10139_v34  ;;  %v4369_v3 = vmul.f32 %v10143_v28, %v4118_v27  ;;  %v3418_v4 = vmul.f32 %v12456_v21, %v12456_v21  ;;  %v12459_v19 = vld [vmem:[#allocation102_spill] sm:$0xff] }
 0x45c   : > { %v5129_v15 = vadd.f32 %v5128_v9, %v4982_v8  ;;  %v4856_v38 = vmul.f32 %v12457_v11, %v4344_v6  ;;  %v3561_v45 = vmul.f32 %v3433_v54, %v3433_v54  ;;  %v3593_v57 = vmul.f32 %v3465_v49, %v3465_v49 }
 0x45d   : > { %v4881_v50 = vmul.f32 %v12458_v44, %v4369_v3  ;;  %v4050_v7 = vpop.permute.xlu1 %4049  ;;  %v10501_v60 = vmul.f32 %v5507_v58, %v3720_v23  ;;  %v4505_v12 = vmul.f32 0.001, %v3705_v14  ;;  %v3450_v26 = vmul.f32 %v12459_v19, %v12459_v19 }
 0x45e   : > { %v4984_v34 = vadd.f32 %v4856_v38, %v10167_v36  ;;  %v5130_v18 = vadd.f32 %v5129_v15, %v4983_v20  ;;  %v4352_v39 = vmul.f32 %v10123_v46, %v4050_v7  ;;  %v4178_v53 = vpop.permute.xlu0 %4177  ;;  %v10507_v24 = vmul.f32 %v5506_v25, %v3719_v59  ;;  %v12460_v59 = vld [vmem:[#allocation87_spill] sm:$0xff]  ;;  %v12462_v7 = vld [vmem:[#allocation76_spill] sm:$0xff] }
 0x45f   : > { %v5119_v8 = vadd.f32 %v5118_v31, %v10453_v63  ;;  %v5009_v9 = vadd.f32 %v4881_v50, %v10180_v48  ;;  %v4384_v6 = vmul.f32 %v10147_v40, %v4178_v53  ;;  %v3546_v23 = vmul.f32 %v3418_v4, %v3418_v4  ;;  %v12461_v50 = vld [vmem:[#allocation25_spill] sm:$0xff] }
 0x460   : > { %v5131_v58 = vadd.f32 %v5130_v18, %v4984_v34  ;;  %v4864_v27 = vmul.f32 %v9492_v52, %v4352_v39  ;;  %v3689_v3 = vmul.f32 %v3561_v45, %v3433_v54  ;;  %v10513_v11 = vmul.f32 %v3593_v57, %v3465_v49 }
 0x461   : > { %v4896_v36 = vmul.f32 %v9781_v43, %v4384_v6  ;;  %v4114_v20 = vpop.permute.xlu1 %4113  ;;  %v5492_v15 = vadd.f32 -0.002, %v4505_v12  ;;  %v3578_v38 = vmul.f32 %v3450_v26, %v3450_v26  ;;  %v3434_v25 = vmul.f32 %v12460_v59, %v12460_v59  ;;  %v12463_v6 = vld [vmem:[#allocation52_spill] sm:$0xff] }
 0x462   : > { %v4992_v63 = vadd.f32 %v4864_v27, %v10214_v16  ;;  %v4368_v48 = vmul.f32 %v10143_v28, %v4114_v20  ;;  %v4122_v31 = vpop.permute.xlu0 %4121  ;;  %v10520_v44 = vadd.f32 %v5131_v58, %v4985_v2  ;;  %v3466_v52 = vmul.f32 %v12461_v50, %v12461_v50 }
 0x463   : > { %v5120_v54 = vrot.slane %v5119_v8, 2  ;;  %v5024_v49 = vadd.f32 %v4896_v36, %v10225_v35  ;;  %v4370_v43 = vmul.f32 %v10143_v28, %v4122_v31  ;;  %v3674_v45 = vmul.f32 %v3546_v23, %v3418_v4 }
 0x464   : > { %v5145_v57 = vadd.f32 %v4993_v56, %v4992_v63  ;;  %v4880_v12 = vmul.f32 %v12462_v7, %v4368_v48  ;;  %v4489_v34 = vmul.f32 0.001, %v3689_v3  ;;  %v4521_v16 = vmul.f32 0.001, %v10513_v11  ;;  %v12466_v48 = vld [vmem:[#allocation57_spill] sm:$0xff] }
 0x465   : > { %v4882_v18 = vmul.f32 %v9656_v47, %v4370_v43  ;;  %v4058_v39 = vpop.permute.xlu1 %4057  ;;  %v3706_v2 = vmul.f32 %v3578_v38, %v3450_v26  ;;  %v3562_v53 = vmul.f32 %v3434_v25, %v3434_v25  ;;  %v3419_v58 = vmul.f32 %v12463_v6, %v12463_v6  ;;  %v12465_v47 = vld [vmem:[#allocation97_spill] sm:$0xff] }
 0x466   : > { %v5008_v27 = vadd.f32 %v4880_v12, %v10242_v30  ;;  %v4354_v35 = vmul.f32 %v10123_v46, %v4058_v39  ;;  %v4186_v36 = vpop.permute.xlu0 %4185  ;;  %v10533_v4 = vmul.f32 %v5492_v15, %v3705_v14  ;;  %v3594_v56 = vmul.f32 %v3466_v52, %v3466_v52 }
 0x467   : > { %v10535_v23 = vadd.f32 %v5120_v54, %v5119_v8  ;;  %v5010_v20 = vadd.f32 %v4882_v18, %v10255_v0  ;;  %v4474_v63 = vmul.f32 0.001, %v3674_v45  ;;  %v3451_v26 = vmul.f32 %v12465_v47, %v12465_v47 }
 0x468   : > { %v5166_v38 = vadd.f32 %v5009_v9, %v5008_v27  ;;  %v4866_v31 = vmul.f32 %v12466_v48, %v4354_v35  ;;  %v4386_v43 = vmul.f32 %v10147_v40, %v4186_v36  ;;  %v5476_v30 = vadd.f32 -0.002, %v4489_v34  ;;  %v12467_v48 = vld [vmem:[#allocation109_spill] sm:$0xff] }
 0x469   : > { %12464 = vst [vmem:[#allocation133_spill] sm:$0xff] %v10535_v23  ;;  %v4182_v7 = vpop.permute.xlu1 %4181  ;;  %v5508_v12 = vadd.f32 -0.002, %v4521_v16  ;;  %v4506_v39 = vmul.f32 0.001, %v3706_v2  ;;  %v3690_v14 = vmul.f32 %v3562_v53, %v3434_v25  ;;  %v3547_v15 = vmul.f32 %v3419_v58, %v3419_v58 }
 0x46a   : > { %v10542_v6 = vadd.f32 %v5166_v38, %v5010_v20  ;;  %v4994_v8 = vadd.f32 %v4866_v31, %v10259_v41  ;;  %v4385_v0 = vmul.f32 %v10147_v40, %v4182_v7  ;;  %v4066_v54 = vpop.permute.xlu0 %4065  ;;  %v3722_v18 = vmul.f32 %v3594_v56, %v3466_v52  ;;  %v12468_v7 = vld [vmem:[#allocation86_spill] sm:$0xff] }
 0x46b   : > { %v4356_v27 = vmul.f32 %v10123_v46, %v4066_v54  ;;  %v5461_v35 = vadd.f32 -0.002, %v4474_v63  ;;  %v3579_v36 = vmul.f32 %v3451_v26, %v3451_v26  ;;  %v4898_v16 = vmul.f32 %v12467_v48, %v4386_v43 }
 0x46c   : > { %v5146_v34 = vadd.f32 %v5145_v57, %v4994_v8  ;;  %v4897_v25 = vmul.f32 %v9802_v17, %v4385_v0  ;;  %v10550_v53 = vmul.f32 %v5476_v30, %v3689_v3  ;;  %v5493_v38 = vadd.f32 -0.002, %v4506_v39  ;;  %v12469_v8 = vld [vmem:[#allocation64_spill] sm:$0xff]  ;;  %v12470_v39 = vld [vmem:[#allocation49_spill] sm:$0xff] }
 0x46d   : > { %v4062_v20 = vpop.permute.xlu1 %4061  ;;  %v4490_v41 = vmul.f32 0.001, %v3690_v14  ;;  %v3675_v31 = vmul.f32 %v3547_v15, %v3419_v58  ;;  %v3435_v52 = vmul.f32 %v12468_v7, %v12468_v7  ;;  %v10557_v57 = vmul.f32 %v5508_v12, %v10513_v11 }
 0x46e   : > { %v5025_v56 = vadd.f32 %v4897_v25, %v10293_v29  ;;  %v4355_v54 = vmul.f32 %v10123_v46, %v4062_v20  ;;  %v4130_v63 = vpop.permute.xlu0 %4129  ;;  %v4522_v43 = vmul.f32 0.001, %v3722_v18  ;;  %v4868_v17 = vmul.f32 %v12469_v8, %v4356_v27 }
 0x46f   : > { %v10560_v3 = vmul.f32 %v5461_v35, %v3674_v45  ;;  %v3707_v30 = vmul.f32 %v3579_v36, %v3451_v26  ;;  %v3467_v58 = vmul.f32 %v12470_v39, %v12470_v39  ;;  %v5026_v15 = vadd.f32 %v4898_v16, %v10275_v42  ;;  %v12487_v39 = vld [vmem:[#allocation74_spill] sm:$0xff] }
 0x470   : > { %v5187_v0 = vadd.f32 %v5025_v56, %v5024_v49  ;;  %v4867_v29 = vmul.f32 %v12380_v61, %v4355_v54  ;;  %v4372_v48 = vmul.f32 %v10143_v28, %v4130_v63  ;;  %v10567_v20 = vmul.f32 %v5493_v38, %v3706_v2  ;;  %v12471_v61 = vld [vmem:[#allocation48_spill] sm:$0xff]  ;;  %v12472_v2 = vld [vmem:[#allocation73_spill] sm:$0xff] }
 0x471   : > { %v4126_v25 = vpop.permute.xlu1 %4125  ;;  %v5477_v11 = vadd.f32 -0.002, %v4490_v41  ;;  %v4475_v12 = vmul.f32 0.001, %v3675_v31  ;;  %v3563_v9 = vmul.f32 %v3435_v52, %v3435_v52  ;;  %v5509_v36 = vadd.f32 -0.002, %v4522_v43 }
 0x472   : > { %v4995_v45 = vadd.f32 %v4867_v29, %v10342_v37  ;;  %v4371_v26 = vmul.f32 %v10143_v28, %v4126_v25  ;;  %v4194_v27 = vpop.permute.xlu0 %4193  ;;  %v5188_v35 = vadd.f32 %v5187_v0, %v5026_v15  ;;  %v4996_v42 = vadd.f32 %v4868_v17, %v10335_v10  ;;  %v12473_v41 = vld [vmem:[#allocation81_spill] sm:$0xff]  ;;  %v12474_v43 = vld [vmem:[#allocation104_spill] sm:$0xff] }
 0x473   : > { %v4507_v49 = vmul.f32 0.001, %v3707_v30  ;;  %v3595_v16 = vmul.f32 %v3467_v58, %v3467_v58  ;;  %v3420_v56 = vmul.f32 %v12471_v61, %v12471_v61  ;;  %v4884_v38 = vmul.f32 %v12472_v2, %v4372_v48  ;;  %v12475_v17 = vld [vmem:[#allocation129_spill] sm:$0xff] }
 0x474   : > { %v5147_v54 = vadd.f32 %v5146_v34, %v4995_v45  ;;  %v4883_v63 = vmul.f32 %v12473_v41, %v4371_v26  ;;  %v4388_v8 = vmul.f32 %v10147_v40, %v4194_v27  ;;  %v10577_v29 = vmul.f32 %v5477_v11, %v3690_v14  ;;  %v12477_v14 = vld [vmem:[#allocation125_spill] sm:$0xff]  ;;  %v12479_v41 = vld [vmem:[#allocation186_spill] sm:$0xff] }
 0x475   : > { %v4190_v37 = vpop.permute.xlu1 %4189  ;;  %v5462_v25 = vadd.f32 -0.002, %v4475_v12  ;;  %v3691_v15 = vmul.f32 %v3563_v9, %v3435_v52  ;;  %v3452_v10 = vmul.f32 %v12474_v43, %v12474_v43  ;;  %v10583_v45 = vmul.f32 %v5509_v36, %v3722_v18  ;;  %v12478_v52 = vld [vmem:[#allocation106_spill] sm:$0xff]  ;;  %v12481_v18 = vld [vmem:[#allocation91_spill] sm:$0xff] }
 0x476   : > { %v5011_v0 = vadd.f32 %v4883_v63, %v12475_v17  ;;  %v4387_v23 = vmul.f32 %v10147_v40, %v4190_v37  ;;  %v4074_v61 = vpop.permute.xlu0 %4073  ;;  %v5148_v34 = vadd.f32 %v5147_v54, %v4996_v42  ;;  %v5494_v26 = vadd.f32 -0.002, %v4507_v49 }
 0x477   : > { %12476 = vst [vmem:[#allocation138_spill] sm:$0xff] %v10583_v45  ;;  %v4358_v48 = vmul.f32 %v10123_v46, %v4074_v61  ;;  %v3723_v27 = vmul.f32 %v3595_v16, %v3467_v58  ;;  %v3548_v2 = vmul.f32 %v3420_v56, %v3420_v56  ;;  %v5012_v11 = vadd.f32 %v4884_v38, %v12477_v14  ;;  %v12482_v61 = vld [vmem:[#allocation132_spill] sm:$0xff]  ;;  %v12483_v38 = vld [vmem:[#allocation127_spill] sm:$0xff]  ;;  %v12499_v45 = vld [vmem:[#allocation90_spill] sm:$0xff] }
 0x478   : > { %v5168_v9 = vadd.f32 %v10542_v6, %v5011_v0  ;;  %v4900_v12 = vmul.f32 %v12478_v52, %v4388_v8  ;;  %v4899_v43 = vmul.f32 %v12479_v41, %v4387_v23  ;;  %v10590_v17 = vmul.f32 %v5462_v25, %v3675_v31  ;;  %v12484_v8 = vld [vmem:[#allocation68_spill] sm:$0xff] }
 0x479   : > { %v4070_v63 = vpop.permute.xlu1 %4069  ;;  %v4491_v37 = vmul.f32 0.001, %v3691_v15  ;;  %v3580_v42 = vmul.f32 %v3452_v10, %v3452_v10  ;;  %v3436_v36 = vmul.f32 %v12481_v18, %v12481_v18  ;;  %v3468_v6 = vmul.f32 %v12483_v38, %v12483_v38  ;;  %v12486_v14 = vld [vmem:[#allocation120_spill] sm:$0xff] }
 0x47a   : > { %12480 = vst [vmem:[#allocation196_spill] sm:$0xff] %v10590_v17  ;;  %v5027_v49 = vadd.f32 %v4899_v43, %v12482_v61  ;;  %v4357_v58 = vmul.f32 %v10123_v46, %v4070_v63  ;;  %v4138_v16 = vpop.permute.xlu0 %4137  ;;  %v5169_v54 = vadd.f32 %v5168_v9, %v5012_v11  ;;  %v4870_v0 = vmul.f32 %v12484_v8, %v4358_v48  ;;  %v12488_v9 = vld [vmem:[#allocation71_spill] sm:$0xff]  ;;  %v12493_v8 = vld [vmem:[#allocation88_spill] sm:$0xff] }
 0x47b   : > { %v10599_v23 = vmul.f32 %v5494_v26, %v3707_v30  ;;  %v4523_v31 = vmul.f32 0.001, %v3723_v27  ;;  %v3676_v25 = vmul.f32 %v3548_v2, %v3420_v56  ;;  %v5028_v52 = vadd.f32 %v4900_v12, %v12486_v14  ;;  %v12489_v17 = vld [vmem:[#allocation135_spill] sm:$0xff]  ;;  %v12490_v12 = vld [vmem:[#allocation190_spill] sm:$0xff] }
 0x47c   : > { %v5189_v41 = vadd.f32 %v5188_v35, %v5027_v49  ;;  %v4869_v18 = vmul.f32 %v12487_v39, %v4357_v58  ;;  %v4374_v43 = vmul.f32 %v10143_v28, %v4138_v16  ;;  %v5478_v63 = vadd.f32 -0.002, %v4491_v37  ;;  %v12491_v58 = vld [vmem:[#allocation105_spill] sm:$0xff] }
 0x47d   : > { %12485 = vst [vmem:[#allocation155_spill] sm:$0xff] %v10599_v23  ;;  %v4134_v61 = vpop.permute.xlu1 %4133  ;;  %v3708_v7 = vmul.f32 %v3580_v42, %v3452_v10  ;;  %v3564_v11 = vmul.f32 %v3436_v36, %v3436_v36  ;;  %v3421_v38 = vmul.f32 %v12488_v9, %v12488_v9  ;;  %v3596_v2 = vmul.f32 %v3468_v6, %v3468_v6  ;;  %v12492_v10 = vld [vmem:[#allocation103_spill] sm:$0xff]  ;;  %v12495_v23 = vld [vmem:[#allocation128_spill] sm:$0xff] }
 0x47e   : > { %v4997_v48 = vadd.f32 %v4869_v18, %v12489_v17  ;;  %v4373_v30 = vmul.f32 %v10143_v28, %v4134_v61  ;;  %v4202_v26 = vpop.permute.xlu0 %4201  ;;  %v5190_v56 = vadd.f32 %v5189_v41, %v5028_v52  ;;  %v4998_v35 = vadd.f32 %v4870_v0, %v12490_v12 }
 0x47f   : > { %v5510_v49 = vadd.f32 -0.002, %v4523_v31  ;;  %v4476_v39 = vmul.f32 0.001, %v3676_v25  ;;  %v3453_v16 = vmul.f32 %v12491_v58, %v12491_v58  ;;  %v4886_v42 = vmul.f32 %v12492_v10, %v4374_v43 }
 0x480   : > { %v5149_v37 = vadd.f32 %v5148_v34, %v4997_v48  ;;  %v4885_v14 = vmul.f32 %v12493_v8, %v4373_v30  ;;  %v4390_v9 = vmul.f32 %v10147_v40, %v4202_v26  ;;  %v10614_v18 = vmul.f32 %v5478_v63, %v3691_v15  ;;  %v12496_v26 = vld [vmem:[#allocation136_spill] sm:$0xff]  ;;  %v12497_v63 = vld [vmem:[#allocation110_spill] sm:$0xff] }
 0x481   : > { %v4198_v17 = vpop.permute.xlu1 %4197  ;;  %v4508_v61 = vmul.f32 0.001, %v3708_v7  ;;  %v3692_v52 = vmul.f32 %v3564_v11, %v3436_v36  ;;  %v3549_v41 = vmul.f32 %v3421_v38, %v3421_v38  ;;  %v3724_v58 = vmul.f32 %v3596_v2, %v3468_v6  ;;  %v12498_v36 = vld [vmem:[#allocation114_spill] sm:$0xff] }
 0x482   : > { %12494 = vst [vmem:[#allocation137_spill] sm:$0xff] %v10614_v18  ;;  %v5013_v0 = vadd.f32 %v4885_v14, %v12495_v23  ;;  %v4389_v31 = vmul.f32 %v10147_v40, %v4198_v17  ;;  %v4082_v12 = vpop.permute.xlu0 %4081  ;;  %v5150_v47 = vadd.f32 %v5149_v37, %v4998_v35  ;;  %v10619_v43 = vmul.f32 %v5510_v49, %v3723_v27  ;;  %v12500_v37 = vld [vmem:[#allocation79_spill] sm:$0xff] }
 0x483   : > { %v4360_v34 = vmul.f32 %v10123_v46, %v4082_v12  ;;  %v5463_v48 = vadd.f32 -0.002, %v4476_v39  ;;  %v3581_v30 = vmul.f32 %v3453_v16, %v3453_v16  ;;  %v5014_v10 = vadd.f32 %v4886_v42, %v12496_v26 }
 0x484   : > { %v5170_v15 = vadd.f32 %v5169_v54, %v5013_v0  ;;  %v4902_v8 = vmul.f32 %v12497_v63, %v4390_v9  ;;  %v4901_v11 = vmul.f32 %v12498_v36, %v4389_v31  ;;  %v5495_v23 = vadd.f32 -0.002, %v4508_v61  ;;  %v12501_v0 = vld [vmem:[#allocation175_spill] sm:$0xff]  ;;  %v12503_v36 = vld [vmem:[#allocation70_spill] sm:$0xff] }
 0x485   : > { %v4078_v18 = vpop.permute.xlu1 %4077  ;;  %v4492_v14 = vmul.f32 0.001, %v3692_v52  ;;  %v3677_v17 = vmul.f32 %v3549_v41, %v3421_v38  ;;  %v3437_v6 = vmul.f32 %v12499_v45, %v12499_v45  ;;  %v4524_v39 = vmul.f32 0.001, %v3724_v58  ;;  %v12502_v31 = vld [vmem:[#allocation83_spill] sm:$0xff] }
 0x486   : > { %v5029_v2 = vadd.f32 %v4901_v11, %v10471_v13  ;;  %v4359_v27 = vmul.f32 %v10123_v46, %v4078_v18  ;;  %v4146_v35 = vpop.permute.xlu0 %4145  ;;  %v5171_v49 = vadd.f32 %v5170_v15, %v5014_v10  ;;  %v4872_v54 = vmul.f32 %v12500_v37, %v4360_v34 }
 0x487   : > { %v10629_v42 = vmul.f32 %v5463_v48, %v3676_v25  ;;  %v10631_v9 = vmul.f32 %v3581_v30, %v3453_v16  ;;  %v3469_v61 = vmul.f32 %v12501_v0, %v12501_v0  ;;  %v5030_v38 = vadd.f32 %v4902_v8, %v10466_v1 }
 0x488   : > { %v5191_v41 = vadd.f32 %v5190_v56, %v5029_v2  ;;  %v4871_v12 = vmul.f32 %v12502_v31, %v4359_v27  ;;  %v4376_v13 = vmul.f32 %v10143_v28, %v4146_v35  ;;  %v10638_v26 = vmul.f32 %v5495_v23, %v3708_v7  ;;  %v12504_v23 = vld [vmem:[#allocation89_spill] sm:$0xff] }
 0x489   : > { %v4142_v18 = vpop.permute.xlu1 %4141  ;;  %v5479_v10 = vadd.f32 -0.002, %v4492_v14  ;;  %v4477_v15 = vmul.f32 0.001, %v3677_v17  ;;  %v3565_v34 = vmul.f32 %v3437_v6, %v3437_v6  ;;  %v5511_v63 = vadd.f32 -0.002, %v4524_v39 }
 0x48a   : > { %v4999_v25 = vadd.f32 %v4871_v12, %v10480_v5  ;;  %v4375_v16 = vmul.f32 %v10143_v28, %v4142_v18  ;;  %v4210_v48 = vpop.permute.xlu0 %4209  ;;  %v5192_v30 = vadd.f32 %v5191_v41, %v5030_v38  ;;  %v5000_v1 = vadd.f32 %v4872_v54, %v10473_v55  ;;  %v12505_v2 = vld [vmem:[#allocation93_spill] sm:$0xff]  ;;  %v12506_v55 = vld [vmem:[#allocation108_spill] sm:$0xff] }
 0x48b   : > { %v4509_v56 = vmul.f32 0.001, %v10631_v9  ;;  %v3597_v8 = vmul.f32 %v3469_v61, %v3469_v61  ;;  %v3422_v11 = vmul.f32 %v12503_v36, %v12503_v36  ;;  %v4888_v14 = vmul.f32 %v12504_v23, %v4376_v13 }
 0x48c   : > { %v5151_v7 = vadd.f32 %v5150_v47, %v4999_v25  ;;  %v4887_v27 = vmul.f32 %v12505_v2, %v4375_v16  ;;  %v4392_v5 = vmul.f32 %v10147_v40, %v4210_v48  ;;  %v10649_v37 = vmul.f32 %v5479_v10, %v3692_v52  ;;  %v12508_v48 = vld [vmem:[#allocation17_spill] sm:$0xff]  ;;  %v12509_v2 = vld [vmem:[#allocation92_spill] sm:$0xff] }
 0x48d   : > { %v4206_v35 = vpop.permute.xlu1 %4205  ;;  %v5464_v38 = vadd.f32 -0.002, %v4477_v15  ;;  %v10651_v39 = vmul.f32 %v3565_v34, %v3437_v6  ;;  %v3454_v54 = vmul.f32 %v12506_v55, %v12506_v55  ;;  %v10657_v13 = vmul.f32 %v5511_v63, %v3724_v58  ;;  %v12507_v15 = vld [vmem:[#allocation115_spill] sm:$0xff] }
 0x48e   : > { %v5015_v41 = vadd.f32 %v4887_v27, %v10490_v62  ;;  %v4391_v31 = vmul.f32 %v10147_v40, %v4206_v35  ;;  %v4150_v47 = vpop.permute.xlu0 %4149  ;;  %v5152_v12 = vadd.f32 %v5151_v7, %v5000_v1  ;;  %v5496_v25 = vadd.f32 -0.002, %v4509_v56  ;;  %v12510_v58 = vld [vmem:[#allocation95_spill] sm:$0xff] }
 0x48f   : > { %v4377_v18 = vmul.f32 %v10143_v28, %v4150_v47  ;;  %v3725_v16 = vmul.f32 %v3597_v8, %v3469_v61  ;;  %v3550_v52 = vmul.f32 %v3422_v11, %v3422_v11  ;;  %v5016_v10 = vadd.f32 %v4888_v14, %v10482_v32 }
 0x490   : > { %v5172_v6 = vadd.f32 %v5171_v49, %v5015_v41  ;;  %v4904_v34 = vmul.f32 %v12507_v15, %v4392_v5  ;;  %v4903_v23 = vmul.f32 %v12508_v48, %v4391_v31  ;;  %v10664_v35 = vmul.f32 %v5464_v38, %v3677_v17  ;;  %v12511_v49 = vld [vmem:[#allocation56_spill] sm:$0xff] }
 0x491   : > { %v4889_v62 = vmul.f32 %v12509_v2, %v4377_v18  ;;  %v4086_v27 = vpop.permute.xlu1 %4085  ;;  %v3582_v1 = vmul.f32 %v3454_v54, %v3454_v54  ;;  %v3438_v63 = vmul.f32 %v12510_v58, %v12510_v58  ;;  %v3470_v7 = vmul.f32 %v12511_v49, %v12511_v49 }
 0x492   : > { %v5031_v56 = vadd.f32 %v4903_v23, %v10507_v24  ;;  %v5173_v61 = vadd.f32 %v5172_v6, %v5016_v10  ;;  %v4361_v8 = vmul.f32 %v10123_v46, %v4086_v27  ;;  %v4214_v32 = vpop.permute.xlu0 %4213  ;;  %v4493_v17 = vmul.f32 0.001, %v10651_v39 }
 0x493   : > { %v5017_v14 = vadd.f32 %v4889_v62, %v10533_v4  ;;  %v4393_v5 = vmul.f32 %v10147_v40, %v4214_v32  ;;  %v4525_v38 = vmul.f32 0.001, %v3725_v16  ;;  %v5032_v41 = vadd.f32 %v4904_v34, %v10501_v60 }
 0x494   : > { %v5193_v31 = vadd.f32 %v5192_v30, %v5031_v56  ;;  %v4873_v47 = vmul.f32 %v12453_v51, %v4361_v8  ;;  %v10677_v24 = vmul.f32 %v3550_v52, %v3422_v11  ;;  %v10680_v15 = vmul.f32 %v3582_v1, %v3454_v54  ;;  %v12512_v11 = vld [vmem:[#allocation126_spill] sm:$0xff] }
 0x495   : > { %v5174_v18 = vadd.f32 %v5173_v61, %v5017_v14  ;;  %v4905_v10 = vmul.f32 %v12454_v33, %v4393_v5  ;;  %v4026_v6 = vpop.permute.xlu1 %4025  ;;  %v3566_v48 = vmul.f32 %v3438_v63, %v3438_v63  ;;  %v3598_v27 = vmul.f32 %v3470_v7, %v3470_v7 }
 0x496   : > { %v5001_v4 = vadd.f32 %v4873_v47, %v10550_v53  ;;  %v5194_v23 = vadd.f32 %v5193_v31, %v5032_v41  ;;  %v4346_v2 = vmul.f32 %v12426_v22, %v4026_v6  ;;  %v4154_v62 = vpop.permute.xlu0 %4153  ;;  %v10687_v30 = vmul.f32 %v5496_v25, %v10631_v9 }
 0x497   : > { %v5033_v60 = vadd.f32 %v4905_v10, %v10557_v57  ;;  %v4378_v51 = vmul.f32 %v10143_v28, %v4154_v62  ;;  %v3423_v33 = vmul.f32 %v12512_v11, %v12512_v11  ;;  %v5480_v34 = vadd.f32 -0.002, %v4493_v17  ;;  %v12515_v62 = vld [vmem:[#allocation52_spill] sm:$0xff] }
 0x498   : > { %v5153_v54 = vadd.f32 %v5152_v12, %v5001_v4  ;;  %v4858_v52 = vmul.f32 %v12456_v21, %v4346_v2  ;;  %v5512_v53 = vadd.f32 -0.002, %v4525_v38  ;;  %v4478_v8 = vmul.f32 0.001, %v10677_v24 }
 0x499   : > { %v5195_v1 = vadd.f32 %v5194_v23, %v5033_v60  ;;  %v4890_v56 = vmul.f32 %v12459_v19, %v4378_v51  ;;  %v4090_v61 = vpop.permute.xlu1 %4089  ;;  %v4510_v57 = vmul.f32 0.001, %v10680_v15  ;;  %v10697_v14 = vmul.f32 %v3566_v48, %v3438_v63  ;;  %v12513_v19 = vld [vmem:[#allocation77_spill] sm:$0xff]  ;;  %v12516_v60 = vld [vmem:[#allocation94_spill] sm:$0xff] }
 0x49a   : > { %v4986_v32 = vadd.f32 %v4858_v52, %v10560_v3  ;;  %v4362_v9 = vmul.f32 %v10123_v46, %v4090_v61  ;;  %v4218_v25 = vpop.permute.xlu0 %4217  ;;  %v10699_v12 = vmul.f32 %v3598_v27, %v3470_v7  ;;  %v3551_v17 = vmul.f32 %v3423_v33, %v3423_v33  ;;  %v6100_v52 = vld [vmem:[%s7234_s29 + $0x14] sm:$0xf] }
 0x49b   : > { %v5018_v21 = vadd.f32 %v4890_v56, %v10567_v20  ;;  %v4394_v5 = vmul.f32 %v10147_v40, %v4218_v25  ;;  %v10705_v38 = vmul.f32 %v12513_v19, %v12513_v19  ;;  %v10710_v31 = vmul.f32 %v5480_v34, %v10651_v39  ;;  %v12517_v56 = vld [vmem:[#allocation97_spill] sm:$0xff] }
 0x49c   : > { %v5133_v41 = vadd.f32 %v10520_v44, %v4986_v32  ;;  %v4874_v3 = vmul.f32 %v12460_v59, %v4362_v9  ;;  %v10712_v63 = vmul.f32 %v5512_v53, %v3725_v16  ;;  %v10715_v10 = vadd.f32 -0.002, %v4478_v8  ;;  %v12514_v16 = vld [vmem:[#allocation138_spill] sm:$0xff]  ;;  %v12518_v32 = vld [vmem:[#allocation196_spill] sm:$0xff] }
 0x49d   : > { %v5175_v7 = vadd.f32 %v5174_v18, %v5018_v21  ;;  %v4906_v47 = vmul.f32 %v12461_v50, %v4394_v5  ;;  %v4030_v20 = vpop.permute.xlu1 %4029  ;;  %v10717_v6 = vadd.f32 -0.002, %v4510_v57  ;;  %v10722_v59 = vmul.f32 0.001, %v10697_v14  ;;  %v6102_v21 = vld [vmem:[%s7234_s29 + $0x1c] sm:$0xf] }
 0x49e   : > { %v5002_v48 = vadd.f32 %v4874_v3, %v10577_v29  ;;  %v4347_v44 = vmul.f32 %v12426_v22, %v4030_v20  ;;  %v4158_v4 = vpop.permute.xlu0 %4157  ;;  %v10725_v39 = vmul.f32 0.001, %v10699_v12  ;;  %v10729_v23 = vmul.f32 %v3551_v17, %v3423_v33  ;;  %v6101_v33 = vld [vmem:[%s7234_s29 + $0x18] sm:$0xf] }
 0x49f   : > { %v5034_v50 = vadd.f32 %v4906_v47, %v12514_v16  ;;  %v4379_v18 = vmul.f32 %v10143_v28, %v4158_v4  ;;  %v10733_v2 = vmul.f32 %v10705_v38, %v10705_v38  ;;  %v10738_v51 = vmul.f32 %v12516_v60, %v12516_v60  ;;  %v12519_v17 = vld [vmem:[#allocation155_spill] sm:$0xff] }
 0x4a0   : > { %v5154_v29 = vadd.f32 %v5153_v54, %v5002_v48  ;;  %v4859_v27 = vmul.f32 %v12515_v62, %v4347_v44  ;;  %v5239_v34 = vmul.f32 %v6100_v52, %v6100_v52  ;;  %v5240_v57 = vmul.f32 %v6101_v33, %v6101_v33  ;;  %v12520_v48 = vld [vmem:[#allocation86_spill] sm:$0xff]  ;;  %v12522_v52 = vld [vmem:[#allocation117_spill] sm:$0xff] }
 0x4a1   : > { %v5196_v53 = vadd.f32 %v5195_v1, %v5034_v50  ;;  %v4891_v61 = vmul.f32 %v12517_v56, %v4379_v18  ;;  %v4094_v8 = vpop.permute.xlu1 %4093  ;;  %v5241_v5 = vmul.f32 %v6102_v21, %v6102_v21  ;;  %v12521_v18 = vld [vmem:[#allocation49_spill] sm:$0xff]  ;;  %v12523_v56 = vrot.slane %v12522_v52, 1 }
 0x4a2   : > { %v4987_v9 = vadd.f32 %v4859_v27, %v12518_v32  ;;  %v4363_v25 = vmul.f32 %v10123_v46, %v4094_v8  ;;  %v4222_v54 = vpop.permute.xlu0 %4221  ;;  %v5258_v1 = vrot.slane %v5239_v34, 3  ;;  %v5259_v4 = vrot.slane %v5240_v57, 2  ;;  %v12524_v33 = vld [vmem:[#allocation137_spill] sm:$0xff] }
 0x4a3   : > { %v5019_v3 = vadd.f32 %v4891_v61, %v12519_v17  ;;  %v4395_v47 = vmul.f32 %v10147_v40, %v4222_v54  ;;  %v5261_v16 = vrot.slane %v5241_v5, 1  ;;  %v5060_v8 = vadd.f32 %v12523_v56, %v12522_v52  ;;  %v12525_v34 = vld [vmem:[#allocation121_spill] sm:$0xff]  ;;  %v12527_v5 = vld [vmem:[#allocation176_spill] sm:$0xff] }
 0x4a4   : > { %v5134_v20 = vadd.f32 %v5133_v41, %v4987_v9  ;;  %v4875_v44 = vmul.f32 %v12520_v48, %v4363_v25  ;;  %v5260_v41 = vsel %vm5216_vm0, %v5259_v4, %v5258_v1  ;;  %v12526_v57 = vrot.slane %v12525_v34, 1  ;;  %v12531_v52 = vld [vmem:[#allocation104_spill] sm:$0xff] }
 0x4a5   : > { %v5176_v50 = vadd.f32 %v5175_v7, %v5019_v3  ;;  %v4907_v62 = vmul.f32 %v12521_v18, %v4395_v47  ;;  %v4034_v27 = vpop.permute.xlu1 %4033  ;;  %v5262_v21 = vsel %vm5218_vm1, %v5261_v16, %v5260_v41  ;;  %v5101_v17 = vrot.slane %v12527_v5, 1  ;;  %v12528_v47 = vld [vmem:[#allocation48_spill] sm:$0xff]  ;;  %v12529_v18 = vld [vmem:[#allocation133_spill] sm:$0xff] }
 0x4a6   : > { %v5003_v61 = vadd.f32 %v4875_v44, %v12524_v33  ;;  %v4348_v32 = vmul.f32 %v12426_v22, %v4034_v27  ;;  %v4162_v54 = vpop.permute.xlu0 %4161  ;;  %v5081_v9 = vadd.f32 %v12526_v57, %v12525_v34  ;;  %v5270_v44 = vsel %vm5269_vm3, %v5262_v21, 0.0  ;;  %v12532_v34 = vld [vmem:[#allocation91_spill] sm:$0xff] }
 0x4a7   : > { %v5035_v7 = vadd.f32 %v4907_v62, %v10619_v43  ;;  %v4380_v25 = vmul.f32 %v10143_v28, %v4162_v54  ;;  %v12530_v27 = vrot.slane %v12529_v18, 1  ;;  %5271 = vadd.xlane.f32.xlu0 %v5270_v44  ;;  %v5102_v43 = vadd.f32 %v5101_v17, %v12527_v5  ;;  %v6104_v5 = vld [vmem:[%s7234_s29 + $0x4] sm:$0xf]  ;;  %v6105_v44 = vld [vmem:[%s7234_s29 + $0x8] sm:$0xf] }
 0x4a8   : > { %v5155_v3 = vadd.f32 %v5154_v29, %v5003_v61  ;;  %v4860_v48 = vmul.f32 %v12528_v47, %v4348_v32  ;;  %v5217_v62 = vsel %vm5216_vm0, %v5081_v9, %v5060_v8  ;;  %v12533_v9 = vld [vmem:[#allocation127_spill] sm:$0xff]  ;;  %v5235_v17 = vmul.f32 %v6104_v5, %v6104_v5 }
 0x4a9   : > { %v5123_v1 = vadd.f32 %v12530_v27, %v12529_v18  ;;  %v5197_v4 = vadd.f32 %v5196_v53, %v5035_v7  ;;  %v4892_v56 = vmul.f32 %v12531_v52, %v4380_v25  ;;  %v4098_v33 = vpop.permute.xlu1 %4097  ;;  %v5219_v54 = vsel %vm5218_vm1, %v5102_v43, %v5217_v62  ;;  %v6106_v27 = vld [vmem:[%s7234_s29 + $0xc] sm:$0xf] }
 0x4aa   : > { %v4988_v16 = vadd.f32 %v4860_v48, %v10629_v42  ;;  %v4364_v29 = vmul.f32 %v10123_v46, %v4098_v33  ;;  %v4226_v61 = vpop.permute.xlu0 %4225  ;;  %v5236_v18 = vmul.f32 %v6105_v44, %v6105_v44  ;;  %v5250_v43 = vrot.slane %v5235_v17, 7  ;;  %v12536_v17 = vld [vmem:[#allocation107_spill] sm:$0xff] }
 0x4ab   : > { %v5020_v32 = vadd.f32 %v4892_v56, %v10638_v26  ;;  %v4396_v53 = vmul.f32 %v10147_v40, %v4226_v61  ;;  %v10777_v42 = vsel %vm5220_vm2, %v5123_v1, %v5219_v54  ;;  %v6103_v26 = vld [vmem:[%s7234_s29] sm:$0xf]  ;;  %v5237_v1 = vmul.f32 %v6106_v27, %v6106_v27  ;;  %v6107_v56 = vld [vmem:[%s7234_s29 + $0x10] sm:$0xf] }
 0x4ac   : > { %v5135_v41 = vadd.f32 %v5134_v20, %v4988_v16  ;;  %v4876_v8 = vmul.f32 %v12532_v34, %v4364_v29  ;;  %v5234_v21 = vmul.f32 %v6103_v26, %v6103_v26  ;;  %v5238_v33 = vmul.f32 %v6107_v56, %v6107_v56  ;;  %v12534_v16 = vld [vmem:[#allocation71_spill] sm:$0xff] }
 0x4ad   : > { %v5177_v57 = vadd.f32 %v5176_v50, %v5020_v32  ;;  %v4908_v7 = vmul.f32 %v12533_v9, %v4396_v53  ;;  %v4038_v25 = vpop.permute.xlu1 %4037  ;;  %v5252_v61 = vrot.slane %v5236_v18, 6  ;;  %v5254_v32 = vrot.slane %v5237_v1, 5  ;;  %v12535_v53 = vld [vmem:[#allocation105_spill] sm:$0xff] }
 0x4ae   : > { %v5004_v47 = vadd.f32 %v4876_v8, %v10649_v37  ;;  %v4349_v20 = vmul.f32 %v12426_v22, %v4038_v25  ;;  %v4166_v48 = vpop.permute.xlu0 %4165  ;;  %v5251_v8 = vsel %vm5222_vm4, %v5250_v43, %v5234_v21  ;;  %v5256_v9 = vrot.slane %v5238_v33, 4 }
 0x4af   : > { %v5036_v52 = vadd.f32 %v4908_v7, %v10657_v13  ;;  %v4381_v50 = vmul.f32 %v10143_v28, %v4166_v48  ;;  %v5253_v26 = vsel %vm5224_vm5, %v5252_v61, %v5251_v8  ;;  %v4766_v56 = vmul.f32 %v10717_v6, %v10680_v15 }
 0x4b0   : > { %v5156_v62 = vadd.f32 %v5155_v3, %v5004_v47  ;;  %v4861_v29 = vmul.f32 %v12534_v16, %v4349_v20  ;;  %v5255_v47 = vsel %vm5226_vm6, %v5254_v32, %v5253_v26  ;;  %v5481_v33 = vadd.f32 -0.002, %v10722_v59 }
 0x4b1   : > { %v5198_v37 = vadd.f32 %v5197_v4, %v5036_v52  ;;  %v4893_v54 = vmul.f32 %v12535_v53, %v4381_v50  ;;  %v4102_v34 = vpop.permute.xlu1 %4101  ;;  %v3455_v4 = vmul.f32 %v12536_v17, %v12536_v17  ;;  %v5257_v48 = vsel %vm5228_vm7, %v5256_v9, %v5255_v47 }
 0x4b2   : > { %v4989_v25 = vadd.f32 %v4861_v29, %v10664_v35  ;;  %v4365_v13 = vmul.f32 %v10123_v46, %v4102_v34  ;;  %v4230_v7 = vpop.permute.xlu0 %4229  ;;  %v3567_v35 = vmul.f32 %v10738_v51, %v10738_v51  ;;  %v5266_v1 = vsel %vm5265_vm8, %v5257_v48, 0.0 }
 0x4b3   : > { %v5021_v3 = vadd.f32 %v4893_v54, %v10687_v30  ;;  %v4397_v5 = vmul.f32 %v10147_v40, %v4230_v7  ;;  %v3727_v30 = vmul.f32 %v10733_v2, %v10705_v38  ;;  %5267 = vadd.xlane.f32.xlu1 %v5266_v1  ;;  %v4479_v38 = vmul.f32 0.001, %v10729_v23 }
 0x4b4   : > { %v5136_v20 = vadd.f32 %v5135_v41, %v4989_v25  ;;  %v4877_v21 = vmul.f32 %v12499_v45, %v4365_v13  ;;  %v4734_v45 = vmul.f32 %v10715_v10, %v10677_v24  ;;  %v3695_v43 = vmul.f32 %v3567_v35, %v10738_v51 }
 0x4b5   : > { %v5178_v44 = vadd.f32 %v5177_v57, %v5021_v3  ;;  %v4909_v18 = vmul.f32 %v12501_v0, %v4397_v5  ;;  %v4042_v27 = vpop.permute.xlu1 %4041  ;;  %v3583_v16 = vmul.f32 %v3455_v4, %v3455_v4  ;;  %v5513_v15 = vadd.f32 -0.002, %v10725_v39 }
 0x4b6   : > { %v5005_v52 = vadd.f32 %v4877_v21, %v10710_v31  ;;  %v4350_v50 = vmul.f32 %v12426_v22, %v4042_v27  ;;  %v4170_v41 = vpop.permute.xlu0 %4169  ;;  %v4527_v6 = vmul.f32 0.001, %v3727_v30  ;;  %v4750_v53 = vmul.f32 %v5481_v33, %v10697_v14 }
 0x4b7   : > { %v5037_v57 = vadd.f32 %v4909_v18, %v10712_v63  ;;  %v4382_v0 = vmul.f32 %v10143_v28, %v4170_v41  ;;  %v3711_v34 = vmul.f32 %v3583_v16, %v3455_v4  ;;  %v4782_v8 = vmul.f32 %v5513_v15, %v10699_v12 }
 0x4b8   : > { %v5157_v2 = vadd.f32 %v5156_v62, %v5005_v52  ;;  %v4862_v31 = vmul.f32 %v12503_v36, %v4350_v50  ;;  %v5466_v36 = vadd.f32 -0.002, %v4479_v38  ;;  %v5514_v25 = vadd.f32 -0.002, %v4527_v6 }
 0x4b9   : > { %v5199_v24 = vadd.f32 %v5198_v37, %v5037_v57  ;;  %v4894_v10 = vmul.f32 %v12506_v55, %v4382_v0  ;;  %v4106_v29 = vpop.permute.xlu1 %4105  ;;  %v4495_v37 = vmul.f32 0.001, %v3695_v43 }
 0x4ba   : > { %v4990_v63 = vadd.f32 %v4862_v31, %v4734_v45  ;;  %v4366_v61 = vmul.f32 %v10123_v46, %v4106_v29  ;;  %v4234_v32 = vpop.permute.xlu0 %4233  ;;  %v4735_v3 = vmul.f32 %v5466_v36, %v10729_v23  ;;  %v4783_v12 = vmul.f32 %v5514_v25, %v3727_v30 }
 0x4bb   : > { %v5022_v59 = vadd.f32 %v4894_v10, %v4766_v56  ;;  %v4398_v62 = vmul.f32 %v10147_v40, %v4234_v32  ;;  %v5482_v4 = vadd.f32 -0.002, %v4495_v37 }
 0x4bc   : > { %v5137_v54 = vadd.f32 %v5136_v20, %v4990_v63  ;;  %v4878_v51 = vmul.f32 %v12510_v58, %v4366_v61  ;;  %v4511_v20 = vmul.f32 0.001, %v3711_v34 }
 0x4bd   : > { %v5179_v55 = vadd.f32 %v5178_v44, %v5022_v59  ;;  %v4910_v39 = vmul.f32 %v12511_v49, %v4398_v62  ;;  %v4046_v9 = vpop.permute.xlu1 %4045  ;;  %v4751_v27 = vmul.f32 %v5482_v4, %v3695_v43  ;;  %v12538_v4 = vld [vmem:[#allocation169_spill] sm:$0xff] }
 0x4be   : > { %v5006_v13 = vadd.f32 %v4878_v51, %v4750_v53  ;;  %v4351_v7 = vmul.f32 %v12426_v22, %v4046_v9  ;;  %v4238_v26 = vpop.permute.xlu0 %4237  ;;  %v5498_v1 = vadd.f32 -0.002, %v4511_v20 }
 0x4bf   : > { %v5038_v14 = vadd.f32 %v4910_v39, %v4782_v8  ;;  %v4399_v5 = vmul.f32 %v10147_v40, %v4238_v26 }
 0x4c0   : > { %v5158_v47 = vadd.f32 %v5157_v2, %v5006_v13  ;;  %v4863_v58 = vmul.f32 %v12512_v11, %v4351_v7 }
 0x4c1   : > { %v5200_v21 = vadd.f32 %v5199_v24, %v5038_v14  ;;  %v4911_v49 = vmul.f32 %v12513_v19, %v4399_v5  ;;  %v4110_v35 = vpop.permute.xlu1 %4109  ;;  %v4767_v19 = vmul.f32 %v5498_v1, %v3711_v34 }
 0x4c2   : > { %v4991_v48 = vadd.f32 %v4863_v58, %v4735_v3  ;;  %v4367_v44 = vmul.f32 %v10123_v46, %v4110_v35 }
 0x4c3   : > { %v5039_v22 = vadd.f32 %v4911_v49, %v4783_v12 }
 0x4c4   : > { %v5138_v18 = vadd.f32 %v5137_v54, %v4991_v48  ;;  %v4879_v23 = vmul.f32 %v12516_v60, %v4367_v44 }
 0x4c5   : > { %v5201_v40 = vadd.f32 %v5200_v21, %v5039_v22  ;;  %v4174_v52 = vpop.permute.xlu1 %4173 }
 0x4c6   : > { %v5139_v50 = vrot.slane %v5138_v18, 4  ;;  %v5007_v11 = vadd.f32 %v4879_v23, %v4751_v27  ;;  %v4383_v45 = vmul.f32 %v10143_v28, %v4174_v52 }
 0x4c7   : > { %v5202_v41 = vrot.slane %v5201_v40, 4 }
 0x4c8   : > { %v5140_v30 = vadd.f32 %v5139_v50, %v5138_v18  ;;  %v5159_v56 = vadd.f32 %v5158_v47, %v5007_v11  ;;  %v4895_v57 = vmul.f32 %v12536_v17, %v4383_v45  ;;  %v12537_v47 = vlaneseq }
 0x4c9   : > { %v5203_v0 = vadd.f32 %v5202_v41, %v5201_v40 }
 0x4ca   : > { %v5141_v46 = vrot.slane %v5140_v30, 2  ;;  %v5160_v33 = vrot.slane %v5159_v56, 4  ;;  %v5023_v38 = vadd.f32 %v4895_v57, %v4767_v19  ;;  %v5290_v58 = vand.u32 127, %v12537_v47 }
 0x4cb   : > { %v5204_v43 = vrot.slane %v5203_v0, 2 }
 0x4cc   : > { %v5142_v2 = vadd.f32 %v5141_v46, %v5140_v30  ;;  %v5161_v31 = vadd.f32 %v5160_v33, %v5159_v56  ;;  %v5180_v60 = vadd.f32 %v5179_v55, %v5023_v38  ;;  %v5293_v20 = vsub.s32 %v5290_v58, %v12538_v4 }
 0x4cd   : > { %v5205_v6 = vadd.f32 %v5204_v43, %v5203_v0 }
 0x4ce   : > { %v5143_v16 = vrot.slane %v5142_v2, 1  ;;  %v5162_v24 = vrot.slane %v5161_v31, 2  ;;  %v5181_v10 = vrot.slane %v5180_v60, 4 }
 0x4cf   : > { %v5206_v53 = vrot.slane %v5205_v6, 1 }
 0x4d0   : > { %v5144_v29 = vadd.f32 %v5143_v16, %v5142_v2  ;;  %v5163_v15 = vadd.f32 %v5162_v24, %v5161_v31  ;;  %v5182_v28 = vadd.f32 %v5181_v10, %v5180_v60 }
 0x4d1   : > { %v5207_v51 = vadd.f32 %v5206_v53, %v5205_v6 }
 0x4d2   : > { %v5164_v63 = vrot.slane %v5163_v15, 1  ;;  %v5183_v61 = vrot.slane %v5182_v28, 2  ;;  %v5223_v17 = vsel %vm5222_vm4, %v5144_v29, %v10777_v42 }
 0x4d4   : > { %v5165_v32 = vadd.f32 %v5164_v63, %v5163_v15  ;;  %v5184_v59 = vadd.f32 %v5183_v61, %v5182_v28 }
 0x4d6   : > { %v5185_v62 = vrot.slane %v5184_v59, 1  ;;  %v5225_v36 = vsel %vm5224_vm5, %v5165_v32, %v5223_v17 }
 0x4d8   : > { %v5186_v54 = vadd.f32 %v5185_v62, %v5184_v59 }
 0x4da   : > { %v5227_v37 = vsel %vm5226_vm6, %v5186_v54, %v5225_v36 }
 0x4db   : > { %v5229_v34 = vsel %vm5228_vm7, %v5207_v51, %v5227_v37 }
 0x4dc   : > { %5231 = vadd.xlane.f32.xlu0 %v5229_v34 }
 0x534   : > { %v5272_v55 = vpop.xlane.xlu0 %5271 }
 0x535   : > { %v5274_v39 = vadd.f32 -0.128, %v5272_v55 }
 0x537   : > { %v5276_v42 = vmul.f32 0.5, %v5274_v39 }
 0x539   : > { %v5281_v13 = vrot.slane %v5276_v42, 3 }
 0x540   : > { %v5268_v8 = vpop.xlane.xlu1 %5267 }
 0x541   : > { %v5273_v9 = vadd.f32 -0.128, %v5268_v8 }
 0x543   : > { %v5275_v25 = vmul.f32 0.5, %v5273_v9 }
 0x545   : > { %v5280_v7 = vrot.slane %v5275_v25, 3 }
 0x547   : > { %v5282_v26 = vsel %vm5279_vm9, %v5280_v7, %v5281_v13 }
 0x569   : > { %v5232_v14 = vpop.xlane.xlu0 %5231 }
 0x56a   : > { %v5233_v3 = vmul.f32 0.5, %v5232_v14 }
 0x56c   : > { %v5284_v5 = vsub.f32 %v5233_v3, %v5282_v26 }
 0x56e   : > { %5287 = vperm.xlu1 %5570, %v5284_v5  }
 0x5ed   : > { %v5288_v21 = vpop.permute.xlu1 %5287 }
 0x5ee   : > { %v5294_v12 = vrot.slane %v5288_v21, %v5293_v20 }
 0x5f0   : > { %5297 = vst.msk [vmem:[%s154_s4] sm:$0x1] %vm5296_vm10, %v5294_v12 }
 0x5f1   : > { %6121 = shalt.err (!%p6118_p3)
}
 0x5f2   : > { %s6122_s22 = scalar_lea.hbm %s10848_s8, 16  ;;  %s6126_s25 = scalar_lea.hbm %s10892_s2, 32 }
 0x5f3   : > { %p6123_p4 = scmp.ne.s32.totalorder %s10848_s8, %s6122_s22  ;;  %p6127_p9 = scmp.lt.u32.totalorder %s10848_s8, %s10892_s2 }
 0x5f4   : > { %p6128_p10 = scmp.lt.u32.totalorder %s6126_s25, %s6122_s22  ;;  %p6130_p12 = scmp.lt.u32.totalorder %s6122_s22, %s10848_s8 }
 0x5f5   : > { %p6124_p7 = pnand %p6123_p4, %p6230_p5 }
 0x5f6   : > { %p6129_p11 = por %p6128_p10, %p6127_p9 }
 0x5f7   : > { %p6125_p8 = pneg %p6124_p7 }
 0x5f8   : > { %p6131_p13 = por %p6130_p12, %p6129_p11 }
 0x5fa   : > { %p6132_p0 = pnand %p6131_p13, %p6125_p8 }
 0x5fc   : > { %6135 = shalt.err (!%p6132_p0)
}
 0x5fd   : > { %5519 = dma.vmem_to_hbm [thread:$0]  (%p6230_p5), %s10850_s5, 16, %s10848_s8, %s5299_s14  }
 0x5fe PF: > { %p5525_p1 = scmp.ge.s32.totalorder %s6170_s12, 2  ;;  %s5323_s28 = sand.u32 1, %s6158_s9  }
 0x5ff   : > { %s5324_s29 = scalar_lea.sflag [#allocation3], %s5323_s28 }
 0x600   : > { %p5522_p2 = pnand %p5525_p1, %p6234_p6 }
 0x602   : > { %6153 = dma.done.wait (!%p5522_p2), %s5324_s29, 16  }
 0x603   : > { %6155 = vsyncadd (!%p5522_p2), %s5324_s29, 4294967280  ;;  %p12_p3 = scmp.ge.s32.totalorder %s6217_s15, 4   ;;  %s12539_s9 = smov %s6162_s10 }
 0x604   : > { %s12540_s10 = smov %s6166_s11  ;;  %s12541_s11 = smov %s6228_s18 }
 0x605   : > { %s12542_s12 = smov %s6217_s15  ;;  %14 = sbr.rel (!%p12_p3) target bundleno = 3 (0x3), region = 66 }
 0x60c   :  { %5328 = vsyncpa [#allocation3], 1 }
 0x60d   :  { %5330 = vsyncpa [#allocation3 + $0x1], 1 }

</bundles_post_ra>
